<compile_context>
chip_gen: v7x
topology: tpu7x:2x2x1
jax: 0.10.0
libtpu: 0.0.40
codegen_flags: <defaults>
</compile_context>

<pallas_src>
import jax
import jax.numpy as jnp
from jax.experimental import pallas as pl
from jax.experimental.pallas import tpu as pltpu

NEG_SLOPE = 0.01   # nn.LeakyReLU default
IN_EPS = 1e-5      # nn.InstanceNorm3d default


def _leaky(x):
    return jnp.where(x >= 0, x, NEG_SLOPE * x)


# ----------------------------------------------------------------------------
# Pallas kernels
# ----------------------------------------------------------------------------
def _conv_in_lrelu_t_kernel(x_ref, w_ref, o_ref):
    """Fused Conv3d + InstanceNorm3d + LeakyReLU, transposed (lane-dense M).

    x_ref: (1, Kp, M)   bf16 im2col patches of one sample (K zero-padded to x8)
    w_ref: (Cout, Kp)   bf16 flattened conv weight (zero-padded columns)
    o_ref: (1, Cout, M) bf16
    """
    M = x_ref.shape[2]
    # Single MXU dot over the full contraction dim: K-accumulation stays inside
    # the MXU instead of per-128-chunk result pops + VALU adds.
    acc = jnp.dot(w_ref[...], x_ref[0],
                  preferred_element_type=jnp.float32)          # (Cout, M) f32
    # InstanceNorm statistics per channel over the spatial (lane) axis, in f32.
    mean = jnp.sum(acc, axis=1, keepdims=True) / M             # (Cout, 1)
    var = jnp.sum(acc * acc, axis=1, keepdims=True) / M - mean * mean
    var = jnp.maximum(var, 0.0)          # guard one-pass f32 cancellation
    inv = jax.lax.rsqrt(var + IN_EPS)
    xn = (acc - mean) * inv
    o_ref[0] = _leaky(xn).astype(o_ref.dtype)


def _conv_in_lrelu_head_kernel(x_ref, w_ref, o_ref):
    """Layer-5 ConvBlock + AdaptiveAvgPool3d(1) + LeakyReLU, fully fused.

    x_ref: (1, M, K) bf16 ; w_ref: (K, Cout) bf16 ; o_ref: (1, 1, Cout) f32
    """
    M = x_ref.shape[1]
    acc = jnp.dot(x_ref[0], w_ref[...],
                  preferred_element_type=jnp.float32)          # (M, Cout) f32
    mean = jnp.sum(acc, axis=0, keepdims=True) / M             # (1, Cout)
    var = jnp.sum(acc * acc, axis=0, keepdims=True) / M - mean * mean
    var = jnp.maximum(var, 0.0)
    inv = jax.lax.rsqrt(var + IN_EPS)
    a = _leaky((acc - mean) * inv)                             # ConvBlock output
    pooled = jnp.sum(a, axis=0, keepdims=True) / M             # AdaptiveAvgPool3d(1)
    o_ref[0] = _leaky(pooled)


# ----------------------------------------------------------------------------
# pallas_call wrappers
# ----------------------------------------------------------------------------
def _conv_block_pallas(patches_t, wmat):
    """patches_t: (N, Kp, M) bf16, wmat: (Cout, Kp) bf16 -> (N, Cout, M) bf16."""
    N, Kp, M = patches_t.shape
    Cout = wmat.shape[0]
    return pl.pallas_call(
        _conv_in_lrelu_t_kernel,
        out_shape=jax.ShapeDtypeStruct((N, Cout, M), jnp.bfloat16),
        grid=(N,),
        in_specs=[
            pl.BlockSpec((1, Kp, M), lambda n: (n, 0, 0)),
            pl.BlockSpec((Cout, Kp), lambda n: (0, 0)),
        ],
        out_specs=pl.BlockSpec((1, Cout, M), lambda n: (n, 0, 0)),
        compiler_params=pltpu.CompilerParams(
            dimension_semantics=("parallel",)),   # one sample per TC on v7x
    )(patches_t, wmat)


def _conv5_head_pallas(patches, wmat):
    """patches: (N, M, K) bf16, wmat: (K, Cout) bf16 -> (N, 1, Cout) f32."""
    N, M, K = patches.shape
    Cout = wmat.shape[1]
    return pl.pallas_call(
        _conv_in_lrelu_head_kernel,
        out_shape=jax.ShapeDtypeStruct((N, 1, Cout), jnp.float32),
        grid=(N,),
        in_specs=[
            pl.BlockSpec((1, M, K), lambda n: (n, 0, 0)),
            pl.BlockSpec((K, Cout), lambda n: (0, 0)),
        ],
        out_specs=pl.BlockSpec((1, 1, Cout), lambda n: (n, 0, 0)),
        compiler_params=pltpu.CompilerParams(
            dimension_semantics=("parallel",)),
    )(patches, wmat)


# ----------------------------------------------------------------------------
# Plain-JAX glue (data movement only)
# ----------------------------------------------------------------------------
def _im2col_3d_t(x):
    """x: (N, C, D, H, W) -> (N, C*27, D*H*W); row index = c*27 + tap."""
    N, C, D, H, W = x.shape
    xp = jnp.pad(x, ((0, 0), (0, 0), (1, 1), (1, 1), (1, 1)))
    taps = [xp[:, :, dz:dz + D, dy:dy + H, dx:dx + W]
            for dz in range(3) for dy in range(3) for dx in range(3)]
    p = jnp.stack(taps, axis=2)                      # (N, C, 27, D, H, W)
    return p.reshape(N, C * 27, D * H * W)


def _maxpool2(x):
    """nn.MaxPool3d(kernel_size=2) on (N, C, D, H, W)."""
    N, C, D, H, W = x.shape
    x = x.reshape(N, C, D // 2, 2, H // 2, 2, W // 2, 2)
    return x.max(axis=(3, 5, 7))


def _round_up(v, m):
    return ((v + m - 1) // m) * m


def init_params(key, in_channels=1, nf=16):
    """Deterministic conv weights, PyTorch-shaped (Cout, Cin, 3, 3, 3)."""
    chans = [in_channels, nf, nf * 2, nf * 4, nf * 8, nf * 16]
    params = []
    for i in range(5):
        cin, cout = chans[i], chans[i + 1]
        key, sub = jax.random.split(key)
        bound = 1.0 / float((cin * 27) ** 0.5)   # kaiming_uniform(a=sqrt(5)) bound
        w = jax.random.uniform(sub, (cout, cin, 3, 3, 3), jnp.float32,
                               minval=-bound, maxval=bound)
        params.append(w)
    return params


@jax.jit
def discriminator_forward(x_ncdhw, params):
    """x_ncdhw: (N, C, D, H, W) -> (N, 256, 1, 1, 1), matching PyTorch."""
    x = x_ncdhw.astype(jnp.bfloat16)       # bf16 activations halve HBM traffic
    # conv1..conv4, each followed by MaxPool3d(2)
    for w in params[:4]:
        N, C, D, H, W = x.shape
        Cout = w.shape[0]
        K = C * 27
        Kp = _round_up(K, 8)               # sublane pad only (27 -> 32, not 128)
        patches = _im2col_3d_t(x)                                   # (N, K, M)
        if Kp != K:
            patches = jnp.pad(patches, ((0, 0), (0, Kp - K), (0, 0)))
        wmat = w.reshape(Cout, K).astype(jnp.bfloat16)
        if Kp != K:
            wmat = jnp.pad(wmat, ((0, 0), (0, Kp - K)))
        y = _conv_block_pallas(patches, wmat)                       # (N, Cout, M)
        y = y.reshape(N, Cout, D, H, W)
        x = _maxpool2(y)

    # conv5 + AdaptiveAvgPool3d(1) + LeakyReLU fused into one kernel.
    w5 = params[4]
    N, C, D, H, W = x.shape
    Cout = w5.shape[0]
    K = C * 27                                                      # 3456 (x128 aligned)
    patches5 = jnp.swapaxes(_im2col_3d_t(x), 1, 2)                  # (N, M, K), tiny
    wmat5 = jnp.transpose(w5.reshape(Cout, K)).astype(jnp.bfloat16)  # (K, Cout)
    out = _conv5_head_pallas(patches5, wmat5)                       # (N, 1, Cout) f32
    return out.reshape(N, Cout, 1, 1, 1)                            # NCDHW


if __name__ == "__main__":
    key = jax.random.PRNGKey(0)
    kx, kp = jax.random.split(key)
    # Small input consistent with the module: NCDHW, in_channels=1.
    # Spatial (16, 16, 32) so that after 4 MaxPool3d(2) stages the conv5 volume
    # still has >1 spatial element (required by InstanceNorm3d semantics).
    x = jax.random.normal(kx, (2, 1, 16, 16, 32), jnp.float32)
    params = init_params(kp, in_channels=1, nf=16)

    out = discriminator_forward(x, params)
    out = jax.block_until_ready(out)

    assert out.shape == (2, 256, 1, 1, 1), out.shape
    assert out.dtype == jnp.float32
    assert bool(jnp.all(jnp.isfinite(out)))
    print("KERNEL_OK")
</pallas_src>

<mosaic_0001>
module attributes {stable_mosaic.version = 11 : i64} {
  func.func @_conv_in_lrelu_t_kernel(%arg0: i32, %arg1: memref<1x32x8192xbf16, #tpu.memory_space<vmem>>, %arg2: memref<16x32xbf16, #tpu.memory_space<vmem>>, %arg3: memref<1x16x8192xbf16, #tpu.memory_space<vmem>>) attributes {dimension_semantics = [#tpu.dimension_semantics<parallel>], iteration_bounds = array<i64: 2>, scalar_prefetch = 0 : i64, scratch_operands = 0 : i64, tpu.core_type = #tpu.core_type<tc>, window_params = [{transform_indices = @transform_0, window_bounds = array<i64: 1, 32, 8192>}, {pipeline_mode = #tpu.pipeline_mode<synchronous>, transform_indices = @transform_1, window_bounds = array<i64: 16, 32>}, {transform_indices = @transform_2, window_bounds = array<i64: 1, 16, 8192>}]} {
    %c0 = arith.constant 0 : index
    %c0_0 = arith.constant 0 : index
    %0 = vector.load %arg2[%c0, %c0_0] : memref<16x32xbf16, #tpu.memory_space<vmem>>, vector<16x32xbf16>
    %c0_1 = arith.constant 0 : index
    %c0_2 = arith.constant 0 : index
    %c0_3 = arith.constant 0 : index
    %1 = vector.load %arg1[%c0_1, %c0_2, %c0_3] : memref<1x32x8192xbf16, #tpu.memory_space<vmem>>, vector<1x32x8192xbf16>
    %2 = vector.shape_cast %1 : vector<1x32x8192xbf16> to vector<32x8192xbf16>
    %cst = arith.constant dense<0.000000e+00> : vector<16x8192xf32>
    %3 = tpu.matmul %0, %2, %cst {dimension_numbers = #tpu.dot_dimension_numbers<[1], [0], [0], [1], [0, 0, 1, 1], [], []>} : vector<16x32xbf16>, vector<32x8192xbf16>, vector<16x8192xf32> -> vector<16x8192xf32>
    %cst_4 = arith.constant dense<0.000000e+00> : vector<16xf32>
    %4 = vector.multi_reduction <add>, %3, %cst_4 [1] : vector<16x8192xf32> to vector<16xf32>
    %5 = vector.shape_cast %4 : vector<16xf32> to vector<16x1xf32>
    %cst_5 = arith.constant 8.192000e+03 : f32
    %6 = vector.broadcast %cst_5 : f32 to vector<16x1xf32>
    %7 = arith.divf %5, %6 : vector<16x1xf32>
    %8 = arith.mulf %3, %3 : vector<16x8192xf32>
    %cst_6 = arith.constant dense<0.000000e+00> : vector<16xf32>
    %9 = vector.multi_reduction <add>, %8, %cst_6 [1] : vector<16x8192xf32> to vector<16xf32>
    %10 = vector.shape_cast %9 : vector<16xf32> to vector<16x1xf32>
    %cst_7 = arith.constant 8.192000e+03 : f32
    %11 = vector.broadcast %cst_7 : f32 to vector<16x1xf32>
    %12 = arith.divf %10, %11 : vector<16x1xf32>
    %13 = arith.mulf %7, %7 : vector<16x1xf32>
    %14 = arith.subf %12, %13 : vector<16x1xf32>
    %cst_8 = arith.constant 0.000000e+00 : f32
    %15 = vector.broadcast %cst_8 : f32 to vector<16x1xf32>
    %16 = arith.maximumf %14, %15 : vector<16x1xf32>
    %cst_9 = arith.constant 9.99999974E-6 : f32
    %17 = vector.broadcast %cst_9 : f32 to vector<16x1xf32>
    %18 = arith.addf %16, %17 : vector<16x1xf32>
    %19 = math.rsqrt %18 : vector<16x1xf32>
    %20 = vector.broadcast %7 : vector<16x1xf32> to vector<16x8192xf32>
    %21 = arith.subf %3, %20 : vector<16x8192xf32>
    %22 = vector.broadcast %19 : vector<16x1xf32> to vector<16x8192xf32>
    %23 = arith.mulf %21, %22 : vector<16x8192xf32>
    %cst_10 = arith.constant 0.000000e+00 : f32
    %24 = vector.broadcast %cst_10 : f32 to vector<16x8192xf32>
    %25 = arith.cmpf oge, %23, %24 : vector<16x8192xf32>
    %cst_11 = arith.constant 0.00999999977 : f32
    %26 = vector.broadcast %cst_11 : f32 to vector<16x8192xf32>
    %27 = arith.mulf %26, %23 : vector<16x8192xf32>
    %28 = arith.select %25, %23, %27 : vector<16x8192xi1>, vector<16x8192xf32>
    %29 = arith.truncf %28 : vector<16x8192xf32> to vector<16x8192xbf16>
    %c0_12 = arith.constant 0 : index
    %c0_13 = arith.constant 0 : index
    %c0_14 = arith.constant 0 : index
    %30 = vector.load %arg3[%c0_12, %c0_13, %c0_14] : memref<1x16x8192xbf16, #tpu.memory_space<vmem>>, vector<1x16x8192xbf16>
    %31 = vector.shape_cast %30 : vector<1x16x8192xbf16> to vector<16x8192xbf16>
    %32 = vector.shape_cast %29 : vector<16x8192xbf16> to vector<1x16x8192xbf16>
    tpu.vector_store %arg3[%c0_12, %c0_13, %c0_14], %32 {strides = array<i32>} : memref<1x16x8192xbf16, #tpu.memory_space<vmem>>, vector<1x16x8192xbf16>,
    return
  }
  func.func @transform_0(%arg0: i32) -> (i32, i32, i32) {
    %c0_i32 = arith.constant 0 : i32
    %c0_i32_0 = arith.constant 0 : i32
    %c0_i32_1 = arith.constant 0 : i32
    return %arg0, %c0_i32, %c0_i32_0 : i32, i32, i32
  }
  func.func @transform_1(%arg0: i32) -> (i32, i32) {
    %c0_i32 = arith.constant 0 : i32
    %c0_i32_0 = arith.constant 0 : i32
    %c0_i32_1 = arith.constant 0 : i32
    return %c0_i32, %c0_i32_0 : i32, i32
  }
  func.func @transform_2(%arg0: i32) -> (i32, i32, i32) {
    %c0_i32 = arith.constant 0 : i32
    %c0_i32_0 = arith.constant 0 : i32
    %c0_i32_1 = arith.constant 0 : i32
    return %arg0, %c0_i32, %c0_i32_0 : i32, i32, i32
  }
}

module attributes {stable_mosaic.version = 11 : i64} {
  func.func @_conv_in_lrelu_t_kernel(%arg0: i32, %arg1: memref<1x432x1024xbf16, #tpu.memory_space<vmem>>, %arg2: memref<32x432xbf16, #tpu.memory_space<vmem>>, %arg3: memref<1x32x1024xbf16, #tpu.memory_space<vmem>>) attributes {dimension_semantics = [#tpu.dimension_semantics<parallel>], iteration_bounds = array<i64: 2>, scalar_prefetch = 0 : i64, scratch_operands = 0 : i64, tpu.core_type = #tpu.core_type<tc>, window_params = [{transform_indices = @transform_0, window_bounds = array<i64: 1, 432, 1024>}, {pipeline_mode = #tpu.pipeline_mode<synchronous>, transform_indices = @transform_1, window_bounds = array<i64: 32, 432>}, {transform_indices = @transform_2, window_bounds = array<i64: 1, 32, 1024>}]} {
    %c0 = arith.constant 0 : index
    %c0_0 = arith.constant 0 : index
    %0 = vector.load %arg2[%c0, %c0_0] : memref<32x432xbf16, #tpu.memory_space<vmem>>, vector<32x432xbf16>
    %c0_1 = arith.constant 0 : index
    %c0_2 = arith.constant 0 : index
    %c0_3 = arith.constant 0 : index
    %1 = vector.load %arg1[%c0_1, %c0_2, %c0_3] : memref<1x432x1024xbf16, #tpu.memory_space<vmem>>, vector<1x432x1024xbf16>
    %2 = vector.shape_cast %1 : vector<1x432x1024xbf16> to vector<432x1024xbf16>
    %cst = arith.constant dense<0.000000e+00> : vector<32x1024xf32>
    %3 = tpu.matmul %0, %2, %cst {dimension_numbers = #tpu.dot_dimension_numbers<[1], [0], [0], [1], [0, 0, 1, 1], [], []>} : vector<32x432xbf16>, vector<432x1024xbf16>, vector<32x1024xf32> -> vector<32x1024xf32>
    %cst_4 = arith.constant dense<0.000000e+00> : vector<32xf32>
    %4 = vector.multi_reduction <add>, %3, %cst_4 [1] : vector<32x1024xf32> to vector<32xf32>
    %5 = vector.shape_cast %4 : vector<32xf32> to vector<32x1xf32>
    %cst_5 = arith.constant 1.024000e+03 : f32
    %6 = vector.broadcast %cst_5 : f32 to vector<32x1xf32>
    %7 = arith.divf %5, %6 : vector<32x1xf32>
    %8 = arith.mulf %3, %3 : vector<32x1024xf32>
    %cst_6 = arith.constant dense<0.000000e+00> : vector<32xf32>
    %9 = vector.multi_reduction <add>, %8, %cst_6 [1] : vector<32x1024xf32> to vector<32xf32>
    %10 = vector.shape_cast %9 : vector<32xf32> to vector<32x1xf32>
    %cst_7 = arith.constant 1.024000e+03 : f32
    %11 = vector.broadcast %cst_7 : f32 to vector<32x1xf32>
    %12 = arith.divf %10, %11 : vector<32x1xf32>
    %13 = arith.mulf %7, %7 : vector<32x1xf32>
    %14 = arith.subf %12, %13 : vector<32x1xf32>
    %cst_8 = arith.constant 0.000000e+00 : f32
    %15 = vector.broadcast %cst_8 : f32 to vector<32x1xf32>
    %16 = arith.maximumf %14, %15 : vector<32x1xf32>
    %cst_9 = arith.constant 9.99999974E-6 : f32
    %17 = vector.broadcast %cst_9 : f32 to vector<32x1xf32>
    %18 = arith.addf %16, %17 : vector<32x1xf32>
    %19 = math.rsqrt %18 : vector<32x1xf32>
    %20 = vector.broadcast %7 : vector<32x1xf32> to vector<32x1024xf32>
    %21 = arith.subf %3, %20 : vector<32x1024xf32>
    %22 = vector.broadcast %19 : vector<32x1xf32> to vector<32x1024xf32>
    %23 = arith.mulf %21, %22 : vector<32x1024xf32>
    %cst_10 = arith.constant 0.000000e+00 : f32
    %24 = vector.broadcast %cst_10 : f32 to vector<32x1024xf32>
    %25 = arith.cmpf oge, %23, %24 : vector<32x1024xf32>
    %cst_11 = arith.constant 0.00999999977 : f32
    %26 = vector.broadcast %cst_11 : f32 to vector<32x1024xf32>
    %27 = arith.mulf %26, %23 : vector<32x1024xf32>
    %28 = arith.select %25, %23, %27 : vector<32x1024xi1>, vector<32x1024xf32>
    %29 = arith.truncf %28 : vector<32x1024xf32> to vector<32x1024xbf16>
    %c0_12 = arith.constant 0 : index
    %c0_13 = arith.constant 0 : index
    %c0_14 = arith.constant 0 : index
    %30 = vector.load %arg3[%c0_12, %c0_13, %c0_14] : memref<1x32x1024xbf16, #tpu.memory_space<vmem>>, vector<1x32x1024xbf16>
    %31 = vector.shape_cast %30 : vector<1x32x1024xbf16> to vector<32x1024xbf16>
    %32 = vector.shape_cast %29 : vector<32x1024xbf16> to vector<1x32x1024xbf16>
    tpu.vector_store %arg3[%c0_12, %c0_13, %c0_14], %32 {strides = array<i32>} : memref<1x32x1024xbf16, #tpu.memory_space<vmem>>, vector<1x32x1024xbf16>,
    return
  }
  func.func @transform_0(%arg0: i32) -> (i32, i32, i32) {
    %c0_i32 = arith.constant 0 : i32
    %c0_i32_0 = arith.constant 0 : i32
    %c0_i32_1 = arith.constant 0 : i32
    return %arg0, %c0_i32, %c0_i32_0 : i32, i32, i32
  }
  func.func @transform_1(%arg0: i32) -> (i32, i32) {
    %c0_i32 = arith.constant 0 : i32
    %c0_i32_0 = arith.constant 0 : i32
    %c0_i32_1 = arith.constant 0 : i32
    return %c0_i32, %c0_i32_0 : i32, i32
  }
  func.func @transform_2(%arg0: i32) -> (i32, i32, i32) {
    %c0_i32 = arith.constant 0 : i32
    %c0_i32_0 = arith.constant 0 : i32
    %c0_i32_1 = arith.constant 0 : i32
    return %arg0, %c0_i32, %c0_i32_0 : i32, i32, i32
  }
}

module attributes {stable_mosaic.version = 11 : i64} {
  func.func @_conv_in_lrelu_t_kernel(%arg0: i32, %arg1: memref<1x864x128xbf16, #tpu.memory_space<vmem>>, %arg2: memref<64x864xbf16, #tpu.memory_space<vmem>>, %arg3: memref<1x64x128xbf16, #tpu.memory_space<vmem>>) attributes {dimension_semantics = [#tpu.dimension_semantics<parallel>], iteration_bounds = array<i64: 2>, scalar_prefetch = 0 : i64, scratch_operands = 0 : i64, tpu.core_type = #tpu.core_type<tc>, window_params = [{transform_indices = @transform_0, window_bounds = array<i64: 1, 864, 128>}, {pipeline_mode = #tpu.pipeline_mode<synchronous>, transform_indices = @transform_1, window_bounds = array<i64: 64, 864>}, {transform_indices = @transform_2, window_bounds = array<i64: 1, 64, 128>}]} {
    %c0 = arith.constant 0 : index
    %c0_0 = arith.constant 0 : index
    %0 = vector.load %arg2[%c0, %c0_0] : memref<64x864xbf16, #tpu.memory_space<vmem>>, vector<64x864xbf16>
    %c0_1 = arith.constant 0 : index
    %c0_2 = arith.constant 0 : index
    %c0_3 = arith.constant 0 : index
    %1 = vector.load %arg1[%c0_1, %c0_2, %c0_3] : memref<1x864x128xbf16, #tpu.memory_space<vmem>>, vector<1x864x128xbf16>
    %2 = vector.shape_cast %1 : vector<1x864x128xbf16> to vector<864x128xbf16>
    %cst = arith.constant dense<0.000000e+00> : vector<64x128xf32>
    %3 = tpu.matmul %0, %2, %cst {dimension_numbers = #tpu.dot_dimension_numbers<[1], [0], [0], [1], [0, 0, 1, 1], [], []>} : vector<64x864xbf16>, vector<864x128xbf16>, vector<64x128xf32> -> vector<64x128xf32>
    %cst_4 = arith.constant dense<0.000000e+00> : vector<64xf32>
    %4 = vector.multi_reduction <add>, %3, %cst_4 [1] : vector<64x128xf32> to vector<64xf32>
    %5 = vector.shape_cast %4 : vector<64xf32> to vector<64x1xf32>
    %cst_5 = arith.constant 1.280000e+02 : f32
    %6 = vector.broadcast %cst_5 : f32 to vector<64x1xf32>
    %7 = arith.divf %5, %6 : vector<64x1xf32>
    %8 = arith.mulf %3, %3 : vector<64x128xf32>
    %cst_6 = arith.constant dense<0.000000e+00> : vector<64xf32>
    %9 = vector.multi_reduction <add>, %8, %cst_6 [1] : vector<64x128xf32> to vector<64xf32>
    %10 = vector.shape_cast %9 : vector<64xf32> to vector<64x1xf32>
    %cst_7 = arith.constant 1.280000e+02 : f32
    %11 = vector.broadcast %cst_7 : f32 to vector<64x1xf32>
    %12 = arith.divf %10, %11 : vector<64x1xf32>
    %13 = arith.mulf %7, %7 : vector<64x1xf32>
    %14 = arith.subf %12, %13 : vector<64x1xf32>
    %cst_8 = arith.constant 0.000000e+00 : f32
    %15 = vector.broadcast %cst_8 : f32 to vector<64x1xf32>
    %16 = arith.maximumf %14, %15 : vector<64x1xf32>
    %cst_9 = arith.constant 9.99999974E-6 : f32
    %17 = vector.broadcast %cst_9 : f32 to vector<64x1xf32>
    %18 = arith.addf %16, %17 : vector<64x1xf32>
    %19 = math.rsqrt %18 : vector<64x1xf32>
    %20 = vector.broadcast %7 : vector<64x1xf32> to vector<64x128xf32>
    %21 = arith.subf %3, %20 : vector<64x128xf32>
    %22 = vector.broadcast %19 : vector<64x1xf32> to vector<64x128xf32>
    %23 = arith.mulf %21, %22 : vector<64x128xf32>
    %cst_10 = arith.constant 0.000000e+00 : f32
    %24 = vector.broadcast %cst_10 : f32 to vector<64x128xf32>
    %25 = arith.cmpf oge, %23, %24 : vector<64x128xf32>
    %cst_11 = arith.constant 0.00999999977 : f32
    %26 = vector.broadcast %cst_11 : f32 to vector<64x128xf32>
    %27 = arith.mulf %26, %23 : vector<64x128xf32>
    %28 = arith.select %25, %23, %27 : vector<64x128xi1>, vector<64x128xf32>
    %29 = arith.truncf %28 : vector<64x128xf32> to vector<64x128xbf16>
    %c0_12 = arith.constant 0 : index
    %c0_13 = arith.constant 0 : index
    %c0_14 = arith.constant 0 : index
    %30 = vector.load %arg3[%c0_12, %c0_13, %c0_14] : memref<1x64x128xbf16, #tpu.memory_space<vmem>>, vector<1x64x128xbf16>
    %31 = vector.shape_cast %30 : vector<1x64x128xbf16> to vector<64x128xbf16>
    %32 = vector.shape_cast %29 : vector<64x128xbf16> to vector<1x64x128xbf16>
    tpu.vector_store %arg3[%c0_12, %c0_13, %c0_14], %32 {strides = array<i32>} : memref<1x64x128xbf16, #tpu.memory_space<vmem>>, vector<1x64x128xbf16>,
    return
  }
  func.func @transform_0(%arg0: i32) -> (i32, i32, i32) {
    %c0_i32 = arith.constant 0 : i32
    %c0_i32_0 = arith.constant 0 : i32
    %c0_i32_1 = arith.constant 0 : i32
    return %arg0, %c0_i32, %c0_i32_0 : i32, i32, i32
  }
  func.func @transform_1(%arg0: i32) -> (i32, i32) {
    %c0_i32 = arith.constant 0 : i32
    %c0_i32_0 = arith.constant 0 : i32
    %c0_i32_1 = arith.constant 0 : i32
    return %c0_i32, %c0_i32_0 : i32, i32
  }
  func.func @transform_2(%arg0: i32) -> (i32, i32, i32) {
    %c0_i32 = arith.constant 0 : i32
    %c0_i32_0 = arith.constant 0 : i32
    %c0_i32_1 = arith.constant 0 : i32
    return %arg0, %c0_i32, %c0_i32_0 : i32, i32, i32
  }
}

module attributes {stable_mosaic.version = 11 : i64} {
  func.func @_conv_in_lrelu_t_kernel(%arg0: i32, %arg1: memref<1x1728x16xbf16, #tpu.memory_space<vmem>>, %arg2: memref<128x1728xbf16, #tpu.memory_space<vmem>>, %arg3: memref<1x128x16xbf16, #tpu.memory_space<vmem>>) attributes {dimension_semantics = [#tpu.dimension_semantics<parallel>], iteration_bounds = array<i64: 2>, scalar_prefetch = 0 : i64, scratch_operands = 0 : i64, tpu.core_type = #tpu.core_type<tc>, window_params = [{transform_indices = @transform_0, window_bounds = array<i64: 1, 1728, 16>}, {pipeline_mode = #tpu.pipeline_mode<synchronous>, transform_indices = @transform_1, window_bounds = array<i64: 128, 1728>}, {transform_indices = @transform_2, window_bounds = array<i64: 1, 128, 16>}]} {
    %c0 = arith.constant 0 : index
    %c0_0 = arith.constant 0 : index
    %0 = vector.load %arg2[%c0, %c0_0] : memref<128x1728xbf16, #tpu.memory_space<vmem>>, vector<128x1728xbf16>
    %c0_1 = arith.constant 0 : index
    %c0_2 = arith.constant 0 : index
    %c0_3 = arith.constant 0 : index
    %1 = vector.load %arg1[%c0_1, %c0_2, %c0_3] : memref<1x1728x16xbf16, #tpu.memory_space<vmem>>, vector<1x1728x16xbf16>
    %2 = vector.shape_cast %1 : vector<1x1728x16xbf16> to vector<1728x16xbf16>
    %cst = arith.constant dense<0.000000e+00> : vector<128x16xf32>
    %3 = tpu.matmul %0, %2, %cst {dimension_numbers = #tpu.dot_dimension_numbers<[1], [0], [0], [1], [0, 0, 1, 1], [], []>} : vector<128x1728xbf16>, vector<1728x16xbf16>, vector<128x16xf32> -> vector<128x16xf32>
    %cst_4 = arith.constant dense<0.000000e+00> : vector<128xf32>
    %4 = vector.multi_reduction <add>, %3, %cst_4 [1] : vector<128x16xf32> to vector<128xf32>
    %5 = vector.shape_cast %4 : vector<128xf32> to vector<128x1xf32>
    %cst_5 = arith.constant 1.600000e+01 : f32
    %6 = vector.broadcast %cst_5 : f32 to vector<128x1xf32>
    %7 = arith.divf %5, %6 : vector<128x1xf32>
    %8 = arith.mulf %3, %3 : vector<128x16xf32>
    %cst_6 = arith.constant dense<0.000000e+00> : vector<128xf32>
    %9 = vector.multi_reduction <add>, %8, %cst_6 [1] : vector<128x16xf32> to vector<128xf32>
    %10 = vector.shape_cast %9 : vector<128xf32> to vector<128x1xf32>
    %cst_7 = arith.constant 1.600000e+01 : f32
    %11 = vector.broadcast %cst_7 : f32 to vector<128x1xf32>
    %12 = arith.divf %10, %11 : vector<128x1xf32>
    %13 = arith.mulf %7, %7 : vector<128x1xf32>
    %14 = arith.subf %12, %13 : vector<128x1xf32>
    %cst_8 = arith.constant 0.000000e+00 : f32
    %15 = vector.broadcast %cst_8 : f32 to vector<128x1xf32>
    %16 = arith.maximumf %14, %15 : vector<128x1xf32>
    %cst_9 = arith.constant 9.99999974E-6 : f32
    %17 = vector.broadcast %cst_9 : f32 to vector<128x1xf32>
    %18 = arith.addf %16, %17 : vector<128x1xf32>
    %19 = math.rsqrt %18 : vector<128x1xf32>
    %20 = vector.broadcast %7 : vector<128x1xf32> to vector<128x16xf32>
    %21 = arith.subf %3, %20 : vector<128x16xf32>
    %22 = vector.broadcast %19 : vector<128x1xf32> to vector<128x16xf32>
    %23 = arith.mulf %21, %22 : vector<128x16xf32>
    %cst_10 = arith.constant 0.000000e+00 : f32
    %24 = vector.broadcast %cst_10 : f32 to vector<128x16xf32>
    %25 = arith.cmpf oge, %23, %24 : vector<128x16xf32>
    %cst_11 = arith.constant 0.00999999977 : f32
    %26 = vector.broadcast %cst_11 : f32 to vector<128x16xf32>
    %27 = arith.mulf %26, %23 : vector<128x16xf32>
    %28 = arith.select %25, %23, %27 : vector<128x16xi1>, vector<128x16xf32>
    %29 = arith.truncf %28 : vector<128x16xf32> to vector<128x16xbf16>
    %c0_12 = arith.constant 0 : index
    %c0_13 = arith.constant 0 : index
    %c0_14 = arith.constant 0 : index
    %30 = vector.load %arg3[%c0_12, %c0_13, %c0_14] : memref<1x128x16xbf16, #tpu.memory_space<vmem>>, vector<1x128x16xbf16>
    %31 = vector.shape_cast %30 : vector<1x128x16xbf16> to vector<128x16xbf16>
    %32 = vector.shape_cast %29 : vector<128x16xbf16> to vector<1x128x16xbf16>
    tpu.vector_store %arg3[%c0_12, %c0_13, %c0_14], %32 {strides = array<i32>} : memref<1x128x16xbf16, #tpu.memory_space<vmem>>, vector<1x128x16xbf16>,
    return
  }
  func.func @transform_0(%arg0: i32) -> (i32, i32, i32) {
    %c0_i32 = arith.constant 0 : i32
    %c0_i32_0 = arith.constant 0 : i32
    %c0_i32_1 = arith.constant 0 : i32
    return %arg0, %c0_i32, %c0_i32_0 : i32, i32, i32
  }
  func.func @transform_1(%arg0: i32) -> (i32, i32) {
    %c0_i32 = arith.constant 0 : i32
    %c0_i32_0 = arith.constant 0 : i32
    %c0_i32_1 = arith.constant 0 : i32
    return %c0_i32, %c0_i32_0 : i32, i32
  }
  func.func @transform_2(%arg0: i32) -> (i32, i32, i32) {
    %c0_i32 = arith.constant 0 : i32
    %c0_i32_0 = arith.constant 0 : i32
    %c0_i32_1 = arith.constant 0 : i32
    return %arg0, %c0_i32, %c0_i32_0 : i32, i32, i32
  }
}

module attributes {stable_mosaic.version = 11 : i64} {
  func.func @_conv_in_lrelu_head_kernel(%arg0: i32, %arg1: memref<1x2x3456xbf16, #tpu.memory_space<vmem>>, %arg2: memref<3456x256xbf16, #tpu.memory_space<vmem>>, %arg3: memref<1x1x256xf32, #tpu.memory_space<vmem>>) attributes {dimension_semantics = [#tpu.dimension_semantics<parallel>], iteration_bounds = array<i64: 2>, scalar_prefetch = 0 : i64, scratch_operands = 0 : i64, tpu.core_type = #tpu.core_type<tc>, window_params = [{transform_indices = @transform_0, window_bounds = array<i64: 1, 2, 3456>}, {pipeline_mode = #tpu.pipeline_mode<synchronous>, transform_indices = @transform_1, window_bounds = array<i64: 3456, 256>}, {transform_indices = @transform_2, window_bounds = array<i64: 1, 1, 256>}]} {
    %c0 = arith.constant 0 : index
    %c0_0 = arith.constant 0 : index
    %c0_1 = arith.constant 0 : index
    %0 = vector.load %arg1[%c0, %c0_0, %c0_1] : memref<1x2x3456xbf16, #tpu.memory_space<vmem>>, vector<1x2x3456xbf16>
    %1 = vector.shape_cast %0 : vector<1x2x3456xbf16> to vector<2x3456xbf16>
    %c0_2 = arith.constant 0 : index
    %c0_3 = arith.constant 0 : index
    %2 = vector.load %arg2[%c0_2, %c0_3] : memref<3456x256xbf16, #tpu.memory_space<vmem>>, vector<3456x256xbf16>
    %cst = arith.constant dense<0.000000e+00> : vector<2x256xf32>
    %3 = tpu.matmul %1, %2, %cst {dimension_numbers = #tpu.dot_dimension_numbers<[1], [0], [0], [1], [0, 0, 1, 1], [], []>} : vector<2x3456xbf16>, vector<3456x256xbf16>, vector<2x256xf32> -> vector<2x256xf32>
    %cst_4 = arith.constant dense<0.000000e+00> : vector<256xf32>
    %4 = vector.multi_reduction <add>, %3, %cst_4 [0] : vector<2x256xf32> to vector<256xf32>
    %5 = vector.shape_cast %4 : vector<256xf32> to vector<1x256xf32>
    %cst_5 = arith.constant 2.000000e+00 : f32
    %6 = vector.broadcast %cst_5 : f32 to vector<1x256xf32>
    %7 = arith.divf %5, %6 : vector<1x256xf32>
    %8 = arith.mulf %3, %3 : vector<2x256xf32>
    %cst_6 = arith.constant dense<0.000000e+00> : vector<256xf32>
    %9 = vector.multi_reduction <add>, %8, %cst_6 [0] : vector<2x256xf32> to vector<256xf32>
    %10 = vector.shape_cast %9 : vector<256xf32> to vector<1x256xf32>
    %cst_7 = arith.constant 2.000000e+00 : f32
    %11 = vector.broadcast %cst_7 : f32 to vector<1x256xf32>
    %12 = arith.divf %10, %11 : vector<1x256xf32>
    %13 = arith.mulf %7, %7 : vector<1x256xf32>
    %14 = arith.subf %12, %13 : vector<1x256xf32>
    %cst_8 = arith.constant 0.000000e+00 : f32
    %15 = vector.broadcast %cst_8 : f32 to vector<1x256xf32>
    %16 = arith.maximumf %14, %15 : vector<1x256xf32>
    %cst_9 = arith.constant 9.99999974E-6 : f32
    %17 = vector.broadcast %cst_9 : f32 to vector<1x256xf32>
    %18 = arith.addf %16, %17 : vector<1x256xf32>
    %19 = math.rsqrt %18 : vector<1x256xf32>
    %20 = vector.broadcast %7 : vector<1x256xf32> to vector<2x256xf32>
    %21 = arith.subf %3, %20 : vector<2x256xf32>
    %22 = vector.broadcast %19 : vector<1x256xf32> to vector<2x256xf32>
    %23 = arith.mulf %21, %22 : vector<2x256xf32>
    %cst_10 = arith.constant 0.000000e+00 : f32
    %24 = vector.broadcast %cst_10 : f32 to vector<2x256xf32>
    %25 = arith.cmpf oge, %23, %24 : vector<2x256xf32>
    %cst_11 = arith.constant 0.00999999977 : f32
    %26 = vector.broadcast %cst_11 : f32 to vector<2x256xf32>
    %27 = arith.mulf %26, %23 : vector<2x256xf32>
    %28 = arith.select %25, %23, %27 : vector<2x256xi1>, vector<2x256xf32>
    %cst_12 = arith.constant dense<0.000000e+00> : vector<256xf32>
    %29 = vector.multi_reduction <add>, %28, %cst_12 [0] : vector<2x256xf32> to vector<256xf32>
    %30 = vector.shape_cast %29 : vector<256xf32> to vector<1x256xf32>
    %cst_13 = arith.constant 2.000000e+00 : f32
    %31 = vector.broadcast %cst_13 : f32 to vector<1x256xf32>
    %32 = arith.divf %30, %31 : vector<1x256xf32>
    %cst_14 = arith.constant 0.000000e+00 : f32
    %33 = vector.broadcast %cst_14 : f32 to vector<1x256xf32>
    %34 = arith.cmpf oge, %32, %33 : vector<1x256xf32>
    %cst_15 = arith.constant 0.00999999977 : f32
    %35 = vector.broadcast %cst_15 : f32 to vector<1x256xf32>
    %36 = arith.mulf %35, %32 : vector<1x256xf32>
    %37 = arith.select %34, %32, %36 : vector<1x256xi1>, vector<1x256xf32>
    %c0_16 = arith.constant 0 : index
    %c0_17 = arith.constant 0 : index
    %c0_18 = arith.constant 0 : index
    %38 = vector.load %arg3[%c0_16, %c0_17, %c0_18] : memref<1x1x256xf32, #tpu.memory_space<vmem>>, vector<1x1x256xf32>
    %39 = vector.shape_cast %38 : vector<1x1x256xf32> to vector<1x256xf32>
    %40 = vector.shape_cast %37 : vector<1x256xf32> to vector<1x1x256xf32>
    tpu.vector_store %arg3[%c0_16, %c0_17, %c0_18], %40 {strides = array<i32>} : memref<1x1x256xf32, #tpu.memory_space<vmem>>, vector<1x1x256xf32>,
    return
  }
  func.func @transform_0(%arg0: i32) -> (i32, i32, i32) {
    %c0_i32 = arith.constant 0 : i32
    %c0_i32_0 = arith.constant 0 : i32
    %c0_i32_1 = arith.constant 0 : i32
    return %arg0, %c0_i32, %c0_i32_0 : i32, i32, i32
  }
  func.func @transform_1(%arg0: i32) -> (i32, i32) {
    %c0_i32 = arith.constant 0 : i32
    %c0_i32_0 = arith.constant 0 : i32
    %c0_i32_1 = arith.constant 0 : i32
    return %c0_i32, %c0_i32_0 : i32, i32
  }
  func.func @transform_2(%arg0: i32) -> (i32, i32, i32) {
    %c0_i32 = arith.constant 0 : i32
    %c0_i32_0 = arith.constant 0 : i32
    %c0_i32_1 = arith.constant 0 : i32
    return %arg0, %c0_i32, %c0_i32_0 : i32, i32, i32
  }
}

</mosaic_0001>

<bundles_post_ra>
// kernel: discriminator_forward.5
= control target key start
LH: loop header
LB: loop body
LE: loop exit
PB: predicated region body
PF: predicated region fallthrough
CT: control target
= control target key end

     0   :  { %s4186_s9 = smov 0   ;;  %s7462_s0 = inlined_call_operand.vmem [shape: bf16[2,32,8192], index: 0, kind: input, shape index: {}]   ;;  %s7463_s1 = inlined_call_operand.vmem [shape: bf16[16,32], index: 1, kind: input, shape index: {}]   ;;  %s7464_s2 = inlined_call_operand.vmem [shape: bf16[2,16,8192], index: 2, kind: output, shape index: {}]  }
   0x1 LB: > { %s3846_s10 = sadd.s32 4294967295, %s4168_s9   ;;  %p3850_p0 = scmp.ge.s32.totalorder %s4168_s9, 1  ;;  %s4168_s9 = sphi %s4186_s9, %s12_s9  }
   0x2   : > { %p112_p1 = scmp.lt.s32.totalorder %s4168_s9, 3 }
   0x4   : > { %p113_p2 = pnand %p3850_p0, %p112_p1 }
   0x6   : > { %116 = sbr.rel (%p113_p2) target bundleno = 774 (0x306), region = 28 }
   0xd   : > { %p134_p3 = scmp.lt.s32.totalorder %s3846_s10, 1  ;;  %v4170_v0 = vmov 0   ;;  %v4221_v25 = vld [vmem:[%s7463_s1] sm:$0xff]   ;;  %vm920_vm0 = vcmask 261120  }
   0xe   : > { %956 = vmatprep.mubr.bf16.mxu0 %v4170_v0  ;;  %999 = vmatprep.mubr.bf16.mxu1 %v4170_v0 }
   0xf   : > { %s8361_s10 = smov (!%p134_p3, %s3846_s10), 1 }
  0x10   : > { %s4082_s11 = sshll.u32 %s8361_s10, 10  ;;  %s4083_s17 = sshll.u32 %s8361_s10, 9 }
  0x11   : > { %s4202_s14 = scalar_lea.vmem %s7462_s0, %s4082_s11  ;;  %s6142_s20 = scalar_lea.vmem %s7464_s2, %s4083_s17 }
  0x12   : > { %v147_v1 = vld [vmem:[%s4202_s14] sm:$0xff]  ;;  %v148_v3 = vld [vmem:[%s4202_s14 + $0x8] sm:$0xff]  ;;  %v149_v14 = vld [vmem:[%s4202_s14 + $0x10] sm:$0xff] }
  0x13   : > { %v179_v2 = vld [vmem:[%s4202_s14 + $0x100] sm:$0xff]  ;;  %v180_v6 = vld [vmem:[%s4202_s14 + $0x108] sm:$0xff]  ;;  %v181_v16 = vld [vmem:[%s4202_s14 + $0x110] sm:$0xff] }
  0x14   : > { %v3857_v4 = vcombine.high %v147_v1, %v179_v2  ;;  %v3856_v5 = vcombine.low %v147_v1, %v179_v2  ;;  %v211_v7 = vld [vmem:[%s4202_s14 + $0x200] sm:$0xff]  ;;  %v3859_v9 = vcombine.high %v148_v3, %v180_v6  ;;  %v3858_v10 = vcombine.low %v148_v3, %v180_v6  ;;  %v212_v12 = vld [vmem:[%s4202_s14 + $0x208] sm:$0xff]  ;;  %v150_v17 = vld [vmem:[%s4202_s14 + $0x18] sm:$0xff] }
  0x15   : > { %v243_v8 = vld [vmem:[%s4202_s14 + $0x300] sm:$0xff]  ;;  %v244_v13 = vld [vmem:[%s4202_s14 + $0x308] sm:$0xff]  ;;  %v182_v18 = vld [vmem:[%s4202_s14 + $0x118] sm:$0xff]  ;;  %v3861_v21 = vcombine.high %v149_v14, %v181_v16  ;;  %v3860_v28 = vcombine.low %v149_v14, %v181_v16 }
  0x16   : > { %v3921_v11 = vcombine.high %v211_v7, %v243_v8  ;;  %924 = vmatprep.subr.bf16.mxu0 %v3857_v4  ;;  %v3923_v15 = vcombine.high %v212_v12, %v244_v13  ;;  %967 = vmatprep.subr.bf16.mxu1 %v3859_v9  ;;  %v3920_v19 = vcombine.low %v211_v7, %v243_v8  ;;  %v213_v23 = vld [vmem:[%s4202_s14 + $0x210] sm:$0xff]  ;;  %v214_v26 = vld [vmem:[%s4202_s14 + $0x218] sm:$0xff]  ;;  %v151_v32 = vld [vmem:[%s4202_s14 + $0x20] sm:$0xff] }
  0x17   : > { %925 = vmatpush1.bf16.msra.mxu0 %v3856_v5  ;;  %968 = vmatpush1.bf16.msra.mxu1 %v3858_v10  ;;  %v3922_v20 = vcombine.low %v212_v12, %v244_v13  ;;  %v3863_v22 = vcombine.high %v150_v17, %v182_v18  ;;  %v245_v24 = vld [vmem:[%s4202_s14 + $0x310] sm:$0xff]  ;;  %v246_v27 = vld [vmem:[%s4202_s14 + $0x318] sm:$0xff]  ;;  %v3862_v29 = vcombine.low %v150_v17, %v182_v18  ;;  %v183_v33 = vld [vmem:[%s4202_s14 + $0x120] sm:$0xff] }
  0x18   : > { %926 = vmatprep.subr.bf16.mxu0 %v3921_v11  ;;  %969 = vmatprep.subr.bf16.mxu1 %v3923_v15  ;;  %v3925_v30 = vcombine.high %v213_v23, %v245_v24  ;;  %v3927_v31 = vcombine.high %v214_v26, %v246_v27  ;;  %v152_v34 = vld [vmem:[%s4202_s14 + $0x28] sm:$0xff]  ;;  %v3924_v36 = vcombine.low %v213_v23, %v245_v24  ;;  %v215_v40 = vld [vmem:[%s4202_s14 + $0x220] sm:$0xff]  ;;  %v153_v48 = vld [vmem:[%s4202_s14 + $0x30] sm:$0xff] }
  0x19   : > { %v184_v35 = vld [vmem:[%s4202_s14 + $0x128] sm:$0xff]  ;;  %v3926_v37 = vcombine.low %v214_v26, %v246_v27  ;;  %v3865_v38 = vcombine.high %v151_v32, %v183_v33  ;;  %v247_v41 = vld [vmem:[%s4202_s14 + $0x320] sm:$0xff]  ;;  %v3864_v44 = vcombine.low %v151_v32, %v183_v33  ;;  %v185_v49 = vld [vmem:[%s4202_s14 + $0x130] sm:$0xff] }
  0x1a   : > { %v3867_v39 = vcombine.high %v152_v34, %v184_v35  ;;  %v216_v42 = vld [vmem:[%s4202_s14 + $0x228] sm:$0xff]  ;;  %v3866_v45 = vcombine.low %v152_v34, %v184_v35  ;;  %v3929_v46 = vcombine.high %v215_v40, %v247_v41  ;;  %v154_v50 = vld [vmem:[%s4202_s14 + $0x38] sm:$0xff]  ;;  %v3928_v52 = vcombine.low %v215_v40, %v247_v41  ;;  %v217_v56 = vld [vmem:[%s4202_s14 + $0x230] sm:$0xff] }
  0x1b   : > { %927 = vmatpush1.bf16.msra.mxu0 %v3920_v19  ;;  %970 = vmatpush1.bf16.msra.mxu1 %v3922_v20  ;;  %v248_v43 = vld [vmem:[%s4202_s14 + $0x328] sm:$0xff]  ;;  %v186_v51 = vld [vmem:[%s4202_s14 + $0x138] sm:$0xff]  ;;  %v3869_v54 = vcombine.high %v153_v48, %v185_v49  ;;  %v249_v57 = vld [vmem:[%s4202_s14 + $0x330] sm:$0xff]  ;;  %v3868_v60 = vcombine.low %v153_v48, %v185_v49 }
  0x1c   : > { %1010 = vmatprep.subr.bf16.mxu0 %v3861_v21  ;;  %1053 = vmatprep.subr.bf16.mxu1 %v3863_v22  ;;  %v3931_v47 = vcombine.high %v216_v42, %v248_v43  ;;  %v3930_v53 = vcombine.low %v216_v42, %v248_v43  ;;  %v3871_v55 = vcombine.high %v154_v50, %v186_v51  ;;  %v218_v58 = vld [vmem:[%s4202_s14 + $0x238] sm:$0xff]  ;;  %v155_v1 = vld [vmem:[%s4202_s14 + $0x40] sm:$0xff]  ;;  %v156_v3 = vld [vmem:[%s4202_s14 + $0x48] sm:$0xff] }
  0x1d   : > { %v250_v59 = vld [vmem:[%s4202_s14 + $0x338] sm:$0xff]  ;;  %v3870_v61 = vcombine.low %v154_v50, %v186_v51  ;;  %v3933_v62 = vcombine.high %v217_v56, %v249_v57  ;;  %v187_v2 = vld [vmem:[%s4202_s14 + $0x140] sm:$0xff]  ;;  %v188_v4 = vld [vmem:[%s4202_s14 + $0x148] sm:$0xff]  ;;  %v3932_v5 = vcombine.low %v217_v56, %v249_v57 }
  0x1e   : > { %3984 = vmatmul.mubr.msk.bf16.vlgmr.msra.gmra.mrb[0].mxu0 %vm920_vm0, %v4221_v25  ;;  %3985 = vmatmul.mubr.msk.bf16.vlgmr.msra.gmra.mrb[0].mxu1 %vm920_vm0, %v4221_v25  ;;  %v3935_v63 = vcombine.high %v218_v58, %v250_v59  ;;  %v3934_v6 = vcombine.low %v218_v58, %v250_v59  ;;  %v3873_v7 = vcombine.high %v155_v1, %v187_v2  ;;  %v219_v9 = vld [vmem:[%s4202_s14 + $0x240] sm:$0xff]  ;;  %v220_v11 = vld [vmem:[%s4202_s14 + $0x248] sm:$0xff]  ;;  %v157_v17 = vld [vmem:[%s4202_s14 + $0x50] sm:$0xff] }
  0x1f   : > { %1011 = vmatpush1.bf16.msra.mxu0 %v3860_v28  ;;  %1054 = vmatpush1.bf16.msra.mxu1 %v3862_v29  ;;  %v3875_v8 = vcombine.high %v156_v3, %v188_v4  ;;  %v251_v10 = vld [vmem:[%s4202_s14 + $0x340] sm:$0xff]  ;;  %v252_v12 = vld [vmem:[%s4202_s14 + $0x348] sm:$0xff]  ;;  %v3872_v13 = vcombine.low %v155_v1, %v187_v2  ;;  %v3874_v14 = vcombine.low %v156_v3, %v188_v4  ;;  %v189_v18 = vld [vmem:[%s4202_s14 + $0x150] sm:$0xff] }
  0x20   : > { %1012 = vmatprep.subr.bf16.mxu0 %v3925_v30  ;;  %1055 = vmatprep.subr.bf16.mxu1 %v3927_v31  ;;  %v3937_v15 = vcombine.high %v219_v9, %v251_v10  ;;  %v3939_v16 = vcombine.high %v220_v11, %v252_v12  ;;  %v158_v19 = vld [vmem:[%s4202_s14 + $0x58] sm:$0xff]  ;;  %v3936_v21 = vcombine.low %v219_v9, %v251_v10  ;;  %v221_v26 = vld [vmem:[%s4202_s14 + $0x250] sm:$0xff]  ;;  %v159_v34 = vld [vmem:[%s4202_s14 + $0x60] sm:$0xff] }
  0x21   : > { %1042 = vmatprep.mubr.bf16.mxu0 %v4170_v0  ;;  %1085 = vmatprep.mubr.bf16.mxu1 %v4170_v0  ;;  %v190_v20 = vld [vmem:[%s4202_s14 + $0x158] sm:$0xff]  ;;  %v3938_v22 = vcombine.low %v220_v11, %v252_v12  ;;  %v3877_v23 = vcombine.high %v157_v17, %v189_v18  ;;  %v253_v27 = vld [vmem:[%s4202_s14 + $0x350] sm:$0xff]  ;;  %v3876_v30 = vcombine.low %v157_v17, %v189_v18  ;;  %v191_v35 = vld [vmem:[%s4202_s14 + $0x160] sm:$0xff] }
  0x22   : > { %v3879_v24 = vcombine.high %v158_v19, %v190_v20  ;;  %v222_v28 = vld [vmem:[%s4202_s14 + $0x258] sm:$0xff]  ;;  %v3878_v31 = vcombine.low %v158_v19, %v190_v20  ;;  %v3941_v32 = vcombine.high %v221_v26, %v253_v27  ;;  %v3881_v40 = vcombine.high %v159_v34, %v191_v35  ;;  %v223_v42 = vld [vmem:[%s4202_s14 + $0x260] sm:$0xff]  ;;  %v161_v50 = vld [vmem:[%s4202_s14 + $0x70] sm:$0xff] }
  0x23   : > { %1013 = vmatpush1.bf16.msra.mxu0 %v3924_v36  ;;  %1056 = vmatpush1.bf16.msra.mxu1 %v3926_v37  ;;  %v254_v29 = vld [vmem:[%s4202_s14 + $0x358] sm:$0xff]  ;;  %v160_v36 = vld [vmem:[%s4202_s14 + $0x68] sm:$0xff]  ;;  %v255_v43 = vld [vmem:[%s4202_s14 + $0x360] sm:$0xff] }
  0x24   : > { %1096 = vmatprep.subr.bf16.mxu0 %v3865_v38  ;;  %1139 = vmatprep.subr.bf16.mxu1 %v3867_v39  ;;  %v3943_v33 = vcombine.high %v222_v28, %v254_v29  ;;  %v192_v37 = vld [vmem:[%s4202_s14 + $0x168] sm:$0xff]  ;;  %v3940_v38 = vcombine.low %v221_v26, %v253_v27  ;;  %v3942_v39 = vcombine.low %v222_v28, %v254_v29  ;;  %v193_v51 = vld [vmem:[%s4202_s14 + $0x170] sm:$0xff]  ;;  %v163_v3 = vld [vmem:[%s4202_s14 + $0x80] sm:$0xff] }
  0x25   : > { %v3883_v41 = vcombine.high %v160_v36, %v192_v37  ;;  %v3945_v48 = vcombine.high %v223_v42, %v255_v43  ;;  %v3885_v56 = vcombine.high %v161_v50, %v193_v51  ;;  %v225_v58 = vld [vmem:[%s4202_s14 + $0x270] sm:$0xff]  ;;  %v195_v4 = vld [vmem:[%s4202_s14 + $0x180] sm:$0xff] }
  0x26   : > { %3986 = vmatmul.mubr.msk.bf16.vlgmr.msra.gmra.mrb[4].mxu0 %vm920_vm0, %v4221_v25  ;;  %3987 = vmatmul.mubr.msk.bf16.vlgmr.msra.gmra.mrb[4].mxu1 %vm920_vm0, %v4221_v25  ;;  %v257_v59 = vld [vmem:[%s4202_s14 + $0x370] sm:$0xff]  ;;  %v3889_v9 = vcombine.high %v163_v3, %v195_v4  ;;  %v227_v11 = vld [vmem:[%s4202_s14 + $0x280] sm:$0xff] }
  0x27   : > { %1097 = vmatpush1.bf16.msra.mxu0 %v3864_v44  ;;  %1140 = vmatpush1.bf16.msra.mxu1 %v3866_v45  ;;  %v224_v44 = vld [vmem:[%s4202_s14 + $0x268] sm:$0xff]  ;;  %v3949_v1 = vcombine.high %v225_v58, %v257_v59  ;;  %v259_v12 = vld [vmem:[%s4202_s14 + $0x380] sm:$0xff]  ;;  %v165_v19 = vld [vmem:[%s4202_s14 + $0x90] sm:$0xff] }
  0x28   : > { %1098 = vmatprep.subr.bf16.mxu0 %v3929_v46  ;;  %1141 = vmatprep.subr.bf16.mxu1 %v3931_v47  ;;  %v256_v45 = vld [vmem:[%s4202_s14 + $0x368] sm:$0xff]  ;;  %v3880_v46 = vcombine.low %v159_v34, %v191_v35  ;;  %v3882_v47 = vcombine.low %v160_v36, %v192_v37  ;;  %v3953_v17 = vcombine.high %v227_v11, %v259_v12  ;;  %v197_v20 = vld [vmem:[%s4202_s14 + $0x190] sm:$0xff]  ;;  %v167_v36 = vld [vmem:[%s4202_s14 + $0xa0] sm:$0xff] }
  0x29   : > { %1128 = vmatprep.mubr.bf16.mxu0 %v4170_v0  ;;  %1171 = vmatprep.mubr.bf16.mxu1 %v4170_v0  ;;  %v3947_v49 = vcombine.high %v224_v44, %v256_v45  ;;  %v3893_v26 = vcombine.high %v165_v19, %v197_v20  ;;  %v229_v28 = vld [vmem:[%s4202_s14 + $0x290] sm:$0xff]  ;;  %v199_v37 = vld [vmem:[%s4202_s14 + $0x1a0] sm:$0xff] }
  0x2a   : > { %v261_v29 = vld [vmem:[%s4202_s14 + $0x390] sm:$0xff] }
  0x2b   : > { %1099 = vmatpush1.bf16.msra.mxu0 %v3928_v52  ;;  %1142 = vmatpush1.bf16.msra.mxu1 %v3930_v53  ;;  %v162_v52 = vld [vmem:[%s4202_s14 + $0x78] sm:$0xff]  ;;  %v3957_v34 = vcombine.high %v229_v28, %v261_v29 }
  0x2c   : > { %1182 = vmatprep.subr.bf16.mxu0 %v3869_v54  ;;  %1225 = vmatprep.subr.bf16.mxu1 %v3871_v55  ;;  %v194_v53 = vld [vmem:[%s4202_s14 + $0x178] sm:$0xff]  ;;  %v3944_v54 = vcombine.low %v223_v42, %v255_v43  ;;  %v3946_v55 = vcombine.low %v224_v44, %v256_v45  ;;  %v3897_v42 = vcombine.high %v167_v36, %v199_v37  ;;  %v231_v44 = vld [vmem:[%s4202_s14 + $0x2a0] sm:$0xff] }
  0x2d   : > { %v3887_v57 = vcombine.high %v162_v52, %v194_v53  ;;  %v263_v45 = vld [vmem:[%s4202_s14 + $0x3a0] sm:$0xff] }
  0x2e   : > { %3988 = vmatmul.mubr.msk.bf16.vlgmr.msra.gmra.mrb[8].mxu0 %vm920_vm0, %v4221_v25  ;;  %3989 = vmatmul.mubr.msk.bf16.vlgmr.msra.gmra.mrb[8].mxu1 %vm920_vm0, %v4221_v25 }
  0x2f   : > { %1183 = vmatpush1.bf16.msra.mxu0 %v3868_v60  ;;  %1226 = vmatpush1.bf16.msra.mxu1 %v3870_v61  ;;  %v226_v60 = vld [vmem:[%s4202_s14 + $0x278] sm:$0xff] }
  0x30   : > { %1184 = vmatprep.subr.bf16.mxu0 %v3933_v62  ;;  %1227 = vmatprep.subr.bf16.mxu1 %v3935_v63  ;;  %v258_v61 = vld [vmem:[%s4202_s14 + $0x378] sm:$0xff]  ;;  %v3884_v62 = vcombine.low %v161_v50, %v193_v51  ;;  %v3886_v63 = vcombine.low %v162_v52, %v194_v53  ;;  %v3961_v50 = vcombine.high %v231_v44, %v263_v45  ;;  %v169_v52 = vld [vmem:[%s4202_s14 + $0xb0] sm:$0xff] }
  0x31   : > { %1214 = vmatprep.mubr.bf16.mxu0 %v4170_v0  ;;  %1257 = vmatprep.mubr.bf16.mxu1 %v4170_v0  ;;  %v3951_v2 = vcombine.high %v226_v60, %v258_v61  ;;  %v201_v53 = vld [vmem:[%s4202_s14 + $0x1b0] sm:$0xff] }
  0x33   : > { %1185 = vmatpush1.bf16.msra.mxu0 %v3932_v5  ;;  %1228 = vmatpush1.bf16.msra.mxu1 %v3934_v6  ;;  %v164_v5 = vld [vmem:[%s4202_s14 + $0x88] sm:$0xff] }
  0x34   : > { %1268 = vmatprep.subr.bf16.mxu0 %v3873_v7  ;;  %1311 = vmatprep.subr.bf16.mxu1 %v3875_v8  ;;  %v196_v6 = vld [vmem:[%s4202_s14 + $0x188] sm:$0xff]  ;;  %v3948_v7 = vcombine.low %v225_v58, %v257_v59  ;;  %v3950_v8 = vcombine.low %v226_v60, %v258_v61  ;;  %v3901_v58 = vcombine.high %v169_v52, %v201_v53  ;;  %v233_v60 = vld [vmem:[%s4202_s14 + $0x2b0] sm:$0xff] }
  0x35   : > { %v3891_v10 = vcombine.high %v164_v5, %v196_v6  ;;  %v265_v61 = vld [vmem:[%s4202_s14 + $0x3b0] sm:$0xff] }
  0x36   : > { %3990 = vmatmul.mubr.msk.bf16.vlgmr.msra.gmra.mrb[12].mxu0 %vm920_vm0, %v4221_v25  ;;  %3991 = vmatmul.mubr.msk.bf16.vlgmr.msra.gmra.mrb[12].mxu1 %vm920_vm0, %v4221_v25 }
  0x37   : > { %1269 = vmatpush1.bf16.msra.mxu0 %v3872_v13  ;;  %1312 = vmatpush1.bf16.msra.mxu1 %v3874_v14  ;;  %v228_v13 = vld [vmem:[%s4202_s14 + $0x288] sm:$0xff] }
  0x38   : > { %1270 = vmatprep.subr.bf16.mxu0 %v3937_v15  ;;  %1313 = vmatprep.subr.bf16.mxu1 %v3939_v16  ;;  %v260_v14 = vld [vmem:[%s4202_s14 + $0x388] sm:$0xff]  ;;  %v3888_v15 = vcombine.low %v163_v3, %v195_v4  ;;  %v3890_v16 = vcombine.low %v164_v5, %v196_v6  ;;  %v3965_v3 = vcombine.high %v233_v60, %v265_v61  ;;  %v171_v5 = vld [vmem:[%s4202_s14 + $0xc0] sm:$0xff] }
  0x39   : > { %1300 = vmatprep.mubr.bf16.mxu0 %v4170_v0  ;;  %1343 = vmatprep.mubr.bf16.mxu1 %v4170_v0  ;;  %v3955_v18 = vcombine.high %v228_v13, %v260_v14  ;;  %v203_v6 = vld [vmem:[%s4202_s14 + $0x1c0] sm:$0xff] }
  0x3b   : > { %1271 = vmatpush1.bf16.msra.mxu0 %v3936_v21  ;;  %1314 = vmatpush1.bf16.msra.mxu1 %v3938_v22  ;;  %v166_v21 = vld [vmem:[%s4202_s14 + $0x98] sm:$0xff] }
  0x3c   : > { %1354 = vmatprep.subr.bf16.mxu0 %v3877_v23  ;;  %1397 = vmatprep.subr.bf16.mxu1 %v3879_v24  ;;  %v198_v22 = vld [vmem:[%s4202_s14 + $0x198] sm:$0xff]  ;;  %v3952_v23 = vcombine.low %v227_v11, %v259_v12  ;;  %v3954_v24 = vcombine.low %v228_v13, %v260_v14  ;;  %v3905_v11 = vcombine.high %v171_v5, %v203_v6  ;;  %v235_v13 = vld [vmem:[%s4202_s14 + $0x2c0] sm:$0xff] }
  0x3d   : > { %v3895_v27 = vcombine.high %v166_v21, %v198_v22  ;;  %v267_v14 = vld [vmem:[%s4202_s14 + $0x3c0] sm:$0xff] }
  0x3e   : > { %3992 = vmatmul.mubr.msk.bf16.vlgmr.msra.gmra.mrb[16].mxu0 %vm920_vm0, %v4221_v25  ;;  %3993 = vmatmul.mubr.msk.bf16.vlgmr.msra.gmra.mrb[16].mxu1 %vm920_vm0, %v4221_v25 }
  0x3f   : > { %1355 = vmatpush1.bf16.msra.mxu0 %v3876_v30  ;;  %1398 = vmatpush1.bf16.msra.mxu1 %v3878_v31  ;;  %v230_v30 = vld [vmem:[%s4202_s14 + $0x298] sm:$0xff] }
  0x40   : > { %1356 = vmatprep.subr.bf16.mxu0 %v3941_v32  ;;  %1399 = vmatprep.subr.bf16.mxu1 %v3943_v33  ;;  %v262_v31 = vld [vmem:[%s4202_s14 + $0x398] sm:$0xff]  ;;  %v3892_v32 = vcombine.low %v165_v19, %v197_v20  ;;  %v3894_v33 = vcombine.low %v166_v21, %v198_v22  ;;  %v3969_v19 = vcombine.high %v235_v13, %v267_v14  ;;  %v173_v21 = vld [vmem:[%s4202_s14 + $0xd0] sm:$0xff] }
  0x41   : > { %1386 = vmatprep.mubr.bf16.mxu0 %v4170_v0  ;;  %1429 = vmatprep.mubr.bf16.mxu1 %v4170_v0  ;;  %v3959_v35 = vcombine.high %v230_v30, %v262_v31  ;;  %v205_v22 = vld [vmem:[%s4202_s14 + $0x1d0] sm:$0xff] }
  0x43   : > { %1357 = vmatpush1.bf16.msra.mxu0 %v3940_v38  ;;  %1400 = vmatpush1.bf16.msra.mxu1 %v3942_v39  ;;  %v168_v38 = vld [vmem:[%s4202_s14 + $0xa8] sm:$0xff] }
  0x44   : > { %1440 = vmatprep.subr.bf16.mxu0 %v3881_v40  ;;  %1483 = vmatprep.subr.bf16.mxu1 %v3883_v41  ;;  %v200_v39 = vld [vmem:[%s4202_s14 + $0x1a8] sm:$0xff]  ;;  %v3956_v40 = vcombine.low %v229_v28, %v261_v29  ;;  %v3958_v41 = vcombine.low %v230_v30, %v262_v31  ;;  %v3909_v28 = vcombine.high %v173_v21, %v205_v22  ;;  %v237_v30 = vld [vmem:[%s4202_s14 + $0x2d0] sm:$0xff] }
  0x45   : > { %v3899_v43 = vcombine.high %v168_v38, %v200_v39  ;;  %v269_v31 = vld [vmem:[%s4202_s14 + $0x3d0] sm:$0xff] }
  0x46   : > { %3994 = vmatmul.mubr.msk.bf16.vlgmr.msra.gmra.mrb[20].mxu0 %vm920_vm0, %v4221_v25  ;;  %3995 = vmatmul.mubr.msk.bf16.vlgmr.msra.gmra.mrb[20].mxu1 %vm920_vm0, %v4221_v25 }
  0x47   : > { %1441 = vmatpush1.bf16.msra.mxu0 %v3880_v46  ;;  %1484 = vmatpush1.bf16.msra.mxu1 %v3882_v47  ;;  %v232_v46 = vld [vmem:[%s4202_s14 + $0x2a8] sm:$0xff] }
  0x48   : > { %1442 = vmatprep.subr.bf16.mxu0 %v3945_v48  ;;  %1485 = vmatprep.subr.bf16.mxu1 %v3947_v49  ;;  %v264_v47 = vld [vmem:[%s4202_s14 + $0x3a8] sm:$0xff]  ;;  %v3896_v48 = vcombine.low %v167_v36, %v199_v37  ;;  %v3898_v49 = vcombine.low %v168_v38, %v200_v39  ;;  %v3973_v36 = vcombine.high %v237_v30, %v269_v31  ;;  %v175_v38 = vld [vmem:[%s4202_s14 + $0xe0] sm:$0xff] }
  0x49   : > { %1472 = vmatprep.mubr.bf16.mxu0 %v4170_v0  ;;  %1515 = vmatprep.mubr.bf16.mxu1 %v4170_v0  ;;  %v3963_v51 = vcombine.high %v232_v46, %v264_v47  ;;  %v207_v39 = vld [vmem:[%s4202_s14 + $0x1e0] sm:$0xff] }
  0x4b   : > { %1443 = vmatpush1.bf16.msra.mxu0 %v3944_v54  ;;  %1486 = vmatpush1.bf16.msra.mxu1 %v3946_v55  ;;  %v170_v54 = vld [vmem:[%s4202_s14 + $0xb8] sm:$0xff] }
  0x4c   : > { %1526 = vmatprep.subr.bf16.mxu0 %v3885_v56  ;;  %1569 = vmatprep.subr.bf16.mxu1 %v3887_v57  ;;  %v202_v55 = vld [vmem:[%s4202_s14 + $0x1b8] sm:$0xff]  ;;  %v3960_v56 = vcombine.low %v231_v44, %v263_v45  ;;  %v3962_v57 = vcombine.low %v232_v46, %v264_v47  ;;  %v3913_v44 = vcombine.high %v175_v38, %v207_v39  ;;  %v239_v46 = vld [vmem:[%s4202_s14 + $0x2e0] sm:$0xff] }
  0x4d   : > { %v3903_v59 = vcombine.high %v170_v54, %v202_v55  ;;  %v271_v47 = vld [vmem:[%s4202_s14 + $0x3e0] sm:$0xff] }
  0x4e   : > { %3996 = vmatmul.mubr.msk.bf16.vlgmr.msra.gmra.mrb[24].mxu0 %vm920_vm0, %v4221_v25  ;;  %3997 = vmatmul.mubr.msk.bf16.vlgmr.msra.gmra.mrb[24].mxu1 %vm920_vm0, %v4221_v25 }
  0x4f   : > { %1527 = vmatpush1.bf16.msra.mxu0 %v3884_v62  ;;  %1570 = vmatpush1.bf16.msra.mxu1 %v3886_v63  ;;  %v234_v62 = vld [vmem:[%s4202_s14 + $0x2b8] sm:$0xff] }
  0x50   : > { %1528 = vmatprep.subr.bf16.mxu0 %v3949_v1  ;;  %1571 = vmatprep.subr.bf16.mxu1 %v3951_v2  ;;  %v266_v63 = vld [vmem:[%s4202_s14 + $0x3b8] sm:$0xff]  ;;  %v3900_v1 = vcombine.low %v169_v52, %v201_v53  ;;  %v3902_v2 = vcombine.low %v170_v54, %v202_v55  ;;  %v3977_v52 = vcombine.high %v239_v46, %v271_v47  ;;  %v177_v54 = vld [vmem:[%s4202_s14 + $0xf0] sm:$0xff] }
  0x51   : > { %1558 = vmatprep.mubr.bf16.mxu0 %v4170_v0  ;;  %1601 = vmatprep.mubr.bf16.mxu1 %v4170_v0  ;;  %v3967_v4 = vcombine.high %v234_v62, %v266_v63  ;;  %v209_v55 = vld [vmem:[%s4202_s14 + $0x1f0] sm:$0xff] }
  0x53   : > { %1529 = vmatpush1.bf16.msra.mxu0 %v3948_v7  ;;  %1572 = vmatpush1.bf16.msra.mxu1 %v3950_v8  ;;  %v172_v7 = vld [vmem:[%s4202_s14 + $0xc8] sm:$0xff] }
  0x54   : > { %1612 = vmatprep.subr.bf16.mxu0 %v3889_v9  ;;  %1655 = vmatprep.subr.bf16.mxu1 %v3891_v10  ;;  %v204_v8 = vld [vmem:[%s4202_s14 + $0x1c8] sm:$0xff]  ;;  %v3964_v9 = vcombine.low %v233_v60, %v265_v61  ;;  %v3966_v10 = vcombine.low %v234_v62, %v266_v63  ;;  %v3917_v60 = vcombine.high %v177_v54, %v209_v55  ;;  %v241_v62 = vld [vmem:[%s4202_s14 + $0x2f0] sm:$0xff] }
  0x55   : > { %v3907_v12 = vcombine.high %v172_v7, %v204_v8  ;;  %v273_v63 = vld [vmem:[%s4202_s14 + $0x3f0] sm:$0xff] }
  0x56   : > { %3998 = vmatmul.mubr.msk.bf16.vlgmr.msra.gmra.mrb[28].mxu0 %vm920_vm0, %v4221_v25  ;;  %3999 = vmatmul.mubr.msk.bf16.vlgmr.msra.gmra.mrb[28].mxu1 %vm920_vm0, %v4221_v25 }
  0x57   : > { %1613 = vmatpush1.bf16.msra.mxu0 %v3888_v15  ;;  %1656 = vmatpush1.bf16.msra.mxu1 %v3890_v16  ;;  %v236_v15 = vld [vmem:[%s4202_s14 + $0x2c8] sm:$0xff] }
  0x58   : > { %1614 = vmatprep.subr.bf16.mxu0 %v3953_v17  ;;  %1657 = vmatprep.subr.bf16.mxu1 %v3955_v18  ;;  %v268_v16 = vld [vmem:[%s4202_s14 + $0x3c8] sm:$0xff]  ;;  %v3904_v17 = vcombine.low %v171_v5, %v203_v6  ;;  %v3906_v18 = vcombine.low %v172_v7, %v204_v8  ;;  %v3981_v5 = vcombine.high %v241_v62, %v273_v63 }
  0x59   : > { %1644 = vmatprep.mubr.bf16.mxu0 %v4170_v0  ;;  %1687 = vmatprep.mubr.bf16.mxu1 %v4170_v0  ;;  %v3971_v20 = vcombine.high %v236_v15, %v268_v16  ;;  %v3980_v7 = vcombine.low %v241_v62, %v273_v63 }
  0x5b   : > { %1615 = vmatpush1.bf16.msra.mxu0 %v3952_v23  ;;  %1658 = vmatpush1.bf16.msra.mxu1 %v3954_v24  ;;  %v174_v23 = vld [vmem:[%s4202_s14 + $0xd8] sm:$0xff] }
  0x5c   : > { %1698 = vmatprep.subr.bf16.mxu0 %v3893_v26  ;;  %1741 = vmatprep.subr.bf16.mxu1 %v3895_v27  ;;  %v206_v24 = vld [vmem:[%s4202_s14 + $0x1d8] sm:$0xff]  ;;  %v3968_v26 = vcombine.low %v235_v13, %v267_v14  ;;  %v3970_v27 = vcombine.low %v236_v15, %v268_v16 }
  0x5d   : > { %v3911_v29 = vcombine.high %v174_v23, %v206_v24 }
  0x5e   : > { %4000 = vmatmul.mubr.msk.bf16.vlgmr.msra.gmra.mrb[32].mxu0 %vm920_vm0, %v4221_v25  ;;  %4001 = vmatmul.mubr.msk.bf16.vlgmr.msra.gmra.mrb[32].mxu1 %vm920_vm0, %v4221_v25 }
  0x5f   : > { %1699 = vmatpush1.bf16.msra.mxu0 %v3892_v32  ;;  %1742 = vmatpush1.bf16.msra.mxu1 %v3894_v33  ;;  %v238_v32 = vld [vmem:[%s4202_s14 + $0x2d8] sm:$0xff] }
  0x60   : > { %1700 = vmatprep.subr.bf16.mxu0 %v3957_v34  ;;  %1743 = vmatprep.subr.bf16.mxu1 %v3959_v35  ;;  %v270_v33 = vld [vmem:[%s4202_s14 + $0x3d8] sm:$0xff]  ;;  %v3908_v34 = vcombine.low %v173_v21, %v205_v22  ;;  %v3910_v35 = vcombine.low %v174_v23, %v206_v24 }
  0x61   : > { %1730 = vmatprep.mubr.bf16.mxu0 %v4170_v0  ;;  %1773 = vmatprep.mubr.bf16.mxu1 %v4170_v0  ;;  %v3975_v37 = vcombine.high %v238_v32, %v270_v33 }
  0x63   : > { %1701 = vmatpush1.bf16.msra.mxu0 %v3956_v40  ;;  %1744 = vmatpush1.bf16.msra.mxu1 %v3958_v41  ;;  %v176_v40 = vld [vmem:[%s4202_s14 + $0xe8] sm:$0xff] }
  0x64   : > { %1784 = vmatprep.subr.bf16.mxu0 %v3897_v42  ;;  %1827 = vmatprep.subr.bf16.mxu1 %v3899_v43  ;;  %v208_v41 = vld [vmem:[%s4202_s14 + $0x1e8] sm:$0xff]  ;;  %v3972_v42 = vcombine.low %v237_v30, %v269_v31  ;;  %v3974_v43 = vcombine.low %v238_v32, %v270_v33 }
  0x65   : > { %v3915_v45 = vcombine.high %v176_v40, %v208_v41 }
  0x66   : > { %4002 = vmatmul.mubr.msk.bf16.vlgmr.msra.gmra.mrb[36].mxu0 %vm920_vm0, %v4221_v25  ;;  %4003 = vmatmul.mubr.msk.bf16.vlgmr.msra.gmra.mrb[36].mxu1 %vm920_vm0, %v4221_v25 }
  0x67   : > { %1785 = vmatpush1.bf16.msra.mxu0 %v3896_v48  ;;  %1828 = vmatpush1.bf16.msra.mxu1 %v3898_v49  ;;  %v240_v48 = vld [vmem:[%s4202_s14 + $0x2e8] sm:$0xff] }
  0x68   : > { %1786 = vmatprep.subr.bf16.mxu0 %v3961_v50  ;;  %1829 = vmatprep.subr.bf16.mxu1 %v3963_v51  ;;  %v272_v49 = vld [vmem:[%s4202_s14 + $0x3e8] sm:$0xff]  ;;  %v3912_v50 = vcombine.low %v175_v38, %v207_v39  ;;  %v3914_v51 = vcombine.low %v176_v40, %v208_v41 }
  0x69   : > { %1816 = vmatprep.mubr.bf16.mxu0 %v4170_v0  ;;  %1859 = vmatprep.mubr.bf16.mxu1 %v4170_v0  ;;  %v3979_v53 = vcombine.high %v240_v48, %v272_v49 }
  0x6b   : > { %1787 = vmatpush1.bf16.msra.mxu0 %v3960_v56  ;;  %1830 = vmatpush1.bf16.msra.mxu1 %v3962_v57  ;;  %v178_v56 = vld [vmem:[%s4202_s14 + $0xf8] sm:$0xff] }
  0x6c   : > { %1870 = vmatprep.subr.bf16.mxu0 %v3901_v58  ;;  %1913 = vmatprep.subr.bf16.mxu1 %v3903_v59  ;;  %v210_v57 = vld [vmem:[%s4202_s14 + $0x1f8] sm:$0xff]  ;;  %v3976_v58 = vcombine.low %v239_v46, %v271_v47  ;;  %v3978_v59 = vcombine.low %v240_v48, %v272_v49 }
  0x6d   : > { %v3919_v61 = vcombine.high %v178_v56, %v210_v57 }
  0x6e   : > { %4004 = vmatmul.mubr.msk.bf16.vlgmr.msra.gmra.mrb[40].mxu0 %vm920_vm0, %v4221_v25  ;;  %4005 = vmatmul.mubr.msk.bf16.vlgmr.msra.gmra.mrb[40].mxu1 %vm920_vm0, %v4221_v25 }
  0x6f   : > { %1871 = vmatpush1.bf16.msra.mxu0 %v3900_v1  ;;  %1914 = vmatpush1.bf16.msra.mxu1 %v3902_v2  ;;  %v242_v1 = vld [vmem:[%s4202_s14 + $0x2f8] sm:$0xff] }
  0x70   : > { %1872 = vmatprep.subr.bf16.mxu0 %v3965_v3  ;;  %1915 = vmatprep.subr.bf16.mxu1 %v3967_v4  ;;  %v274_v2 = vld [vmem:[%s4202_s14 + $0x3f8] sm:$0xff]  ;;  %v3916_v3 = vcombine.low %v177_v54, %v209_v55  ;;  %v3918_v4 = vcombine.low %v178_v56, %v210_v57 }
  0x71   : > { %1902 = vmatprep.mubr.bf16.mxu0 %v4170_v0  ;;  %1945 = vmatprep.mubr.bf16.mxu1 %v4170_v0  ;;  %v3983_v6 = vcombine.high %v242_v1, %v274_v2  ;;  %v3982_v8 = vcombine.low %v242_v1, %v274_v2 }
  0x73   : > { %1873 = vmatpush1.bf16.msra.mxu0 %v3964_v9  ;;  %1916 = vmatpush1.bf16.msra.mxu1 %v3966_v10 }
  0x74   : > { %1956 = vmatprep.subr.bf16.mxu0 %v3905_v11  ;;  %1999 = vmatprep.subr.bf16.mxu1 %v3907_v12 }
  0x76   : > { %4006 = vmatmul.mubr.msk.bf16.vlgmr.msra.gmra.mrb[44].mxu0 %vm920_vm0, %v4221_v25  ;;  %4007 = vmatmul.mubr.msk.bf16.vlgmr.msra.gmra.mrb[44].mxu1 %vm920_vm0, %v4221_v25 }
  0x77   : > { %1957 = vmatpush1.bf16.msra.mxu0 %v3904_v17  ;;  %2000 = vmatpush1.bf16.msra.mxu1 %v3906_v18 }
  0x78   : > { %1958 = vmatprep.subr.bf16.mxu0 %v3969_v19  ;;  %2001 = vmatprep.subr.bf16.mxu1 %v3971_v20 }
  0x79   : > { %1988 = vmatprep.mubr.bf16.mxu0 %v4170_v0  ;;  %2031 = vmatprep.mubr.bf16.mxu1 %v4170_v0 }
  0x7b   : > { %1959 = vmatpush1.bf16.msra.mxu0 %v3968_v26  ;;  %2002 = vmatpush1.bf16.msra.mxu1 %v3970_v27 }
  0x7c   : > { %2042 = vmatprep.subr.bf16.mxu0 %v3909_v28  ;;  %2085 = vmatprep.subr.bf16.mxu1 %v3911_v29 }
  0x7e   : > { %4008 = vmatmul.mubr.msk.bf16.vlgmr.msra.gmra.mrb[48].mxu0 %vm920_vm0, %v4221_v25  ;;  %4009 = vmatmul.mubr.msk.bf16.vlgmr.msra.gmra.mrb[48].mxu1 %vm920_vm0, %v4221_v25 }
  0x7f   : > { %2043 = vmatpush1.bf16.msra.mxu0 %v3908_v34  ;;  %2086 = vmatpush1.bf16.msra.mxu1 %v3910_v35 }
  0x80   : > { %2044 = vmatprep.subr.bf16.mxu0 %v3973_v36  ;;  %2087 = vmatprep.subr.bf16.mxu1 %v3975_v37 }
  0x81   : > { %2074 = vmatprep.mubr.bf16.mxu0 %v4170_v0  ;;  %2117 = vmatprep.mubr.bf16.mxu1 %v4170_v0 }
  0x83   : > { %2045 = vmatpush1.bf16.msra.mxu0 %v3972_v42  ;;  %2088 = vmatpush1.bf16.msra.mxu1 %v3974_v43 }
  0x84   : > { %2128 = vmatprep.subr.bf16.mxu0 %v3913_v44  ;;  %2171 = vmatprep.subr.bf16.mxu1 %v3915_v45 }
  0x86   : > { %4010 = vmatmul.mubr.msk.bf16.vlgmr.msra.gmra.mrb[52].mxu0 %vm920_vm0, %v4221_v25  ;;  %4011 = vmatmul.mubr.msk.bf16.vlgmr.msra.gmra.mrb[52].mxu1 %vm920_vm0, %v4221_v25 }
  0x87   : > { %2129 = vmatpush1.bf16.msra.mxu0 %v3912_v50  ;;  %2172 = vmatpush1.bf16.msra.mxu1 %v3914_v51 }
  0x88   : > { %2130 = vmatprep.subr.bf16.mxu0 %v3977_v52  ;;  %2173 = vmatprep.subr.bf16.mxu1 %v3979_v53 }
  0x89   : > { %2160 = vmatprep.mubr.bf16.mxu0 %v4170_v0  ;;  %2203 = vmatprep.mubr.bf16.mxu1 %v4170_v0 }
  0x8b   : > { %2131 = vmatpush1.bf16.msra.mxu0 %v3976_v58  ;;  %2174 = vmatpush1.bf16.msra.mxu1 %v3978_v59 }
  0x8c   : > { %2214 = vmatprep.subr.bf16.mxu0 %v3917_v60  ;;  %2257 = vmatprep.subr.bf16.mxu1 %v3919_v61 }
  0x8e   : > { %4012 = vmatmul.mubr.msk.bf16.vlgmr.msra.gmra.mrb[56].mxu0 %vm920_vm0, %v4221_v25  ;;  %4013 = vmatmul.mubr.msk.bf16.vlgmr.msra.gmra.mrb[56].mxu1 %vm920_vm0, %v4221_v25 }
  0x8f   : > { %2215 = vmatpush1.bf16.msra.mxu0 %v3916_v3  ;;  %2258 = vmatpush1.bf16.msra.mxu1 %v3918_v4 }
  0x90   : > { %2216 = vmatprep.subr.bf16.mxu0 %v3981_v5  ;;  %2259 = vmatprep.subr.bf16.mxu1 %v3983_v6 }
  0x91   : > { %2246 = vmatprep.mubr.bf16.mxu0 %v4170_v0  ;;  %2289 = vmatprep.mubr.bf16.mxu1 %v4170_v0 }
  0x93   : > { %2217 = vmatpush1.bf16.msra.mxu0 %v3980_v7  ;;  %2260 = vmatpush1.bf16.msra.mxu1 %v3982_v8 }
  0x96   : > { %4014 = vmatmul.mubr.msk.bf16.vlgmr.msra.gmra.mrb[60].mxu0 %vm920_vm0, %v4221_v25  ;;  %4015 = vmatmul.mubr.msk.bf16.vlgmr.msra.gmra.mrb[60].mxu1 %vm920_vm0, %v4221_v25 }
  0xf1   : > { %v4431_v9 = vpop.f32.mrb[0].mxu0  ;;  %v4437_v12 = vpop.f32.mrb[0].mxu1 }
  0xf2   : > { %v2433_v10 = vmul.f32 %v4431_v9, %v4431_v9  ;;  %v4435_v11 = vpop.f32.mrb[1].mxu0  ;;  %v2435_v25 = vmul.f32 %v4437_v12, %v4437_v12  ;;  %v4447_v15 = vpop.f32.mrb[1].mxu1 }
  0xf3   : > { %v2300_v0 = vadd.f32 %v4435_v11, %v4431_v9  ;;  %v2434_v13 = vmul.f32 %v4435_v11, %v4435_v11  ;;  %v4443_v14 = vpop.f32.mrb[2].mxu0  ;;  %v2436_v18 = vmul.f32 %v4447_v15, %v4447_v15  ;;  %v4455_v19 = vpop.f32.mrb[2].mxu1 }
  0xf4   : > { %7705 = vst [vmem:[#allocation2_spill] sm:$0xff] %v4443_v14  ;;  %v2497_v16 = vmul.f32 %v4443_v14, %v4443_v14  ;;  %v4451_v17 = vpop.f32.mrb[3].mxu0  ;;  %7707 = vst [vmem:[#allocation4_spill] sm:$0xff] %v4455_v19  ;;  %v4462_v24 = vpop.f32.mrb[3].mxu1  ;;  %v2499_v26 = vmul.f32 %v4455_v19, %v4455_v19 }
  0xf5   : > { %7706 = vst [vmem:[#allocation3_spill] sm:$0xff] %v4451_v17  ;;  %v2561_v20 = vadd.f32 %v2434_v13, %v2433_v10  ;;  %v2301_v21 = vadd.f32 %v2300_v0, %v4437_v12  ;;  %v2365_v22 = vadd.f32 %v4451_v17, %v4443_v14  ;;  %v2498_v23 = vmul.f32 %v4451_v17, %v4451_v17 }
  0xf6   : > { %7708 = vst [vmem:[#allocation5_spill] sm:$0xff] %v4462_v24  ;;  %v2500_v34 = vmul.f32 %v4462_v24, %v4462_v24 }
  0xf7   : > { %v2562_v27 = vadd.f32 %v2561_v20, %v2435_v25  ;;  %v2626_v28 = vadd.f32 %v2498_v23, %v2497_v16  ;;  %v2302_v29 = vadd.f32 %v2301_v21, %v4447_v15  ;;  %v2366_v30 = vadd.f32 %v2365_v22, %v4455_v19 }
  0xf9   : > { %v2563_v31 = vadd.f32 %v2562_v27, %v2436_v18  ;;  %v2627_v32 = vadd.f32 %v2626_v28, %v2499_v26  ;;  %v2367_v33 = vadd.f32 %v2366_v30, %v4462_v24  ;;  %v4471_v35 = vpop.f32.mrb[4].mxu0  ;;  %v4478_v39 = vpop.f32.mrb[4].mxu1 }
  0xfa   : > { %v2303_v36 = vadd.f32 %v2302_v29, %v4471_v35  ;;  %v2437_v37 = vmul.f32 %v4471_v35, %v4471_v35  ;;  %v4476_v38 = vpop.f32.mrb[5].mxu0  ;;  %v2439_v43 = vmul.f32 %v4478_v39, %v4478_v39  ;;  %v4486_v44 = vpop.f32.mrb[5].mxu1 }
  0xfb   : > { %v2628_v40 = vadd.f32 %v2627_v32, %v2500_v34  ;;  %v2438_v41 = vmul.f32 %v4476_v38, %v4476_v38  ;;  %v4482_v42 = vpop.f32.mrb[6].mxu0  ;;  %v4494_v50 = vpop.f32.mrb[6].mxu1  ;;  %v2440_v57 = vmul.f32 %v4486_v44, %v4486_v44 }
  0xfc   : > { %7709 = vst [vmem:[#allocation6_spill] sm:$0xff] %v4482_v42  ;;  %v2564_v45 = vadd.f32 %v2563_v31, %v2437_v37  ;;  %v2304_v46 = vadd.f32 %v2303_v36, %v4476_v38  ;;  %v2368_v47 = vadd.f32 %v2367_v33, %v4482_v42  ;;  %v2501_v48 = vmul.f32 %v4482_v42, %v4482_v42  ;;  %v4492_v49 = vpop.f32.mrb[7].mxu0  ;;  %v4498_v52 = vpop.f32.mrb[7].mxu1 }
  0xfd   : > { %7710 = vst [vmem:[#allocation7_spill] sm:$0xff] %v4492_v49  ;;  %7711 = vst [vmem:[#allocation8_spill] sm:$0xff] %v4494_v50  ;;  %v2502_v51 = vmul.f32 %v4492_v49, %v4492_v49  ;;  %v2503_v58 = vmul.f32 %v4494_v50, %v4494_v50  ;;  %v2504_v63 = vmul.f32 %v4498_v52, %v4498_v52 }
  0xfe   : > { %7712 = vst [vmem:[#allocation9_spill] sm:$0xff] %v4498_v52  ;;  %v2565_v53 = vadd.f32 %v2564_v45, %v2438_v41  ;;  %v2629_v54 = vadd.f32 %v2628_v40, %v2501_v48  ;;  %v2305_v55 = vadd.f32 %v2304_v46, %v4478_v39  ;;  %v2369_v56 = vadd.f32 %v2368_v47, %v4492_v49 }
 0x100   : > { %v2566_v59 = vadd.f32 %v2565_v53, %v2439_v43  ;;  %v2630_v60 = vadd.f32 %v2629_v54, %v2502_v51  ;;  %v2306_v61 = vadd.f32 %v2305_v55, %v4486_v44  ;;  %v2370_v62 = vadd.f32 %v2369_v56, %v4494_v50 }
 0x101   : > { %v4510_v1 = vpop.f32.mrb[8].mxu0  ;;  %v4516_v7 = vpop.f32.mrb[8].mxu1 }
 0x102   : > { %v2567_v2 = vadd.f32 %v2566_v59, %v2440_v57  ;;  %v2631_v3 = vadd.f32 %v2630_v60, %v2503_v58  ;;  %v2371_v4 = vadd.f32 %v2370_v62, %v4498_v52  ;;  %v2307_v5 = vadd.f32 %v2306_v61, %v4510_v1  ;;  %v4514_v6 = vpop.f32.mrb[9].mxu0  ;;  %v4524_v13 = vpop.f32.mrb[9].mxu1 }
 0x103   : > { %v2441_v8 = vmul.f32 %v4510_v1, %v4510_v1  ;;  %v2442_v10 = vmul.f32 %v4514_v6, %v4514_v6  ;;  %v4522_v0 = vpop.f32.mrb[10].mxu0  ;;  %v4532_v22 = vpop.f32.mrb[10].mxu1  ;;  %v2443_v26 = vmul.f32 %v4516_v7, %v4516_v7  ;;  %v2444_v41 = vmul.f32 %v4524_v13, %v4524_v13 }
 0x104   : > { %7713 = vst [vmem:[#allocation10_spill] sm:$0xff] %v4522_v0  ;;  %v2632_v25 = vadd.f32 %v2631_v3, %v2504_v63  ;;  %v2308_v16 = vadd.f32 %v2307_v5, %v4514_v6  ;;  %v2372_v18 = vadd.f32 %v2371_v4, %v4522_v0  ;;  %v2505_v20 = vmul.f32 %v4522_v0, %v4522_v0  ;;  %v4530_v21 = vpop.f32.mrb[11].mxu0  ;;  %v4538_v28 = vpop.f32.mrb[11].mxu1 }
 0x105   : > { %7714 = vst [vmem:[#allocation11_spill] sm:$0xff] %v4530_v21  ;;  %7715 = vst [vmem:[#allocation12_spill] sm:$0xff] %v4532_v22  ;;  %v2568_v23 = vadd.f32 %v2567_v2, %v2441_v8  ;;  %v2506_v27 = vmul.f32 %v4530_v21, %v4530_v21  ;;  %v2507_v37 = vmul.f32 %v4532_v22, %v4532_v22 }
 0x106   : > { %7716 = vst [vmem:[#allocation13_spill] sm:$0xff] %v4538_v28  ;;  %v2633_v29 = vadd.f32 %v2632_v25, %v2505_v20  ;;  %v2309_v30 = vadd.f32 %v2308_v16, %v4516_v7  ;;  %v2373_v31 = vadd.f32 %v2372_v18, %v4530_v21  ;;  %v2508_v43 = vmul.f32 %v4538_v28, %v4538_v28 }
 0x107   : > { %v2569_v32 = vadd.f32 %v2568_v23, %v2442_v10 }
 0x108   : > { %v2634_v33 = vadd.f32 %v2633_v29, %v2506_v27  ;;  %v2310_v34 = vadd.f32 %v2309_v30, %v4524_v13  ;;  %v2374_v36 = vadd.f32 %v2373_v31, %v4532_v22 }
 0x109   : > { %v2570_v40 = vadd.f32 %v2569_v32, %v2443_v26  ;;  %v4550_v45 = vpop.f32.mrb[12].mxu0  ;;  %v4558_v54 = vpop.f32.mrb[12].mxu1 }
 0x10a   : > { %v2635_v46 = vadd.f32 %v2634_v33, %v2507_v37  ;;  %v2375_v47 = vadd.f32 %v2374_v36, %v4538_v28  ;;  %v2311_v48 = vadd.f32 %v2310_v34, %v4550_v45  ;;  %v2445_v51 = vmul.f32 %v4550_v45, %v4550_v45  ;;  %v4556_v53 = vpop.f32.mrb[13].mxu0  ;;  %v4564_v58 = vpop.f32.mrb[13].mxu1 }
 0x10b   : > { %v2571_v55 = vadd.f32 %v2570_v40, %v2444_v41  ;;  %v2446_v56 = vmul.f32 %v4556_v53, %v4556_v53  ;;  %v4562_v57 = vpop.f32.mrb[14].mxu0  ;;  %v4572_v2 = vpop.f32.mrb[14].mxu1  ;;  %v2447_v4 = vmul.f32 %v4558_v54, %v4558_v54  ;;  %v2448_v30 = vmul.f32 %v4564_v58, %v4564_v58 }
 0x10c   : > { %7717 = vst [vmem:[#allocation14_spill] sm:$0xff] %v4562_v57  ;;  %v2636_v59 = vadd.f32 %v2635_v46, %v2508_v43  ;;  %v2312_v60 = vadd.f32 %v2311_v48, %v4556_v53  ;;  %v2376_v61 = vadd.f32 %v2375_v47, %v4562_v57  ;;  %v2509_v62 = vmul.f32 %v4562_v57, %v4562_v57  ;;  %v4570_v63 = vpop.f32.mrb[15].mxu0  ;;  %v4578_v8 = vpop.f32.mrb[15].mxu1 }
 0x10d   : > { %7718 = vst [vmem:[#allocation15_spill] sm:$0xff] %v4570_v63  ;;  %7719 = vst [vmem:[#allocation16_spill] sm:$0xff] %v4572_v2  ;;  %v2572_v3 = vadd.f32 %v2571_v55, %v2445_v51  ;;  %v2510_v5 = vmul.f32 %v4570_v63, %v4570_v63  ;;  %v2511_v27 = vmul.f32 %v4572_v2, %v4572_v2 }
 0x10e   : > { %7720 = vst [vmem:[#allocation17_spill] sm:$0xff] %v4578_v8  ;;  %v2637_v10 = vadd.f32 %v2636_v59, %v2509_v62  ;;  %v2313_v25 = vadd.f32 %v2312_v60, %v4558_v54  ;;  %v2377_v16 = vadd.f32 %v2376_v61, %v4570_v63  ;;  %v2512_v31 = vmul.f32 %v4578_v8, %v4578_v8 }
 0x10f   : > { %v2573_v18 = vadd.f32 %v2572_v3, %v2446_v56 }
 0x110   : > { %v2638_v20 = vadd.f32 %v2637_v10, %v2510_v5  ;;  %v2314_v23 = vadd.f32 %v2313_v25, %v4564_v58  ;;  %v2378_v26 = vadd.f32 %v2377_v16, %v4572_v2 }
 0x111   : > { %v2574_v29 = vadd.f32 %v2573_v18, %v2447_v4  ;;  %v4590_v32 = vpop.f32.mrb[16].mxu0  ;;  %v4598_v41 = vpop.f32.mrb[16].mxu1 }
 0x112   : > { %v2639_v33 = vadd.f32 %v2638_v20, %v2511_v27  ;;  %v2379_v34 = vadd.f32 %v2378_v26, %v4578_v8  ;;  %v2315_v36 = vadd.f32 %v2314_v23, %v4590_v32  ;;  %v2449_v37 = vmul.f32 %v4590_v32, %v4590_v32  ;;  %v4596_v40 = vpop.f32.mrb[17].mxu0  ;;  %v4604_v48 = vpop.f32.mrb[17].mxu1 }
 0x113   : > { %v2575_v43 = vadd.f32 %v2574_v29, %v2448_v30  ;;  %v2450_v46 = vmul.f32 %v4596_v40, %v4596_v40  ;;  %v4602_v47 = vpop.f32.mrb[18].mxu0  ;;  %v4612_v61 = vpop.f32.mrb[18].mxu1  ;;  %v2451_v3 = vmul.f32 %v4598_v41, %v4598_v41  ;;  %v2452_v30 = vmul.f32 %v4604_v48, %v4604_v48 }
 0x114   : > { %7721 = vst [vmem:[#allocation18_spill] sm:$0xff] %v4602_v47  ;;  %v2640_v51 = vadd.f32 %v2639_v33, %v2512_v31  ;;  %v2316_v55 = vadd.f32 %v2315_v36, %v4596_v40  ;;  %v2380_v56 = vadd.f32 %v2379_v34, %v4602_v47  ;;  %v2513_v59 = vmul.f32 %v4602_v47, %v4602_v47  ;;  %v4610_v60 = vpop.f32.mrb[19].mxu0  ;;  %v4618_v5 = vpop.f32.mrb[19].mxu1 }
 0x115   : > { %7722 = vst [vmem:[#allocation19_spill] sm:$0xff] %v4610_v60  ;;  %7723 = vst [vmem:[#allocation20_spill] sm:$0xff] %v4612_v61  ;;  %v2576_v62 = vadd.f32 %v2575_v43, %v2449_v37  ;;  %v2514_v4 = vmul.f32 %v4610_v60, %v4610_v60  ;;  %v2515_v27 = vmul.f32 %v4612_v61, %v4612_v61 }
 0x116   : > { %7724 = vst [vmem:[#allocation21_spill] sm:$0xff] %v4618_v5  ;;  %v2641_v10 = vadd.f32 %v2640_v51, %v2513_v59  ;;  %v2317_v25 = vadd.f32 %v2316_v55, %v4598_v41  ;;  %v2381_v16 = vadd.f32 %v2380_v56, %v4610_v60  ;;  %v2516_v31 = vmul.f32 %v4618_v5, %v4618_v5 }
 0x117   : > { %v2577_v18 = vadd.f32 %v2576_v62, %v2450_v46 }
 0x118   : > { %v2642_v20 = vadd.f32 %v2641_v10, %v2514_v4  ;;  %v2318_v23 = vadd.f32 %v2317_v25, %v4604_v48  ;;  %v2382_v26 = vadd.f32 %v2381_v16, %v4612_v61 }
 0x119   : > { %v2578_v29 = vadd.f32 %v2577_v18, %v2451_v3  ;;  %v4630_v33 = vpop.f32.mrb[20].mxu0  ;;  %v4638_v51 = vpop.f32.mrb[20].mxu1 }
 0x11a   : > { %v2643_v34 = vadd.f32 %v2642_v20, %v2515_v27  ;;  %v2383_v36 = vadd.f32 %v2382_v26, %v4618_v5  ;;  %v2319_v37 = vadd.f32 %v2318_v23, %v4630_v33  ;;  %v2453_v43 = vmul.f32 %v4630_v33, %v4630_v33  ;;  %v4636_v46 = vpop.f32.mrb[21].mxu0  ;;  %v4644_v62 = vpop.f32.mrb[21].mxu1 }
 0x11b   : > { %v2579_v55 = vadd.f32 %v2578_v29, %v2452_v30  ;;  %v2454_v56 = vmul.f32 %v4636_v46, %v4636_v46  ;;  %v4642_v59 = vpop.f32.mrb[22].mxu0  ;;  %v4652_v18 = vpop.f32.mrb[22].mxu1  ;;  %v2455_v23 = vmul.f32 %v4638_v51, %v4638_v51  ;;  %v2456_v5 = vmul.f32 %v4644_v62, %v4644_v62 }
 0x11c   : > { %7725 = vst [vmem:[#allocation22_spill] sm:$0xff] %v4642_v59  ;;  %v2644_v3 = vadd.f32 %v2643_v34, %v2516_v31  ;;  %v2320_v4 = vadd.f32 %v2319_v37, %v4636_v46  ;;  %v2384_v10 = vadd.f32 %v2383_v36, %v4642_v59  ;;  %v2517_v25 = vmul.f32 %v4642_v59, %v4642_v59  ;;  %v4650_v16 = vpop.f32.mrb[23].mxu0  ;;  %v4658_v27 = vpop.f32.mrb[23].mxu1 }
 0x11d   : > { %7726 = vst [vmem:[#allocation23_spill] sm:$0xff] %v4650_v16  ;;  %7727 = vst [vmem:[#allocation24_spill] sm:$0xff] %v4652_v18  ;;  %v2580_v20 = vadd.f32 %v2579_v55, %v2453_v43  ;;  %v2518_v26 = vmul.f32 %v4650_v16, %v4650_v16  ;;  %v2519_v43 = vmul.f32 %v4652_v18, %v4652_v18 }
 0x11e   : > { %7728 = vst [vmem:[#allocation25_spill] sm:$0xff] %v4658_v27  ;;  %v2645_v29 = vadd.f32 %v2644_v3, %v2517_v25  ;;  %v2321_v30 = vadd.f32 %v2320_v4, %v4638_v51  ;;  %v2385_v31 = vadd.f32 %v2384_v10, %v4650_v16  ;;  %v2520_v3 = vmul.f32 %v4658_v27, %v4658_v27 }
 0x11f   : > { %v2581_v34 = vadd.f32 %v2580_v20, %v2454_v56 }
 0x120   : > { %v2646_v36 = vadd.f32 %v2645_v29, %v2518_v26  ;;  %v2322_v37 = vadd.f32 %v2321_v30, %v4644_v62  ;;  %v2386_v59 = vadd.f32 %v2385_v31, %v4652_v18 }
 0x121   : > { %v2582_v55 = vadd.f32 %v2581_v34, %v2455_v23  ;;  %v4670_v25 = vpop.f32.mrb[24].mxu0  ;;  %v4678_v29 = vpop.f32.mrb[24].mxu1 }
 0x122   : > { %v2647_v4 = vadd.f32 %v2646_v36, %v2519_v43  ;;  %v2387_v56 = vadd.f32 %v2386_v59, %v4658_v27  ;;  %v2323_v10 = vadd.f32 %v2322_v37, %v4670_v25  ;;  %v2457_v20 = vmul.f32 %v4670_v25, %v4670_v25  ;;  %v4676_v26 = vpop.f32.mrb[25].mxu0  ;;  %v4684_v34 = vpop.f32.mrb[25].mxu1 }
 0x123   : > { %v2583_v23 = vadd.f32 %v2582_v55, %v2456_v5  ;;  %v2458_v30 = vmul.f32 %v4676_v26, %v4676_v26  ;;  %v4682_v31 = vpop.f32.mrb[26].mxu0  ;;  %v4692_v18 = vpop.f32.mrb[26].mxu1  ;;  %v2459_v55 = vmul.f32 %v4678_v29, %v4678_v29  ;;  %v2460_v8 = vmul.f32 %v4684_v34, %v4684_v34 }
 0x124   : > { %7729 = vst [vmem:[#allocation26_spill] sm:$0xff] %v4682_v31  ;;  %v2648_v36 = vadd.f32 %v2647_v4, %v2520_v3  ;;  %v2324_v59 = vadd.f32 %v2323_v10, %v4676_v26  ;;  %v2388_v37 = vadd.f32 %v2387_v56, %v4682_v31  ;;  %v2521_v43 = vmul.f32 %v4682_v31, %v4682_v31  ;;  %v4690_v27 = vpop.f32.mrb[27].mxu0  ;;  %v4698_v61 = vpop.f32.mrb[27].mxu1 }
 0x125   : > { %7730 = vst [vmem:[#allocation27_spill] sm:$0xff] %v4690_v27  ;;  %7731 = vst [vmem:[#allocation28_spill] sm:$0xff] %v4692_v18  ;;  %v2584_v5 = vadd.f32 %v2583_v23, %v2457_v20  ;;  %v2522_v16 = vmul.f32 %v4690_v27, %v4690_v27  ;;  %v2523_v20 = vmul.f32 %v4692_v18, %v4692_v18 }
 0x126   : > { %7732 = vst [vmem:[#allocation29_spill] sm:$0xff] %v4698_v61  ;;  %v2649_v3 = vadd.f32 %v2648_v36, %v2521_v43  ;;  %v2325_v4 = vadd.f32 %v2324_v59, %v4678_v29  ;;  %v2389_v56 = vadd.f32 %v2388_v37, %v4690_v27  ;;  %v2524_v36 = vmul.f32 %v4698_v61, %v4698_v61 }
 0x127   : > { %v2585_v10 = vadd.f32 %v2584_v5, %v2458_v30 }
 0x128   : > { %v2650_v31 = vadd.f32 %v2649_v3, %v2522_v16  ;;  %v2326_v60 = vadd.f32 %v2325_v4, %v4684_v34  ;;  %v2390_v47 = vadd.f32 %v2389_v56, %v4692_v18 }
 0x129   : > { %v2586_v23 = vadd.f32 %v2585_v10, %v2459_v55  ;;  %v4710_v43 = vpop.f32.mrb[28].mxu0  ;;  %v4718_v3 = vpop.f32.mrb[28].mxu1 }
 0x12a   : > { %v2651_v59 = vadd.f32 %v2650_v31, %v2523_v20  ;;  %v2391_v30 = vadd.f32 %v2390_v47, %v4698_v61  ;;  %v2327_v16 = vadd.f32 %v2326_v60, %v4710_v43  ;;  %v2461_v37 = vmul.f32 %v4710_v43, %v4710_v43  ;;  %v4716_v5 = vpop.f32.mrb[29].mxu0  ;;  %v4724_v10 = vpop.f32.mrb[29].mxu1 }
 0x12b   : > { %v2587_v55 = vadd.f32 %v2586_v23, %v2460_v8  ;;  %v2462_v4 = vmul.f32 %v4716_v5, %v4716_v5  ;;  %v4722_v56 = vpop.f32.mrb[30].mxu0  ;;  %v4732_v18 = vpop.f32.mrb[30].mxu1  ;;  %v2463_v23 = vmul.f32 %v4718_v3, %v4718_v3  ;;  %v2464_v28 = vmul.f32 %v4724_v10, %v4724_v10 }
 0x12c   : > { %7733 = vst [vmem:[#allocation30_spill] sm:$0xff] %v4722_v56  ;;  %v2652_v31 = vadd.f32 %v2651_v59, %v2524_v36  ;;  %v2328_v47 = vadd.f32 %v2327_v16, %v4716_v5  ;;  %v2392_v60 = vadd.f32 %v2391_v30, %v4722_v56  ;;  %v2525_v20 = vmul.f32 %v4722_v56, %v4722_v56  ;;  %v4730_v61 = vpop.f32.mrb[31].mxu0  ;;  %v4738_v2 = vpop.f32.mrb[31].mxu1 }
 0x12d   : > { %7734 = vst [vmem:[#allocation31_spill] sm:$0xff] %v4730_v61  ;;  %7735 = vst [vmem:[#allocation32_spill] sm:$0xff] %v4732_v18  ;;  %v2588_v8 = vadd.f32 %v2587_v55, %v2461_v37  ;;  %v2526_v27 = vmul.f32 %v4730_v61, %v4730_v61  ;;  %v2527_v37 = vmul.f32 %v4732_v18, %v4732_v18 }
 0x12e   : > { %7736 = vst [vmem:[#allocation33_spill] sm:$0xff] %v4738_v2  ;;  %v2653_v36 = vadd.f32 %v2652_v31, %v2525_v20  ;;  %v2329_v59 = vadd.f32 %v2328_v47, %v4718_v3  ;;  %v2393_v30 = vadd.f32 %v2392_v60, %v4730_v61  ;;  %v2528_v31 = vmul.f32 %v4738_v2, %v4738_v2 }
 0x12f   : > { %v2589_v16 = vadd.f32 %v2588_v8, %v2462_v4 }
 0x130   : > { %v2654_v56 = vadd.f32 %v2653_v36, %v2526_v27  ;;  %v2330_v63 = vadd.f32 %v2329_v59, %v4724_v10  ;;  %v2394_v57 = vadd.f32 %v2393_v30, %v4732_v18 }
 0x131   : > { %v2590_v55 = vadd.f32 %v2589_v16, %v2463_v23  ;;  %v4750_v20 = vpop.f32.mrb[32].mxu0  ;;  %v4758_v36 = vpop.f32.mrb[32].mxu1 }
 0x132   : > { %v2655_v47 = vadd.f32 %v2654_v56, %v2527_v37  ;;  %v2395_v4 = vadd.f32 %v2394_v57, %v4738_v2  ;;  %v2331_v27 = vadd.f32 %v2330_v63, %v4750_v20  ;;  %v2465_v60 = vmul.f32 %v4750_v20, %v4750_v20  ;;  %v4756_v8 = vpop.f32.mrb[33].mxu0  ;;  %v4764_v16 = vpop.f32.mrb[33].mxu1 }
 0x133   : > { %v2591_v23 = vadd.f32 %v2590_v55, %v2464_v28  ;;  %v2466_v59 = vmul.f32 %v4756_v8, %v4756_v8  ;;  %v4762_v30 = vpop.f32.mrb[34].mxu0  ;;  %v4772_v18 = vpop.f32.mrb[34].mxu1  ;;  %v2467_v55 = vmul.f32 %v4758_v36, %v4758_v36  ;;  %v2468_v52 = vmul.f32 %v4764_v16, %v4764_v16 }
 0x134   : > { %7737 = vst [vmem:[#allocation34_spill] sm:$0xff] %v4762_v30  ;;  %v2656_v56 = vadd.f32 %v2655_v47, %v2528_v31  ;;  %v2332_v57 = vadd.f32 %v2331_v27, %v4756_v8  ;;  %v2396_v63 = vadd.f32 %v2395_v4, %v4762_v30  ;;  %v2529_v37 = vmul.f32 %v4762_v30, %v4762_v30  ;;  %v4770_v2 = vpop.f32.mrb[35].mxu0  ;;  %v4778_v22 = vpop.f32.mrb[35].mxu1 }
 0x135   : > { %7738 = vst [vmem:[#allocation35_spill] sm:$0xff] %v4770_v2  ;;  %7739 = vst [vmem:[#allocation36_spill] sm:$0xff] %v4772_v18  ;;  %v2592_v28 = vadd.f32 %v2591_v23, %v2465_v60  ;;  %v2530_v61 = vmul.f32 %v4770_v2, %v4770_v2  ;;  %v2531_v60 = vmul.f32 %v4772_v18, %v4772_v18 }
 0x136   : > { %7740 = vst [vmem:[#allocation37_spill] sm:$0xff] %v4778_v22  ;;  %v2657_v31 = vadd.f32 %v2656_v56, %v2529_v37  ;;  %v2333_v47 = vadd.f32 %v2332_v57, %v4758_v36  ;;  %v2397_v4 = vadd.f32 %v2396_v63, %v4770_v2  ;;  %v2532_v56 = vmul.f32 %v4778_v22, %v4778_v22 }
 0x137   : > { %v2593_v27 = vadd.f32 %v2592_v28, %v2466_v59 }
 0x138   : > { %v2658_v30 = vadd.f32 %v2657_v31, %v2530_v61  ;;  %v2334_v21 = vadd.f32 %v2333_v47, %v4764_v16  ;;  %v2398_v0 = vadd.f32 %v2397_v4, %v4772_v18 }
 0x139   : > { %v2594_v23 = vadd.f32 %v2593_v27, %v2467_v55  ;;  %v4790_v37 = vpop.f32.mrb[36].mxu0  ;;  %v4798_v31 = vpop.f32.mrb[36].mxu1 }
 0x13a   : > { %v2659_v57 = vadd.f32 %v2658_v30, %v2531_v60  ;;  %v2399_v59 = vadd.f32 %v2398_v0, %v4778_v22  ;;  %v2335_v61 = vadd.f32 %v2334_v21, %v4790_v37  ;;  %v2469_v63 = vmul.f32 %v4790_v37, %v4790_v37  ;;  %v4796_v28 = vpop.f32.mrb[37].mxu0  ;;  %v4804_v27 = vpop.f32.mrb[37].mxu1 }
 0x13b   : > { %v2595_v55 = vadd.f32 %v2594_v23, %v2468_v52  ;;  %v2470_v47 = vmul.f32 %v4796_v28, %v4796_v28  ;;  %v4802_v4 = vpop.f32.mrb[38].mxu0  ;;  %v4812_v18 = vpop.f32.mrb[38].mxu1  ;;  %v2471_v23 = vmul.f32 %v4798_v31, %v4798_v31  ;;  %v2472_v24 = vmul.f32 %v4804_v27, %v4804_v27 }
 0x13c   : > { %7741 = vst [vmem:[#allocation38_spill] sm:$0xff] %v4802_v4  ;;  %v2660_v30 = vadd.f32 %v2659_v57, %v2532_v56  ;;  %v2336_v0 = vadd.f32 %v2335_v61, %v4796_v28  ;;  %v2400_v21 = vadd.f32 %v2399_v59, %v4802_v4  ;;  %v2533_v60 = vmul.f32 %v4802_v4, %v4802_v4  ;;  %v4810_v22 = vpop.f32.mrb[39].mxu0  ;;  %v4818_v50 = vpop.f32.mrb[39].mxu1 }
 0x13d   : > { %7742 = vst [vmem:[#allocation39_spill] sm:$0xff] %v4810_v22  ;;  %7743 = vst [vmem:[#allocation40_spill] sm:$0xff] %v4812_v18  ;;  %v2596_v52 = vadd.f32 %v2595_v55, %v2469_v63  ;;  %v2534_v2 = vmul.f32 %v4810_v22, %v4810_v22  ;;  %v2535_v63 = vmul.f32 %v4812_v18, %v4812_v18 }
 0x13e   : > { %7744 = vst [vmem:[#allocation41_spill] sm:$0xff] %v4818_v50  ;;  %v2661_v56 = vadd.f32 %v2660_v30, %v2533_v60  ;;  %v2337_v57 = vadd.f32 %v2336_v0, %v4798_v31  ;;  %v2401_v59 = vadd.f32 %v2400_v21, %v4810_v22  ;;  %v2536_v30 = vmul.f32 %v4818_v50, %v4818_v50 }
 0x13f   : > { %v2597_v61 = vadd.f32 %v2596_v52, %v2470_v47 }
 0x140   : > { %v2662_v4 = vadd.f32 %v2661_v56, %v2534_v2  ;;  %v2338_v49 = vadd.f32 %v2337_v57, %v4804_v27  ;;  %v2402_v42 = vadd.f32 %v2401_v59, %v4812_v18 }
 0x141   : > { %v2598_v55 = vadd.f32 %v2597_v61, %v2471_v23  ;;  %v4830_v60 = vpop.f32.mrb[40].mxu0  ;;  %v4838_v56 = vpop.f32.mrb[40].mxu1 }
 0x142   : > { %v2663_v0 = vadd.f32 %v2662_v4, %v2535_v63  ;;  %v2403_v47 = vadd.f32 %v2402_v42, %v4818_v50  ;;  %v2339_v2 = vadd.f32 %v2338_v49, %v4830_v60  ;;  %v2473_v21 = vmul.f32 %v4830_v60, %v4830_v60  ;;  %v4836_v52 = vpop.f32.mrb[41].mxu0  ;;  %7746 = vst [vmem:[#allocation43_spill] sm:$0xff] %v4838_v56  ;;  %v4844_v61 = vpop.f32.mrb[41].mxu1 }
 0x143   : > { %7745 = vst [vmem:[#allocation42_spill] sm:$0xff] %v4836_v52  ;;  %v2599_v23 = vadd.f32 %v2598_v55, %v2472_v24  ;;  %v2474_v57 = vmul.f32 %v4836_v52, %v4836_v52  ;;  %v4842_v59 = vpop.f32.mrb[42].mxu0  ;;  %7748 = vst [vmem:[#allocation45_spill] sm:$0xff] %v4844_v61  ;;  %v4852_v18 = vpop.f32.mrb[42].mxu1  ;;  %v2475_v55 = vmul.f32 %v4838_v56, %v4838_v56 }
 0x144   : > { %7747 = vst [vmem:[#allocation44_spill] sm:$0xff] %v4842_v59  ;;  %v2664_v4 = vadd.f32 %v2663_v0, %v2536_v30  ;;  %v2340_v42 = vadd.f32 %v2339_v2, %v4836_v52  ;;  %v2404_v49 = vadd.f32 %v2403_v47, %v4842_v59  ;;  %v2537_v63 = vmul.f32 %v4842_v59, %v4842_v59  ;;  %v4850_v50 = vpop.f32.mrb[43].mxu0  ;;  %v4858_v19 = vpop.f32.mrb[43].mxu1 }
 0x145   : > { %7749 = vst [vmem:[#allocation46_spill] sm:$0xff] %v4850_v50  ;;  %7750 = vst [vmem:[#allocation47_spill] sm:$0xff] %v4852_v18  ;;  %v2600_v24 = vadd.f32 %v2599_v23, %v2473_v21  ;;  %v2538_v22 = vmul.f32 %v4850_v50, %v4850_v50  ;;  %v2539_v21 = vmul.f32 %v4852_v18, %v4852_v18 }
 0x146   : > { %7751 = vst [vmem:[#allocation48_spill] sm:$0xff] %v4858_v19  ;;  %v2665_v30 = vadd.f32 %v2664_v4, %v2537_v63  ;;  %v2341_v0 = vadd.f32 %v2340_v42, %v4838_v56  ;;  %v2405_v47 = vadd.f32 %v2404_v49, %v4850_v50  ;;  %v2476_v52 = vmul.f32 %v4844_v61, %v4844_v61 }
 0x147   : > { %v2601_v2 = vadd.f32 %v2600_v24, %v2474_v57  ;;  %v2540_v4 = vmul.f32 %v4858_v19, %v4858_v19 }
 0x148   : > { %v2666_v59 = vadd.f32 %v2665_v30, %v2538_v22  ;;  %v2342_v17 = vadd.f32 %v2341_v0, %v4844_v61  ;;  %v2406_v14 = vadd.f32 %v2405_v47, %v4852_v18 }
 0x149   : > { %v2602_v23 = vadd.f32 %v2601_v2, %v2475_v55  ;;  %v4870_v63 = vpop.f32.mrb[44].mxu0  ;;  %v4878_v30 = vpop.f32.mrb[44].mxu1 }
 0x14a   : > { %7752 = vst [vmem:[#allocation49_spill] sm:$0xff] %v4870_v63  ;;  %v2667_v42 = vadd.f32 %v2666_v59, %v2539_v21  ;;  %v2407_v57 = vadd.f32 %v2406_v14, %v4858_v19  ;;  %v2343_v22 = vadd.f32 %v2342_v17, %v4870_v63  ;;  %v2477_v49 = vmul.f32 %v4870_v63, %v4870_v63  ;;  %v4876_v24 = vpop.f32.mrb[45].mxu0  ;;  %v4884_v2 = vpop.f32.mrb[45].mxu1 }
 0x14b   : > { %7753 = vst [vmem:[#allocation50_spill] sm:$0xff] %v4876_v24  ;;  %7754 = vst [vmem:[#allocation51_spill] sm:$0xff] %v4878_v30  ;;  %v2603_v55 = vadd.f32 %v2602_v23, %v2476_v52  ;;  %v2478_v0 = vmul.f32 %v4876_v24, %v4876_v24  ;;  %v4882_v47 = vpop.f32.mrb[46].mxu0  ;;  %v4892_v18 = vpop.f32.mrb[46].mxu1  ;;  %v2479_v23 = vmul.f32 %v4878_v30, %v4878_v30 }
 0x14c   : > { %7755 = vst [vmem:[#allocation52_spill] sm:$0xff] %v4882_v47  ;;  %7756 = vst [vmem:[#allocation53_spill] sm:$0xff] %v4884_v2  ;;  %v2668_v59 = vadd.f32 %v2667_v42, %v2540_v4  ;;  %v2344_v14 = vadd.f32 %v2343_v22, %v4876_v24  ;;  %v2408_v17 = vadd.f32 %v2407_v57, %v4882_v47  ;;  %v4890_v19 = vpop.f32.mrb[47].mxu0  ;;  %v4898_v63 = vpop.f32.mrb[47].mxu1 }
 0x14d   : > { %v2541_v21 = vmul.f32 %v4882_v47, %v4882_v47  ;;  %7757 = vst [vmem:[#allocation54_spill] sm:$0xff] %v4890_v19  ;;  %7758 = vst [vmem:[#allocation55_spill] sm:$0xff] %v4892_v18  ;;  %v2604_v52 = vadd.f32 %v2603_v55, %v2477_v49  ;;  %v2542_v50 = vmul.f32 %v4890_v19, %v4890_v19 }
 0x14e   : > { %7759 = vst [vmem:[#allocation56_spill] sm:$0xff] %v4898_v63  ;;  %v2345_v42 = vadd.f32 %v2344_v14, %v4878_v30  ;;  %v2409_v57 = vadd.f32 %v2408_v17, %v4890_v19  ;;  %v2543_v49 = vmul.f32 %v4892_v18, %v4892_v18  ;;  %v2480_v56 = vmul.f32 %v4884_v2, %v4884_v2 }
 0x14f   : > { %v2669_v4 = vadd.f32 %v2668_v59, %v2541_v21  ;;  %v2605_v22 = vadd.f32 %v2604_v52, %v2478_v0  ;;  %v2544_v59 = vmul.f32 %v4898_v63, %v4898_v63 }
 0x150   : > { %v2346_v24 = vadd.f32 %v2345_v42, %v4884_v2  ;;  %v2410_v61 = vadd.f32 %v2409_v57, %v4892_v18 }
 0x151   : > { %v2670_v47 = vadd.f32 %v2669_v4, %v2542_v50  ;;  %v2606_v55 = vadd.f32 %v2605_v22, %v2479_v23  ;;  %v4910_v21 = vpop.f32.mrb[48].mxu0  ;;  %v4918_v4 = vpop.f32.mrb[48].mxu1 }
 0x152   : > { %7760 = vst [vmem:[#allocation57_spill] sm:$0xff] %v4910_v21  ;;  %v2411_v0 = vadd.f32 %v2410_v61, %v4898_v63  ;;  %v2347_v50 = vadd.f32 %v2346_v24, %v4910_v21  ;;  %v2481_v17 = vmul.f32 %v4910_v21, %v4910_v21  ;;  %v4916_v52 = vpop.f32.mrb[49].mxu0  ;;  %7762 = vst [vmem:[#allocation59_spill] sm:$0xff] %v4918_v4  ;;  %v4924_v22 = vpop.f32.mrb[49].mxu1 }
 0x153   : > { %v2671_v14 = vadd.f32 %v2670_v47, %v2543_v49  ;;  %7761 = vst [vmem:[#allocation58_spill] sm:$0xff] %v4916_v52  ;;  %v2607_v23 = vadd.f32 %v2606_v55, %v2480_v56  ;;  %v2482_v42 = vmul.f32 %v4916_v52, %v4916_v52  ;;  %v4922_v57 = vpop.f32.mrb[50].mxu0  ;;  %7764 = vst [vmem:[#allocation61_spill] sm:$0xff] %v4924_v22  ;;  %v4932_v18 = vpop.f32.mrb[50].mxu1 }
 0x154   : > { %7763 = vst [vmem:[#allocation60_spill] sm:$0xff] %v4922_v57  ;;  %v2348_v61 = vadd.f32 %v2347_v50, %v4916_v52  ;;  %v2412_v24 = vadd.f32 %v2411_v0, %v4922_v57  ;;  %v2545_v49 = vmul.f32 %v4922_v57, %v4922_v57  ;;  %v4930_v63 = vpop.f32.mrb[51].mxu0  ;;  %7766 = vst [vmem:[#allocation63_spill] sm:$0xff] %v4932_v18  ;;  %v4938_v21 = vpop.f32.mrb[51].mxu1 }
 0x155   : > { %v2672_v47 = vadd.f32 %v2671_v14, %v2544_v59  ;;  %7765 = vst [vmem:[#allocation62_spill] sm:$0xff] %v4930_v63  ;;  %v2608_v56 = vadd.f32 %v2607_v23, %v2481_v17  ;;  %v2483_v55 = vmul.f32 %v4918_v4, %v4918_v4  ;;  %v2546_v19 = vmul.f32 %v4930_v63, %v4930_v63 }
 0x156   : > { %7767 = vst [vmem:[#allocation64_spill] sm:$0xff] %v4938_v21  ;;  %v2349_v14 = vadd.f32 %v2348_v61, %v4918_v4  ;;  %v2413_v0 = vadd.f32 %v2412_v24, %v4930_v63  ;;  %v2547_v17 = vmul.f32 %v4932_v18, %v4932_v18  ;;  %v2484_v30 = vmul.f32 %v4924_v22, %v4924_v22 }
 0x157   : > { %v2673_v59 = vadd.f32 %v2672_v47, %v2545_v49  ;;  %v2609_v50 = vadd.f32 %v2608_v56, %v2482_v42  ;;  %v2548_v47 = vmul.f32 %v4938_v21, %v4938_v21 }
 0x158   : > { %v2350_v52 = vadd.f32 %v2349_v14, %v4924_v22  ;;  %v2414_v2 = vadd.f32 %v2413_v0, %v4932_v18 }
 0x159   : > { %v2674_v57 = vadd.f32 %v2673_v59, %v2546_v19  ;;  %v2610_v23 = vadd.f32 %v2609_v50, %v2483_v55  ;;  %v4950_v49 = vpop.f32.mrb[52].mxu0  ;;  %v4958_v59 = vpop.f32.mrb[52].mxu1 }
 0x15a   : > { %7768 = vst [vmem:[#allocation65_spill] sm:$0xff] %v4950_v49  ;;  %v2415_v42 = vadd.f32 %v2414_v2, %v4938_v21  ;;  %v2351_v19 = vadd.f32 %v2350_v52, %v4950_v49  ;;  %v2485_v24 = vmul.f32 %v4950_v49, %v4950_v49  ;;  %v4956_v56 = vpop.f32.mrb[53].mxu0  ;;  %7770 = vst [vmem:[#allocation67_spill] sm:$0xff] %v4958_v59  ;;  %v4964_v50 = vpop.f32.mrb[53].mxu1 }
 0x15b   : > { %v2675_v61 = vadd.f32 %v2674_v57, %v2547_v17  ;;  %7769 = vst [vmem:[#allocation66_spill] sm:$0xff] %v4956_v56  ;;  %v2611_v55 = vadd.f32 %v2610_v23, %v2484_v30  ;;  %v2486_v14 = vmul.f32 %v4956_v56, %v4956_v56  ;;  %v4962_v0 = vpop.f32.mrb[54].mxu0  ;;  %7772 = vst [vmem:[#allocation69_spill] sm:$0xff] %v4964_v50  ;;  %v4972_v18 = vpop.f32.mrb[54].mxu1 }
 0x15c   : > { %7771 = vst [vmem:[#allocation68_spill] sm:$0xff] %v4962_v0  ;;  %v2352_v2 = vadd.f32 %v2351_v19, %v4956_v56  ;;  %v2416_v52 = vadd.f32 %v2415_v42, %v4962_v0  ;;  %v2549_v17 = vmul.f32 %v4962_v0, %v4962_v0  ;;  %v4970_v21 = vpop.f32.mrb[55].mxu0  ;;  %7774 = vst [vmem:[#allocation71_spill] sm:$0xff] %v4972_v18  ;;  %v4978_v49 = vpop.f32.mrb[55].mxu1 }
 0x15d   : > { %v2676_v57 = vadd.f32 %v2675_v61, %v2548_v47  ;;  %7773 = vst [vmem:[#allocation70_spill] sm:$0xff] %v4970_v21  ;;  %v2612_v30 = vadd.f32 %v2611_v55, %v2485_v24  ;;  %v2487_v23 = vmul.f32 %v4958_v59, %v4958_v59  ;;  %v2550_v63 = vmul.f32 %v4970_v21, %v4970_v21 }
 0x15e   : > { %7775 = vst [vmem:[#allocation72_spill] sm:$0xff] %v4978_v49  ;;  %v2353_v61 = vadd.f32 %v2352_v2, %v4958_v59  ;;  %v2417_v42 = vadd.f32 %v2416_v52, %v4970_v21  ;;  %v2551_v24 = vmul.f32 %v4972_v18, %v4972_v18  ;;  %v2488_v4 = vmul.f32 %v4964_v50, %v4964_v50 }
 0x15f   : > { %v2677_v47 = vadd.f32 %v2676_v57, %v2549_v17  ;;  %v2613_v19 = vadd.f32 %v2612_v30, %v2486_v14  ;;  %v2552_v57 = vmul.f32 %v4978_v49, %v4978_v49 }
 0x160   : > { %v2354_v56 = vadd.f32 %v2353_v61, %v4964_v50  ;;  %v2418_v22 = vadd.f32 %v2417_v42, %v4972_v18 }
 0x161   : > { %v2678_v0 = vadd.f32 %v2677_v47, %v2550_v63  ;;  %v2614_v55 = vadd.f32 %v2613_v19, %v2487_v23  ;;  %v4990_v17 = vpop.f32.mrb[56].mxu0  ;;  %v4998_v47 = vpop.f32.mrb[56].mxu1 }
 0x162   : > { %7776 = vst [vmem:[#allocation73_spill] sm:$0xff] %v4990_v17  ;;  %v2419_v14 = vadd.f32 %v2418_v22, %v4978_v49  ;;  %v2355_v63 = vadd.f32 %v2354_v56, %v4990_v17  ;;  %v2489_v52 = vmul.f32 %v4990_v17, %v4990_v17  ;;  %v4996_v30 = vpop.f32.mrb[57].mxu0  ;;  %7778 = vst [vmem:[#allocation75_spill] sm:$0xff] %v4998_v47  ;;  %v5004_v19 = vpop.f32.mrb[57].mxu1 }
 0x163   : > { %v2679_v2 = vadd.f32 %v2678_v0, %v2551_v24  ;;  %7777 = vst [vmem:[#allocation74_spill] sm:$0xff] %v4996_v30  ;;  %v2615_v23 = vadd.f32 %v2614_v55, %v2488_v4  ;;  %v2490_v61 = vmul.f32 %v4996_v30, %v4996_v30  ;;  %v5002_v42 = vpop.f32.mrb[58].mxu0  ;;  %7780 = vst [vmem:[#allocation77_spill] sm:$0xff] %v5004_v19  ;;  %v5012_v18 = vpop.f32.mrb[58].mxu1 }
 0x164   : > { %7779 = vst [vmem:[#allocation76_spill] sm:$0xff] %v5002_v42  ;;  %v2356_v22 = vadd.f32 %v2355_v63, %v4996_v30  ;;  %v2420_v56 = vadd.f32 %v2419_v14, %v5002_v42  ;;  %v2553_v24 = vmul.f32 %v5002_v42, %v5002_v42  ;;  %v5010_v49 = vpop.f32.mrb[59].mxu0  ;;  %7782 = vst [vmem:[#allocation79_spill] sm:$0xff] %v5012_v18  ;;  %v5018_v17 = vpop.f32.mrb[59].mxu1 }
 0x165   : > { %v2680_v0 = vadd.f32 %v2679_v2, %v2552_v57  ;;  %7781 = vst [vmem:[#allocation78_spill] sm:$0xff] %v5010_v49  ;;  %v2616_v4 = vadd.f32 %v2615_v23, %v2489_v52  ;;  %v2491_v55 = vmul.f32 %v4998_v47, %v4998_v47  ;;  %v2554_v21 = vmul.f32 %v5010_v49, %v5010_v49 }
 0x166   : > { %7783 = vst [vmem:[#allocation80_spill] sm:$0xff] %v5018_v17  ;;  %v2357_v2 = vadd.f32 %v2356_v22, %v4998_v47  ;;  %v2421_v14 = vadd.f32 %v2420_v56, %v5010_v49  ;;  %v2555_v52 = vmul.f32 %v5012_v18, %v5012_v18  ;;  %v2492_v59 = vmul.f32 %v5004_v19, %v5004_v19 }
 0x167   : > { %v2681_v57 = vadd.f32 %v2680_v0, %v2553_v24  ;;  %v2617_v63 = vadd.f32 %v2616_v4, %v2490_v61  ;;  %v2556_v0 = vmul.f32 %v5018_v17, %v5018_v17 }
 0x168   : > { %v2358_v30 = vadd.f32 %v2357_v2, %v5004_v19  ;;  %v2422_v50 = vadd.f32 %v2421_v14, %v5012_v18 }
 0x169   : > { %v2682_v42 = vadd.f32 %v2681_v57, %v2554_v21  ;;  %v2618_v23 = vadd.f32 %v2617_v63, %v2491_v55  ;;  %v5030_v24 = vpop.f32.mrb[60].mxu0  ;;  %v5038_v57 = vpop.f32.mrb[60].mxu1 }
 0x16a   : > { %7784 = vst [vmem:[#allocation81_spill] sm:$0xff] %v5030_v24  ;;  %v2423_v61 = vadd.f32 %v2422_v50, %v5018_v17  ;;  %v2359_v21 = vadd.f32 %v2358_v30, %v5030_v24  ;;  %v2493_v56 = vmul.f32 %v5030_v24, %v5030_v24  ;;  %v5036_v4 = vpop.f32.mrb[61].mxu0  ;;  %7786 = vst [vmem:[#allocation83_spill] sm:$0xff] %v5038_v57  ;;  %v5044_v63 = vpop.f32.mrb[61].mxu1 }
 0x16b   : > { %v2683_v22 = vadd.f32 %v2682_v42, %v2555_v52  ;;  %7785 = vst [vmem:[#allocation82_spill] sm:$0xff] %v5036_v4  ;;  %v2619_v55 = vadd.f32 %v2618_v23, %v2492_v59  ;;  %v2494_v2 = vmul.f32 %v5036_v4, %v5036_v4  ;;  %v5042_v14 = vpop.f32.mrb[62].mxu0  ;;  %v5052_v18 = vpop.f32.mrb[62].mxu1  ;;  %v2495_v23 = vmul.f32 %v5038_v57, %v5038_v57 }
 0x16c   : > { %7787 = vst [vmem:[#allocation84_spill] sm:$0xff] %v5042_v14  ;;  %v2360_v50 = vadd.f32 %v2359_v21, %v5036_v4  ;;  %v2424_v30 = vadd.f32 %v2423_v61, %v5042_v14  ;;  %v2557_v52 = vmul.f32 %v5042_v14, %v5042_v14  ;;  %v5050_v17 = vpop.f32.mrb[63].mxu0  ;;  %7789 = vst [vmem:[#allocation86_spill] sm:$0xff] %v5052_v18  ;;  %v5058_v24 = vpop.f32.mrb[63].mxu1 }
 0x16d   : > { %v2684_v42 = vadd.f32 %v2683_v22, %v2556_v0  ;;  %7788 = vst [vmem:[#allocation85_spill] sm:$0xff] %v5050_v17  ;;  %v2620_v59 = vadd.f32 %v2619_v55, %v2493_v56  ;;  %v2558_v49 = vmul.f32 %v5050_v17, %v5050_v17  ;;  %7790 = vst [vmem:[#allocation87_spill] sm:$0xff] %v5058_v24 }
 0x16e   : > { %v2425_v22 = vadd.f32 %v2424_v30, %v5050_v17  ;;  %v2361_v61 = vadd.f32 %v2360_v50, %v5038_v57  ;;  %v2559_v4 = vmul.f32 %v5052_v18, %v5052_v18  ;;  %v2496_v19 = vmul.f32 %v5044_v63, %v5044_v63 }
 0x16f   : > { %v2685_v0 = vadd.f32 %v2684_v42, %v2557_v52  ;;  %v2621_v21 = vadd.f32 %v2620_v59, %v2494_v2  ;;  %v2560_v42 = vmul.f32 %v5058_v24, %v5058_v24 }
 0x170   : > { %v2362_v56 = vadd.f32 %v2361_v61, %v5044_v63  ;;  %v2426_v55 = vadd.f32 %v2425_v22, %v5052_v18 }
 0x171   : > { %v2686_v14 = vadd.f32 %v2685_v0, %v2558_v49  ;;  %v2622_v47 = vadd.f32 %v2621_v21, %v2495_v23 }
 0x172   : > { %2363 = vadd.xlane.f32.xlu0 %v2362_v56  ;;  %v2427_v30 = vadd.f32 %v2426_v55, %v5058_v24  ;;  %v7806_v56 = vld [vmem:[#allocation73_spill] sm:$0xff]  ;;  %v7807_v24 = vld [vmem:[#allocation74_spill] sm:$0xff] }
 0x173   : > { %v2687_v50 = vadd.f32 %v2686_v14, %v2559_v4  ;;  %v2623_v2 = vadd.f32 %v2622_v47, %v2496_v19  ;;  %v7809_v14 = vld [vmem:[#allocation77_spill] sm:$0xff]  ;;  %v7811_v19 = vld [vmem:[#allocation82_spill] sm:$0xff] }
 0x174   : > { %v7810_v4 = vld [vmem:[#allocation81_spill] sm:$0xff] }
 0x175   : > { %v2688_v49 = vadd.f32 %v2687_v50, %v2560_v42  ;;  %2624 = vadd.xlane.f32.xlu1 %v2623_v2 }
 0x176   : > { %2428 = vadd.xlane.f32.xlu0 %v2427_v30 }
 0x179   : > { %2689 = vadd.xlane.f32.xlu1 %v2688_v49  ;;  %v7794_v49 = vld [vmem:[#allocation49_spill] sm:$0xff] }
 0x1ff   : > { %v2364_v52 = vpop.xlane.xlu0 %2363 }
 0x200   : > { %v5071_v59 = vmul.f32 0.00012207031, %v2364_v52 }
 0x202   : > { %v2625_v0 = vpop.xlane.xlu1 %2624  ;;  %v2693_v23 = vmul.f32 %v5071_v59, %v5071_v59  ;;  %v7812_v30 = vsub.f32 %v4431_v9, %v5071_v59  ;;  %v7813_v42 = vsub.f32 %v4435_v11, %v5071_v59  ;;  %v7816_v9 = vsub.f32 %v4447_v15, %v5071_v59 }
 0x203   : > { %v2691_v22 = vmul.f32 0.00012207031, %v2625_v0  ;;  %v2429_v2 = vpop.xlane.xlu0 %2428  ;;  %v7808_v0 = vld [vmem:[#allocation75_spill] sm:$0xff]  ;;  %v7817_v11 = vsub.f32 %v4471_v35, %v5071_v59 }
 0x204   : > { %v5223_v57 = vmul.f32 0.00012207031, %v2429_v2  ;;  %v7819_v2 = vsub.f32 %v4478_v39, %v5071_v59 }
 0x205   : > { %v2695_v61 = vsub.f32 %v2691_v22, %v2693_v23  ;;  %v7791_v23 = vld [vmem:[#allocation42_spill] sm:$0xff]  ;;  %v7814_v22 = vsub.f32 %v4437_v12, %v5071_v59  ;;  %v7818_v12 = vsub.f32 %v4476_v38, %v5071_v59 }
 0x206   : > { %7815 = vst [vmem:[#allocation42_spill] sm:$0xff] %v5223_v57 }
 0x207   : > { %v2697_v21 = vmax.f32 %v2695_v61, 0.0  ;;  %v7792_v61 = vld [vmem:[#allocation43_spill] sm:$0xff] }
 0x209   : > { %v2699_v55 = vadd.f32 1e-05, %v2697_v21  ;;  %v7805_v21 = vld [vmem:[#allocation69_spill] sm:$0xff] }
 0x20b   : > { %4158 = vrsqrt.f32 %v2699_v55  ;;  %v7793_v55 = vld [vmem:[#allocation45_spill] sm:$0xff] }
 0x215   : > { %v5179_v18 = vpop.eup %4158 }
 0x216   : > { %v5209_v52 = vmul.f32 %v5179_v18, %v7812_v30  ;;  %v5215_v17 = vmul.f32 %v5179_v18, %v7813_v42  ;;  %v5221_v47 = vmul.f32 %v5179_v18, %v7814_v22  ;;  %v5229_v30 = vmul.f32 %v5179_v18, %v7816_v9 }
 0x217   : > { %v5235_v42 = vmul.f32 %v5179_v18, %v7817_v11  ;;  %v5241_v22 = vmul.f32 %v5179_v18, %v7818_v12  ;;  %v5247_v15 = vmul.f32 %v5179_v18, %v7819_v2  ;;  %v7820_v9 = vsub.f32 %v4486_v44, %v5071_v59 }
 0x218   : > { %v7821_v11 = vsub.f32 %v4510_v1, %v5071_v59  ;;  %v7822_v12 = vsub.f32 %v4514_v6, %v5071_v59  ;;  %v7823_v2 = vsub.f32 %v4516_v7, %v5071_v59  ;;  %vm2959_vm1 = vcmp.ge.f32.partialorder %v5209_v52, 0.0 }
 0x219   : > { %v5253_v35 = vmul.f32 %v5179_v18, %v7820_v9  ;;  %v7824_v9 = vsub.f32 %v4524_v13, %v5071_v59  ;;  %vm2960_vm2 = vcmp.ge.f32.partialorder %v5215_v17, 0.0  ;;  %vm2961_vm3 = vcmp.ge.f32.partialorder %v5221_v47, 0.0 }
 0x21a   : > { %v5259_v38 = vmul.f32 %v5179_v18, %v7821_v11  ;;  %v5265_v39 = vmul.f32 %v5179_v18, %v7822_v12  ;;  %v5271_v44 = vmul.f32 %v5179_v18, %v7823_v2  ;;  %v7825_v11 = vsub.f32 %v4550_v45, %v5071_v59 }
 0x21b   : > { %v5277_v1 = vmul.f32 %v5179_v18, %v7824_v9  ;;  %v7826_v12 = vsub.f32 %v4556_v53, %v5071_v59  ;;  %v7827_v2 = vsub.f32 %v4558_v54, %v5071_v59  ;;  %v7828_v9 = vsub.f32 %v4564_v58, %v5071_v59 }
 0x21c   : > { %v5283_v6 = vmul.f32 %v5179_v18, %v7825_v11  ;;  %v7829_v11 = vsub.f32 %v4590_v32, %v5071_v59  ;;  %vm2962_vm4 = vcmp.ge.f32.partialorder %v5229_v30, 0.0  ;;  %vm2963_vm5 = vcmp.ge.f32.partialorder %v5235_v42, 0.0 }
 0x21d   : > { %v5289_v7 = vmul.f32 %v5179_v18, %v7826_v12  ;;  %v5295_v13 = vmul.f32 %v5179_v18, %v7827_v2  ;;  %v5301_v45 = vmul.f32 %v5179_v18, %v7828_v9  ;;  %v7830_v12 = vsub.f32 %v4596_v40, %v5071_v59 }
 0x21e   : > { %v5307_v53 = vmul.f32 %v5179_v18, %v7829_v11  ;;  %v7831_v2 = vsub.f32 %v4598_v41, %v5071_v59  ;;  %v7832_v9 = vsub.f32 %v4604_v48, %v5071_v59  ;;  %v7833_v11 = vsub.f32 %v4630_v33, %v5071_v59 }
 0x21f   : > { %v5313_v54 = vmul.f32 %v5179_v18, %v7830_v12  ;;  %v7834_v12 = vsub.f32 %v4636_v46, %v5071_v59  ;;  %vm2964_vm6 = vcmp.ge.f32.partialorder %v5241_v22, 0.0  ;;  %vm2965_vm7 = vcmp.ge.f32.partialorder %v5247_v15, 0.0 }
 0x220   : > { %v5319_v58 = vmul.f32 %v5179_v18, %v7831_v2  ;;  %v5325_v32 = vmul.f32 %v5179_v18, %v7832_v9  ;;  %v5331_v40 = vmul.f32 %v5179_v18, %v7833_v11  ;;  %v7835_v2 = vsub.f32 %v4638_v51, %v5071_v59 }
 0x221   : > { %v5337_v41 = vmul.f32 %v5179_v18, %v7834_v12  ;;  %v7836_v9 = vsub.f32 %v4644_v62, %v5071_v59  ;;  %v7837_v11 = vsub.f32 %v4670_v25, %v5071_v59  ;;  %v7838_v12 = vsub.f32 %v4676_v26, %v5071_v59 }
 0x222   : > { %v5343_v48 = vmul.f32 %v5179_v18, %v7835_v2  ;;  %v7839_v2 = vsub.f32 %v4678_v29, %v5071_v59  ;;  %vm2966_vm8 = vcmp.ge.f32.partialorder %v5253_v35, 0.0  ;;  %vm2967_vm9 = vcmp.ge.f32.partialorder %v5259_v38, 0.0 }
 0x223   : > { %v5349_v33 = vmul.f32 %v5179_v18, %v7836_v9  ;;  %v5355_v46 = vmul.f32 %v5179_v18, %v7837_v11  ;;  %v5361_v51 = vmul.f32 %v5179_v18, %v7838_v12  ;;  %v7840_v9 = vsub.f32 %v4684_v34, %v5071_v59 }
 0x224   : > { %v5367_v62 = vmul.f32 %v5179_v18, %v7839_v2  ;;  %v7841_v11 = vsub.f32 %v4710_v43, %v5071_v59  ;;  %v7842_v12 = vsub.f32 %v4716_v5, %v5071_v59  ;;  %v7843_v2 = vsub.f32 %v4718_v3, %v5071_v59 }
 0x225   : > { %v5373_v25 = vmul.f32 %v5179_v18, %v7840_v9  ;;  %v7844_v9 = vsub.f32 %v4724_v10, %v5071_v59  ;;  %vm2968_vm10 = vcmp.ge.f32.partialorder %v5265_v39, 0.0  ;;  %vm2969_vm11 = vcmp.ge.f32.partialorder %v5271_v44, 0.0 }
 0x226   : > { %v5379_v26 = vmul.f32 %v5179_v18, %v7841_v11  ;;  %v5385_v29 = vmul.f32 %v5179_v18, %v7842_v12  ;;  %v5391_v34 = vmul.f32 %v5179_v18, %v7843_v2  ;;  %v7845_v11 = vsub.f32 %v4750_v20, %v5071_v59 }
 0x227   : > { %v5397_v43 = vmul.f32 %v5179_v18, %v7844_v9  ;;  %v7846_v12 = vsub.f32 %v4756_v8, %v5071_v59  ;;  %v7847_v2 = vsub.f32 %v4758_v36, %v5071_v59  ;;  %v7848_v9 = vsub.f32 %v4764_v16, %v5071_v59 }
 0x228   : > { %v5403_v5 = vmul.f32 %v5179_v18, %v7845_v11  ;;  %v7849_v11 = vsub.f32 %v4790_v37, %v5071_v59  ;;  %vm2970_vm12 = vcmp.ge.f32.partialorder %v5277_v1, 0.0  ;;  %vm2971_vm13 = vcmp.ge.f32.partialorder %v5283_v6, 0.0 }
 0x229   : > { %v5409_v3 = vmul.f32 %v5179_v18, %v7846_v12  ;;  %v5415_v10 = vmul.f32 %v5179_v18, %v7847_v2  ;;  %v5421_v20 = vmul.f32 %v5179_v18, %v7848_v9  ;;  %v7850_v12 = vsub.f32 %v4796_v28, %v5071_v59 }
 0x22a   : > { %v5427_v8 = vmul.f32 %v5179_v18, %v7849_v11  ;;  %v7852_v2 = vsub.f32 %v4798_v31, %v5071_v59  ;;  %v7853_v9 = vsub.f32 %v4804_v27, %v5071_v59  ;;  %v7854_v11 = vsub.f32 %v4830_v60, %v5071_v59 }
 0x22b   : > { %v5433_v36 = vmul.f32 %v5179_v18, %v7850_v12  ;;  %v7855_v12 = vsub.f32 %v7791_v23, %v5071_v59  ;;  %vm2972_vm14 = vcmp.ge.f32.partialorder %v5289_v7, 0.0  ;;  %vm2973_vm15 = vcmp.ge.f32.partialorder %v5295_v13, 0.0 }
 0x22c   : > { %v5439_v16 = vmul.f32 %v5179_v18, %v7852_v2  ;;  %v5445_v37 = vmul.f32 %v5179_v18, %v7853_v9  ;;  %v5451_v28 = vmul.f32 %v5179_v18, %v7854_v11  ;;  %v7857_v2 = vsub.f32 %v7792_v61, %v5071_v59 }
 0x22d   : > { %7851 = vst [vmem:[#allocation43_spill] sm:$0xff] %v5433_v36  ;;  %v5457_v31 = vmul.f32 %v5179_v18, %v7855_v12  ;;  %v7858_v9 = vsub.f32 %v7793_v55, %v5071_v59  ;;  %v7860_v11 = vsub.f32 %v7794_v49, %v5071_v59  ;;  %v7862_v12 = vld [vmem:[#allocation50_spill] sm:$0xff]  ;;  %vm2974_vm0 = vcmp.ge.f32.partialorder %v5301_v45, 0.0 }
 0x22e   : > { %v5463_v27 = vmul.f32 %v5179_v18, %v7857_v2  ;;  %v7863_v50 = vsub.f32 %v7862_v12, %v5071_v59  ;;  %v7865_v2 = vld [vmem:[#allocation51_spill] sm:$0xff] }
 0x22f   : > { %7856 = vst [vmem:[#allocation45_spill] sm:$0xff] %v5457_v31  ;;  %v5469_v60 = vmul.f32 %v5179_v18, %v7858_v9  ;;  %v5475_v23 = vmul.f32 %v5179_v18, %v7860_v11  ;;  %v7866_v57 = vsub.f32 %v7865_v2, %v5071_v59  ;;  %v7868_v9 = vld [vmem:[#allocation53_spill] sm:$0xff] }
 0x230   : > { %v5481_v61 = vmul.f32 %v5179_v18, %v7863_v50  ;;  %v7871_v11 = vld [vmem:[#allocation57_spill] sm:$0xff]  ;;  %v7874_v50 = vld [vmem:[#allocation58_spill] sm:$0xff] }
 0x231   : > { %7859 = vst [vmem:[#allocation49_spill] sm:$0xff] %v5469_v60  ;;  %7861 = vst [vmem:[#allocation69_spill] sm:$0xff] %v5475_v23  ;;  %v5487_v55 = vmul.f32 %v5179_v18, %v7866_v57  ;;  %v7869_v60 = vsub.f32 %v7868_v9, %v5071_v59  ;;  %v7872_v23 = vsub.f32 %v7871_v11, %v5071_v59  ;;  %v7877_v57 = vld [vmem:[#allocation59_spill] sm:$0xff] }
 0x232   : > { %7864 = vst [vmem:[#allocation73_spill] sm:$0xff] %v5481_v61  ;;  %v7875_v61 = vsub.f32 %v7874_v50, %v5071_v59 }
 0x233   : > { %7867 = vst [vmem:[#allocation74_spill] sm:$0xff] %v5487_v55  ;;  %v5493_v49 = vmul.f32 %v5179_v18, %v7869_v60  ;;  %v5499_v12 = vmul.f32 %v5179_v18, %v7872_v23  ;;  %v7878_v55 = vsub.f32 %v7877_v57, %v5071_v59  ;;  %v7880_v60 = vld [vmem:[#allocation61_spill] sm:$0xff] }
 0x234   : > { %v5505_v2 = vmul.f32 %v5179_v18, %v7875_v61  ;;  %v7883_v23 = vld [vmem:[#allocation65_spill] sm:$0xff]  ;;  %v7886_v61 = vld [vmem:[#allocation66_spill] sm:$0xff] }
 0x235   : > { %7870 = vst [vmem:[#allocation75_spill] sm:$0xff] %v5493_v49  ;;  %7873 = vst [vmem:[#allocation77_spill] sm:$0xff] %v5499_v12  ;;  %v5511_v9 = vmul.f32 %v5179_v18, %v7878_v55  ;;  %v7881_v49 = vsub.f32 %v7880_v60, %v5071_v59  ;;  %v7884_v12 = vsub.f32 %v7883_v23, %v5071_v59  ;;  %v7889_v55 = vld [vmem:[#allocation67_spill] sm:$0xff] }
 0x236   : > { %7876 = vst [vmem:[#allocation81_spill] sm:$0xff] %v5505_v2  ;;  %v7887_v2 = vsub.f32 %v7886_v61, %v5071_v59 }
 0x237   : > { %7879 = vst [vmem:[#allocation82_spill] sm:$0xff] %v5511_v9  ;;  %v5517_v11 = vmul.f32 %v5179_v18, %v7881_v49  ;;  %v5523_v50 = vmul.f32 %v5179_v18, %v7884_v12  ;;  %v7890_v9 = vsub.f32 %v7889_v55, %v5071_v59  ;;  %v7892_v49 = vsub.f32 %v7805_v21, %v5071_v59 }
 0x238   : > { %v5529_v57 = vmul.f32 %v5179_v18, %v7887_v2  ;;  %v7894_v12 = vsub.f32 %v7806_v56, %v5071_v59  ;;  %v7896_v2 = vsub.f32 %v7807_v24, %v5071_v59 }
 0x239   : > { %7882 = vst [vmem:[#allocation50_spill] sm:$0xff] %v5517_v11  ;;  %7885 = vst [vmem:[#allocation51_spill] sm:$0xff] %v5523_v50  ;;  %v5535_v60 = vmul.f32 %v5179_v18, %v7890_v9  ;;  %v5541_v23 = vmul.f32 %v5179_v18, %v7892_v49  ;;  %v7898_v9 = vsub.f32 %v7808_v0, %v5071_v59 }
 0x23a   : > { %7888 = vst [vmem:[#allocation53_spill] sm:$0xff] %v5529_v57  ;;  %v5547_v61 = vmul.f32 %v5179_v18, %v7894_v12  ;;  %v5553_v55 = vmul.f32 %v5179_v18, %v7896_v2  ;;  %v7900_v49 = vsub.f32 %v7809_v14, %v5071_v59  ;;  %v7902_v12 = vsub.f32 %v7810_v4, %v5071_v59 }
 0x23b   : > { %7891 = vst [vmem:[#allocation57_spill] sm:$0xff] %v5535_v60  ;;  %7893 = vst [vmem:[#allocation58_spill] sm:$0xff] %v5541_v23  ;;  %v5559_v21 = vmul.f32 %v5179_v18, %v7898_v9  ;;  %v7904_v2 = vsub.f32 %v7811_v19, %v5071_v59  ;;  %v7906_v19 = vld [vmem:[#allocation83_spill] sm:$0xff]  ;;  %v3087_v9 = vmul.f32 0.01, %v5209_v52 }
 0x23c   : > { %7895 = vst [vmem:[#allocation59_spill] sm:$0xff] %v5547_v61  ;;  %7897 = vst [vmem:[#allocation61_spill] sm:$0xff] %v5553_v55  ;;  %v5565_v56 = vmul.f32 %v5179_v18, %v7900_v49  ;;  %v5571_v24 = vmul.f32 %v5179_v18, %v7902_v12  ;;  %v7907_v4 = vsub.f32 %v7906_v19, %v5071_v59  ;;  %v3088_v49 = vmul.f32 0.01, %v5215_v17 }
 0x23d   : > { %7899 = vst [vmem:[#allocation65_spill] sm:$0xff] %v5559_v21  ;;  %v5577_v0 = vmul.f32 %v5179_v18, %v7904_v2  ;;  %v3089_v12 = vmul.f32 0.01, %v5221_v47  ;;  %v7909_v2 = vsub.f32 %v5044_v63, %v5071_v59  ;;  %v3090_v19 = vmul.f32 0.01, %v5229_v30 }
 0x23e   : > { %7901 = vst [vmem:[#allocation66_spill] sm:$0xff] %v5565_v56  ;;  %7903 = vst [vmem:[#allocation67_spill] sm:$0xff] %v5571_v24  ;;  %v5592_v14 = vmul.f32 %v5179_v18, %v7907_v4  ;;  %v3091_v4 = vmul.f32 0.01, %v5235_v42  ;;  %v3093_v24 = vmul.f32 0.01, %v5247_v15 }
 0x23f   : > { %7905 = vst [vmem:[#allocation88_spill] sm:$0xff] %v5577_v0  ;;  %v5602_v0 = vmul.f32 %v5179_v18, %v7909_v2  ;;  %v3094_v56 = vmul.f32 0.01, %v5253_v35  ;;  %v3095_v21 = vmul.f32 0.01, %v5259_v38  ;;  %v5615_v18 = vsel %vm2959_vm1, %v5209_v52, %v3087_v9 }
 0x240   : > { %7908 = vst [vmem:[#allocation83_spill] sm:$0xff] %v5592_v14  ;;  %v3092_v14 = vmul.f32 0.01, %v5241_v22  ;;  %7911 = vst [vmem:[#allocation90_spill] sm:$0xff] %v5615_v18  ;;  %v3096_v63 = vmul.f32 0.01, %v5265_v39  ;;  %v5641_v18 = vsel %vm2961_vm3, %v5221_v47, %v3089_v12  ;;  %v5656_v61 = vsel %vm2962_vm4, %v5229_v30, %v3090_v19 }
 0x241   : > { %7910 = vst [vmem:[#allocation89_spill] sm:$0xff] %v5602_v0  ;;  %v3097_v59 = vmul.f32 0.01, %v5271_v44  ;;  %v5621_v2 = vmul.f32 0.01, %v5277_v1  ;;  %v5626_v0 = vsel %vm2960_vm2, %v5215_v17, %v3088_v49  ;;  %7913 = vst [vmem:[#allocation92_spill] sm:$0xff] %v5641_v18 }
 0x242   : > { %7912 = vst [vmem:[#allocation91_spill] sm:$0xff] %v5626_v0  ;;  %v5630_v55 = vmul.f32 0.01, %v5283_v6  ;;  %v5633_v52 = vmul.f32 0.01, %v5289_v7  ;;  %7915 = vst [vmem:[#allocation94_spill] sm:$0xff] %v5656_v61 }
 0x243   : > { %v5636_v9 = vmul.f32 0.01, %v5295_v13  ;;  %v5645_v17 = vmul.f32 0.01, %v5301_v45  ;;  %v5648_v49 = vmul.f32 0.01, %v5307_v53 }
 0x244   : > { %v5651_v0 = vmul.f32 0.01, %v5313_v54  ;;  %v5660_v47 = vmul.f32 0.01, %v5319_v58  ;;  %v5663_v12 = vmul.f32 0.01, %v5325_v32 }
 0x245   : > { %v5666_v18 = vmul.f32 0.01, %v5331_v40  ;;  %vm2975_vm1 = vcmp.ge.f32.partialorder %v5307_v53, 0.0  ;;  %v5675_v30 = vmul.f32 0.01, %v5337_v41  ;;  %vm2976_vm2 = vcmp.ge.f32.partialorder %v5313_v54, 0.0 }
 0x246   : > { %7914 = vst [vmem:[#allocation93_spill] sm:$0xff] %v5651_v0  ;;  %v5671_v0 = vsel %vm2963_vm5, %v5235_v42, %v3091_v4  ;;  %v5678_v19 = vmul.f32 0.01, %v5343_v48  ;;  %v5681_v61 = vmul.f32 0.01, %v5349_v33  ;;  %vm2977_vm3 = vcmp.ge.f32.partialorder %v5319_v58, 0.0 }
 0x247   : > { %7916 = vst [vmem:[#allocation95_spill] sm:$0xff] %v5666_v18  ;;  %7917 = vst [vmem:[#allocation96_spill] sm:$0xff] %v5671_v0  ;;  %v5686_v18 = vsel %vm2964_vm6, %v5241_v22, %v3092_v14  ;;  %v5690_v42 = vmul.f32 0.01, %v5355_v46  ;;  %v5693_v4 = vmul.f32 0.01, %v5361_v51 }
 0x248   : > { %7918 = vst [vmem:[#allocation97_spill] sm:$0xff] %v5681_v61  ;;  %7919 = vst [vmem:[#allocation98_spill] sm:$0xff] %v5686_v18  ;;  %v5696_v0 = vmul.f32 0.01, %v5367_v62  ;;  %v5701_v61 = vsel %vm2965_vm7, %v5247_v15, %v3093_v24  ;;  %v5705_v22 = vmul.f32 0.01, %v5373_v25 }
 0x249   : > { %7921 = vst [vmem:[#allocation100_spill] sm:$0xff] %v5701_v61  ;;  %v5708_v14 = vmul.f32 0.01, %v5379_v26  ;;  %v5711_v18 = vmul.f32 0.01, %v5385_v29  ;;  %vm2978_vm4 = vcmp.ge.f32.partialorder %v5325_v32, 0.0 }
 0x24a   : > { %7920 = vst [vmem:[#allocation99_spill] sm:$0xff] %v5696_v0  ;;  %v5716_v0 = vsel %vm2966_vm8, %v5253_v35, %v3094_v56  ;;  %v5722_v15 = vmul.f32 0.01, %v5391_v34  ;;  %v5725_v24 = vmul.f32 0.01, %v5397_v43  ;;  %v5733_v35 = vsel %vm2967_vm9, %v5259_v38, %v3095_v21 }
 0x24b   : > { %7922 = vst [vmem:[#allocation101_spill] sm:$0xff] %v5716_v0  ;;  %v5728_v61 = vmul.f32 0.01, %v5403_v5  ;;  %7924 = vst [vmem:[#allocation103_spill] sm:$0xff] %v5733_v35  ;;  %vm2981_vm7 = vcmp.ge.f32.partialorder %v5343_v48, 0.0  ;;  %v5751_v38 = vsel %vm2968_vm10, %v5265_v39, %v3096_v63  ;;  %vm2985_vm9 = vcmp.ge.f32.partialorder %v5367_v62, 0.0 }
 0x24c   : > { %v5740_v56 = vmul.f32 0.01, %v5409_v3  ;;  %v5743_v0 = vmul.f32 0.01, %v5415_v10  ;;  %7926 = vst [vmem:[#allocation105_spill] sm:$0xff] %v5751_v38  ;;  %v5769_v39 = vsel %vm2969_vm11, %v5271_v44, %v3097_v59  ;;  %vm2989_vm10 = vcmp.ge.f32.partialorder %v5391_v34, 0.0 }
 0x24d   : > { %7923 = vst [vmem:[#allocation102_spill] sm:$0xff] %v5728_v61  ;;  %v5746_v61 = vmul.f32 0.01, %v5421_v20  ;;  %v5758_v21 = vmul.f32 0.01, %v5427_v8  ;;  %7928 = vst [vmem:[#allocation107_spill] sm:$0xff] %v5769_v39  ;;  %v5788_v44 = vsel %vm2970_vm12, %v5277_v1, %v5621_v2  ;;  %v5807_v1 = vsel %vm2971_vm13, %v5283_v6, %v5630_v55 }
 0x24e   : > { %v5761_v35 = vmul.f32 0.01, %v5433_v36  ;;  %v5776_v63 = vmul.f32 0.01, %v5445_v37  ;;  %v5779_v38 = vmul.f32 0.01, %v5451_v28  ;;  %v5826_v6 = vsel %vm2972_vm14, %v5289_v7, %v5633_v52 }
 0x24f   : > { %7925 = vst [vmem:[#allocation104_spill] sm:$0xff] %v5746_v61  ;;  %v5764_v61 = vmul.f32 0.01, %v5439_v16  ;;  %7932 = vst [vmem:[#allocation111_spill] sm:$0xff] %v5788_v44  ;;  %vm2993_vm11 = vcmp.ge.f32.partialorder %v5415_v10, 0.0  ;;  %v7934_v39 = vld [vmem:[#allocation49_spill] sm:$0xff]  ;;  %v5845_v7 = vsel %vm2973_vm15, %v5295_v13, %v5636_v9  ;;  %v5864_v13 = vsel %vm2974_vm0, %v5301_v45, %v5645_v17 }
 0x250   : > { %7929 = vst [vmem:[#allocation108_spill] sm:$0xff] %v5776_v63  ;;  %7930 = vst [vmem:[#allocation109_spill] sm:$0xff] %v5779_v38  ;;  %v5795_v59 = vmul.f32 0.01, %v5463_v27  ;;  %v5798_v38 = vmul.f32 0.01, %v7934_v39  ;;  %v5877_v45 = vsel %vm2975_vm1, %v5307_v53, %v5648_v49 }
 0x251   : > { %7927 = vst [vmem:[#allocation106_spill] sm:$0xff] %v5764_v61  ;;  %v5782_v61 = vmul.f32 0.01, %v5457_v31  ;;  %7938 = vst [vmem:[#allocation113_spill] sm:$0xff] %v5807_v1  ;;  %vm2997_vm12 = vcmp.ge.f32.partialorder %v5439_v16, 0.0  ;;  %v7939_v2 = vld [vmem:[#allocation73_spill] sm:$0xff] }
 0x252   : > { %7933 = vst [vmem:[#allocation112_spill] sm:$0xff] %v5795_v59  ;;  %7935 = vst [vmem:[#allocation49_spill] sm:$0xff] %v5798_v38  ;;  %v5814_v44 = vmul.f32 0.01, %v7939_v2  ;;  %v7941_v38 = vld [vmem:[#allocation74_spill] sm:$0xff]  ;;  %vm3001_vm13 = vcmp.ge.f32.partialorder %v5463_v27, 0.0 }
 0x253   : > { %7931 = vst [vmem:[#allocation110_spill] sm:$0xff] %v5782_v61  ;;  %v7936_v61 = vld [vmem:[#allocation69_spill] sm:$0xff]  ;;  %v5817_v59 = vmul.f32 0.01, %v7941_v38  ;;  %7945 = vst [vmem:[#allocation114_spill] sm:$0xff] %v5826_v6  ;;  %vm3005_vm14 = vcmp.ge.f32.partialorder %v7941_v38, 0.0 }
 0x254   : > { %v5801_v63 = vmul.f32 0.01, %v7936_v61  ;;  %7940 = vst [vmem:[#allocation73_spill] sm:$0xff] %v5814_v44  ;;  %v7946_v55 = vld [vmem:[#allocation77_spill] sm:$0xff]  ;;  %v5852_v52 = vmul.f32 0.01, %v5517_v11 }
 0x255   : > { %7942 = vst [vmem:[#allocation74_spill] sm:$0xff] %v5817_v59  ;;  %v5833_v1 = vmul.f32 0.01, %v7946_v55  ;;  %v7947_v59 = vld [vmem:[#allocation81_spill] sm:$0xff]  ;;  %v5855_v6 = vmul.f32 0.01, %v5523_v50 }
 0x256   : > { %7937 = vst [vmem:[#allocation69_spill] sm:$0xff] %v5801_v63  ;;  %v7943_v63 = vld [vmem:[#allocation75_spill] sm:$0xff]  ;;  %v5836_v44 = vmul.f32 0.01, %v7947_v59  ;;  %7950 = vst [vmem:[#allocation81_spill] sm:$0xff] %v5845_v7  ;;  %vm3013_vm0 = vcmp.ge.f32.partialorder %v5535_v60, 0.0 }
 0x257   : > { %v5820_v36 = vmul.f32 0.01, %v7943_v63  ;;  %7951 = vst [vmem:[#allocation115_spill] sm:$0xff] %v5852_v52  ;;  %7952 = vst [vmem:[#allocation116_spill] sm:$0xff] %v5855_v6  ;;  %v3141_v9 = vmul.f32 0.01, %v5535_v60 }
 0x258   : > { %7954 = vst [vmem:[#allocation118_spill] sm:$0xff] %v5864_v13  ;;  %v3142_v7 = vmul.f32 0.01, %v5541_v23  ;;  %v7955_v6 = vld [vmem:[#allocation59_spill] sm:$0xff]  ;;  %7956 = vst [vmem:[#allocation119_spill] sm:$0xff] %v5877_v45  ;;  %v7957_v17 = vld [vmem:[#allocation61_spill] sm:$0xff] }
 0x259   : > { %7944 = vst [vmem:[#allocation75_spill] sm:$0xff] %v5820_v36  ;;  %v7948_v36 = vld [vmem:[#allocation82_spill] sm:$0xff]  ;;  %v3144_v13 = vmul.f32 0.01, %v7957_v17  ;;  %v7962_v49 = vld [vmem:[#allocation67_spill] sm:$0xff]  ;;  %v7963_v45 = vld [vmem:[#allocation88_spill] sm:$0xff] }
 0x25a   : > { %v5839_v31 = vmul.f32 0.01, %v7948_v36  ;;  %vm3009_vm15 = vcmp.ge.f32.partialorder %v7948_v36, 0.0  ;;  %v7959_v11 = vld [vmem:[#allocation66_spill] sm:$0xff]  ;;  %v7960_v36 = vld [vmem:[#allocation93_spill] sm:$0xff]  ;;  %vm3019_vm5 = vcmp.ge.f32.partialorder %v7962_v49, 0.0 }
 0x25b   : > { %v3146_v52 = vmul.f32 0.01, %v7959_v11  ;;  %v5890_v53 = vsel %vm2976_vm2, %v5313_v54, %v7960_v36  ;;  %v3147_v17 = vmul.f32 0.01, %v7962_v49  ;;  %v7964_v23 = vld [vmem:[#allocation83_spill] sm:$0xff]  ;;  %v5903_v54 = vsel %vm2977_vm3, %v5319_v58, %v5660_v47  ;;  %v7965_v36 = vld [vmem:[#allocation89_spill] sm:$0xff] }
 0x25c   : > { %7949 = vst [vmem:[#allocation77_spill] sm:$0xff] %v5839_v31  ;;  %v5858_v31 = vmul.f32 0.01, %v5529_v57  ;;  %v7958_v57 = vld [vmem:[#allocation65_spill] sm:$0xff]  ;;  %v3149_v60 = vmul.f32 0.01, %v7964_v23  ;;  %v5912_v49 = vsel %vm2978_vm4, %v5325_v32, %v5663_v12  ;;  %v5930_v47 = vsel %vm2981_vm7, %v5343_v48, %v5678_v19 }
 0x25d   : > { %v3145_v50 = vmul.f32 0.01, %v7958_v57  ;;  %7961 = vst [vmem:[#allocation65_spill] sm:$0xff] %v5890_v53  ;;  %vm3017_vm1 = vcmp.ge.f32.partialorder %v7958_v57, 0.0  ;;  %vm3021_vm2 = vcmp.ge.f32.partialorder %v7964_v23, 0.0  ;;  %vm3022_vm6 = vcmp.ge.f32.partialorder %v7965_v36, 0.0 }
 0x25e   : > { %7953 = vst [vmem:[#allocation117_spill] sm:$0xff] %v5858_v31  ;;  %v3143_v31 = vmul.f32 0.01, %v7955_v6  ;;  %v3148_v6 = vmul.f32 0.01, %v7963_v45  ;;  %v7966_v45 = vld [vmem:[#allocation95_spill] sm:$0xff] }
 0x25f   : > { %v3150_v53 = vmul.f32 0.01, %v7965_v36  ;;  %vm7967_vm8 = vcmp.ge.f32.partialorder %v5331_v40, 0.0  ;;  %vm7968_vm3 = vcmp.ge.f32.partialorder %v5337_v41, 0.0  ;;  %v7969_v32 = vld [vmem:[#allocation97_spill] sm:$0xff]  ;;  %vm7970_vm4 = vcmp.ge.f32.partialorder %v5349_v33, 0.0 }
 0x260   : > { %v5918_v11 = vsel %vm7967_vm8, %v5331_v40, %v7966_v45  ;;  %v5924_v58 = vsel %vm7968_vm3, %v5337_v41, %v5675_v30  ;;  %v5936_v12 = vsel %vm7970_vm4, %v5349_v33, %v7969_v32  ;;  %vm7971_vm8 = vcmp.ge.f32.partialorder %v5355_v46, 0.0  ;;  %v7973_v48 = vld [vmem:[#allocation99_spill] sm:$0xff]  ;;  %v7999_v45 = vld [vmem:[#allocation73_spill] sm:$0xff] }
 0x261   : > { %v5942_v40 = vsel %vm7971_vm8, %v5355_v46, %v5690_v42  ;;  %vm7972_vm3 = vcmp.ge.f32.partialorder %v5361_v51, 0.0  ;;  %v5954_v30 = vsel %vm2985_vm9, %v5367_v62, %v7973_v48  ;;  %vm7974_vm7 = vcmp.ge.f32.partialorder %v5373_v25, 0.0 }
 0x262   : > { %v5948_v41 = vsel %vm7972_vm3, %v5361_v51, %v5693_v4  ;;  %v5960_v33 = vsel %vm7974_vm7, %v5373_v25, %v5705_v22  ;;  %vm7975_vm4 = vcmp.ge.f32.partialorder %v5379_v26, 0.0  ;;  %vm7976_vm8 = vcmp.ge.f32.partialorder %v5385_v29, 0.0 }
 0x263   : > { %v5966_v46 = vsel %vm7975_vm4, %v5379_v26, %v5708_v14  ;;  %v5972_v51 = vsel %vm7976_vm8, %v5385_v29, %v5711_v18  ;;  %v5978_v62 = vsel %vm2989_vm10, %v5391_v34, %v5722_v15  ;;  %vm7977_vm9 = vcmp.ge.f32.partialorder %v5397_v43, 0.0  ;;  %v7978_v26 = vld [vmem:[#allocation102_spill] sm:$0xff]  ;;  %v7992_v15 = vld [vmem:[#allocation45_spill] sm:$0xff] }
 0x264   : > { %v5984_v25 = vsel %vm7977_vm9, %v5397_v43, %v5725_v24  ;;  %vm7979_vm3 = vcmp.ge.f32.partialorder %v5403_v5, 0.0  ;;  %vm7980_vm7 = vcmp.ge.f32.partialorder %v5409_v3, 0.0  ;;  %v6002_v34 = vsel %vm2993_vm11, %v5415_v10, %v5743_v0  ;;  %v7981_v43 = vld [vmem:[#allocation104_spill] sm:$0xff]  ;;  %v7986_v10 = vld [vmem:[#allocation106_spill] sm:$0xff] }
 0x265   : > { %v5990_v19 = vsel %vm7979_vm3, %v5403_v5, %v7978_v26  ;;  %v5996_v29 = vsel %vm7980_vm7, %v5409_v3, %v5740_v56  ;;  %vm7982_vm10 = vcmp.ge.f32.partialorder %v5421_v20, 0.0  ;;  %vm7983_vm4 = vcmp.ge.f32.partialorder %v5427_v8, 0.0  ;;  %v7984_v3 = vld [vmem:[#allocation43_spill] sm:$0xff]  ;;  %v7991_v14 = vld [vmem:[#allocation110_spill] sm:$0xff] }
 0x266   : > { %v6008_v18 = vsel %vm7982_vm10, %v5421_v20, %v7981_v43  ;;  %v6014_v5 = vsel %vm7983_vm4, %v5427_v8, %v5758_v21  ;;  %vm7985_vm8 = vcmp.ge.f32.partialorder %v7984_v3, 0.0  ;;  %v6026_v0 = vsel %vm2997_vm12, %v5439_v16, %v7986_v10  ;;  %v7987_v20 = vld [vmem:[#allocation108_spill] sm:$0xff]  ;;  %v7989_v8 = vld [vmem:[#allocation109_spill] sm:$0xff]  ;;  %v8007_v43 = vld [vmem:[#allocation82_spill] sm:$0xff] }
 0x267   : > { %v6020_v42 = vsel %vm7985_vm8, %v7984_v3, %v5761_v35  ;;  %vm7988_vm11 = vcmp.ge.f32.partialorder %v5445_v37, 0.0  ;;  %vm7990_vm9 = vcmp.ge.f32.partialorder %v5451_v28, 0.0  ;;  %vm7993_vm3 = vcmp.ge.f32.partialorder %v7992_v15, 0.0  ;;  %v7994_v16 = vld [vmem:[#allocation112_spill] sm:$0xff]  ;;  %v8009_v10 = vld [vmem:[#allocation50_spill] sm:$0xff] }
 0x268   : > { %v6032_v4 = vsel %vm7988_vm11, %v5445_v37, %v7987_v20  ;;  %v6038_v22 = vsel %vm7990_vm9, %v5451_v28, %v7989_v8  ;;  %v6044_v24 = vsel %vm7993_vm3, %v7992_v15, %v7991_v14  ;;  %v6050_v35 = vsel %vm3001_vm13, %v5463_v27, %v7994_v16  ;;  %v7995_v37 = vld [vmem:[#allocation49_spill] sm:$0xff]  ;;  %v8001_v27 = vld [vmem:[#allocation74_spill] sm:$0xff] }
 0x269   : > { %vm7996_vm12 = vcmp.ge.f32.partialorder %v7934_v39, 0.0  ;;  %v7997_v28 = vld [vmem:[#allocation69_spill] sm:$0xff]  ;;  %vm7998_vm7 = vcmp.ge.f32.partialorder %v7936_v61, 0.0  ;;  %vm8000_vm10 = vcmp.ge.f32.partialorder %v7939_v2, 0.0  ;;  %v6075_v48 = vsel %vm3005_vm14, %v7941_v38, %v8001_v27 }
 0x26a   : > { %v6056_v56 = vsel %vm7996_vm12, %v7934_v39, %v7995_v37  ;;  %v6062_v21 = vsel %vm7998_vm7, %v7936_v61, %v7997_v28  ;;  %v6068_v32 = vsel %vm8000_vm10, %v7939_v2, %v7999_v45  ;;  %v8002_v39 = vld [vmem:[#allocation75_spill] sm:$0xff]  ;;  %vm8003_vm13 = vcmp.ge.f32.partialorder %v7943_v63, 0.0  ;;  %v8006_v38 = vld [vmem:[#allocation77_spill] sm:$0xff]  ;;  %v8018_v37 = vld [vmem:[#allocation58_spill] sm:$0xff] }
 0x26b   : > { %v6081_v26 = vsel %vm8003_vm13, %v7943_v63, %v8002_v39  ;;  %vm8004_vm4 = vcmp.ge.f32.partialorder %v7946_v55, 0.0  ;;  %vm8005_vm8 = vcmp.ge.f32.partialorder %v7947_v59, 0.0  ;;  %v6099_v3 = vsel %vm3009_vm15, %v8007_v43, %v8006_v38  ;;  %v8008_v63 = vld [vmem:[#allocation115_spill] sm:$0xff]  ;;  %v8017_v15 = vld [vmem:[#allocation57_spill] sm:$0xff] }
 0x26c   : > { %v6087_v61 = vsel %vm8004_vm4, %v7946_v55, %v5833_v1  ;;  %v6093_v2 = vsel %vm8005_vm8, %v7947_v59, %v5836_v44  ;;  %vm8010_vm14 = vcmp.ge.f32.partialorder %v8009_v10, 0.0  ;;  %v8011_v1 = vld [vmem:[#allocation116_spill] sm:$0xff]  ;;  %v8012_v55 = vld [vmem:[#allocation51_spill] sm:$0xff]  ;;  %v8014_v44 = vld [vmem:[#allocation117_spill] sm:$0xff]  ;;  %v6122_v16 = vsel %vm3013_vm0, %v8017_v15, %v3141_v9 }
 0x26d   : > { %v6105_v20 = vsel %vm8010_vm14, %v8009_v10, %v8008_v63  ;;  %vm8013_vm11 = vcmp.ge.f32.partialorder %v8012_v55, 0.0  ;;  %v8015_v59 = vld [vmem:[#allocation53_spill] sm:$0xff]  ;;  %vm8019_vm15 = vcmp.ge.f32.partialorder %v8018_v37, 0.0  ;;  %v8020_v45 = vld [vmem:[#allocation59_spill] sm:$0xff]  ;;  %v8024_v9 = vld [vmem:[#allocation66_spill] sm:$0xff] }
 0x26e   : > { %v6111_v8 = vsel %vm8013_vm11, %v8012_v55, %v8011_v1  ;;  %vm8016_vm9 = vcmp.ge.f32.partialorder %v8015_v59, 0.0  ;;  %v6127_v28 = vsel %vm8019_vm15, %v8018_v37, %v3142_v7  ;;  %vm8021_vm3 = vcmp.ge.f32.partialorder %v8020_v45, 0.0  ;;  %v8022_v39 = vld [vmem:[#allocation61_spill] sm:$0xff]  ;;  %v8026_v43 = vld [vmem:[#allocation67_spill] sm:$0xff]  ;;  %v8028_v63 = vld [vmem:[#allocation88_spill] sm:$0xff] }
 0x26f   : > { %v6117_v14 = vsel %vm8016_vm9, %v8015_v59, %v8014_v44  ;;  %v6132_v27 = vsel %vm8021_vm3, %v8020_v45, %v3143_v31  ;;  %vm8023_vm12 = vcmp.ge.f32.partialorder %v8022_v39, 0.0  ;;  %v6147_v7 = vsel %vm3017_vm1, %v7958_v57, %v3145_v50  ;;  %v8034_v1 = vld [vmem:[#allocation91_spill] sm:$0xff]  ;;  %v8036_v44 = vld [vmem:[#allocation94_spill] sm:$0xff]  ;;  %v8037_v15 = vld [vmem:[#allocation96_spill] sm:$0xff] }
 0x270   : > { %v6137_v38 = vsel %vm8023_vm12, %v8022_v39, %v3144_v13  ;;  %vm8025_vm0 = vcmp.ge.f32.partialorder %v8024_v9, 0.0  ;;  %v6157_v13 = vsel %vm3019_vm5, %v8026_v43, %v3147_v17  ;;  %vm8029_vm7 = vcmp.ge.f32.partialorder %v8028_v63, 0.0  ;;  %v8035_v17 = vld [vmem:[#allocation92_spill] sm:$0xff]  ;;  %v8040_v39 = vld [vmem:[#allocation101_spill] sm:$0xff]  ;;  %v8044_v43 = vld [vmem:[#allocation111_spill] sm:$0xff] }
 0x271   : > { %v6152_v31 = vsel %vm8025_vm0, %v8024_v9, %v3146_v52  ;;  %8027 = vst [vmem:[#allocation93_spill] sm:$0xff] %v6157_v13  ;;  %v6162_v10 = vsel %vm8029_vm7, %v8028_v63, %v3148_v6  ;;  %v6167_v50 = vsel %vm3021_vm2, %v7964_v23, %v3149_v60  ;;  %v6172_v57 = vsel %vm3022_vm6, %v7965_v36, %v3150_v53  ;;  %v8033_v52 = vld [vmem:[#allocation90_spill] sm:$0xff]  ;;  %v8039_v45 = vld [vmem:[#allocation100_spill] sm:$0xff]  ;;  %v8041_v23 = vld [vmem:[#allocation103_spill] sm:$0xff] }
 0x272   : > { %8030 = vst [vmem:[#allocation83_spill] sm:$0xff] %v6162_v10  ;;  %8031 = vst [vmem:[#allocation89_spill] sm:$0xff] %v6167_v50  ;;  %v4084_v55 = vpack.c.bf16 %v8034_v1, %v8033_v52  ;;  %v4085_v59 = vpack.c.bf16 %v8036_v44, %v8035_v17  ;;  %v8038_v6 = vld [vmem:[#allocation98_spill] sm:$0xff]  ;;  %v4087_v60 = vpack.c.bf16 %v8040_v39, %v8039_v45  ;;  %v8042_v9 = vld [vmem:[#allocation105_spill] sm:$0xff] }
 0x273   : > { %8032 = vst [vmem:[#allocation95_spill] sm:$0xff] %v6172_v57  ;;  %v4086_v37 = vpack.c.bf16 %v8038_v6, %v8037_v15  ;;  %v4088_v53 = vpack.c.bf16 %v8042_v9, %v8041_v23  ;;  %v8043_v36 = vld [vmem:[#allocation107_spill] sm:$0xff]  ;;  %v8045_v52 = vld [vmem:[#allocation113_spill] sm:$0xff]  ;;  %v8046_v1 = vld [vmem:[#allocation114_spill] sm:$0xff]  ;;  %v4093_v6 = vpack.c.bf16 %v5912_v49, %v5903_v54  ;;  %v4094_v45 = vpack.c.bf16 %v5924_v58, %v5918_v11 }
 0x274   : > { %v4089_v63 = vpack.c.bf16 %v8044_v43, %v8043_v36  ;;  %v4090_v57 = vpack.c.bf16 %v8046_v1, %v8045_v52  ;;  %v8047_v50 = vld [vmem:[#allocation81_spill] sm:$0xff]  ;;  %v8048_v17 = vld [vmem:[#allocation118_spill] sm:$0xff]  ;;  %v8049_v10 = vld [vmem:[#allocation119_spill] sm:$0xff]  ;;  %3727 = vst [vmem:[%s6142_s20] sm:$0xff] %v4084_v55  ;;  %v4095_v39 = vpack.c.bf16 %v5936_v12, %v5930_v47  ;;  %v4098_v11 = vpack.c.bf16 %v5972_v51, %v5966_v46 }
 0x275   : > { %v4091_v44 = vpack.c.bf16 %v8048_v17, %v8047_v50  ;;  %v8050_v13 = vld [vmem:[#allocation65_spill] sm:$0xff]  ;;  %3728 = vst [vmem:[%s6142_s20 + $0x8] sm:$0xff] %v4085_v59  ;;  %v4096_v50 = vpack.c.bf16 %v5948_v41, %v5942_v40  ;;  %3729 = vst [vmem:[%s6142_s20 + $0x10] sm:$0xff] %v4086_v37  ;;  %v4099_v49 = vpack.c.bf16 %v5984_v25, %v5978_v62  ;;  %v8064_v59 = vld [vmem:[#allocation10_spill] sm:$0xff] }
 0x276   : > { %v4092_v15 = vpack.c.bf16 %v8050_v13, %v8049_v10  ;;  %v4097_v13 = vpack.c.bf16 %v5960_v33, %v5954_v30  ;;  %3730 = vst [vmem:[%s6142_s20 + $0x18] sm:$0xff] %v4087_v60  ;;  %3731 = vst [vmem:[%s6142_s20 + $0x20] sm:$0xff] %v4088_v53  ;;  %v4100_v54 = vpack.c.bf16 %v5996_v29, %v5990_v19  ;;  %v8065_v60 = vld [vmem:[#allocation11_spill] sm:$0xff]  ;;  %v8066_v9 = vld [vmem:[#allocation12_spill] sm:$0xff] }
 0x277   : > { %3732 = vst [vmem:[%s6142_s20 + $0x28] sm:$0xff] %v4089_v63  ;;  %v4101_v58 = vpack.c.bf16 %v6008_v18, %v6002_v34  ;;  %3733 = vst [vmem:[%s6142_s20 + $0x30] sm:$0xff] %v4090_v57  ;;  %v4102_v47 = vpack.c.bf16 %v6020_v42, %v6014_v5  ;;  %v4103_v12 = vpack.c.bf16 %v6032_v4, %v6026_v0  ;;  %v2690_v34 = vpop.xlane.xlu1 %2689  ;;  %v8063_v57 = vld [vmem:[#allocation9_spill] sm:$0xff]  ;;  %v8068_v63 = vld [vmem:[#allocation14_spill] sm:$0xff] }
 0x278   : > { %3734 = vst [vmem:[%s6142_s20 + $0x38] sm:$0xff] %v4091_v44  ;;  %3735 = vst [vmem:[%s6142_s20 + $0x40] sm:$0xff] %v4092_v15  ;;  %v4104_v40 = vpack.c.bf16 %v6044_v24, %v6038_v22  ;;  %v4105_v41 = vpack.c.bf16 %v6056_v56, %v6050_v35  ;;  %v4106_v30 = vpack.c.bf16 %v6068_v32, %v6062_v21  ;;  %v8051_v18 = vld [vmem:[#allocation93_spill] sm:$0xff]  ;;  %v2692_v24 = vmul.f32 0.00012207031, %v2690_v34  ;;  %v8055_v35 = vld [vmem:[#allocation42_spill] sm:$0xff] }
 0x279   : > { %3736 = vst [vmem:[%s6142_s20 + $0x48] sm:$0xff] %v4093_v6  ;;  %3737 = vst [vmem:[%s6142_s20 + $0x50] sm:$0xff] %v4094_v45  ;;  %v4107_v33 = vpack.c.bf16 %v6081_v26, %v6075_v48  ;;  %v4108_v46 = vpack.c.bf16 %v6093_v2, %v6087_v61  ;;  %v4109_v51 = vpack.c.bf16 %v6105_v20, %v6099_v3  ;;  %v8052_v5 = vld [vmem:[#allocation83_spill] sm:$0xff]  ;;  %v8053_v0 = vld [vmem:[#allocation89_spill] sm:$0xff] }
 0x27a   : > { %3738 = vst [vmem:[%s6142_s20 + $0x58] sm:$0xff] %v4095_v39  ;;  %3739 = vst [vmem:[%s6142_s20 + $0x60] sm:$0xff] %v4096_v50  ;;  %v4110_v62 = vpack.c.bf16 %v6117_v14, %v6111_v8  ;;  %v4111_v25 = vpack.c.bf16 %v6127_v28, %v6122_v16  ;;  %v4112_v19 = vpack.c.bf16 %v6137_v38, %v6132_v27  ;;  %v8054_v4 = vld [vmem:[#allocation95_spill] sm:$0xff]  ;;  %v8056_v26 = vld [vmem:[#allocation2_spill] sm:$0xff] }
 0x27b   : > { %3740 = vst [vmem:[%s6142_s20 + $0x68] sm:$0xff] %v4097_v13  ;;  %3741 = vst [vmem:[%s6142_s20 + $0x70] sm:$0xff] %v4098_v11  ;;  %v4113_v29 = vpack.c.bf16 %v6152_v31, %v6147_v7  ;;  %v4114_v42 = vpack.c.bf16 %v8052_v5, %v8051_v18  ;;  %v4115_v22 = vpack.c.bf16 %v8054_v4, %v8053_v0  ;;  %v8057_v2 = vld [vmem:[#allocation3_spill] sm:$0xff]  ;;  %v8058_v20 = vld [vmem:[#allocation4_spill] sm:$0xff] }
 0x27c   : > { %3742 = vst [vmem:[%s6142_s20 + $0x78] sm:$0xff] %v4099_v49  ;;  %3743 = vst [vmem:[%s6142_s20 + $0x80] sm:$0xff] %v4100_v54  ;;  %v2694_v56 = vmul.f32 %v8055_v35, %v8055_v35  ;;  %v8059_v14 = vld [vmem:[#allocation5_spill] sm:$0xff]  ;;  %v8060_v28 = vld [vmem:[#allocation6_spill] sm:$0xff]  ;;  %v8120_v15 = vsub.f32 %v8056_v26, %v8055_v35  ;;  %v8121_v16 = vsub.f32 %v8057_v2, %v8055_v35 }
 0x27d   : > { %3744 = vst [vmem:[%s6142_s20 + $0x88] sm:$0xff] %v4101_v58  ;;  %3745 = vst [vmem:[%s6142_s20 + $0x90] sm:$0xff] %v4102_v47  ;;  %v8061_v38 = vld [vmem:[#allocation7_spill] sm:$0xff]  ;;  %v8062_v31 = vld [vmem:[#allocation8_spill] sm:$0xff]  ;;  %v8122_v3 = vsub.f32 %v8058_v20, %v8055_v35  ;;  %v8123_v17 = vsub.f32 %v8059_v14, %v8055_v35 }
 0x27e   : > { %3746 = vst [vmem:[%s6142_s20 + $0x98] sm:$0xff] %v4103_v12  ;;  %3747 = vst [vmem:[%s6142_s20 + $0xa0] sm:$0xff] %v4104_v40  ;;  %v2696_v21 = vsub.f32 %v2692_v24, %v2694_v56  ;;  %v8067_v36 = vld [vmem:[#allocation13_spill] sm:$0xff]  ;;  %v8069_v1 = vld [vmem:[#allocation15_spill] sm:$0xff] }
 0x27f   : > { %3748 = vst [vmem:[%s6142_s20 + $0xa8] sm:$0xff] %v4105_v41  ;;  %3749 = vst [vmem:[%s6142_s20 + $0xb0] sm:$0xff] %v4106_v30  ;;  %v8070_v44 = vld [vmem:[#allocation16_spill] sm:$0xff]  ;;  %v8071_v6 = vld [vmem:[#allocation17_spill] sm:$0xff] }
 0x280   : > { %3750 = vst [vmem:[%s6142_s20 + $0xb8] sm:$0xff] %v4107_v33  ;;  %3751 = vst [vmem:[%s6142_s20 + $0xc0] sm:$0xff] %v4108_v46  ;;  %v2698_v32 = vmax.f32 %v2696_v21, 0.0  ;;  %v8072_v39 = vld [vmem:[#allocation18_spill] sm:$0xff]  ;;  %v8073_v13 = vld [vmem:[#allocation19_spill] sm:$0xff] }
 0x281   : > { %3752 = vst [vmem:[%s6142_s20 + $0xc8] sm:$0xff] %v4109_v51  ;;  %3753 = vst [vmem:[%s6142_s20 + $0xd0] sm:$0xff] %v4110_v62  ;;  %v8074_v49 = vld [vmem:[#allocation20_spill] sm:$0xff]  ;;  %v8075_v58 = vld [vmem:[#allocation21_spill] sm:$0xff] }
 0x282   : > { %3754 = vst [vmem:[%s6142_s20 + $0xd8] sm:$0xff] %v4111_v25  ;;  %3755 = vst [vmem:[%s6142_s20 + $0xe0] sm:$0xff] %v4112_v19  ;;  %v2700_v48 = vadd.f32 1e-05, %v2698_v32  ;;  %v8076_v12 = vld [vmem:[#allocation22_spill] sm:$0xff]  ;;  %v8077_v41 = vld [vmem:[#allocation23_spill] sm:$0xff] }
 0x283   : > { %3756 = vst [vmem:[%s6142_s20 + $0xe8] sm:$0xff] %v4113_v29  ;;  %3757 = vst [vmem:[%s6142_s20 + $0xf0] sm:$0xff] %v4114_v42  ;;  %v8078_v33 = vld [vmem:[#allocation24_spill] sm:$0xff]  ;;  %v8079_v51 = vld [vmem:[#allocation25_spill] sm:$0xff] }
 0x284   : > { %3758 = vst [vmem:[%s6142_s20 + $0xf8] sm:$0xff] %v4115_v22  ;;  %4160 = vrsqrt.f32 %v2700_v48  ;;  %v8080_v25 = vld [vmem:[#allocation26_spill] sm:$0xff]  ;;  %v8081_v29 = vld [vmem:[#allocation27_spill] sm:$0xff]  ;;  %v8082_v18 = vld [vmem:[#allocation28_spill] sm:$0xff] }
 0x285   : > { %v8083_v42 = vld [vmem:[#allocation29_spill] sm:$0xff]  ;;  %v8084_v4 = vld [vmem:[#allocation30_spill] sm:$0xff]  ;;  %v8085_v24 = vld [vmem:[#allocation31_spill] sm:$0xff] }
 0x286   : > { %v8086_v21 = vld [vmem:[#allocation32_spill] sm:$0xff]  ;;  %v8087_v48 = vld [vmem:[#allocation33_spill] sm:$0xff]  ;;  %v8088_v34 = vld [vmem:[#allocation34_spill] sm:$0xff] }
 0x287   : > { %v8089_v5 = vld [vmem:[#allocation35_spill] sm:$0xff]  ;;  %v8090_v0 = vld [vmem:[#allocation36_spill] sm:$0xff]  ;;  %v8091_v22 = vld [vmem:[#allocation37_spill] sm:$0xff] }
 0x288   : > { %v8092_v56 = vld [vmem:[#allocation38_spill] sm:$0xff]  ;;  %v8093_v32 = vld [vmem:[#allocation39_spill] sm:$0xff]  ;;  %v8094_v19 = vld [vmem:[#allocation40_spill] sm:$0xff] }
 0x289   : > { %v8095_v62 = vld [vmem:[#allocation41_spill] sm:$0xff]  ;;  %v8096_v46 = vld [vmem:[#allocation44_spill] sm:$0xff]  ;;  %v8097_v30 = vld [vmem:[#allocation46_spill] sm:$0xff] }
 0x28a   : > { %v8098_v40 = vld [vmem:[#allocation47_spill] sm:$0xff]  ;;  %v8099_v47 = vld [vmem:[#allocation48_spill] sm:$0xff]  ;;  %v8101_v11 = vld [vmem:[#allocation54_spill] sm:$0xff] }
 0x28b   : > { %v8100_v54 = vld [vmem:[#allocation52_spill] sm:$0xff]  ;;  %v8102_v50 = vld [vmem:[#allocation55_spill] sm:$0xff]  ;;  %v8113_v52 = vld [vmem:[#allocation78_spill] sm:$0xff] }
 0x28c   : > { %v8103_v45 = vld [vmem:[#allocation56_spill] sm:$0xff]  ;;  %v8114_v53 = vld [vmem:[#allocation79_spill] sm:$0xff]  ;;  %v8117_v55 = vld [vmem:[#allocation85_spill] sm:$0xff] }
 0x28d   : > { %v8115_v23 = vld [vmem:[#allocation80_spill] sm:$0xff]  ;;  %v8118_v10 = vld [vmem:[#allocation86_spill] sm:$0xff]  ;;  %v8119_v7 = vld [vmem:[#allocation87_spill] sm:$0xff] }
 0x28e   : > { %v6374_v27 = vpop.eup %4160  ;;  %v8116_v37 = vld [vmem:[#allocation84_spill] sm:$0xff] }
 0x28f   : > { %v6406_v43 = vmul.f32 %v6374_v27, %v8120_v15  ;;  %v6412_v8 = vmul.f32 %v6374_v27, %v8121_v16  ;;  %v6418_v61 = vmul.f32 %v6374_v27, %v8122_v3  ;;  %v6424_v26 = vmul.f32 %v6374_v27, %v8123_v17 }
 0x290   : > { %v8124_v15 = vsub.f32 %v8060_v28, %v8055_v35  ;;  %v8125_v16 = vsub.f32 %v8061_v38, %v8055_v35  ;;  %v8126_v3 = vsub.f32 %v8062_v31, %v8055_v35  ;;  %v8127_v17 = vsub.f32 %v8063_v57, %v8055_v35 }
 0x291   : > { %vm3023_vm5 = vcmp.ge.f32.partialorder %v6406_v43, 0.0  ;;  %vm3024_vm6 = vcmp.ge.f32.partialorder %v6412_v8, 0.0  ;;  %vm3025_vm1 = vcmp.ge.f32.partialorder %v6418_v61, 0.0  ;;  %vm3026_vm2 = vcmp.ge.f32.partialorder %v6424_v26, 0.0 }
 0x292   : > { %v6430_v2 = vmul.f32 %v6374_v27, %v8124_v15  ;;  %v6436_v20 = vmul.f32 %v6374_v27, %v8125_v16  ;;  %v6442_v14 = vmul.f32 %v6374_v27, %v8126_v3  ;;  %v6448_v28 = vmul.f32 %v6374_v27, %v8127_v17 }
 0x293   : > { %v8128_v15 = vsub.f32 %v8064_v59, %v8055_v35  ;;  %v8129_v16 = vsub.f32 %v8065_v60, %v8055_v35  ;;  %v8130_v3 = vsub.f32 %v8066_v9, %v8055_v35  ;;  %v8131_v17 = vsub.f32 %v8067_v36, %v8055_v35 }
 0x294   : > { %vm3027_vm10 = vcmp.ge.f32.partialorder %v6430_v2, 0.0  ;;  %vm3028_vm13 = vcmp.ge.f32.partialorder %v6436_v20, 0.0  ;;  %vm3029_vm4 = vcmp.ge.f32.partialorder %v6442_v14, 0.0  ;;  %vm3030_vm8 = vcmp.ge.f32.partialorder %v6448_v28, 0.0 }
 0x295   : > { %v6454_v38 = vmul.f32 %v6374_v27, %v8128_v15  ;;  %v6460_v31 = vmul.f32 %v6374_v27, %v8129_v16  ;;  %v6466_v57 = vmul.f32 %v6374_v27, %v8130_v3  ;;  %v6472_v59 = vmul.f32 %v6374_v27, %v8131_v17 }
 0x296   : > { %v8132_v15 = vsub.f32 %v8068_v63, %v8055_v35  ;;  %v8133_v16 = vsub.f32 %v8069_v1, %v8055_v35  ;;  %v8134_v3 = vsub.f32 %v8070_v44, %v8055_v35  ;;  %v8135_v17 = vsub.f32 %v8071_v6, %v8055_v35 }
 0x297   : > { %vm3031_vm14 = vcmp.ge.f32.partialorder %v6454_v38, 0.0  ;;  %vm3032_vm11 = vcmp.ge.f32.partialorder %v6460_v31, 0.0  ;;  %vm3033_vm9 = vcmp.ge.f32.partialorder %v6466_v57, 0.0  ;;  %vm3034_vm15 = vcmp.ge.f32.partialorder %v6472_v59, 0.0 }
 0x298   : > { %v6478_v60 = vmul.f32 %v6374_v27, %v8132_v15  ;;  %v6484_v9 = vmul.f32 %v6374_v27, %v8133_v16  ;;  %v6490_v36 = vmul.f32 %v6374_v27, %v8134_v3  ;;  %v6496_v63 = vmul.f32 %v6374_v27, %v8135_v17 }
 0x299   : > { %v8136_v15 = vsub.f32 %v8072_v39, %v8055_v35  ;;  %v8137_v16 = vsub.f32 %v8073_v13, %v8055_v35  ;;  %v8138_v3 = vsub.f32 %v8074_v49, %v8055_v35  ;;  %v8139_v17 = vsub.f32 %v8075_v58, %v8055_v35 }
 0x29a   : > { %vm3035_vm3 = vcmp.ge.f32.partialorder %v6478_v60, 0.0  ;;  %vm3036_vm12 = vcmp.ge.f32.partialorder %v6484_v9, 0.0  ;;  %vm3037_vm0 = vcmp.ge.f32.partialorder %v6490_v36, 0.0  ;;  %vm3038_vm7 = vcmp.ge.f32.partialorder %v6496_v63, 0.0 }
 0x29b   : > { %v6502_v1 = vmul.f32 %v6374_v27, %v8136_v15  ;;  %v6508_v44 = vmul.f32 %v6374_v27, %v8137_v16  ;;  %v6514_v6 = vmul.f32 %v6374_v27, %v8138_v3  ;;  %v6520_v39 = vmul.f32 %v6374_v27, %v8139_v17 }
 0x29c   : > { %v8140_v15 = vsub.f32 %v8076_v12, %v8055_v35  ;;  %v8141_v16 = vsub.f32 %v8077_v41, %v8055_v35  ;;  %v8142_v3 = vsub.f32 %v8078_v33, %v8055_v35  ;;  %v8143_v17 = vsub.f32 %v8079_v51, %v8055_v35 }
 0x29e   : > { %v6526_v13 = vmul.f32 %v6374_v27, %v8140_v15  ;;  %v6532_v49 = vmul.f32 %v6374_v27, %v8141_v16  ;;  %v6538_v58 = vmul.f32 %v6374_v27, %v8142_v3  ;;  %v6544_v12 = vmul.f32 %v6374_v27, %v8143_v17 }
 0x29f   : > { %v8144_v15 = vsub.f32 %v8080_v25, %v8055_v35  ;;  %v8145_v16 = vsub.f32 %v8081_v29, %v8055_v35  ;;  %v8146_v3 = vsub.f32 %v8082_v18, %v8055_v35  ;;  %v8147_v17 = vsub.f32 %v8083_v42, %v8055_v35 }
 0x2a1   : > { %v6550_v41 = vmul.f32 %v6374_v27, %v8144_v15  ;;  %v6556_v33 = vmul.f32 %v6374_v27, %v8145_v16  ;;  %v6562_v51 = vmul.f32 %v6374_v27, %v8146_v3  ;;  %v6568_v25 = vmul.f32 %v6374_v27, %v8147_v17 }
 0x2a2   : > { %v8148_v15 = vsub.f32 %v8084_v4, %v8055_v35  ;;  %v8149_v16 = vsub.f32 %v8085_v24, %v8055_v35  ;;  %v8150_v3 = vsub.f32 %v8086_v21, %v8055_v35  ;;  %v8151_v17 = vsub.f32 %v8087_v48, %v8055_v35 }
 0x2a4   : > { %v6574_v29 = vmul.f32 %v6374_v27, %v8148_v15  ;;  %v6580_v18 = vmul.f32 %v6374_v27, %v8149_v16  ;;  %v6586_v42 = vmul.f32 %v6374_v27, %v8150_v3  ;;  %v6592_v4 = vmul.f32 %v6374_v27, %v8151_v17 }
 0x2a5   : > { %v8152_v15 = vsub.f32 %v8088_v34, %v8055_v35  ;;  %v8153_v16 = vsub.f32 %v8089_v5, %v8055_v35  ;;  %v8154_v3 = vsub.f32 %v8090_v0, %v8055_v35  ;;  %v8155_v17 = vsub.f32 %v8091_v22, %v8055_v35 }
 0x2a7   : > { %v6598_v24 = vmul.f32 %v6374_v27, %v8152_v15  ;;  %v6604_v21 = vmul.f32 %v6374_v27, %v8153_v16  ;;  %v6610_v48 = vmul.f32 %v6374_v27, %v8154_v3  ;;  %v6616_v34 = vmul.f32 %v6374_v27, %v8155_v17 }
 0x2a8   : > { %v8156_v15 = vsub.f32 %v8092_v56, %v8055_v35  ;;  %v8157_v16 = vsub.f32 %v8093_v32, %v8055_v35  ;;  %v8158_v3 = vsub.f32 %v8094_v19, %v8055_v35  ;;  %v8159_v17 = vsub.f32 %v8095_v62, %v8055_v35 }
 0x2aa   : > { %v6622_v5 = vmul.f32 %v6374_v27, %v8156_v15  ;;  %v6628_v0 = vmul.f32 %v6374_v27, %v8157_v16  ;;  %v6634_v22 = vmul.f32 %v6374_v27, %v8158_v3  ;;  %v6640_v56 = vmul.f32 %v6374_v27, %v8159_v17 }
 0x2ab   : > { %v8160_v15 = vsub.f32 %v8096_v46, %v8055_v35  ;;  %v8161_v16 = vsub.f32 %v8097_v30, %v8055_v35  ;;  %v8163_v3 = vsub.f32 %v8098_v40, %v8055_v35  ;;  %v8164_v17 = vsub.f32 %v8099_v47, %v8055_v35 }
 0x2ad   : > { %v6646_v32 = vmul.f32 %v6374_v27, %v8160_v15  ;;  %v6652_v19 = vmul.f32 %v6374_v27, %v8161_v16  ;;  %v6658_v62 = vmul.f32 %v6374_v27, %v8163_v3  ;;  %v6664_v46 = vmul.f32 %v6374_v27, %v8164_v17 }
 0x2ae   : > { %v8165_v15 = vsub.f32 %v8100_v54, %v8055_v35  ;;  %v8167_v16 = vsub.f32 %v8101_v11, %v8055_v35  ;;  %v8169_v3 = vsub.f32 %v8102_v50, %v8055_v35  ;;  %v8171_v17 = vsub.f32 %v8103_v45, %v8055_v35 }
 0x2af   : > { %8162 = vst [vmem:[#allocation97_spill] sm:$0xff] %v6652_v19 }
 0x2b0   : > { %v6670_v30 = vmul.f32 %v6374_v27, %v8165_v15  ;;  %v6676_v40 = vmul.f32 %v6374_v27, %v8167_v16  ;;  %v6682_v47 = vmul.f32 %v6374_v27, %v8169_v3  ;;  %v6688_v54 = vmul.f32 %v6374_v27, %v8171_v17  ;;  %v8173_v15 = vld [vmem:[#allocation60_spill] sm:$0xff]  ;;  %v8176_v16 = vld [vmem:[#allocation62_spill] sm:$0xff]  ;;  %v8179_v3 = vld [vmem:[#allocation63_spill] sm:$0xff] }
 0x2b1   : > { %v8182_v17 = vld [vmem:[#allocation64_spill] sm:$0xff] }
 0x2b2   : > { %8166 = vst [vmem:[#allocation99_spill] sm:$0xff] %v6670_v30  ;;  %8168 = vst [vmem:[#allocation102_spill] sm:$0xff] %v6676_v40  ;;  %v8174_v30 = vsub.f32 %v8173_v15, %v8055_v35  ;;  %v8177_v40 = vsub.f32 %v8176_v16, %v8055_v35 }
 0x2b3   : > { %8170 = vst [vmem:[#allocation104_spill] sm:$0xff] %v6682_v47  ;;  %8172 = vst [vmem:[#allocation43_spill] sm:$0xff] %v6688_v54  ;;  %v8180_v47 = vsub.f32 %v8179_v3, %v8055_v35  ;;  %v8183_v54 = vsub.f32 %v8182_v17, %v8055_v35 }
 0x2b4   : > { %v6694_v11 = vmul.f32 %v6374_v27, %v8174_v30  ;;  %v6700_v50 = vmul.f32 %v6374_v27, %v8177_v40  ;;  %v8185_v30 = vld [vmem:[#allocation68_spill] sm:$0xff]  ;;  %v8188_v40 = vld [vmem:[#allocation70_spill] sm:$0xff] }
 0x2b5   : > { %v6706_v45 = vmul.f32 %v6374_v27, %v8180_v47  ;;  %v6712_v15 = vmul.f32 %v6374_v27, %v8183_v54  ;;  %v8191_v47 = vld [vmem:[#allocation71_spill] sm:$0xff]  ;;  %v8194_v54 = vld [vmem:[#allocation72_spill] sm:$0xff] }
 0x2b6   : > { %8175 = vst [vmem:[#allocation106_spill] sm:$0xff] %v6694_v11  ;;  %8178 = vst [vmem:[#allocation108_spill] sm:$0xff] %v6700_v50  ;;  %v8186_v11 = vsub.f32 %v8185_v30, %v8055_v35  ;;  %v8189_v50 = vsub.f32 %v8188_v40, %v8055_v35 }
 0x2b7   : > { %8181 = vst [vmem:[#allocation109_spill] sm:$0xff] %v6706_v45  ;;  %8184 = vst [vmem:[#allocation110_spill] sm:$0xff] %v6712_v15  ;;  %v8192_v45 = vsub.f32 %v8191_v47, %v8055_v35  ;;  %v8195_v15 = vsub.f32 %v8194_v54, %v8055_v35 }
 0x2b8   : > { %v6718_v16 = vmul.f32 %v6374_v27, %v8186_v11  ;;  %v6724_v3 = vmul.f32 %v6374_v27, %v8189_v50  ;;  %v8197_v11 = vld [vmem:[#allocation76_spill] sm:$0xff]  ;;  %v8200_v50 = vsub.f32 %v8113_v52, %v8055_v35 }
 0x2b9   : > { %v6730_v17 = vmul.f32 %v6374_v27, %v8192_v45  ;;  %v6736_v30 = vmul.f32 %v6374_v27, %v8195_v15  ;;  %v8202_v45 = vsub.f32 %v8114_v53, %v8055_v35  ;;  %v8204_v15 = vsub.f32 %v8115_v23, %v8055_v35 }
 0x2ba   : > { %8187 = vst [vmem:[#allocation45_spill] sm:$0xff] %v6718_v16  ;;  %8190 = vst [vmem:[#allocation112_spill] sm:$0xff] %v6724_v3  ;;  %v8198_v16 = vsub.f32 %v8197_v11, %v8055_v35  ;;  %v6748_v47 = vmul.f32 %v6374_v27, %v8200_v50  ;;  %v8208_v50 = vsub.f32 %v8117_v55, %v8055_v35  ;;  %v3151_v23 = vmul.f32 0.01, %v6406_v43 }
 0x2bb   : > { %8193 = vst [vmem:[#allocation49_spill] sm:$0xff] %v6730_v17  ;;  %8196 = vst [vmem:[#allocation69_spill] sm:$0xff] %v6736_v30  ;;  %v6754_v54 = vmul.f32 %v6374_v27, %v8202_v45  ;;  %v6760_v11 = vmul.f32 %v6374_v27, %v8204_v15  ;;  %v8210_v55 = vsub.f32 %v8118_v10, %v8055_v35  ;;  %v3152_v45 = vmul.f32 0.01, %v6412_v8 }
 0x2bc   : > { %v6742_v40 = vmul.f32 %v6374_v27, %v8198_v16  ;;  %8201 = vst [vmem:[#allocation74_spill] sm:$0xff] %v6748_v47  ;;  %v8206_v16 = vsub.f32 %v8116_v37, %v8055_v35  ;;  %v6772_v53 = vmul.f32 %v6374_v27, %v8208_v50  ;;  %v3153_v15 = vmul.f32 0.01, %v6418_v61 }
 0x2bd   : > { %8203 = vst [vmem:[#allocation75_spill] sm:$0xff] %v6754_v54  ;;  %8205 = vst [vmem:[#allocation77_spill] sm:$0xff] %v6760_v11  ;;  %v6787_v37 = vmul.f32 %v6374_v27, %v8210_v55  ;;  %v3154_v10 = vmul.f32 0.01, %v6424_v26  ;;  %v3155_v55 = vmul.f32 0.01, %v6430_v2 }
 0x2be   : > { %8199 = vst [vmem:[#allocation73_spill] sm:$0xff] %v6742_v40  ;;  %v6766_v52 = vmul.f32 %v6374_v27, %v8206_v16  ;;  %8209 = vst [vmem:[#allocation115_spill] sm:$0xff] %v6772_v53  ;;  %v8212_v16 = vsub.f32 %v8119_v7, %v8055_v35  ;;  %v3157_v53 = vmul.f32 0.01, %v6442_v14  ;;  %v3159_v11 = vmul.f32 0.01, %v6454_v38 }
 0x2bf   : > { %8211 = vst [vmem:[#allocation50_spill] sm:$0xff] %v6787_v37  ;;  %v3156_v37 = vmul.f32 0.01, %v6436_v20  ;;  %v6810_v35 = vsel %vm3023_vm5, %v6406_v43, %v3151_v23  ;;  %v3161_v7 = vmul.f32 0.01, %v6466_v57  ;;  %v6851_v47 = vsel %vm3026_vm2, %v6424_v26, %v3154_v10 }
 0x2c0   : > { %8207 = vst [vmem:[#allocation82_spill] sm:$0xff] %v6766_v52  ;;  %v6797_v50 = vmul.f32 %v6374_v27, %v8212_v16  ;;  %v3158_v52 = vmul.f32 0.01, %v6448_v28  ;;  %8214 = vst [vmem:[#allocation51_spill] sm:$0xff] %v6810_v35  ;;  %v3160_v27 = vmul.f32 0.01, %v6460_v31  ;;  %v6836_v35 = vsel %vm3025_vm1, %v6418_v61, %v3153_v15 }
 0x2c1   : > { %v6816_v16 = vmul.f32 0.01, %v6472_v59  ;;  %v6825_v54 = vmul.f32 0.01, %v6478_v60  ;;  %v6828_v43 = vmul.f32 0.01, %v6484_v9 }
 0x2c2   : > { %8213 = vst [vmem:[#allocation116_spill] sm:$0xff] %v6797_v50  ;;  %v6821_v50 = vsel %vm3024_vm6, %v6412_v8, %v3152_v45  ;;  %v6831_v23 = vmul.f32 0.01, %v6490_v36  ;;  %8216 = vst [vmem:[#allocation53_spill] sm:$0xff] %v6836_v35  ;;  %v6840_v8 = vmul.f32 0.01, %v6496_v63 }
 0x2c3   : > { %8215 = vst [vmem:[#allocation117_spill] sm:$0xff] %v6821_v50  ;;  %v6843_v45 = vmul.f32 0.01, %v6502_v1  ;;  %v6846_v50 = vmul.f32 0.01, %v6508_v44  ;;  %8218 = vst [vmem:[#allocation58_spill] sm:$0xff] %v6851_v47 }
 0x2c4   : > { %v6855_v61 = vmul.f32 0.01, %v6514_v6  ;;  %v6858_v15 = vmul.f32 0.01, %v6520_v39  ;;  %v6861_v35 = vmul.f32 0.01, %v6526_v13 }
 0x2c5   : > { %8217 = vst [vmem:[#allocation57_spill] sm:$0xff] %v6846_v50  ;;  %v6866_v50 = vsel %vm3027_vm10, %v6430_v2, %v3155_v55  ;;  %vm3039_vm5 = vcmp.ge.f32.partialorder %v6502_v1, 0.0  ;;  %v6870_v26 = vmul.f32 0.01, %v6532_v49  ;;  %v6873_v10 = vmul.f32 0.01, %v6538_v58 }
 0x2c6   : > { %8219 = vst [vmem:[#allocation59_spill] sm:$0xff] %v6861_v35  ;;  %8220 = vst [vmem:[#allocation61_spill] sm:$0xff] %v6866_v50  ;;  %v6876_v47 = vmul.f32 0.01, %v6544_v12  ;;  %v6881_v35 = vsel %vm3028_vm13, %v6436_v20, %v3156_v37  ;;  %vm3040_vm6 = vcmp.ge.f32.partialorder %v6508_v44, 0.0  ;;  %vm3041_vm1 = vcmp.ge.f32.partialorder %v6514_v6, 0.0 }
 0x2c7   : > { %8222 = vst [vmem:[#allocation67_spill] sm:$0xff] %v6881_v35  ;;  %v6885_v2 = vmul.f32 0.01, %v6550_v41  ;;  %v6888_v55 = vmul.f32 0.01, %v6556_v33  ;;  %vm3042_vm2 = vcmp.ge.f32.partialorder %v6520_v39, 0.0 }
 0x2c8   : > { %8221 = vst [vmem:[#allocation66_spill] sm:$0xff] %v6876_v47  ;;  %v6891_v50 = vmul.f32 0.01, %v6562_v51  ;;  %v6896_v47 = vsel %vm3029_vm4, %v6442_v14, %v3157_v53  ;;  %v6900_v20 = vmul.f32 0.01, %v6568_v25  ;;  %vm3045_vm4 = vcmp.ge.f32.partialorder %v6538_v58, 0.0 }
 0x2c9   : > { %8224 = vst [vmem:[#allocation90_spill] sm:$0xff] %v6896_v47  ;;  %v6903_v37 = vmul.f32 0.01, %v6574_v29  ;;  %v6906_v35 = vmul.f32 0.01, %v6580_v18 }
 0x2ca   : > { %8223 = vst [vmem:[#allocation88_spill] sm:$0xff] %v6891_v50  ;;  %v6911_v50 = vsel %vm3030_vm8, %v6448_v28, %v3158_v52  ;;  %v6917_v14 = vmul.f32 0.01, %v6586_v42  ;;  %v6920_v53 = vmul.f32 0.01, %v6592_v4  ;;  %v6928_v28 = vsel %vm3031_vm14, %v6454_v38, %v3159_v11 }
 0x2cb   : > { %8225 = vst [vmem:[#allocation91_spill] sm:$0xff] %v6911_v50  ;;  %v6923_v47 = vmul.f32 0.01, %v6598_v24  ;;  %8227 = vst [vmem:[#allocation94_spill] sm:$0xff] %v6928_v28  ;;  %v6935_v52 = vmul.f32 0.01, %v6604_v21  ;;  %v6946_v38 = vsel %vm3032_vm11, %v6460_v31, %v3160_v27  ;;  %v6964_v31 = vsel %vm3033_vm9, %v6466_v57, %v3161_v7 }
 0x2cc   : > { %v6938_v50 = vmul.f32 0.01, %v6610_v48  ;;  %8229 = vst [vmem:[#allocation98_spill] sm:$0xff] %v6946_v38  ;;  %vm3049_vm14 = vcmp.ge.f32.partialorder %v6562_v51, 0.0  ;;  %v6953_v11 = vmul.f32 0.01, %v6622_v5  ;;  %v6983_v57 = vsel %vm3034_vm15, %v6472_v59, %v6816_v16 }
 0x2cd   : > { %8226 = vst [vmem:[#allocation92_spill] sm:$0xff] %v6923_v47  ;;  %v6941_v47 = vmul.f32 0.01, %v6616_v34  ;;  %v6956_v28 = vmul.f32 0.01, %v6628_v0  ;;  %8231 = vst [vmem:[#allocation101_spill] sm:$0xff] %v6964_v31  ;;  %v7002_v59 = vsel %vm3035_vm3, %v6478_v60, %v6825_v54  ;;  %v7021_v60 = vsel %vm3036_vm12, %v6484_v9, %v6828_v43 }
 0x2ce   : > { %vm3053_vm11 = vcmp.ge.f32.partialorder %v6586_v42, 0.0  ;;  %v6971_v27 = vmul.f32 0.01, %v6640_v56  ;;  %v6974_v38 = vmul.f32 0.01, %v6646_v32  ;;  %8235 = vst [vmem:[#allocation111_spill] sm:$0xff] %v6983_v57  ;;  %v7040_v9 = vsel %vm3037_vm0, %v6490_v36, %v6831_v23 }
 0x2cf   : > { %8228 = vst [vmem:[#allocation96_spill] sm:$0xff] %v6941_v47  ;;  %v6959_v47 = vmul.f32 0.01, %v6634_v22  ;;  %vm3057_vm9 = vcmp.ge.f32.partialorder %v6610_v48, 0.0  ;;  %v6990_v7 = vmul.f32 0.01, %v6658_v62  ;;  %v7059_v36 = vsel %vm3038_vm7, %v6496_v63, %v6840_v8 }
 0x2d0   : > { %8232 = vst [vmem:[#allocation103_spill] sm:$0xff] %v6971_v27  ;;  %8233 = vst [vmem:[#allocation105_spill] sm:$0xff] %v6974_v38  ;;  %v6993_v31 = vmul.f32 0.01, %v6664_v46  ;;  %vm3061_vm15 = vcmp.ge.f32.partialorder %v6634_v22, 0.0  ;;  %v8241_v16 = vld [vmem:[#allocation102_spill] sm:$0xff]  ;;  %v7072_v63 = vsel %vm3039_vm5, %v6502_v1, %v6843_v45 }
 0x2d1   : > { %8230 = vst [vmem:[#allocation100_spill] sm:$0xff] %v6959_v47  ;;  %v6977_v47 = vmul.f32 0.01, %v6652_v19  ;;  %8236 = vst [vmem:[#allocation113_spill] sm:$0xff] %v6990_v7  ;;  %v7009_v57 = vmul.f32 0.01, %v8241_v16 }
 0x2d2   : > { %8237 = vst [vmem:[#allocation114_spill] sm:$0xff] %v6993_v31  ;;  %8240 = vst [vmem:[#allocation118_spill] sm:$0xff] %v7002_v59  ;;  %v8243_v31 = vld [vmem:[#allocation104_spill] sm:$0xff]  ;;  %vm3065_vm3 = vcmp.ge.f32.partialorder %v6658_v62, 0.0  ;;  %v8248_v54 = vld [vmem:[#allocation106_spill] sm:$0xff]  ;;  %vm3077_vm7 = vcmp.ge.f32.partialorder %v6730_v17, 0.0 }
 0x2d3   : > { %8234 = vst [vmem:[#allocation107_spill] sm:$0xff] %v6977_v47  ;;  %v8238_v47 = vld [vmem:[#allocation99_spill] sm:$0xff]  ;;  %8242 = vst [vmem:[#allocation119_spill] sm:$0xff] %v7009_v57  ;;  %v7012_v7 = vmul.f32 0.01, %v8243_v31  ;;  %vm3069_vm12 = vcmp.ge.f32.partialorder %v8243_v31, 0.0 }
 0x2d4   : > { %v6996_v38 = vmul.f32 0.01, %v8238_v47  ;;  %8247 = vst [vmem:[#allocation83_spill] sm:$0xff] %v7021_v60  ;;  %v7028_v59 = vmul.f32 0.01, %v8248_v54  ;;  %8254 = vst [vmem:[#allocation2_spill] sm:$0xff] %v7040_v9 }
 0x2d5   : > { %8244 = vst [vmem:[#allocation65_spill] sm:$0xff] %v7012_v7  ;;  %v8250_v7 = vld [vmem:[#allocation108_spill] sm:$0xff]  ;;  %v8255_v43 = vld [vmem:[#allocation110_spill] sm:$0xff]  ;;  %8260 = vst [vmem:[#allocation6_spill] sm:$0xff] %v7059_v36  ;;  %v3205_v23 = vmul.f32 0.01, %v6730_v17 }
 0x2d6   : > { %8239 = vst [vmem:[#allocation81_spill] sm:$0xff] %v6996_v38  ;;  %v8245_v38 = vld [vmem:[#allocation43_spill] sm:$0xff]  ;;  %8249 = vst [vmem:[#allocation89_spill] sm:$0xff] %v7028_v59  ;;  %v7031_v57 = vmul.f32 0.01, %v8250_v7  ;;  %v8262_v8 = vld [vmem:[#allocation74_spill] sm:$0xff] }
 0x2d7   : > { %v7015_v27 = vmul.f32 0.01, %v8245_v38  ;;  %v7047_v60 = vmul.f32 0.01, %v8255_v43  ;;  %v3206_v9 = vmul.f32 0.01, %v6736_v30 }
 0x2d8   : > { %8251 = vst [vmem:[#allocation95_spill] sm:$0xff] %v7031_v57  ;;  %v8257_v57 = vld [vmem:[#allocation45_spill] sm:$0xff]  ;;  %8261 = vst [vmem:[#allocation7_spill] sm:$0xff] %v7072_v63  ;;  %v3208_v36 = vmul.f32 0.01, %v8262_v8  ;;  %v8267_v45 = vld [vmem:[#allocation82_spill] sm:$0xff] }
 0x2d9   : > { %8246 = vst [vmem:[#allocation93_spill] sm:$0xff] %v7015_v27  ;;  %v8252_v27 = vld [vmem:[#allocation109_spill] sm:$0xff]  ;;  %8256 = vst [vmem:[#allocation3_spill] sm:$0xff] %v7047_v60  ;;  %v7050_v59 = vmul.f32 0.01, %v8257_v57  ;;  %vm3083_vm10 = vcmp.ge.f32.partialorder %v8267_v45, 0.0 }
 0x2da   : > { %v7034_v19 = vmul.f32 0.01, %v8252_v27  ;;  %vm3073_vm0 = vcmp.ge.f32.partialorder %v8252_v27, 0.0  ;;  %v8265_v60 = vld [vmem:[#allocation57_spill] sm:$0xff]  ;;  %v8268_v63 = vld [vmem:[#allocation115_spill] sm:$0xff]  ;;  %v8269_v30 = vld [vmem:[#allocation50_spill] sm:$0xff] }
 0x2db   : > { %8258 = vst [vmem:[#allocation4_spill] sm:$0xff] %v7050_v59  ;;  %v8264_v59 = vld [vmem:[#allocation77_spill] sm:$0xff]  ;;  %v7085_v1 = vsel %vm3040_vm6, %v6508_v44, %v8265_v60  ;;  %v3211_v8 = vmul.f32 0.01, %v8267_v45  ;;  %v3213_v17 = vmul.f32 0.01, %v8269_v30  ;;  %v7098_v44 = vsel %vm3041_vm1, %v6514_v6, %v6855_v61 }
 0x2dc   : > { %8253 = vst [vmem:[#allocation42_spill] sm:$0xff] %v7034_v19  ;;  %v7053_v19 = vmul.f32 0.01, %v6724_v3  ;;  %v8263_v3 = vld [vmem:[#allocation75_spill] sm:$0xff]  ;;  %v3210_v43 = vmul.f32 0.01, %v8264_v59  ;;  %v7107_v45 = vsel %vm3042_vm2, %v6520_v39, %v6858_v15  ;;  %v7125_v61 = vsel %vm3045_vm4, %v6538_v58, %v6873_v10 }
 0x2dd   : > { %v3209_v57 = vmul.f32 0.01, %v8263_v3  ;;  %8266 = vst [vmem:[#allocation8_spill] sm:$0xff] %v7085_v1  ;;  %vm3081_vm5 = vcmp.ge.f32.partialorder %v8263_v3, 0.0  ;;  %vm3085_vm6 = vcmp.ge.f32.partialorder %v8269_v30, 0.0  ;;  %v8270_v60 = vld [vmem:[#allocation116_spill] sm:$0xff] }
 0x2de   : > { %8259 = vst [vmem:[#allocation5_spill] sm:$0xff] %v7053_v19  ;;  %v3207_v19 = vmul.f32 0.01, %v6742_v40  ;;  %v3212_v40 = vmul.f32 0.01, %v8268_v63  ;;  %vm3086_vm13 = vcmp.ge.f32.partialorder %v8270_v60, 0.0 }
 0x2df   : > { %v3214_v1 = vmul.f32 0.01, %v8270_v60  ;;  %v8271_v63 = vld [vmem:[#allocation59_spill] sm:$0xff]  ;;  %vm8272_vm8 = vcmp.ge.f32.partialorder %v6526_v13, 0.0  ;;  %vm8273_vm1 = vcmp.ge.f32.partialorder %v6532_v49, 0.0  ;;  %v8274_v39 = vld [vmem:[#allocation66_spill] sm:$0xff] }
 0x2e0   : > { %v7113_v59 = vsel %vm8272_vm8, %v6526_v13, %v8271_v63  ;;  %v7119_v6 = vsel %vm8273_vm1, %v6532_v49, %v6870_v26  ;;  %vm8275_vm2 = vcmp.ge.f32.partialorder %v6544_v12, 0.0  ;;  %vm8276_vm8 = vcmp.ge.f32.partialorder %v6550_v41, 0.0  ;;  %v8278_v58 = vld [vmem:[#allocation88_spill] sm:$0xff] }
 0x2e1   : > { %v7131_v15 = vsel %vm8275_vm2, %v6544_v12, %v8274_v39  ;;  %v7137_v13 = vsel %vm8276_vm8, %v6550_v41, %v6885_v2  ;;  %vm8277_vm1 = vcmp.ge.f32.partialorder %v6556_v33, 0.0  ;;  %v7149_v26 = vsel %vm3049_vm14, %v6562_v51, %v8278_v58 }
 0x2e2   : > { %v7143_v49 = vsel %vm8277_vm1, %v6556_v33, %v6888_v55  ;;  %vm8279_vm4 = vcmp.ge.f32.partialorder %v6568_v25, 0.0  ;;  %vm8280_vm2 = vcmp.ge.f32.partialorder %v6574_v29, 0.0  ;;  %vm8281_vm8 = vcmp.ge.f32.partialorder %v6580_v18, 0.0 }
 0x2e3   : > { %v7155_v12 = vsel %vm8279_vm4, %v6568_v25, %v6900_v20  ;;  %v7161_v41 = vsel %vm8280_vm2, %v6574_v29, %v6903_v37  ;;  %v7167_v33 = vsel %vm8281_vm8, %v6580_v18, %v6906_v35  ;;  %v7173_v51 = vsel %vm3053_vm11, %v6586_v42, %v6917_v14  ;;  %v8283_v29 = vld [vmem:[#allocation92_spill] sm:$0xff]  ;;  %v8296_v20 = vld [vmem:[#allocation97_spill] sm:$0xff] }
 0x2e4   : > { %vm8282_vm14 = vcmp.ge.f32.partialorder %v6592_v4, 0.0  ;;  %vm8284_vm1 = vcmp.ge.f32.partialorder %v6598_v24, 0.0  ;;  %vm8285_vm4 = vcmp.ge.f32.partialorder %v6604_v21, 0.0  ;;  %v7197_v42 = vsel %vm3057_vm9, %v6610_v48, %v6938_v50  ;;  %v8290_v48 = vld [vmem:[#allocation100_spill] sm:$0xff] }
 0x2e5   : > { %v7179_v25 = vsel %vm8282_vm14, %v6592_v4, %v6920_v53  ;;  %v7185_v10 = vsel %vm8284_vm1, %v6598_v24, %v8283_v29  ;;  %v7191_v18 = vsel %vm8285_vm4, %v6604_v21, %v6935_v52  ;;  %v8286_v4 = vld [vmem:[#allocation96_spill] sm:$0xff]  ;;  %vm8287_vm11 = vcmp.ge.f32.partialorder %v6616_v34, 0.0  ;;  %v8303_v52 = vld [vmem:[#allocation119_spill] sm:$0xff] }
 0x2e6   : > { %v7203_v35 = vsel %vm8287_vm11, %v6616_v34, %v8286_v4  ;;  %vm8288_vm2 = vcmp.ge.f32.partialorder %v6622_v5, 0.0  ;;  %vm8289_vm8 = vcmp.ge.f32.partialorder %v6628_v0, 0.0  ;;  %v7221_v50 = vsel %vm3061_vm15, %v6634_v22, %v8290_v48  ;;  %v8291_v34 = vld [vmem:[#allocation103_spill] sm:$0xff]  ;;  %v8298_v22 = vld [vmem:[#allocation113_spill] sm:$0xff]  ;;  %v8314_v48 = vld [vmem:[#allocation110_spill] sm:$0xff] }
 0x2e7   : > { %v7209_v24 = vsel %vm8288_vm2, %v6622_v5, %v6953_v11  ;;  %v7215_v21 = vsel %vm8289_vm8, %v6628_v0, %v6956_v28  ;;  %vm8292_vm9 = vcmp.ge.f32.partialorder %v6640_v56, 0.0  ;;  %v8293_v5 = vld [vmem:[#allocation105_spill] sm:$0xff]  ;;  %vm8294_vm14 = vcmp.ge.f32.partialorder %v6646_v32, 0.0  ;;  %v8295_v0 = vld [vmem:[#allocation107_spill] sm:$0xff] }
 0x2e8   : > { %v7227_v2 = vsel %vm8292_vm9, %v6640_v56, %v8291_v34  ;;  %v7233_v55 = vsel %vm8294_vm14, %v6646_v32, %v8293_v5  ;;  %vm8297_vm1 = vcmp.ge.f32.partialorder %v8296_v20, 0.0  ;;  %v7245_v14 = vsel %vm3065_vm3, %v6658_v62, %v8298_v22  ;;  %v8299_v56 = vld [vmem:[#allocation114_spill] sm:$0xff]  ;;  %v8301_v32 = vld [vmem:[#allocation81_spill] sm:$0xff] }
 0x2e9   : > { %v7239_v37 = vsel %vm8297_vm1, %v8296_v20, %v8295_v0  ;;  %vm8300_vm15 = vcmp.ge.f32.partialorder %v6664_v46, 0.0  ;;  %vm8302_vm4 = vcmp.ge.f32.partialorder %v8238_v47, 0.0  ;;  %vm8304_vm11 = vcmp.ge.f32.partialorder %v8241_v16, 0.0  ;;  %v8305_v62 = vld [vmem:[#allocation65_spill] sm:$0xff]  ;;  %v8320_v20 = vld [vmem:[#allocation112_spill] sm:$0xff] }
 0x2ea   : > { %v7251_v53 = vsel %vm8300_vm15, %v6664_v46, %v8299_v56  ;;  %v7257_v28 = vsel %vm8302_vm4, %v8238_v47, %v8301_v32  ;;  %v7263_v11 = vsel %vm8304_vm11, %v8241_v16, %v8303_v52  ;;  %v7269_v63 = vsel %vm3069_vm12, %v8243_v31, %v8305_v62  ;;  %v8306_v46 = vld [vmem:[#allocation93_spill] sm:$0xff]  ;;  %v8310_v16 = vld [vmem:[#allocation95_spill] sm:$0xff]  ;;  %v8312_v31 = vld [vmem:[#allocation42_spill] sm:$0xff] }
 0x2eb   : > { %vm8307_vm3 = vcmp.ge.f32.partialorder %v8245_v38, 0.0  ;;  %v8308_v47 = vld [vmem:[#allocation89_spill] sm:$0xff]  ;;  %vm8309_vm2 = vcmp.ge.f32.partialorder %v8248_v54, 0.0  ;;  %vm8311_vm8 = vcmp.ge.f32.partialorder %v8250_v7, 0.0  ;;  %v7293_v4 = vsel %vm3073_vm0, %v8252_v27, %v8312_v31 }
 0x2ec   : > { %v7275_v39 = vsel %vm8307_vm3, %v8245_v38, %v8306_v46  ;;  %v7281_v58 = vsel %vm8309_vm2, %v8248_v54, %v8308_v47  ;;  %v7287_v29 = vsel %vm8311_vm8, %v8250_v7, %v8310_v16  ;;  %v8313_v38 = vld [vmem:[#allocation3_spill] sm:$0xff]  ;;  %vm8315_vm12 = vcmp.ge.f32.partialorder %v8314_v48, 0.0  ;;  %v8316_v54 = vld [vmem:[#allocation4_spill] sm:$0xff]  ;;  %v8317_v5 = vld [vmem:[#allocation45_spill] sm:$0xff] }
 0x2ed   : > { %v7299_v34 = vsel %vm8315_vm12, %v8314_v48, %v8313_v38  ;;  %vm8318_vm9 = vcmp.ge.f32.partialorder %v8317_v5, 0.0  ;;  %v8319_v7 = vld [vmem:[#allocation5_spill] sm:$0xff]  ;;  %vm8321_vm14 = vcmp.ge.f32.partialorder %v8320_v20, 0.0  ;;  %v8327_v47 = vld [vmem:[#allocation74_spill] sm:$0xff]  ;;  %v8333_v48 = vld [vmem:[#allocation115_spill] sm:$0xff] }
 0x2ee   : > { %v7305_v0 = vsel %vm8318_vm9, %v8317_v5, %v8316_v54  ;;  %v7311_v22 = vsel %vm8321_vm14, %v8320_v20, %v8319_v7  ;;  %v8322_v27 = vld [vmem:[#allocation49_spill] sm:$0xff]  ;;  %vm8328_vm15 = vcmp.ge.f32.partialorder %v8327_v47, 0.0  ;;  %v8331_v38 = vld [vmem:[#allocation82_spill] sm:$0xff]  ;;  %vm8334_vm4 = vcmp.ge.f32.partialorder %v8333_v48, 0.0 }
 0x2ef   : > { %v7316_v56 = vsel %vm3077_vm7, %v8322_v27, %v3205_v23  ;;  %v8323_v32 = vld [vmem:[#allocation69_spill] sm:$0xff]  ;;  %v7331_v16 = vsel %vm8328_vm15, %v8327_v47, %v3208_v36  ;;  %v7336_v23 = vsel %vm3081_vm5, %v8263_v3, %v3209_v57  ;;  %v7351_v36 = vsel %vm8334_vm4, %v8333_v48, %v3212_v40  ;;  %v8341_v7 = vld [vmem:[#allocation58_spill] sm:$0xff]  ;;  %v8343_v40 = vld [vmem:[#allocation67_spill] sm:$0xff] }
 0x2f0   : > { %vm8324_vm0 = vcmp.ge.f32.partialorder %v8323_v32, 0.0  ;;  %v8325_v62 = vld [vmem:[#allocation73_spill] sm:$0xff]  ;;  %8335 = vst [vmem:[#allocation10_spill] sm:$0xff] %v7351_v36  ;;  %v7356_v3 = vsel %vm3085_vm6, %v8269_v30, %v3213_v17  ;;  %v7361_v57 = vsel %vm3086_vm13, %v8270_v60, %v3214_v1  ;;  %v8345_v47 = vld [vmem:[#allocation91_spill] sm:$0xff]  ;;  %v8346_v30 = vld [vmem:[#allocation94_spill] sm:$0xff] }
 0x2f1   : > { %v7321_v52 = vsel %vm8324_vm0, %v8323_v32, %v3206_v9  ;;  %vm8326_vm1 = vcmp.ge.f32.partialorder %v8325_v62, 0.0  ;;  %v8329_v31 = vld [vmem:[#allocation77_spill] sm:$0xff]  ;;  %8336 = vst [vmem:[#allocation11_spill] sm:$0xff] %v7356_v3  ;;  %8337 = vst [vmem:[#allocation12_spill] sm:$0xff] %v7361_v57  ;;  %v8352_v3 = vld [vmem:[#allocation2_spill] sm:$0xff] }
 0x2f2   : > { %v7326_v46 = vsel %vm8326_vm1, %v8325_v62, %v3207_v19  ;;  %vm8330_vm7 = vcmp.ge.f32.partialorder %v8329_v31, 0.0  ;;  %v7346_v19 = vsel %vm3083_vm10, %v8331_v38, %v3211_v8  ;;  %v8339_v54 = vld [vmem:[#allocation117_spill] sm:$0xff]  ;;  %v8344_v62 = vld [vmem:[#allocation90_spill] sm:$0xff]  ;;  %v8349_v38 = vld [vmem:[#allocation111_spill] sm:$0xff] }
 0x2f3   : > { %v7341_v9 = vsel %vm8330_vm7, %v8329_v31, %v3210_v43  ;;  %8332 = vst [vmem:[#allocation9_spill] sm:$0xff] %v7346_v19  ;;  %v8338_v43 = vld [vmem:[#allocation51_spill] sm:$0xff]  ;;  %v8340_v8 = vld [vmem:[#allocation53_spill] sm:$0xff]  ;;  %v4119_v17 = vpack.c.bf16 %v8345_v47, %v8344_v62  ;;  %v8347_v31 = vld [vmem:[#allocation98_spill] sm:$0xff]  ;;  %v4126_v62 = vpack.c.bf16 %v7119_v6, %v7113_v59  ;;  %v4127_v47 = vpack.c.bf16 %v7131_v15, %v7125_v61 }
 0x2f4   : > { %v4116_v5 = vpack.c.bf16 %v8339_v54, %v8338_v43  ;;  %v4117_v20 = vpack.c.bf16 %v8341_v7, %v8340_v8  ;;  %v8342_v27 = vld [vmem:[#allocation61_spill] sm:$0xff]  ;;  %v4120_v1 = vpack.c.bf16 %v8347_v31, %v8346_v30  ;;  %v8350_v43 = vld [vmem:[#allocation118_spill] sm:$0xff]  ;;  %v8351_v54 = vld [vmem:[#allocation83_spill] sm:$0xff]  ;;  %v4130_v59 = vpack.c.bf16 %v7167_v33, %v7161_v41 }
 0x2f5   : > { %v4118_v32 = vpack.c.bf16 %v8343_v40, %v8342_v27  ;;  %v8348_v60 = vld [vmem:[#allocation101_spill] sm:$0xff]  ;;  %v4122_v57 = vpack.c.bf16 %v8351_v54, %v8350_v43  ;;  %v8353_v8 = vld [vmem:[#allocation6_spill] sm:$0xff]  ;;  %v8354_v36 = vld [vmem:[#allocation7_spill] sm:$0xff]  ;;  %v4125_v40 = vpack.c.bf16 %v7107_v45, %v7098_v44  ;;  %3762 = vst [vmem:[%s6142_s20 + $0x118] sm:$0xff] %v4119_v17  ;;  %v4131_v45 = vpack.c.bf16 %v7179_v25, %v7173_v51 }
 0x2f6   : > { %v4121_v48 = vpack.c.bf16 %v8349_v38, %v8348_v60  ;;  %v4123_v7 = vpack.c.bf16 %v8353_v8, %v8352_v3  ;;  %v8355_v19 = vld [vmem:[#allocation8_spill] sm:$0xff]  ;;  %3759 = vst [vmem:[%s6142_s20 + $0x100] sm:$0xff] %v4116_v5  ;;  %3760 = vst [vmem:[%s6142_s20 + $0x108] sm:$0xff] %v4117_v20  ;;  %v4128_v3 = vpack.c.bf16 %v7143_v49, %v7137_v13 }
 0x2f7   : > { %v4124_v27 = vpack.c.bf16 %v8355_v19, %v8354_v36  ;;  %v4129_v19 = vpack.c.bf16 %v7155_v12, %v7149_v26  ;;  %3761 = vst [vmem:[%s6142_s20 + $0x110] sm:$0xff] %v4118_v32  ;;  %3763 = vst [vmem:[%s6142_s20 + $0x120] sm:$0xff] %v4120_v1  ;;  %v4132_v44 = vpack.c.bf16 %v7191_v18, %v7185_v10 }
 0x2f8   : > { %3764 = vst [vmem:[%s6142_s20 + $0x128] sm:$0xff] %v4121_v48  ;;  %v4133_v6 = vpack.c.bf16 %v7203_v35, %v7197_v42  ;;  %3765 = vst [vmem:[%s6142_s20 + $0x130] sm:$0xff] %v4122_v57  ;;  %v4134_v61 = vpack.c.bf16 %v7215_v21, %v7209_v24  ;;  %v4135_v15 = vpack.c.bf16 %v7227_v2, %v7221_v50  ;;  %v8357_v35 = vld [vmem:[#allocation10_spill] sm:$0xff]  ;;  %v8358_v21 = vld [vmem:[#allocation11_spill] sm:$0xff] }
 0x2f9   : > { %3766 = vst [vmem:[%s6142_s20 + $0x138] sm:$0xff] %v4123_v7  ;;  %3767 = vst [vmem:[%s6142_s20 + $0x140] sm:$0xff] %v4124_v27  ;;  %v4136_v13 = vpack.c.bf16 %v7239_v37, %v7233_v55  ;;  %v4137_v49 = vpack.c.bf16 %v7251_v53, %v7245_v14  ;;  %v4138_v26 = vpack.c.bf16 %v7263_v11, %v7257_v28  ;;  %v8359_v50 = vld [vmem:[#allocation12_spill] sm:$0xff] }
 0x2fa   : > { %3768 = vst [vmem:[%s6142_s20 + $0x148] sm:$0xff] %v4125_v40  ;;  %3769 = vst [vmem:[%s6142_s20 + $0x150] sm:$0xff] %v4126_v62  ;;  %v4139_v12 = vpack.c.bf16 %v7275_v39, %v7269_v63  ;;  %v4140_v41 = vpack.c.bf16 %v7287_v29, %v7281_v58  ;;  %v4141_v33 = vpack.c.bf16 %v7299_v34, %v7293_v4  ;;  %v8356_v42 = vld [vmem:[#allocation9_spill] sm:$0xff] }
 0x2fb   : > { %3770 = vst [vmem:[%s6142_s20 + $0x158] sm:$0xff] %v4127_v47  ;;  %3771 = vst [vmem:[%s6142_s20 + $0x160] sm:$0xff] %v4128_v3  ;;  %v4142_v51 = vpack.c.bf16 %v7311_v22, %v7305_v0  ;;  %v4143_v25 = vpack.c.bf16 %v7321_v52, %v7316_v56  ;;  %v4144_v10 = vpack.c.bf16 %v7331_v16, %v7326_v46 }
 0x2fc   : > { %3772 = vst [vmem:[%s6142_s20 + $0x168] sm:$0xff] %v4129_v19  ;;  %3773 = vst [vmem:[%s6142_s20 + $0x170] sm:$0xff] %v4130_v59  ;;  %v4145_v18 = vpack.c.bf16 %v7341_v9, %v7336_v23  ;;  %v4146_v24 = vpack.c.bf16 %v8357_v35, %v8356_v42  ;;  %v4147_v2 = vpack.c.bf16 %v8359_v50, %v8358_v21 }
 0x2fd   : > { %3774 = vst [vmem:[%s6142_s20 + $0x178] sm:$0xff] %v4131_v45  ;;  %3775 = vst [vmem:[%s6142_s20 + $0x180] sm:$0xff] %v4132_v44 }
 0x2fe   : > { %3776 = vst [vmem:[%s6142_s20 + $0x188] sm:$0xff] %v4133_v6  ;;  %3777 = vst [vmem:[%s6142_s20 + $0x190] sm:$0xff] %v4134_v61 }
 0x2ff   : > { %3778 = vst [vmem:[%s6142_s20 + $0x198] sm:$0xff] %v4135_v15  ;;  %3779 = vst [vmem:[%s6142_s20 + $0x1a0] sm:$0xff] %v4136_v13 }
 0x300   : > { %3780 = vst [vmem:[%s6142_s20 + $0x1a8] sm:$0xff] %v4137_v49  ;;  %3781 = vst [vmem:[%s6142_s20 + $0x1b0] sm:$0xff] %v4138_v26 }
 0x301   : > { %3782 = vst [vmem:[%s6142_s20 + $0x1b8] sm:$0xff] %v4139_v12  ;;  %3783 = vst [vmem:[%s6142_s20 + $0x1c0] sm:$0xff] %v4140_v41 }
 0x302   : > { %3784 = vst [vmem:[%s6142_s20 + $0x1c8] sm:$0xff] %v4141_v33  ;;  %3785 = vst [vmem:[%s6142_s20 + $0x1d0] sm:$0xff] %v4142_v51 }
 0x303   : > { %3786 = vst [vmem:[%s6142_s20 + $0x1d8] sm:$0xff] %v4143_v25  ;;  %3787 = vst [vmem:[%s6142_s20 + $0x1e0] sm:$0xff] %v4144_v10 }
 0x304   : > { %3788 = vst [vmem:[%s6142_s20 + $0x1e8] sm:$0xff] %v4145_v18  ;;  %3789 = vst [vmem:[%s6142_s20 + $0x1f0] sm:$0xff] %v4146_v24 }
 0x305   : > { %3790 = vst [vmem:[%s6142_s20 + $0x1f8] sm:$0xff] %v4147_v2 }
 0x306 PF: > { %s12_s9 = sadd.s32 1, %s4168_s9  }
 0x307   : > { %p9_p4 = scmp.ge.s32.totalorder %s12_s9, 4  }
 0x309   :  { %11 = sbr.rel (!%p9_p4) target bundleno = 1 (0x1), region = 58 }

// kernel: discriminator_forward.6
= control target key start
LH: loop header
LB: loop body
LE: loop exit
PB: predicated region body
PF: predicated region fallthrough
CT: control target
= control target key end

     0   :  { %s2737_s9 = smov 0   ;;  %s3391_s0 = inlined_call_operand.vmem [shape: bf16[2,432,1024], index: 0, kind: input, shape index: {}]   ;;  %s3392_s1 = inlined_call_operand.vmem [shape: bf16[32,432], index: 1, kind: input, shape index: {}]   ;;  %s3393_s2 = inlined_call_operand.vmem [shape: bf16[2,32,1024], index: 2, kind: output, shape index: {}]  }
   0x1 LB: > { %s2378_s10 = sadd.s32 4294967295, %s2720_s9   ;;  %p2382_p0 = scmp.ge.s32.totalorder %s2720_s9, 1  ;;  %s2720_s9 = sphi %s2737_s9, %s12_s9  }
   0x2   : > { %p112_p1 = scmp.lt.s32.totalorder %s2720_s9, 3 }
   0x4   : > { %p113_p2 = pnand %p2382_p0, %p112_p1 }
   0x5   : > { %p134_p3 = scmp.lt.s32.totalorder (!%p113_p2), %s2378_s10, 1  ;;  %v2748_v0 = vld [vmem:[%s3392_s1 + $0x4] ss:$16 sps:$4 sm:$0xff] (!%p113_p2)   ;;  %vm1487_vm0 = vcmask (!%p113_p2), 392192  }
   0x6   : > { %116 = sbr.rel (%p113_p2) target bundleno = 669 (0x29d), region = 28  ;;  %1526 = vmatprep.mubr.bf16.mxu0 (!%p113_p2), %v2748_v0  ;;  %1632 = vmatprep.mubr.bf16.mxu1 (!%p113_p2), %v2748_v0 }
   0xd   : > { %s3399_s10 = smov (!%p134_p3, %s2378_s10), 1 }
   0xe   : > { %s2685_s13 = smul.u32 1728, %s3399_s10  ;;  %s2636_s3 = sshll.u32 %s3399_s10, 7 }
   0xf   : > { %s3281_s6 = scalar_lea.vmem %s3393_s2, %s2636_s3 }
  0x10   : > { %s2758_s16 = scalar_lea.vmem %s3391_s0, %s2685_s13 }
  0x11   : > { %v153_v1 = vld [vmem:[%s2758_s16] sm:$0xff]  ;;  %v154_v3 = vld [vmem:[%s2758_s16 + $0x8] sm:$0xff] }
  0x12   : > { %v157_v2 = vld [vmem:[%s2758_s16 + $0x20] sm:$0xff]  ;;  %v158_v5 = vld [vmem:[%s2758_s16 + $0x28] sm:$0xff] }
  0x13   : > { %v2395_v4 = vcombine.high %v153_v1, %v157_v2  ;;  %v2394_v6 = vcombine.low %v153_v1, %v157_v2  ;;  %v161_v7 = vld [vmem:[%s2758_s16 + $0x40] sm:$0xff]  ;;  %v2397_v9 = vcombine.high %v154_v3, %v158_v5  ;;  %v2396_v10 = vcombine.low %v154_v3, %v158_v5  ;;  %v162_v12 = vld [vmem:[%s2758_s16 + $0x48] sm:$0xff] }
  0x14   : > { %v165_v8 = vld [vmem:[%s2758_s16 + $0x60] sm:$0xff]  ;;  %v166_v13 = vld [vmem:[%s2758_s16 + $0x68] sm:$0xff] }
  0x15   : > { %v2403_v11 = vcombine.high %v161_v7, %v165_v8  ;;  %v169_v14 = vld [vmem:[%s2758_s16 + $0x80] sm:$0xff]  ;;  %1494 = vmatprep.subr.bf16.mxu0 %v2395_v4  ;;  %v2405_v15 = vcombine.high %v162_v12, %v166_v13  ;;  %v170_v17 = vld [vmem:[%s2758_s16 + $0x88] sm:$0xff]  ;;  %1600 = vmatprep.subr.bf16.mxu1 %v2397_v9  ;;  %v2402_v19 = vcombine.low %v161_v7, %v165_v8 }
  0x16   : > { %v173_v16 = vld [vmem:[%s2758_s16 + $0xa0] sm:$0xff]  ;;  %v174_v18 = vld [vmem:[%s2758_s16 + $0xa8] sm:$0xff]  ;;  %1495 = vmatpush1.bf16.msra.mxu0 %v2394_v6  ;;  %1601 = vmatpush1.bf16.msra.mxu1 %v2396_v10  ;;  %v2404_v20 = vcombine.low %v162_v12, %v166_v13 }
  0x17   : > { %1496 = vmatprep.subr.bf16.mxu0 %v2403_v11  ;;  %v2411_v21 = vcombine.high %v169_v14, %v173_v16  ;;  %1602 = vmatprep.subr.bf16.mxu1 %v2405_v15  ;;  %v2413_v22 = vcombine.high %v170_v17, %v174_v18  ;;  %v177_v23 = vld [vmem:[%s2758_s16 + $0xc0] sm:$0xff]  ;;  %v178_v25 = vld [vmem:[%s2758_s16 + $0xc8] sm:$0xff]  ;;  %v2410_v27 = vcombine.low %v169_v14, %v173_v16 }
  0x18   : > { %v181_v24 = vld [vmem:[%s2758_s16 + $0xe0] sm:$0xff]  ;;  %v182_v26 = vld [vmem:[%s2758_s16 + $0xe8] sm:$0xff]  ;;  %v2412_v28 = vcombine.low %v170_v17, %v174_v18 }
  0x19   : > { %v2419_v29 = vcombine.high %v177_v23, %v181_v24  ;;  %v2421_v30 = vcombine.high %v178_v25, %v182_v26  ;;  %v185_v31 = vld [vmem:[%s2758_s16 + $0x100] sm:$0xff]  ;;  %v186_v33 = vld [vmem:[%s2758_s16 + $0x108] sm:$0xff]  ;;  %v2418_v35 = vcombine.low %v177_v23, %v181_v24  ;;  %v2420_v36 = vcombine.low %v178_v25, %v182_v26 }
  0x1a   : > { %1497 = vmatpush1.bf16.msra.mxu0 %v2402_v19  ;;  %1603 = vmatpush1.bf16.msra.mxu1 %v2404_v20  ;;  %v189_v32 = vld [vmem:[%s2758_s16 + $0x120] sm:$0xff]  ;;  %v190_v34 = vld [vmem:[%s2758_s16 + $0x128] sm:$0xff] }
  0x1b   : > { %1498 = vmatprep.subr.bf16.mxu0 %v2411_v21  ;;  %1604 = vmatprep.subr.bf16.mxu1 %v2413_v22  ;;  %v2427_v37 = vcombine.high %v185_v31, %v189_v32  ;;  %v2429_v38 = vcombine.high %v186_v33, %v190_v34  ;;  %v193_v39 = vld [vmem:[%s2758_s16 + $0x140] sm:$0xff]  ;;  %v194_v41 = vld [vmem:[%s2758_s16 + $0x148] sm:$0xff]  ;;  %v2426_v43 = vcombine.low %v185_v31, %v189_v32 }
  0x1c   : > { %v197_v40 = vld [vmem:[%s2758_s16 + $0x160] sm:$0xff]  ;;  %v198_v42 = vld [vmem:[%s2758_s16 + $0x168] sm:$0xff]  ;;  %v2428_v44 = vcombine.low %v186_v33, %v190_v34 }
  0x1d   : > { %v2435_v45 = vcombine.high %v193_v39, %v197_v40  ;;  %v2437_v46 = vcombine.high %v194_v41, %v198_v42  ;;  %v201_v47 = vld [vmem:[%s2758_s16 + $0x180] sm:$0xff]  ;;  %v202_v49 = vld [vmem:[%s2758_s16 + $0x188] sm:$0xff]  ;;  %v2434_v51 = vcombine.low %v193_v39, %v197_v40  ;;  %v2436_v52 = vcombine.low %v194_v41, %v198_v42 }
  0x1e   : > { %1499 = vmatpush1.bf16.msra.mxu0 %v2410_v27  ;;  %1605 = vmatpush1.bf16.msra.mxu1 %v2412_v28  ;;  %v205_v48 = vld [vmem:[%s2758_s16 + $0x1a0] sm:$0xff]  ;;  %v206_v50 = vld [vmem:[%s2758_s16 + $0x1a8] sm:$0xff] }
  0x1f   : > { %1500 = vmatprep.subr.bf16.mxu0 %v2419_v29  ;;  %1606 = vmatprep.subr.bf16.mxu1 %v2421_v30  ;;  %v2443_v53 = vcombine.high %v201_v47, %v205_v48  ;;  %v2445_v54 = vcombine.high %v202_v49, %v206_v50  ;;  %v209_v55 = vld [vmem:[%s2758_s16 + $0x1c0] sm:$0xff]  ;;  %v210_v57 = vld [vmem:[%s2758_s16 + $0x1c8] sm:$0xff]  ;;  %v2442_v59 = vcombine.low %v201_v47, %v205_v48 }
  0x20   : > { %v213_v56 = vld [vmem:[%s2758_s16 + $0x1e0] sm:$0xff]  ;;  %v214_v58 = vld [vmem:[%s2758_s16 + $0x1e8] sm:$0xff]  ;;  %v2444_v60 = vcombine.low %v202_v49, %v206_v50 }
  0x21   : > { %v2451_v61 = vcombine.high %v209_v55, %v213_v56  ;;  %v2453_v62 = vcombine.high %v210_v57, %v214_v58  ;;  %v217_v63 = vld [vmem:[%s2758_s16 + $0x200] sm:$0xff]  ;;  %v218_v2 = vld [vmem:[%s2758_s16 + $0x208] sm:$0xff]  ;;  %v2450_v4 = vcombine.low %v209_v55, %v213_v56  ;;  %v2452_v5 = vcombine.low %v210_v57, %v214_v58 }
  0x22   : > { %1501 = vmatpush1.bf16.msra.mxu0 %v2418_v35  ;;  %1607 = vmatpush1.bf16.msra.mxu1 %v2420_v36  ;;  %v221_v1 = vld [vmem:[%s2758_s16 + $0x220] sm:$0xff]  ;;  %v222_v3 = vld [vmem:[%s2758_s16 + $0x228] sm:$0xff] }
  0x23   : > { %1502 = vmatprep.subr.bf16.mxu0 %v2427_v37  ;;  %1608 = vmatprep.subr.bf16.mxu1 %v2429_v38  ;;  %v2459_v6 = vcombine.high %v217_v63, %v221_v1  ;;  %v2461_v7 = vcombine.high %v218_v2, %v222_v3  ;;  %v225_v8 = vld [vmem:[%s2758_s16 + $0x240] sm:$0xff]  ;;  %v226_v10 = vld [vmem:[%s2758_s16 + $0x248] sm:$0xff]  ;;  %v2458_v12 = vcombine.low %v217_v63, %v221_v1 }
  0x24   : > { %v229_v9 = vld [vmem:[%s2758_s16 + $0x260] sm:$0xff]  ;;  %v230_v11 = vld [vmem:[%s2758_s16 + $0x268] sm:$0xff]  ;;  %v2460_v13 = vcombine.low %v218_v2, %v222_v3 }
  0x25   : > { %v2467_v14 = vcombine.high %v225_v8, %v229_v9  ;;  %v2469_v15 = vcombine.high %v226_v10, %v230_v11  ;;  %v233_v16 = vld [vmem:[%s2758_s16 + $0x280] sm:$0xff]  ;;  %v234_v18 = vld [vmem:[%s2758_s16 + $0x288] sm:$0xff]  ;;  %v2466_v20 = vcombine.low %v225_v8, %v229_v9  ;;  %v2468_v21 = vcombine.low %v226_v10, %v230_v11 }
  0x26   : > { %1503 = vmatpush1.bf16.msra.mxu0 %v2426_v43  ;;  %1609 = vmatpush1.bf16.msra.mxu1 %v2428_v44  ;;  %v237_v17 = vld [vmem:[%s2758_s16 + $0x2a0] sm:$0xff]  ;;  %v238_v19 = vld [vmem:[%s2758_s16 + $0x2a8] sm:$0xff] }
  0x27   : > { %1504 = vmatprep.subr.bf16.mxu0 %v2435_v45  ;;  %1610 = vmatprep.subr.bf16.mxu1 %v2437_v46  ;;  %v2475_v22 = vcombine.high %v233_v16, %v237_v17  ;;  %v2477_v23 = vcombine.high %v234_v18, %v238_v19  ;;  %v241_v24 = vld [vmem:[%s2758_s16 + $0x2c0] sm:$0xff]  ;;  %v242_v26 = vld [vmem:[%s2758_s16 + $0x2c8] sm:$0xff]  ;;  %v2474_v28 = vcombine.low %v233_v16, %v237_v17 }
  0x28   : > { %v245_v25 = vld [vmem:[%s2758_s16 + $0x2e0] sm:$0xff]  ;;  %v246_v27 = vld [vmem:[%s2758_s16 + $0x2e8] sm:$0xff]  ;;  %v2476_v29 = vcombine.low %v234_v18, %v238_v19 }
  0x29   : > { %v2483_v30 = vcombine.high %v241_v24, %v245_v25  ;;  %v2485_v31 = vcombine.high %v242_v26, %v246_v27  ;;  %v249_v32 = vld [vmem:[%s2758_s16 + $0x300] sm:$0xff]  ;;  %v250_v34 = vld [vmem:[%s2758_s16 + $0x308] sm:$0xff]  ;;  %v2482_v36 = vcombine.low %v241_v24, %v245_v25  ;;  %v2484_v37 = vcombine.low %v242_v26, %v246_v27 }
  0x2a   : > { %1505 = vmatpush1.bf16.msra.mxu0 %v2434_v51  ;;  %1611 = vmatpush1.bf16.msra.mxu1 %v2436_v52  ;;  %v253_v33 = vld [vmem:[%s2758_s16 + $0x320] sm:$0xff]  ;;  %v254_v35 = vld [vmem:[%s2758_s16 + $0x328] sm:$0xff] }
  0x2b   : > { %1506 = vmatprep.subr.bf16.mxu0 %v2443_v53  ;;  %1612 = vmatprep.subr.bf16.mxu1 %v2445_v54  ;;  %v2491_v38 = vcombine.high %v249_v32, %v253_v33  ;;  %v2493_v39 = vcombine.high %v250_v34, %v254_v35  ;;  %v257_v40 = vld [vmem:[%s2758_s16 + $0x340] sm:$0xff]  ;;  %v258_v42 = vld [vmem:[%s2758_s16 + $0x348] sm:$0xff]  ;;  %v2490_v44 = vcombine.low %v249_v32, %v253_v33 }
  0x2c   : > { %v261_v41 = vld [vmem:[%s2758_s16 + $0x360] sm:$0xff]  ;;  %v262_v43 = vld [vmem:[%s2758_s16 + $0x368] sm:$0xff]  ;;  %v2492_v45 = vcombine.low %v250_v34, %v254_v35 }
  0x2d   : > { %v2499_v46 = vcombine.high %v257_v40, %v261_v41  ;;  %v2501_v47 = vcombine.high %v258_v42, %v262_v43  ;;  %v265_v48 = vld [vmem:[%s2758_s16 + $0x380] sm:$0xff]  ;;  %v266_v50 = vld [vmem:[%s2758_s16 + $0x388] sm:$0xff]  ;;  %v2498_v52 = vcombine.low %v257_v40, %v261_v41  ;;  %v2500_v53 = vcombine.low %v258_v42, %v262_v43 }
  0x2e   : > { %1507 = vmatpush1.bf16.msra.mxu0 %v2442_v59  ;;  %1613 = vmatpush1.bf16.msra.mxu1 %v2444_v60  ;;  %v269_v49 = vld [vmem:[%s2758_s16 + $0x3a0] sm:$0xff]  ;;  %v270_v51 = vld [vmem:[%s2758_s16 + $0x3a8] sm:$0xff] }
  0x2f   : > { %1508 = vmatprep.subr.bf16.mxu0 %v2451_v61  ;;  %1614 = vmatprep.subr.bf16.mxu1 %v2453_v62  ;;  %v2507_v54 = vcombine.high %v265_v48, %v269_v49  ;;  %v2509_v55 = vcombine.high %v266_v50, %v270_v51  ;;  %v273_v56 = vld [vmem:[%s2758_s16 + $0x3c0] sm:$0xff]  ;;  %v274_v58 = vld [vmem:[%s2758_s16 + $0x3c8] sm:$0xff]  ;;  %v2506_v60 = vcombine.low %v265_v48, %v269_v49 }
  0x30   : > { %v277_v57 = vld [vmem:[%s2758_s16 + $0x3e0] sm:$0xff]  ;;  %v278_v59 = vld [vmem:[%s2758_s16 + $0x3e8] sm:$0xff]  ;;  %v2508_v61 = vcombine.low %v266_v50, %v270_v51 }
  0x31   : > { %v2515_v62 = vcombine.high %v273_v56, %v277_v57  ;;  %v2517_v63 = vcombine.high %v274_v58, %v278_v59  ;;  %v281_v1 = vld [vmem:[%s2758_s16 + $0x400] sm:$0xff]  ;;  %v282_v3 = vld [vmem:[%s2758_s16 + $0x408] sm:$0xff] }
  0x32   : > { %1509 = vmatpush1.bf16.msra.mxu0 %v2450_v4  ;;  %1615 = vmatpush1.bf16.msra.mxu1 %v2452_v5  ;;  %v285_v2 = vld [vmem:[%s2758_s16 + $0x420] sm:$0xff]  ;;  %v286_v4 = vld [vmem:[%s2758_s16 + $0x428] sm:$0xff]  ;;  %v2514_v5 = vcombine.low %v273_v56, %v277_v57 }
  0x33   : > { %1510 = vmatprep.subr.bf16.mxu0 %v2459_v6  ;;  %1616 = vmatprep.subr.bf16.mxu1 %v2461_v7  ;;  %v2516_v6 = vcombine.low %v274_v58, %v278_v59  ;;  %v2523_v7 = vcombine.high %v281_v1, %v285_v2  ;;  %v2525_v8 = vcombine.high %v282_v3, %v286_v4  ;;  %v289_v9 = vld [vmem:[%s2758_s16 + $0x440] sm:$0xff]  ;;  %v318_v40 = vld [vmem:[%s2758_s16 + $0x528] sm:$0xff] }
  0x34   : > { %v293_v10 = vld [vmem:[%s2758_s16 + $0x460] sm:$0xff]  ;;  %v326_v48 = vld [vmem:[%s2758_s16 + $0x568] sm:$0xff] }
  0x35   : > { %v2833_v11 = vld [vmem:[%s3392_s1] ss:$16 sps:$4 sm:$0xff]   ;;  %v2531_v16 = vcombine.high %v289_v9, %v293_v10  ;;  %v334_v56 = vld [vmem:[%s2758_s16 + $0x5a8] sm:$0xff] }
  0x36   : > { %1511 = vmatpush1.bf16.msra.mxu0 %v2458_v12  ;;  %1617 = vmatpush1.bf16.msra.mxu1 %v2460_v13  ;;  %v290_v12 = vld [vmem:[%s2758_s16 + $0x448] sm:$0xff]  ;;  %v297_v18 = vld [vmem:[%s2758_s16 + $0x480] sm:$0xff] }
  0x37   : > { %1512 = vmatprep.subr.bf16.mxu0 %v2467_v14  ;;  %1618 = vmatprep.subr.bf16.mxu1 %v2469_v15  ;;  %v294_v13 = vld [vmem:[%s2758_s16 + $0x468] sm:$0xff]  ;;  %v2522_v14 = vcombine.low %v281_v1, %v285_v2  ;;  %v2524_v15 = vcombine.low %v282_v3, %v286_v4  ;;  %v301_v19 = vld [vmem:[%s2758_s16 + $0x4a0] sm:$0xff] }
  0x38   : > { %v2533_v17 = vcombine.high %v290_v12, %v294_v13  ;;  %v2532_v24 = vcombine.low %v290_v12, %v294_v13  ;;  %v2539_v25 = vcombine.high %v297_v18, %v301_v19  ;;  %v305_v27 = vld [vmem:[%s2758_s16 + $0x4c0] sm:$0xff]  ;;  %v2538_v32 = vcombine.low %v297_v18, %v301_v19  ;;  %v342_v1 = vld [vmem:[%s2758_s16 + $0x5e8] sm:$0xff] }
  0x39   : > { %v358_v18 = vld [vmem:[%s2758_s16 + $0x668] sm:$0xff] }
  0x3a   : > { %1513 = vmatpush1.bf16.msra.mxu0 %v2466_v20  ;;  %1619 = vmatpush1.bf16.msra.mxu1 %v2468_v21  ;;  %v2842_v20 = vld [vmem:[%s3392_s1 + $0x24] ss:$16 sps:$4 sm:$0xff]   ;;  %v298_v21 = vld [vmem:[%s2758_s16 + $0x488] sm:$0xff] }
  0x3b   : > { %1514 = vmatprep.subr.bf16.mxu0 %v2475_v22  ;;  %1620 = vmatprep.subr.bf16.mxu1 %v2477_v23  ;;  %v302_v22 = vld [vmem:[%s2758_s16 + $0x4a8] sm:$0xff]  ;;  %v2530_v23 = vcombine.low %v289_v9, %v293_v10 }
  0x3c   : > { %v2541_v26 = vcombine.high %v298_v21, %v302_v22  ;;  %v2540_v33 = vcombine.low %v298_v21, %v302_v22  ;;  %v350_v9 = vld [vmem:[%s2758_s16 + $0x628] sm:$0xff] }
  0x3e   : > { %1515 = vmatpush1.bf16.msra.mxu0 %v2474_v28  ;;  %1621 = vmatpush1.bf16.msra.mxu1 %v2476_v29  ;;  %v309_v28 = vld [vmem:[%s2758_s16 + $0x4e0] sm:$0xff]  ;;  %v306_v29 = vld [vmem:[%s2758_s16 + $0x4c8] sm:$0xff] }
  0x3f   : > { %1516 = vmatprep.subr.bf16.mxu0 %v2483_v30  ;;  %1622 = vmatprep.subr.bf16.mxu1 %v2485_v31  ;;  %v310_v30 = vld [vmem:[%s2758_s16 + $0x4e8] sm:$0xff]  ;;  %v2857_v31 = vld [vmem:[%s3392_s1 + $0x20] ss:$16 sps:$4 sm:$0xff]   ;;  %v2547_v34 = vcombine.high %v305_v27, %v309_v28  ;;  %v2546_v41 = vcombine.low %v305_v27, %v309_v28 }
  0x40   : > { %v2549_v35 = vcombine.high %v306_v29, %v310_v30  ;;  %v2548_v42 = vcombine.low %v306_v29, %v310_v30  ;;  %v366_v27 = vld [vmem:[%s2758_s16 + $0x6a8] sm:$0xff] }
  0x42   : > { %1517 = vmatpush1.bf16.msra.mxu0 %v2482_v36  ;;  %1623 = vmatpush1.bf16.msra.mxu1 %v2484_v37  ;;  %v313_v36 = vld [vmem:[%s2758_s16 + $0x500] sm:$0xff] }
  0x43   : > { %1518 = vmatprep.subr.bf16.mxu0 %v2491_v38  ;;  %1624 = vmatprep.subr.bf16.mxu1 %v2493_v39  ;;  %v317_v37 = vld [vmem:[%s2758_s16 + $0x520] sm:$0xff]  ;;  %v2864_v38 = vld [vmem:[%s3392_s1 + $0xc] ss:$16 sps:$4 sm:$0xff]  }
  0x44   : > { %v314_v39 = vld [vmem:[%s2758_s16 + $0x508] sm:$0xff]  ;;  %v2555_v43 = vcombine.high %v313_v36, %v317_v37  ;;  %v2554_v49 = vcombine.low %v313_v36, %v317_v37  ;;  %v160_v36 = vld [vmem:[%s2758_s16 + $0x38] sm:$0xff] }
  0x45   : > { %v2556_v50 = vcombine.low %v314_v39, %v318_v40 }
  0x46   : > { %1519 = vmatpush1.bf16.msra.mxu0 %v2490_v44  ;;  %1625 = vmatpush1.bf16.msra.mxu1 %v2492_v45  ;;  %v2557_v44 = vcombine.high %v314_v39, %v318_v40  ;;  %v321_v45 = vld [vmem:[%s2758_s16 + $0x540] sm:$0xff] }
  0x47   : > { %1520 = vmatprep.subr.bf16.mxu0 %v2499_v46  ;;  %1626 = vmatprep.subr.bf16.mxu1 %v2501_v47  ;;  %v325_v46 = vld [vmem:[%s2758_s16 + $0x560] sm:$0xff]  ;;  %v322_v47 = vld [vmem:[%s2758_s16 + $0x548] sm:$0xff] }
  0x48   : > { %v2563_v51 = vcombine.high %v321_v45, %v325_v46  ;;  %v2562_v57 = vcombine.low %v321_v45, %v325_v46  ;;  %v2564_v58 = vcombine.low %v322_v47, %v326_v48  ;;  %v164_v45 = vld [vmem:[%s2758_s16 + $0x58] sm:$0xff] }
  0x49   : > { %v168_v46 = vld [vmem:[%s2758_s16 + $0x78] sm:$0xff] }
  0x4a   : > { %1521 = vmatpush1.bf16.msra.mxu0 %v2498_v52  ;;  %1627 = vmatpush1.bf16.msra.mxu1 %v2500_v53  ;;  %v2565_v52 = vcombine.high %v322_v47, %v326_v48  ;;  %v329_v53 = vld [vmem:[%s2758_s16 + $0x580] sm:$0xff] }
  0x4b   : > { %1522 = vmatprep.subr.bf16.mxu0 %v2507_v54  ;;  %1628 = vmatprep.subr.bf16.mxu1 %v2509_v55  ;;  %v333_v54 = vld [vmem:[%s2758_s16 + $0x5a0] sm:$0xff]  ;;  %v330_v55 = vld [vmem:[%s2758_s16 + $0x588] sm:$0xff] }
  0x4c   : > { %v2571_v59 = vcombine.high %v329_v53, %v333_v54  ;;  %v2570_v2 = vcombine.low %v329_v53, %v333_v54  ;;  %v2572_v3 = vcombine.low %v330_v55, %v334_v56  ;;  %v175_v53 = vld [vmem:[%s2758_s16 + $0xb0] sm:$0xff]  ;;  %v172_v54 = vld [vmem:[%s2758_s16 + $0x98] sm:$0xff] }
  0x4e   : > { %1523 = vmatpush1.bf16.msra.mxu0 %v2506_v60  ;;  %1629 = vmatpush1.bf16.msra.mxu1 %v2508_v61  ;;  %v2573_v60 = vcombine.high %v330_v55, %v334_v56  ;;  %v337_v61 = vld [vmem:[%s2758_s16 + $0x5c0] sm:$0xff]  ;;  %v176_v55 = vld [vmem:[%s2758_s16 + $0xb8] sm:$0xff] }
  0x4f   : > { %1524 = vmatprep.subr.bf16.mxu0 %v2515_v62  ;;  %1630 = vmatprep.subr.bf16.mxu1 %v2517_v63  ;;  %v341_v62 = vld [vmem:[%s2758_s16 + $0x5e0] sm:$0xff]  ;;  %v338_v63 = vld [vmem:[%s2758_s16 + $0x5c8] sm:$0xff] }
  0x50   : > { %v2579_v4 = vcombine.high %v337_v61, %v341_v62  ;;  %v2578_v10 = vcombine.low %v337_v61, %v341_v62  ;;  %v2580_v12 = vcombine.low %v338_v63, %v342_v1  ;;  %v183_v61 = vld [vmem:[%s2758_s16 + $0xf0] sm:$0xff]  ;;  %v2931_v62 = vld [vmem:[%s3392_s1 + $0x28] ss:$16 sps:$4 sm:$0xff]  }
  0x52   : > { %1525 = vmatpush1.bf16.msra.mxu0 %v2514_v5  ;;  %1631 = vmatpush1.bf16.msra.mxu1 %v2516_v6  ;;  %v2581_v5 = vcombine.high %v338_v63, %v342_v1  ;;  %v345_v6 = vld [vmem:[%s2758_s16 + $0x600] sm:$0xff]  ;;  %v180_v63 = vld [vmem:[%s2758_s16 + $0xd8] sm:$0xff] }
  0x53   : > { %1547 = vmatprep.subr.bf16.mxu0 %v2523_v7  ;;  %1653 = vmatprep.subr.bf16.mxu1 %v2525_v8  ;;  %v349_v7 = vld [vmem:[%s2758_s16 + $0x620] sm:$0xff]  ;;  %v346_v8 = vld [vmem:[%s2758_s16 + $0x608] sm:$0xff]  ;;  %v184_v1 = vld [vmem:[%s2758_s16 + $0xf8] sm:$0xff] }
  0x54   : > { %v2587_v13 = vcombine.high %v345_v6, %v349_v7  ;;  %v2586_v19 = vcombine.low %v345_v6, %v349_v7  ;;  %v2588_v21 = vcombine.low %v346_v8, %v350_v9  ;;  %v187_v6 = vld [vmem:[%s2758_s16 + $0x110] sm:$0xff] }
  0x55   : > { %1527 = vmatmul.mubr.bf16.vlgmr.msra.gmra.mrb[0].mxu0 %v2833_v11  ;;  %1633 = vmatmul.mubr.bf16.vlgmr.msra.gmra.mrb[0].mxu1 %v2833_v11  ;;  %v191_v7 = vld [vmem:[%s2758_s16 + $0x130] sm:$0xff] }
  0x56   : > { %1548 = vmatpush1.bf16.msra.mxu0 %v2522_v14  ;;  %1654 = vmatpush1.bf16.msra.mxu1 %v2524_v15  ;;  %v2589_v14 = vcombine.high %v346_v8, %v350_v9  ;;  %v353_v15 = vld [vmem:[%s2758_s16 + $0x640] sm:$0xff]  ;;  %v188_v8 = vld [vmem:[%s2758_s16 + $0x118] sm:$0xff] }
  0x57   : > { %1549 = vmatprep.subr.bf16.mxu0 %v2531_v16  ;;  %1655 = vmatprep.subr.bf16.mxu1 %v2533_v17  ;;  %v357_v16 = vld [vmem:[%s2758_s16 + $0x660] sm:$0xff]  ;;  %v354_v17 = vld [vmem:[%s2758_s16 + $0x648] sm:$0xff]  ;;  %v192_v9 = vld [vmem:[%s2758_s16 + $0x138] sm:$0xff] }
  0x58   : > { %1536 = vmatprep.mubr.bf16.mxu0 %v2842_v20  ;;  %1642 = vmatprep.mubr.bf16.mxu1 %v2842_v20  ;;  %v2595_v22 = vcombine.high %v353_v15, %v357_v16  ;;  %v2594_v28 = vcombine.low %v353_v15, %v357_v16  ;;  %v2596_v29 = vcombine.low %v354_v17, %v358_v18  ;;  %v195_v15 = vld [vmem:[%s2758_s16 + $0x150] sm:$0xff] }
  0x59   : > { %v199_v16 = vld [vmem:[%s2758_s16 + $0x170] sm:$0xff] }
  0x5a   : > { %1550 = vmatpush1.bf16.msra.mxu0 %v2530_v23  ;;  %1656 = vmatpush1.bf16.msra.mxu1 %v2532_v24  ;;  %v2597_v23 = vcombine.high %v354_v17, %v358_v18  ;;  %v361_v24 = vld [vmem:[%s2758_s16 + $0x680] sm:$0xff]  ;;  %v196_v17 = vld [vmem:[%s2758_s16 + $0x158] sm:$0xff] }
  0x5b   : > { %1551 = vmatprep.subr.bf16.mxu0 %v2539_v25  ;;  %1657 = vmatprep.subr.bf16.mxu1 %v2541_v26  ;;  %v365_v25 = vld [vmem:[%s2758_s16 + $0x6a0] sm:$0xff]  ;;  %v362_v26 = vld [vmem:[%s2758_s16 + $0x688] sm:$0xff]  ;;  %v200_v18 = vld [vmem:[%s2758_s16 + $0x178] sm:$0xff] }
  0x5c   : > { %v2603_v30 = vcombine.high %v361_v24, %v365_v25  ;;  %v2602_v37 = vcombine.low %v361_v24, %v365_v25  ;;  %v2604_v39 = vcombine.low %v362_v26, %v366_v27  ;;  %v203_v24 = vld [vmem:[%s2758_s16 + $0x190] sm:$0xff] }
  0x5d   : > { %1537 = vmatmul.mubr.bf16.gmra.mrb[4].mxu0 %v2857_v31  ;;  %1643 = vmatmul.mubr.bf16.gmra.mrb[4].mxu1 %v2857_v31  ;;  %v207_v25 = vld [vmem:[%s2758_s16 + $0x1b0] sm:$0xff] }
  0x5e   : > { %1552 = vmatpush1.bf16.msra.mxu0 %v2538_v32  ;;  %1658 = vmatpush1.bf16.msra.mxu1 %v2540_v33  ;;  %v2605_v32 = vcombine.high %v362_v26, %v366_v27  ;;  %v155_v33 = vld [vmem:[%s2758_s16 + $0x10] sm:$0xff]  ;;  %v204_v26 = vld [vmem:[%s2758_s16 + $0x198] sm:$0xff] }
  0x5f   : > { %1553 = vmatprep.subr.bf16.mxu0 %v2547_v34  ;;  %1659 = vmatprep.subr.bf16.mxu1 %v2549_v35  ;;  %v159_v34 = vld [vmem:[%s2758_s16 + $0x30] sm:$0xff]  ;;  %v156_v35 = vld [vmem:[%s2758_s16 + $0x18] sm:$0xff] }
  0x60   : > { %2610 = vmatprep.mubr.msk.bf16.mxu0 %vm1487_vm0, %v2864_v38  ;;  %2612 = vmatprep.mubr.msk.bf16.mxu1 %vm1487_vm0, %v2864_v38  ;;  %v2399_v40 = vcombine.high %v155_v33, %v159_v34  ;;  %v2398_v47 = vcombine.low %v155_v33, %v159_v34  ;;  %v2400_v48 = vcombine.low %v156_v35, %v160_v36  ;;  %v208_v27 = vld [vmem:[%s2758_s16 + $0x1b8] sm:$0xff]  ;;  %v215_v33 = vld [vmem:[%s2758_s16 + $0x1f0] sm:$0xff] }
  0x61   : > { %v212_v34 = vld [vmem:[%s2758_s16 + $0x1d8] sm:$0xff] }
  0x62   : > { %1554 = vmatpush1.bf16.msra.mxu0 %v2546_v41  ;;  %1660 = vmatpush1.bf16.msra.mxu1 %v2548_v42  ;;  %v2401_v41 = vcombine.high %v156_v35, %v160_v36  ;;  %v163_v42 = vld [vmem:[%s2758_s16 + $0x50] sm:$0xff]  ;;  %v216_v35 = vld [vmem:[%s2758_s16 + $0x1f8] sm:$0xff]  ;;  %v2446_v36 = vcombine.low %v203_v24, %v207_v25 }
  0x63   : > { %1555 = vmatprep.subr.bf16.mxu0 %v2555_v43  ;;  %1661 = vmatprep.subr.bf16.mxu1 %v2557_v44  ;;  %v167_v43 = vld [vmem:[%s2758_s16 + $0x70] sm:$0xff]  ;;  %v2907_v44 = vld [vmem:[%s3392_s1 + $0x8] ss:$16 sps:$4 sm:$0xff]  }
  0x64   : > { %v2406_v56 = vcombine.low %v163_v42, %v167_v43 }
  0x66   : > { %1556 = vmatpush1.bf16.msra.mxu0 %v2554_v49  ;;  %1662 = vmatpush1.bf16.msra.mxu1 %v2556_v50  ;;  %v2407_v49 = vcombine.high %v163_v42, %v167_v43  ;;  %v2409_v50 = vcombine.high %v164_v45, %v168_v46  ;;  %v223_v42 = vld [vmem:[%s2758_s16 + $0x230] sm:$0xff]  ;;  %v220_v43 = vld [vmem:[%s2758_s16 + $0x218] sm:$0xff] }
  0x67   : > { %1557 = vmatprep.subr.bf16.mxu0 %v2563_v51  ;;  %1663 = vmatprep.subr.bf16.mxu1 %v2565_v52  ;;  %v2914_v51 = vld [vmem:[%s3392_s1 + $0x2c] ss:$16 sps:$4 sm:$0xff]   ;;  %v171_v52 = vld [vmem:[%s2758_s16 + $0x90] sm:$0xff] }
  0x6a   : > { %1558 = vmatpush1.bf16.msra.mxu0 %v2562_v57  ;;  %1664 = vmatpush1.bf16.msra.mxu1 %v2564_v58  ;;  %v2408_v57 = vcombine.low %v164_v45, %v168_v46  ;;  %v2415_v58 = vcombine.high %v171_v52, %v175_v53  ;;  %v224_v45 = vld [vmem:[%s2758_s16 + $0x238] sm:$0xff] }
  0x6b   : > { %1559 = vmatprep.subr.bf16.mxu0 %v2571_v59  ;;  %1665 = vmatprep.subr.bf16.mxu1 %v2573_v60  ;;  %v2417_v59 = vcombine.high %v172_v54, %v176_v55  ;;  %v179_v60 = vld [vmem:[%s2758_s16 + $0xd0] sm:$0xff] }
  0x6e   : > { %1560 = vmatpush1.bf16.msra.mxu0 %v2570_v2  ;;  %1666 = vmatpush1.bf16.msra.mxu1 %v2572_v3  ;;  %v2414_v2 = vcombine.low %v171_v52, %v175_v53  ;;  %v2416_v3 = vcombine.low %v172_v54, %v176_v55  ;;  %v231_v52 = vld [vmem:[%s2758_s16 + $0x270] sm:$0xff]  ;;  %v228_v53 = vld [vmem:[%s2758_s16 + $0x258] sm:$0xff] }
  0x6f   : > { %1561 = vmatprep.subr.bf16.mxu0 %v2579_v4  ;;  %1667 = vmatprep.subr.bf16.mxu1 %v2581_v5  ;;  %v2423_v4 = vcombine.high %v179_v60, %v183_v61  ;;  %v2425_v5 = vcombine.high %v180_v63, %v184_v1  ;;  %v232_v54 = vld [vmem:[%s2758_s16 + $0x278] sm:$0xff] }
  0x72   : > { %1562 = vmatpush1.bf16.msra.mxu0 %v2578_v10  ;;  %1668 = vmatpush1.bf16.msra.mxu1 %v2580_v12  ;;  %v2422_v10 = vcombine.low %v179_v60, %v183_v61  ;;  %v2424_v12 = vcombine.low %v180_v63, %v184_v1  ;;  %v239_v60 = vld [vmem:[%s2758_s16 + $0x2b0] sm:$0xff]  ;;  %v236_v61 = vld [vmem:[%s2758_s16 + $0x298] sm:$0xff] }
  0x73   : > { %1563 = vmatprep.subr.bf16.mxu0 %v2587_v13  ;;  %1669 = vmatprep.subr.bf16.mxu1 %v2589_v14  ;;  %v2431_v13 = vcombine.high %v187_v6, %v191_v7  ;;  %v2433_v14 = vcombine.high %v188_v8, %v192_v9  ;;  %v240_v63 = vld [vmem:[%s2758_s16 + $0x2b8] sm:$0xff] }
  0x76   : > { %1564 = vmatpush1.bf16.msra.mxu0 %v2586_v19  ;;  %1670 = vmatpush1.bf16.msra.mxu1 %v2588_v21  ;;  %v2430_v19 = vcombine.low %v187_v6, %v191_v7  ;;  %v2432_v21 = vcombine.low %v188_v8, %v192_v9  ;;  %v247_v6 = vld [vmem:[%s2758_s16 + $0x2f0] sm:$0xff]  ;;  %v244_v7 = vld [vmem:[%s2758_s16 + $0x2d8] sm:$0xff] }
  0x77   : > { %1565 = vmatprep.subr.bf16.mxu0 %v2595_v22  ;;  %1671 = vmatprep.subr.bf16.mxu1 %v2597_v23  ;;  %v2439_v22 = vcombine.high %v195_v15, %v199_v16  ;;  %v2441_v23 = vcombine.high %v196_v17, %v200_v18  ;;  %v248_v8 = vld [vmem:[%s2758_s16 + $0x2f8] sm:$0xff] }
  0x7a   : > { %1566 = vmatpush1.bf16.msra.mxu0 %v2594_v28  ;;  %1672 = vmatpush1.bf16.msra.mxu1 %v2596_v29  ;;  %v2438_v28 = vcombine.low %v195_v15, %v199_v16  ;;  %v2447_v29 = vcombine.high %v203_v24, %v207_v25  ;;  %v255_v15 = vld [vmem:[%s2758_s16 + $0x330] sm:$0xff]  ;;  %v252_v16 = vld [vmem:[%s2758_s16 + $0x318] sm:$0xff] }
  0x7b   : > { %1567 = vmatprep.subr.bf16.mxu0 %v2603_v30  ;;  %1673 = vmatprep.subr.bf16.mxu1 %v2605_v32  ;;  %v2449_v30 = vcombine.high %v204_v26, %v208_v27  ;;  %v211_v32 = vld [vmem:[%s2758_s16 + $0x1d0] sm:$0xff]  ;;  %v260_v25 = vld [vmem:[%s2758_s16 + $0x358] sm:$0xff] }
  0x7c   : > { %v2454_v46 = vcombine.low %v211_v32, %v215_v33  ;;  %v263_v24 = vld [vmem:[%s2758_s16 + $0x370] sm:$0xff] }
  0x7e   : > { %1568 = vmatpush1.bf16.msra.mxu0 %v2602_v37  ;;  %1674 = vmatpush1.bf16.msra.mxu1 %v2604_v39  ;;  %v2448_v37 = vcombine.low %v204_v26, %v208_v27  ;;  %v2455_v39 = vcombine.high %v211_v32, %v215_v33  ;;  %v264_v26 = vld [vmem:[%s2758_s16 + $0x378] sm:$0xff]  ;;  %v271_v32 = vld [vmem:[%s2758_s16 + $0x3b0] sm:$0xff] }
  0x7f   : > { %1706 = vmatprep.subr.bf16.mxu0 %v2399_v40  ;;  %1812 = vmatprep.subr.bf16.mxu1 %v2401_v41  ;;  %v2457_v40 = vcombine.high %v212_v34, %v216_v35  ;;  %v219_v41 = vld [vmem:[%s2758_s16 + $0x210] sm:$0xff]  ;;  %v268_v33 = vld [vmem:[%s2758_s16 + $0x398] sm:$0xff] }
  0x80   : > { %v2462_v55 = vcombine.low %v219_v41, %v223_v42 }
  0x81   : > { %1580 = vmatmul.mubr.bf16.vlgmr.msra.gmra.mrb[0].mxu0 %v2907_v44  ;;  %1686 = vmatmul.mubr.bf16.vlgmr.msra.gmra.mrb[0].mxu1 %v2907_v44 }
  0x82   : > { %1707 = vmatpush1.bf16.msra.mxu0 %v2398_v47  ;;  %1813 = vmatpush1.bf16.msra.mxu1 %v2400_v48  ;;  %v2456_v47 = vcombine.low %v212_v34, %v216_v35  ;;  %v2463_v48 = vcombine.high %v219_v41, %v223_v42  ;;  %v272_v34 = vld [vmem:[%s2758_s16 + $0x3b8] sm:$0xff]  ;;  %v279_v41 = vld [vmem:[%s2758_s16 + $0x3f0] sm:$0xff] }
  0x83   : > { %1708 = vmatprep.subr.bf16.mxu0 %v2407_v49  ;;  %1814 = vmatprep.subr.bf16.mxu1 %v2409_v50  ;;  %v2465_v49 = vcombine.high %v220_v43, %v224_v45  ;;  %v227_v50 = vld [vmem:[%s2758_s16 + $0x250] sm:$0xff]  ;;  %v276_v42 = vld [vmem:[%s2758_s16 + $0x3d8] sm:$0xff] }
  0x84   : > { %2611 = vmatprep.mubr.msk.bf16.mxu0 %vm1487_vm0, %v2914_v51  ;;  %2613 = vmatprep.mubr.msk.bf16.mxu1 %vm1487_vm0, %v2914_v51  ;;  %v2470_v1 = vcombine.low %v227_v50, %v231_v52 }
  0x86   : > { %1709 = vmatpush1.bf16.msra.mxu0 %v2406_v56  ;;  %1815 = vmatpush1.bf16.msra.mxu1 %v2408_v57  ;;  %v2464_v56 = vcombine.low %v220_v43, %v224_v45  ;;  %v2471_v57 = vcombine.high %v227_v50, %v231_v52  ;;  %v280_v43 = vld [vmem:[%s2758_s16 + $0x3f8] sm:$0xff]  ;;  %v287_v50 = vld [vmem:[%s2758_s16 + $0x430] sm:$0xff] }
  0x87   : > { %1710 = vmatprep.subr.bf16.mxu0 %v2415_v58  ;;  %1816 = vmatprep.subr.bf16.mxu1 %v2417_v59  ;;  %v2473_v58 = vcombine.high %v228_v53, %v232_v54  ;;  %v235_v59 = vld [vmem:[%s2758_s16 + $0x290] sm:$0xff]  ;;  %v284_v52 = vld [vmem:[%s2758_s16 + $0x418] sm:$0xff] }
  0x88   : > { %v2478_v9 = vcombine.low %v235_v59, %v239_v60 }
  0x89   : > { %1590 = vmatmul.mubr.bf16.gmra.mrb[4].mxu0 %v2931_v62  ;;  %1696 = vmatmul.mubr.bf16.gmra.mrb[4].mxu1 %v2931_v62 }
  0x8a   : > { %1711 = vmatpush1.bf16.msra.mxu0 %v2414_v2  ;;  %1817 = vmatpush1.bf16.msra.mxu1 %v2416_v3  ;;  %v2472_v2 = vcombine.low %v228_v53, %v232_v54  ;;  %v2479_v3 = vcombine.high %v235_v59, %v239_v60  ;;  %v288_v53 = vld [vmem:[%s2758_s16 + $0x438] sm:$0xff]  ;;  %v295_v59 = vld [vmem:[%s2758_s16 + $0x470] sm:$0xff] }
  0x8b   : > { %1712 = vmatprep.subr.bf16.mxu0 %v2423_v4  ;;  %1818 = vmatprep.subr.bf16.mxu1 %v2425_v5  ;;  %v2481_v4 = vcombine.high %v236_v61, %v240_v63  ;;  %v243_v5 = vld [vmem:[%s2758_s16 + $0x2d0] sm:$0xff]  ;;  %v292_v60 = vld [vmem:[%s2758_s16 + $0x458] sm:$0xff] }
  0x8c   : > { %1738 = vmatprep.mubr.bf16.mxu0 %v2748_v0  ;;  %1844 = vmatprep.mubr.bf16.mxu1 %v2748_v0  ;;  %v2440_v0 = vcombine.low %v196_v17, %v200_v18  ;;  %v256_v17 = vld [vmem:[%s2758_s16 + $0x338] sm:$0xff]  ;;  %v2486_v18 = vcombine.low %v243_v5, %v247_v6 }
  0x8e   : > { %1713 = vmatpush1.bf16.msra.mxu0 %v2422_v10  ;;  %1819 = vmatpush1.bf16.msra.mxu1 %v2424_v12  ;;  %v2480_v10 = vcombine.low %v236_v61, %v240_v63  ;;  %v2487_v12 = vcombine.high %v243_v5, %v247_v6  ;;  %v296_v61 = vld [vmem:[%s2758_s16 + $0x478] sm:$0xff]  ;;  %v303_v5 = vld [vmem:[%s2758_s16 + $0x4b0] sm:$0xff] }
  0x8f   : > { %1714 = vmatprep.subr.bf16.mxu0 %v2431_v13  ;;  %1820 = vmatprep.subr.bf16.mxu1 %v2433_v14  ;;  %v2489_v13 = vcombine.high %v244_v7, %v248_v8  ;;  %v251_v14 = vld [vmem:[%s2758_s16 + $0x310] sm:$0xff]  ;;  %v300_v6 = vld [vmem:[%s2758_s16 + $0x498] sm:$0xff] }
  0x90   : > { %v2494_v27 = vcombine.low %v251_v14, %v255_v15 }
  0x92   : > { %1715 = vmatpush1.bf16.msra.mxu0 %v2430_v19  ;;  %1821 = vmatpush1.bf16.msra.mxu1 %v2432_v21  ;;  %v2488_v19 = vcombine.low %v244_v7, %v248_v8  ;;  %v2495_v21 = vcombine.high %v251_v14, %v255_v15  ;;  %v304_v7 = vld [vmem:[%s2758_s16 + $0x4b8] sm:$0xff]  ;;  %v311_v14 = vld [vmem:[%s2758_s16 + $0x4f0] sm:$0xff] }
  0x93   : > { %1716 = vmatprep.subr.bf16.mxu0 %v2439_v22  ;;  %1822 = vmatprep.subr.bf16.mxu1 %v2441_v23  ;;  %v2497_v22 = vcombine.high %v252_v16, %v256_v17  ;;  %v259_v23 = vld [vmem:[%s2758_s16 + $0x350] sm:$0xff]  ;;  %v308_v15 = vld [vmem:[%s2758_s16 + $0x4d8] sm:$0xff] }
  0x94   : > { %v2502_v35 = vcombine.low %v259_v23, %v263_v24 }
  0x96   : > { %1717 = vmatpush1.bf16.msra.mxu0 %v2438_v28  ;;  %1823 = vmatpush1.bf16.msra.mxu1 %v2440_v0  ;;  %v2496_v28 = vcombine.low %v252_v16, %v256_v17  ;;  %v2503_v0 = vcombine.high %v259_v23, %v263_v24  ;;  %v312_v16 = vld [vmem:[%s2758_s16 + $0x4f8] sm:$0xff]  ;;  %v2544_v17 = vcombine.low %v300_v6, %v304_v7 }
  0x97   : > { %1718 = vmatprep.subr.bf16.mxu0 %v2447_v29  ;;  %1824 = vmatprep.subr.bf16.mxu1 %v2449_v30  ;;  %v2505_v29 = vcombine.high %v260_v25, %v264_v26  ;;  %v267_v30 = vld [vmem:[%s2758_s16 + $0x390] sm:$0xff]  ;;  %v316_v23 = vld [vmem:[%s2758_s16 + $0x518] sm:$0xff] }
  0x98   : > { %v2510_v45 = vcombine.low %v267_v30, %v271_v32  ;;  %v320_v24 = vld [vmem:[%s2758_s16 + $0x538] sm:$0xff] }
  0x9a   : > { %1719 = vmatpush1.bf16.msra.mxu0 %v2446_v36  ;;  %1825 = vmatpush1.bf16.msra.mxu1 %v2448_v37  ;;  %v2504_v36 = vcombine.low %v260_v25, %v264_v26  ;;  %v2511_v37 = vcombine.high %v267_v30, %v271_v32  ;;  %v2552_v25 = vcombine.low %v308_v15, %v312_v16  ;;  %v328_v30 = vld [vmem:[%s2758_s16 + $0x578] sm:$0xff] }
  0x9b   : > { %1720 = vmatprep.subr.bf16.mxu0 %v2455_v39  ;;  %1826 = vmatprep.subr.bf16.mxu1 %v2457_v40  ;;  %v2513_v39 = vcombine.high %v268_v33, %v272_v34  ;;  %v275_v40 = vld [vmem:[%s2758_s16 + $0x3d0] sm:$0xff]  ;;  %v2560_v32 = vcombine.low %v316_v23, %v320_v24 }
  0x9c   : > { %v2518_v54 = vcombine.low %v275_v40, %v279_v41 }
  0x9e   : > { %1721 = vmatpush1.bf16.msra.mxu0 %v2454_v46  ;;  %1827 = vmatpush1.bf16.msra.mxu1 %v2456_v47  ;;  %v2512_v46 = vcombine.low %v268_v33, %v272_v34  ;;  %v2519_v47 = vcombine.high %v275_v40, %v279_v41 }
  0x9f   : > { %1722 = vmatprep.subr.bf16.mxu0 %v2463_v48  ;;  %1828 = vmatprep.subr.bf16.mxu1 %v2465_v49  ;;  %v2521_v48 = vcombine.high %v276_v42, %v280_v43  ;;  %v283_v49 = vld [vmem:[%s2758_s16 + $0x410] sm:$0xff] }
  0xa0   : > { %v2526_v63 = vcombine.low %v283_v49, %v287_v50 }
  0xa2   : > { %1723 = vmatpush1.bf16.msra.mxu0 %v2462_v55  ;;  %1829 = vmatpush1.bf16.msra.mxu1 %v2464_v56  ;;  %v2520_v55 = vcombine.low %v276_v42, %v280_v43  ;;  %v2527_v56 = vcombine.high %v283_v49, %v287_v50  ;;  %v339_v43 = vld [vmem:[%s2758_s16 + $0x5d0] sm:$0xff] }
  0xa3   : > { %1724 = vmatprep.subr.bf16.mxu0 %v2471_v57  ;;  %1830 = vmatprep.subr.bf16.mxu1 %v2473_v58  ;;  %v2529_v57 = vcombine.high %v284_v52, %v288_v53  ;;  %v291_v58 = vld [vmem:[%s2758_s16 + $0x450] sm:$0xff] }
  0xa4   : > { %v2534_v8 = vcombine.low %v291_v58, %v295_v59 }
  0xa6   : > { %1725 = vmatpush1.bf16.msra.mxu0 %v2470_v1  ;;  %1831 = vmatpush1.bf16.msra.mxu1 %v2472_v2  ;;  %v2528_v1 = vcombine.low %v284_v52, %v288_v53  ;;  %v2535_v2 = vcombine.high %v291_v58, %v295_v59  ;;  %v347_v53 = vld [vmem:[%s2758_s16 + $0x610] sm:$0xff] }
  0xa7   : > { %1726 = vmatprep.subr.bf16.mxu0 %v2479_v3  ;;  %1832 = vmatprep.subr.bf16.mxu1 %v2481_v4  ;;  %v2537_v3 = vcombine.high %v292_v60, %v296_v61  ;;  %v299_v4 = vld [vmem:[%s2758_s16 + $0x490] sm:$0xff] }
  0xaa   : > { %1727 = vmatpush1.bf16.msra.mxu0 %v2478_v9  ;;  %1833 = vmatpush1.bf16.msra.mxu1 %v2480_v10  ;;  %v2536_v9 = vcombine.low %v292_v60, %v296_v61  ;;  %v2543_v10 = vcombine.high %v299_v4, %v303_v5  ;;  %v355_v61 = vld [vmem:[%s2758_s16 + $0x650] sm:$0xff] }
  0xab   : > { %1728 = vmatprep.subr.bf16.mxu0 %v2487_v12  ;;  %1834 = vmatprep.subr.bf16.mxu1 %v2489_v13  ;;  %v2545_v12 = vcombine.high %v300_v6, %v304_v7  ;;  %v307_v13 = vld [vmem:[%s2758_s16 + $0x4d0] sm:$0xff] }
  0xac   : > { %v363_v7 = vld [vmem:[%s2758_s16 + $0x690] sm:$0xff] }
  0xae   : > { %1729 = vmatpush1.bf16.msra.mxu0 %v2486_v18  ;;  %1835 = vmatpush1.bf16.msra.mxu1 %v2488_v19  ;;  %v2551_v18 = vcombine.high %v307_v13, %v311_v14  ;;  %v2553_v19 = vcombine.high %v308_v15, %v312_v16 }
  0xaf   : > { %1730 = vmatprep.subr.bf16.mxu0 %v2495_v21  ;;  %1836 = vmatprep.subr.bf16.mxu1 %v2497_v22  ;;  %v315_v21 = vld [vmem:[%s2758_s16 + $0x510] sm:$0xff] }
  0xb0   : > { %v319_v22 = vld [vmem:[%s2758_s16 + $0x530] sm:$0xff] }
  0xb1   : > { %v2559_v26 = vcombine.high %v315_v21, %v319_v22 }
  0xb2   : > { %1731 = vmatpush1.bf16.msra.mxu0 %v2494_v27  ;;  %1837 = vmatpush1.bf16.msra.mxu1 %v2496_v28  ;;  %v2561_v27 = vcombine.high %v316_v23, %v320_v24  ;;  %v323_v28 = vld [vmem:[%s2758_s16 + $0x550] sm:$0xff] }
  0xb3   : > { %1732 = vmatprep.subr.bf16.mxu0 %v2503_v0  ;;  %1838 = vmatprep.subr.bf16.mxu1 %v2505_v29  ;;  %v327_v0 = vld [vmem:[%s2758_s16 + $0x570] sm:$0xff]  ;;  %v324_v29 = vld [vmem:[%s2758_s16 + $0x558] sm:$0xff] }
  0xb4   : > { %v2567_v33 = vcombine.high %v323_v28, %v327_v0  ;;  %v2569_v34 = vcombine.high %v324_v29, %v328_v30  ;;  %v2566_v40 = vcombine.low %v323_v28, %v327_v0 }
  0xb6   : > { %1733 = vmatpush1.bf16.msra.mxu0 %v2502_v35  ;;  %1839 = vmatpush1.bf16.msra.mxu1 %v2504_v36  ;;  %v331_v35 = vld [vmem:[%s2758_s16 + $0x590] sm:$0xff] }
  0xb7   : > { %1734 = vmatprep.subr.bf16.mxu0 %v2511_v37  ;;  %1840 = vmatprep.subr.bf16.mxu1 %v2513_v39  ;;  %v335_v36 = vld [vmem:[%s2758_s16 + $0x5b0] sm:$0xff]  ;;  %v332_v37 = vld [vmem:[%s2758_s16 + $0x598] sm:$0xff] }
  0xb8   : > { %v336_v39 = vld [vmem:[%s2758_s16 + $0x5b8] sm:$0xff]  ;;  %v2575_v41 = vcombine.high %v331_v35, %v335_v36 }
  0xb9   : > { %v2577_v42 = vcombine.high %v332_v37, %v336_v39  ;;  %v2576_v49 = vcombine.low %v332_v37, %v336_v39 }
  0xba   : > { %1735 = vmatpush1.bf16.msra.mxu0 %v2510_v45  ;;  %1841 = vmatpush1.bf16.msra.mxu1 %v2512_v46  ;;  %v343_v45 = vld [vmem:[%s2758_s16 + $0x5f0] sm:$0xff]  ;;  %v340_v46 = vld [vmem:[%s2758_s16 + $0x5d8] sm:$0xff] }
  0xbb   : > { %1736 = vmatprep.subr.bf16.mxu0 %v2519_v47  ;;  %1842 = vmatprep.subr.bf16.mxu1 %v2521_v48  ;;  %v344_v47 = vld [vmem:[%s2758_s16 + $0x5f8] sm:$0xff]  ;;  %v2574_v48 = vcombine.low %v331_v35, %v335_v36  ;;  %v2583_v50 = vcombine.high %v339_v43, %v343_v45 }
  0xbc   : > { %v2585_v52 = vcombine.high %v340_v46, %v344_v47  ;;  %v2584_v58 = vcombine.low %v340_v46, %v344_v47 }
  0xbe   : > { %1737 = vmatpush1.bf16.msra.mxu0 %v2518_v54  ;;  %1843 = vmatpush1.bf16.msra.mxu1 %v2520_v55  ;;  %v351_v54 = vld [vmem:[%s2758_s16 + $0x630] sm:$0xff]  ;;  %v348_v55 = vld [vmem:[%s2758_s16 + $0x618] sm:$0xff] }
  0xbf   : > { %1759 = vmatprep.subr.bf16.mxu0 %v2527_v56  ;;  %1865 = vmatprep.subr.bf16.mxu1 %v2529_v57  ;;  %v352_v56 = vld [vmem:[%s2758_s16 + $0x638] sm:$0xff]  ;;  %v2582_v57 = vcombine.low %v339_v43, %v343_v45  ;;  %v2591_v59 = vcombine.high %v347_v53, %v351_v54 }
  0xc0   : > { %v2593_v60 = vcombine.high %v348_v55, %v352_v56 }
  0xc1   : > { %1739 = vmatmul.mubr.bf16.vlgmr.msra.gmra.mrb[8].mxu0 %v2833_v11  ;;  %1845 = vmatmul.mubr.bf16.vlgmr.msra.gmra.mrb[8].mxu1 %v2833_v11  ;;  %v2542_v11 = vcombine.low %v299_v4, %v303_v5  ;;  %v2592_v4 = vcombine.low %v348_v55, %v352_v56 }
  0xc2   : > { %1760 = vmatpush1.bf16.msra.mxu0 %v2526_v63  ;;  %1866 = vmatpush1.bf16.msra.mxu1 %v2528_v1  ;;  %v359_v63 = vld [vmem:[%s2758_s16 + $0x670] sm:$0xff]  ;;  %v356_v1 = vld [vmem:[%s2758_s16 + $0x658] sm:$0xff] }
  0xc3   : > { %1761 = vmatprep.subr.bf16.mxu0 %v2535_v2  ;;  %1867 = vmatprep.subr.bf16.mxu1 %v2537_v3  ;;  %v360_v2 = vld [vmem:[%s2758_s16 + $0x678] sm:$0xff]  ;;  %v2590_v3 = vcombine.low %v347_v53, %v351_v54  ;;  %v2599_v5 = vcombine.high %v355_v61, %v359_v63 }
  0xc4   : > { %1748 = vmatprep.mubr.bf16.mxu0 %v2842_v20  ;;  %1854 = vmatprep.mubr.bf16.mxu1 %v2842_v20  ;;  %v2550_v20 = vcombine.low %v307_v13, %v311_v14  ;;  %v2601_v6 = vcombine.high %v356_v1, %v360_v2  ;;  %v2600_v13 = vcombine.low %v356_v1, %v360_v2 }
  0xc6   : > { %1762 = vmatpush1.bf16.msra.mxu0 %v2534_v8  ;;  %1868 = vmatpush1.bf16.msra.mxu1 %v2536_v9  ;;  %v367_v8 = vld [vmem:[%s2758_s16 + $0x6b0] sm:$0xff]  ;;  %v364_v9 = vld [vmem:[%s2758_s16 + $0x698] sm:$0xff] }
  0xc7   : > { %1763 = vmatprep.subr.bf16.mxu0 %v2543_v10  ;;  %1869 = vmatprep.subr.bf16.mxu1 %v2545_v12  ;;  %v368_v10 = vld [vmem:[%s2758_s16 + $0x6b8] sm:$0xff]  ;;  %v2598_v12 = vcombine.low %v355_v61, %v359_v63  ;;  %v2607_v14 = vcombine.high %v363_v7, %v367_v8  ;;  %v2606_v16 = vcombine.low %v363_v7, %v367_v8 }
  0xc8   : > { %v2609_v15 = vcombine.high %v364_v9, %v368_v10 }
  0xc9   : > { %1749 = vmatmul.mubr.bf16.gmra.mrb[12].mxu0 %v2857_v31  ;;  %1855 = vmatmul.mubr.bf16.gmra.mrb[12].mxu1 %v2857_v31  ;;  %v2558_v31 = vcombine.low %v315_v21, %v319_v22 }
  0xca   : > { %1764 = vmatpush1.bf16.msra.mxu0 %v2542_v11  ;;  %1870 = vmatpush1.bf16.msra.mxu1 %v2544_v17  ;;  %v2608_v11 = vcombine.low %v364_v9, %v368_v10 }
  0xcb   : > { %1765 = vmatprep.subr.bf16.mxu0 %v2551_v18  ;;  %1871 = vmatprep.subr.bf16.mxu1 %v2553_v19 }
  0xcc   : > { %2614 = vmatprep.mubr.msk.bf16.mxu0 %vm1487_vm0, %v2864_v38  ;;  %2616 = vmatprep.mubr.msk.bf16.mxu1 %vm1487_vm0, %v2864_v38  ;;  %v2568_v38 = vcombine.low %v324_v29, %v328_v30 }
  0xce   : > { %1766 = vmatpush1.bf16.msra.mxu0 %v2550_v20  ;;  %1872 = vmatpush1.bf16.msra.mxu1 %v2552_v25 }
  0xcf   : > { %1767 = vmatprep.subr.bf16.mxu0 %v2559_v26  ;;  %1873 = vmatprep.subr.bf16.mxu1 %v2561_v27 }
  0xd2   : > { %1768 = vmatpush1.bf16.msra.mxu0 %v2558_v31  ;;  %1874 = vmatpush1.bf16.msra.mxu1 %v2560_v32 }
  0xd3   : > { %1769 = vmatprep.subr.bf16.mxu0 %v2567_v33  ;;  %1875 = vmatprep.subr.bf16.mxu1 %v2569_v34 }
  0xd6   : > { %1770 = vmatpush1.bf16.msra.mxu0 %v2566_v40  ;;  %1876 = vmatpush1.bf16.msra.mxu1 %v2568_v38 }
  0xd7   : > { %1771 = vmatprep.subr.bf16.mxu0 %v2575_v41  ;;  %1877 = vmatprep.subr.bf16.mxu1 %v2577_v42 }
  0xda   : > { %1772 = vmatpush1.bf16.msra.mxu0 %v2574_v48  ;;  %1878 = vmatpush1.bf16.msra.mxu1 %v2576_v49 }
  0xdb   : > { %1773 = vmatprep.subr.bf16.mxu0 %v2583_v50  ;;  %1879 = vmatprep.subr.bf16.mxu1 %v2585_v52 }
  0xde   : > { %1774 = vmatpush1.bf16.msra.mxu0 %v2582_v57  ;;  %1880 = vmatpush1.bf16.msra.mxu1 %v2584_v58 }
  0xdf   : > { %1775 = vmatprep.subr.bf16.mxu0 %v2591_v59  ;;  %1881 = vmatprep.subr.bf16.mxu1 %v2593_v60 }
  0xe2   : > { %1776 = vmatpush1.bf16.msra.mxu0 %v2590_v3  ;;  %1882 = vmatpush1.bf16.msra.mxu1 %v2592_v4 }
  0xe3   : > { %1777 = vmatprep.subr.bf16.mxu0 %v2599_v5  ;;  %1883 = vmatprep.subr.bf16.mxu1 %v2601_v6 }
  0xe6   : > { %1778 = vmatpush1.bf16.msra.mxu0 %v2598_v12  ;;  %1884 = vmatpush1.bf16.msra.mxu1 %v2600_v13 }
  0xe7   : > { %1779 = vmatprep.subr.bf16.mxu0 %v2607_v14  ;;  %1885 = vmatprep.subr.bf16.mxu1 %v2609_v15 }
  0xea   : > { %1780 = vmatpush1.bf16.msra.mxu0 %v2606_v16  ;;  %1886 = vmatpush1.bf16.msra.mxu1 %v2608_v11 }
  0xed   : > { %1792 = vmatmul.mubr.bf16.vlgmr.msra.gmra.mrb[8].mxu0 %v2907_v44  ;;  %1898 = vmatmul.mubr.bf16.vlgmr.msra.gmra.mrb[8].mxu1 %v2907_v44 }
  0xee   : > { %2615 = vmatprep.mubr.msk.bf16.mxu0 %vm1487_vm0, %v2914_v51  ;;  %2617 = vmatprep.mubr.msk.bf16.mxu1 %vm1487_vm0, %v2914_v51 }
  0xf5   : > { %1802 = vmatmul.mubr.bf16.gmra.mrb[12].mxu0 %v2931_v62  ;;  %1908 = vmatmul.mubr.bf16.gmra.mrb[12].mxu1 %v2931_v62 }
 0x154   : > { %v3049_v17 = vpop.f32.mrb[0].mxu0  ;;  %v3053_v19 = vpop.f32.mrb[0].mxu1 }
 0x155   : > { %v1959_v18 = vmul.f32 %v3049_v17, %v3049_v17  ;;  %v3055_v21 = vpop.f32.mrb[1].mxu0  ;;  %v3061_v51 = vpop.f32.mrb[1].mxu1  ;;  %v1961_v25 = vmul.f32 %v3053_v19, %v3053_v19 }
 0x156   : > { %v1918_v44 = vadd.f32 %v3055_v21, %v3049_v17  ;;  %v1960_v22 = vmul.f32 %v3055_v21, %v3055_v21  ;;  %v3063_v23 = vpop.f32.mrb[2].mxu0  ;;  %v3067_v24 = vpop.f32.mrb[2].mxu1  ;;  %v1962_v31 = vmul.f32 %v3061_v51, %v3061_v51 }
 0x157   : > { %v1967_v62 = vmul.f32 %v3063_v23, %v3063_v23  ;;  %v3069_v20 = vpop.f32.mrb[3].mxu0  ;;  %v3076_v0 = vpop.f32.mrb[3].mxu1  ;;  %v1969_v34 = vmul.f32 %v3067_v24, %v3067_v24 }
 0x158   : > { %v1991_v26 = vadd.f32 %v1960_v22, %v1959_v18  ;;  %v1919_v27 = vadd.f32 %v1918_v44, %v3053_v19  ;;  %v1927_v28 = vadd.f32 %v3069_v20, %v3063_v23  ;;  %v1968_v29 = vmul.f32 %v3069_v20, %v3069_v20 }
 0x159   : > { %v1970_v40 = vmul.f32 %v3076_v0, %v3076_v0 }
 0x15a   : > { %v1920_v30 = vadd.f32 %v1919_v27, %v3061_v51  ;;  %v1992_v32 = vadd.f32 %v1991_v26, %v1961_v25  ;;  %v1928_v33 = vadd.f32 %v1927_v28, %v3067_v24  ;;  %v2000_v35 = vadd.f32 %v1968_v29, %v1967_v62 }
 0x15c   : > { %v1993_v36 = vadd.f32 %v1992_v32, %v1962_v31  ;;  %v1929_v37 = vadd.f32 %v1928_v33, %v3076_v0  ;;  %v3087_v39 = vpop.f32.mrb[4].mxu0  ;;  %v2001_v38 = vadd.f32 %v2000_v35, %v1969_v34  ;;  %v3093_v42 = vpop.f32.mrb[4].mxu1 }
 0x15d   : > { %v1975_v41 = vmul.f32 %v3087_v39, %v3087_v39  ;;  %v3095_v43 = vpop.f32.mrb[5].mxu0  ;;  %v3101_v47 = vpop.f32.mrb[5].mxu1  ;;  %v1977_v54 = vmul.f32 %v3093_v42, %v3093_v42 }
 0x15e   : > { %v1936_v45 = vadd.f32 %v3095_v43, %v3087_v39  ;;  %v1976_v46 = vmul.f32 %v3095_v43, %v3095_v43  ;;  %v3103_v48 = vpop.f32.mrb[6].mxu0  ;;  %v2002_v49 = vadd.f32 %v2001_v38, %v1970_v40  ;;  %v3107_v52 = vpop.f32.mrb[6].mxu1  ;;  %v1978_v61 = vmul.f32 %v3101_v47, %v3101_v47 }
 0x15f   : > { %v1983_v50 = vmul.f32 %v3103_v48, %v3103_v48  ;;  %v3109_v53 = vpop.f32.mrb[7].mxu0  ;;  %v3116_v58 = vpop.f32.mrb[7].mxu1  ;;  %v1985_v2 = vmul.f32 %v3107_v52, %v3107_v52 }
 0x160   : > { %v2009_v55 = vadd.f32 %v1976_v46, %v1975_v41  ;;  %v1937_v56 = vadd.f32 %v1936_v45, %v3093_v42  ;;  %v1945_v57 = vadd.f32 %v3109_v53, %v3103_v48  ;;  %v1984_v59 = vmul.f32 %v3109_v53, %v3109_v53 }
 0x161   : > { %v1986_v6 = vmul.f32 %v3116_v58, %v3116_v58 }
 0x162   : > { %v1938_v60 = vadd.f32 %v1937_v56, %v3101_v47  ;;  %v2010_v63 = vadd.f32 %v2009_v55, %v1977_v54  ;;  %v1946_v1 = vadd.f32 %v1945_v57, %v3107_v52  ;;  %v2018_v3 = vadd.f32 %v1984_v59, %v1983_v50 }
 0x164   : > { %v2011_v4 = vadd.f32 %v2010_v63, %v1978_v61  ;;  %v1947_v5 = vadd.f32 %v1946_v1, %v3116_v58  ;;  %v2019_v7 = vadd.f32 %v2018_v3, %v1985_v2 }
 0x166   : > { %v2020_v8 = vadd.f32 %v2019_v7, %v1986_v6 }
 0x1c0   : > { %v3129_v9 = vpop.f32.mrb[8].mxu0  ;;  %v3134_v13 = vpop.f32.mrb[8].mxu1 }
 0x1c1   : > { %v1921_v10 = vadd.f32 %v1920_v30, %v3129_v9  ;;  %v1963_v12 = vmul.f32 %v3129_v9, %v3129_v9  ;;  %v3136_v14 = vpop.f32.mrb[9].mxu0  ;;  %v3140_v16 = vpop.f32.mrb[9].mxu1  ;;  %v1965_v32 = vmul.f32 %v3134_v13, %v3134_v13 }
 0x1c2   : > { %v1964_v15 = vmul.f32 %v3136_v14, %v3136_v14  ;;  %v3142_v11 = vpop.f32.mrb[10].mxu0  ;;  %v3148_v25 = vpop.f32.mrb[10].mxu1  ;;  %v1966_v38 = vmul.f32 %v3140_v16, %v3140_v16 }
 0x1c3   : > { %v1994_v18 = vadd.f32 %v1993_v36, %v1963_v12  ;;  %v1922_v44 = vadd.f32 %v1921_v10, %v3136_v14  ;;  %v1930_v22 = vadd.f32 %v1929_v37, %v3142_v11  ;;  %v1971_v62 = vmul.f32 %v3142_v11, %v3142_v11  ;;  %v3150_v26 = vpop.f32.mrb[11].mxu0  ;;  %v3154_v28 = vpop.f32.mrb[11].mxu1 }
 0x1c4   : > { %v1972_v27 = vmul.f32 %v3150_v26, %v3150_v26  ;;  %v1973_v34 = vmul.f32 %v3148_v25, %v3148_v25 }
 0x1c5   : > { %v2003_v29 = vadd.f32 %v2002_v49, %v1971_v62  ;;  %v1931_v30 = vadd.f32 %v1930_v22, %v3150_v26  ;;  %v1923_v31 = vadd.f32 %v1922_v44, %v3134_v13  ;;  %v1995_v33 = vadd.f32 %v1994_v18, %v1964_v15 }
 0x1c7   : > { %v1924_v35 = vadd.f32 %v1923_v31, %v3140_v16  ;;  %v2004_v36 = vadd.f32 %v2003_v29, %v1972_v27  ;;  %v1932_v37 = vadd.f32 %v1931_v30, %v3148_v25  ;;  %v1996_v41 = vadd.f32 %v1995_v33, %v1965_v32 }
 0x1c8   : > { %v3164_v40 = vpop.f32.mrb[12].mxu0  ;;  %v3171_v49 = vpop.f32.mrb[12].mxu1 }
 0x1c9   : > { %v1939_v45 = vadd.f32 %v1938_v60, %v3164_v40  ;;  %v1979_v46 = vmul.f32 %v3164_v40, %v3164_v40  ;;  %1925 = vadd.xlane.f32.xlu0 %v1924_v35  ;;  %v3173_v50 = vpop.f32.mrb[13].mxu0  ;;  %v2005_v54 = vadd.f32 %v2004_v36, %v1973_v34  ;;  %v1933_v55 = vadd.f32 %v1932_v37, %v3154_v28  ;;  %v3176_v56 = vpop.f32.mrb[13].mxu1 }
 0x1ca   : > { %v1980_v57 = vmul.f32 %v3173_v50, %v3173_v50  ;;  %v3180_v59 = vpop.f32.mrb[14].mxu0  ;;  %v1974_v60 = vmul.f32 %v3154_v28, %v3154_v28  ;;  %v1997_v61 = vadd.f32 %v1996_v41, %v1966_v38  ;;  %v3188_v6 = vpop.f32.mrb[14].mxu1 }
 0x1cb   : > { %v2012_v63 = vadd.f32 %v2011_v4, %v1979_v46  ;;  %v1940_v1 = vadd.f32 %v1939_v45, %v3173_v50  ;;  %v1948_v2 = vadd.f32 %v1947_v5, %v3180_v59  ;;  %v1987_v3 = vmul.f32 %v3180_v59, %v3180_v59  ;;  %v3190_v7 = vpop.f32.mrb[15].mxu0  ;;  %v3194_v12 = vpop.f32.mrb[15].mxu1 }
 0x1cc   : > { %v1988_v10 = vmul.f32 %v3190_v7, %v3190_v7  ;;  %v2006_v15 = vadd.f32 %v2005_v54, %v1974_v60  ;;  %v1981_v5 = vmul.f32 %v3171_v49, %v3171_v49  ;;  %v1989_v62 = vmul.f32 %v3188_v6, %v3188_v6 }
 0x1cd   : > { %v2021_v18 = vadd.f32 %v2020_v8, %v1987_v3  ;;  %v1949_v4 = vadd.f32 %v1948_v2, %v3190_v7  ;;  %1934 = vadd.xlane.f32.xlu0 %v1933_v55  ;;  %v1941_v44 = vadd.f32 %v1940_v1, %v3171_v49  ;;  %v2013_v22 = vadd.f32 %v2012_v63, %v1980_v57 }
 0x1ce   : > { %2007 = vadd.xlane.f32.xlu1 %v2006_v15  ;;  %v1982_v8 = vmul.f32 %v3176_v56, %v3176_v56  ;;  %v1990_v32 = vmul.f32 %v3194_v12, %v3194_v12 }
 0x1cf   : > { %v2022_v27 = vadd.f32 %v2021_v18, %v1988_v10  ;;  %v1942_v29 = vadd.f32 %v1941_v44, %v3176_v56  ;;  %v1950_v30 = vadd.f32 %v1949_v4, %v3188_v6  ;;  %v2014_v31 = vadd.f32 %v2013_v22, %v1981_v5 }
 0x1d1   : > { %1998 = vadd.xlane.f32.xlu0 %v1997_v61  ;;  %v1951_v33 = vadd.f32 %v1950_v30, %v3194_v12  ;;  %v2023_v34 = vadd.f32 %v2022_v27, %v1989_v62  ;;  %v2015_v35 = vadd.f32 %v2014_v31, %v1982_v8 }
 0x1d2   : > { %1943 = vadd.xlane.f32.xlu1 %v1942_v29 }
 0x1d3   : > { %v2024_v36 = vadd.f32 %v2023_v34, %v1990_v32 }
 0x1d5   : > { %2016 = vadd.xlane.f32.xlu0 %v2015_v35 }
 0x1d6   : > { %1952 = vadd.xlane.f32.xlu1 %v1951_v33 }
 0x1da   : > { %2025 = vadd.xlane.f32.xlu1 %v2024_v36 }
 0x256   : > { %v1926_v37 = vpop.xlane.xlu0 %1925 }
 0x257   : > { %v3209_v41 = vmul.f32 0.0009765625, %v1926_v37 }
 0x259   : > { %v2031_v61 = vmul.f32 %v3209_v41, %v3209_v41  ;;  %v2051_v8 = vsub.f32 %v3049_v17, %v3209_v41  ;;  %v2052_v31 = vsub.f32 %v3055_v21, %v3209_v41  ;;  %v2053_v32 = vsub.f32 %v3053_v19, %v3209_v41 }
 0x25a   : > { %v1935_v38 = vpop.xlane.xlu0 %1934  ;;  %v2054_v34 = vsub.f32 %v3061_v51, %v3209_v41  ;;  %v2055_v35 = vsub.f32 %v3129_v9, %v3209_v41  ;;  %v2056_v17 = vsub.f32 %v3136_v14, %v3209_v41  ;;  %v2057_v21 = vsub.f32 %v3134_v13, %v3209_v41 }
 0x25b   : > { %v2008_v45 = vpop.xlane.xlu1 %2007  ;;  %v3211_v46 = vmul.f32 0.0009765625, %v1935_v38  ;;  %v2058_v38 = vsub.f32 %v3140_v16, %v3209_v41 }
 0x25c   : > { %v2028_v54 = vmul.f32 0.0009765625, %v2008_v45 }
 0x25d   : > { %v2032_v55 = vmul.f32 %v3211_v46, %v3211_v46  ;;  %v2059_v45 = vsub.f32 %v3063_v23, %v3211_v46  ;;  %v2065_v23 = vsub.f32 %v3148_v25, %v3211_v46 }
 0x25e   : > { %v1999_v57 = vpop.xlane.xlu0 %1998 }
 0x25f   : > { %v2036_v60 = vsub.f32 %v2028_v54, %v2032_v55  ;;  %v2027_v63 = vmul.f32 0.0009765625, %v1999_v57  ;;  %v1944_v1 = vpop.xlane.xlu1 %1943  ;;  %v2060_v54 = vsub.f32 %v3069_v20, %v3211_v46  ;;  %v2061_v55 = vsub.f32 %v3067_v24, %v3211_v46 }
 0x260   : > { %v3217_v2 = vmul.f32 0.0009765625, %v1944_v1  ;;  %v2064_v1 = vsub.f32 %v3150_v26, %v3211_v46  ;;  %v2066_v20 = vsub.f32 %v3154_v28, %v3211_v46 }
 0x261   : > { %v2040_v3 = vmax.f32 %v2036_v60, 0.0  ;;  %v2035_v10 = vsub.f32 %v2027_v63, %v2031_v61  ;;  %v2062_v61 = vsub.f32 %v3076_v0, %v3211_v46  ;;  %v2063_v63 = vsub.f32 %v3142_v11, %v3211_v46 }
 0x262   : > { %v2017_v15 = vpop.xlane.xlu0 %2016  ;;  %v2033_v22 = vmul.f32 %v3217_v2, %v3217_v2  ;;  %v2067_v24 = vsub.f32 %v3087_v39, %v3217_v2  ;;  %v2069_v0 = vsub.f32 %v3093_v42, %v3217_v2  ;;  %v2070_v11 = vsub.f32 %v3101_v47, %v3217_v2 }
 0x263   : > { %v2044_v18 = vadd.f32 1e-05, %v2040_v3  ;;  %v2039_v4 = vmax.f32 %v2035_v10, 0.0  ;;  %v1953_v44 = vpop.xlane.xlu1 %1952  ;;  %v2029_v5 = vmul.f32 0.0009765625, %v2017_v15  ;;  %v2068_v3 = vsub.f32 %v3095_v43, %v3217_v2 }
 0x264   : > { %v3221_v27 = vmul.f32 0.0009765625, %v1953_v44  ;;  %v3397_v42 = vsub.f32 %v3176_v56, %v3217_v2 }
 0x265   : > { %2706 = vrsqrt.f32 %v2044_v18  ;;  %v2043_v62 = vadd.f32 1e-05, %v2039_v4  ;;  %v2037_v29 = vsub.f32 %v2029_v5, %v2033_v22 }
 0x266   : > { %v2034_v36 = vmul.f32 %v3221_v27, %v3221_v27 }
 0x267   : > { %2708 = vrsqrt.f32 %v2043_v62  ;;  %v2026_v30 = vpop.xlane.xlu1 %2025  ;;  %v2041_v33 = vmax.f32 %v2037_v29, 0.0 }
 0x268   : > { %v2030_v37 = vmul.f32 0.0009765625, %v2026_v30 }
 0x269   : > { %v2045_v57 = vadd.f32 1e-05, %v2041_v33 }
 0x26a   : > { %v2038_v60 = vsub.f32 %v2030_v37, %v2034_v36 }
 0x26b   : > { %2710 = vrsqrt.f32 %v2045_v57 }
 0x26c   : > { %v2042_v10 = vmax.f32 %v2038_v60, 0.0 }
 0x26e   : > { %v3273_v18 = vadd.f32 1e-05, %v2042_v10 }
 0x26f   : > { %v2707_v28 = vpop.eup %2706 }
 0x270   : > { %v2091_v4 = vmul.f32 %v2707_v28, %v2059_v45  ;;  %v2092_v44 = vmul.f32 %v2707_v28, %v2060_v54  ;;  %v2093_v5 = vmul.f32 %v2707_v28, %v2061_v55  ;;  %v2094_v22 = vmul.f32 %v2707_v28, %v2062_v61 }
 0x271   : > { %v2709_v62 = vpop.eup %2708  ;;  %v2095_v29 = vmul.f32 %v2707_v28, %v2063_v63  ;;  %v2096_v30 = vmul.f32 %v2707_v28, %v2064_v1  ;;  %v2097_v33 = vmul.f32 %v2707_v28, %v2065_v23  ;;  %v2098_v36 = vmul.f32 %v2707_v28, %v2066_v20 }
 0x272   : > { %vm2123_vm1 = vcmp.ge.f32.partialorder %v2091_v4, 0.0  ;;  %vm2124_vm2 = vcmp.ge.f32.partialorder %v2092_v44, 0.0  ;;  %vm2125_vm3 = vcmp.ge.f32.partialorder %v2093_v5, 0.0  ;;  %vm2126_vm4 = vcmp.ge.f32.partialorder %v2094_v22, 0.0 }
 0x273   : > { %vm2127_vm5 = vcmp.ge.f32.partialorder %v2095_v29, 0.0  ;;  %vm2128_vm6 = vcmp.ge.f32.partialorder %v2096_v30, 0.0  ;;  %vm2129_vm7 = vcmp.ge.f32.partialorder %v2097_v33, 0.0  ;;  %vm2130_vm8 = vcmp.ge.f32.partialorder %v2098_v36, 0.0 }
 0x274   : > { %v2155_v37 = vmul.f32 0.01, %v2091_v4  ;;  %v2156_v57 = vmul.f32 0.01, %v2092_v44  ;;  %v2157_v45 = vmul.f32 0.01, %v2093_v5  ;;  %v2083_v54 = vmul.f32 %v2709_v62, %v2051_v8 }
 0x275   : > { %v2158_v55 = vmul.f32 0.01, %v2094_v22  ;;  %v2159_v60 = vmul.f32 0.01, %v2095_v29  ;;  %v2160_v61 = vmul.f32 0.01, %v2096_v30  ;;  %v2084_v63 = vmul.f32 %v2709_v62, %v2052_v31  ;;  %v2711_v46 = vpop.eup %2710 }
 0x276   : > { %v2161_v1 = vmul.f32 0.01, %v2097_v33  ;;  %v2162_v23 = vmul.f32 0.01, %v2098_v36  ;;  %v2187_v20 = vsel %vm2123_vm1, %v2091_v4, %v2155_v37  ;;  %v2188_v10 = vsel %vm2124_vm2, %v2092_v44, %v2156_v57 }
 0x277   : > { %v2189_v28 = vsel %vm2125_vm3, %v2093_v5, %v2157_v45  ;;  %v2190_v8 = vsel %vm2126_vm4, %v2094_v22, %v2158_v55  ;;  %v2191_v15 = vsel %vm2127_vm5, %v2095_v29, %v2159_v60  ;;  %v2192_v31 = vsel %vm2128_vm6, %v2096_v30, %v2160_v61 }
 0x278   : > { %v2193_v4 = vsel %vm2129_vm7, %v2097_v33, %v2161_v1  ;;  %v2194_v44 = vsel %vm2130_vm8, %v2098_v36, %v2162_v23  ;;  %v2641_v37 = vpack.c.bf16 %v2188_v10, %v2187_v20  ;;  %v2642_v57 = vpack.c.bf16 %v2190_v8, %v2189_v28 }
 0x279   : > { %v2643_v25 = vpack.c.bf16 %v2192_v31, %v2191_v15  ;;  %v2644_v26 = vpack.c.bf16 %v2194_v44, %v2193_v4  ;;  %v2085_v5 = vmul.f32 %v2709_v62, %v2053_v32  ;;  %v2086_v22 = vmul.f32 %v2709_v62, %v2054_v34 }
 0x27a   : > { %2311 = vst [vmem:[%s3281_s6 + $0x20] sm:$0xff] %v2641_v37  ;;  %2312 = vst [vmem:[%s3281_s6 + $0x28] sm:$0xff] %v2642_v57  ;;  %v2087_v29 = vmul.f32 %v2709_v62, %v2055_v35  ;;  %v2088_v30 = vmul.f32 %v2709_v62, %v2056_v17  ;;  %v2089_v15 = vmul.f32 %v2709_v62, %v2057_v21  ;;  %vm2115_vm9 = vcmp.ge.f32.partialorder %v2083_v54, 0.0 }
 0x27b   : > { %v2090_v19 = vmul.f32 %v2709_v62, %v2058_v38  ;;  %2313 = vst [vmem:[%s3281_s6 + $0x30] sm:$0xff] %v2643_v25  ;;  %2314 = vst [vmem:[%s3281_s6 + $0x38] sm:$0xff] %v2644_v26  ;;  %vm2116_vm10 = vcmp.ge.f32.partialorder %v2084_v63, 0.0  ;;  %vm2117_vm11 = vcmp.ge.f32.partialorder %v2085_v5, 0.0  ;;  %vm2118_vm12 = vcmp.ge.f32.partialorder %v2086_v22, 0.0 }
 0x27c   : > { %vm2119_vm13 = vcmp.ge.f32.partialorder %v2087_v29, 0.0  ;;  %vm2120_vm14 = vcmp.ge.f32.partialorder %v2088_v30, 0.0  ;;  %vm2121_vm15 = vcmp.ge.f32.partialorder %v2089_v15, 0.0  ;;  %v2147_v51 = vmul.f32 0.01, %v2083_v54 }
 0x27d   : > { %vm2122_vm0 = vcmp.ge.f32.partialorder %v2090_v19, 0.0  ;;  %v2148_v9 = vmul.f32 0.01, %v2084_v63  ;;  %v2149_v14 = vmul.f32 0.01, %v2085_v5  ;;  %v2099_v13 = vmul.f32 %v2711_v46, %v2067_v24 }
 0x27e   : > { %v2150_v32 = vmul.f32 0.01, %v2086_v22  ;;  %v2151_v16 = vmul.f32 0.01, %v2087_v29  ;;  %v2152_v41 = vmul.f32 0.01, %v2088_v30  ;;  %v2100_v34 = vmul.f32 %v2711_v46, %v2068_v3 }
 0x27f   : > { %v2153_v35 = vmul.f32 0.01, %v2089_v15  ;;  %v2154_v17 = vmul.f32 0.01, %v2090_v19  ;;  %v2179_v21 = vsel %vm2115_vm9, %v2083_v54, %v2147_v51  ;;  %v2180_v38 = vsel %vm2116_vm10, %v2084_v63, %v2148_v9 }
 0x280   : > { %v2181_v26 = vsel %vm2117_vm11, %v2085_v5, %v2149_v14  ;;  %v2182_v39 = vsel %vm2118_vm12, %v2086_v22, %v2150_v32  ;;  %v2183_v24 = vsel %vm2119_vm13, %v2087_v29, %v2151_v16  ;;  %v2184_v25 = vsel %vm2120_vm14, %v2088_v30, %v2152_v41 }
 0x281   : > { %v2185_v43 = vsel %vm2121_vm15, %v2089_v15, %v2153_v35  ;;  %v2186_v3 = vsel %vm2122_vm0, %v2090_v19, %v2154_v17  ;;  %v2637_v62 = vpack.c.bf16 %v2180_v38, %v2179_v21  ;;  %v2638_v33 = vpack.c.bf16 %v2182_v39, %v2181_v26 }
 0x282   : > { %v2639_v36 = vpack.c.bf16 %v2184_v25, %v2183_v24  ;;  %v2640_v45 = vpack.c.bf16 %v2186_v3, %v2185_v43  ;;  %v2101_v54 = vmul.f32 %v2711_v46, %v2069_v0  ;;  %v2102_v55 = vmul.f32 %v2711_v46, %v2070_v11 }
 0x283   : > { %2307 = vst [vmem:[%s3281_s6] sm:$0xff] %v2637_v62  ;;  %2308 = vst [vmem:[%s3281_s6 + $0x8] sm:$0xff] %v2638_v33  ;;  %v3394_v60 = vsub.f32 %v3164_v40, %v3217_v2  ;;  %v3395_v63 = vsub.f32 %v3173_v50, %v3217_v2  ;;  %v3396_v23 = vsub.f32 %v3171_v49, %v3217_v2  ;;  %vm2131_vm1 = vcmp.ge.f32.partialorder %v2099_v13, 0.0 }
 0x284   : > { %v2106_v0 = vmul.f32 %v2711_v46, %v3397_v42  ;;  %2309 = vst [vmem:[%s3281_s6 + $0x10] sm:$0xff] %v2639_v36  ;;  %2310 = vst [vmem:[%s3281_s6 + $0x18] sm:$0xff] %v2640_v45  ;;  %vm2132_vm2 = vcmp.ge.f32.partialorder %v2100_v34, 0.0  ;;  %vm2133_vm3 = vcmp.ge.f32.partialorder %v2101_v54, 0.0  ;;  %vm2134_vm4 = vcmp.ge.f32.partialorder %v2102_v55, 0.0 }
 0x285   : > { %v2103_v61 = vmul.f32 %v2711_v46, %v3394_v60  ;;  %v2104_v1 = vmul.f32 %v2711_v46, %v3395_v63  ;;  %v2105_v20 = vmul.f32 %v2711_v46, %v3396_v23  ;;  %v2163_v47 = vmul.f32 0.01, %v2099_v13 }
 0x286   : > { %vm2138_vm8 = vcmp.ge.f32.partialorder %v2106_v0, 0.0  ;;  %v2164_v40 = vmul.f32 0.01, %v2100_v34  ;;  %v2165_v50 = vmul.f32 0.01, %v2101_v54  ;;  %2712 = vrsqrt.f32 %v3273_v18 }
 0x287   : > { %vm2135_vm5 = vcmp.ge.f32.partialorder %v2103_v61, 0.0  ;;  %vm2136_vm6 = vcmp.ge.f32.partialorder %v2104_v1, 0.0  ;;  %vm2137_vm7 = vcmp.ge.f32.partialorder %v2105_v20, 0.0  ;;  %v2166_v49 = vmul.f32 0.01, %v2102_v55 }
 0x288   : > { %v2167_v11 = vmul.f32 0.01, %v2103_v61  ;;  %v2168_v56 = vmul.f32 0.01, %v2104_v1  ;;  %v2169_v2 = vmul.f32 0.01, %v2105_v20  ;;  %v2195_v10 = vsel %vm2131_vm1, %v2099_v13, %v2163_v47 }
 0x289   : > { %v2170_v46 = vmul.f32 0.01, %v2106_v0  ;;  %v2196_v28 = vsel %vm2132_vm2, %v2100_v34, %v2164_v40  ;;  %v2197_v8 = vsel %vm2133_vm3, %v2101_v54, %v2165_v50  ;;  %v2198_v31 = vsel %vm2134_vm4, %v2102_v55, %v2166_v49 }
 0x28a   : > { %v2199_v4 = vsel %vm2135_vm5, %v2103_v61, %v2167_v11  ;;  %v2200_v18 = vsel %vm2136_vm6, %v2104_v1, %v2168_v56  ;;  %v2201_v44 = vsel %vm2137_vm7, %v2105_v20, %v2169_v2  ;;  %v2645_v57 = vpack.c.bf16 %v2196_v28, %v2195_v10 }
 0x28b   : > { %v2202_v37 = vsel %vm2138_vm8, %v2106_v0, %v2170_v46  ;;  %v2646_v5 = vpack.c.bf16 %v2198_v31, %v2197_v8  ;;  %v2647_v22 = vpack.c.bf16 %v2200_v18, %v2199_v4  ;;  %v2075_v30 = vsub.f32 %v3103_v48, %v3221_v27 }
 0x28c   : > { %v2648_v29 = vpack.c.bf16 %v2202_v37, %v2201_v44  ;;  %2315 = vst [vmem:[%s3281_s6 + $0x40] sm:$0xff] %v2645_v57  ;;  %v2076_v15 = vsub.f32 %v3109_v53, %v3221_v27  ;;  %v2077_v19 = vsub.f32 %v3107_v52, %v3221_v27  ;;  %v2078_v51 = vsub.f32 %v3116_v58, %v3221_v27 }
 0x28d   : > { %2316 = vst [vmem:[%s3281_s6 + $0x48] sm:$0xff] %v2646_v5  ;;  %2317 = vst [vmem:[%s3281_s6 + $0x50] sm:$0xff] %v2647_v22  ;;  %v2079_v14 = vsub.f32 %v3180_v59, %v3221_v27  ;;  %v2080_v13 = vsub.f32 %v3190_v7, %v3221_v27  ;;  %v2081_v32 = vsub.f32 %v3188_v6, %v3221_v27 }
 0x28e   : > { %2318 = vst [vmem:[%s3281_s6 + $0x58] sm:$0xff] %v2648_v29  ;;  %v2082_v48 = vsub.f32 %v3194_v12, %v3221_v27 }
 0x290   : > { %v2713_v9 = vpop.eup %2712 }
 0x291   : > { %v2107_v53 = vmul.f32 %v2713_v9, %v2075_v30  ;;  %v2108_v16 = vmul.f32 %v2713_v9, %v2076_v15  ;;  %v2109_v41 = vmul.f32 %v2713_v9, %v2077_v19  ;;  %v2110_v52 = vmul.f32 %v2713_v9, %v2078_v51 }
 0x292   : > { %v2111_v34 = vmul.f32 %v2713_v9, %v2079_v14  ;;  %v2112_v35 = vmul.f32 %v2713_v9, %v2080_v13  ;;  %v2113_v58 = vmul.f32 %v2713_v9, %v2081_v32  ;;  %v2114_v17 = vmul.f32 %v2713_v9, %v2082_v48 }
 0x293   : > { %vm2139_vm9 = vcmp.ge.f32.partialorder %v2107_v53, 0.0  ;;  %vm2140_vm10 = vcmp.ge.f32.partialorder %v2108_v16, 0.0  ;;  %vm2141_vm11 = vcmp.ge.f32.partialorder %v2109_v41, 0.0  ;;  %vm2142_vm12 = vcmp.ge.f32.partialorder %v2110_v52, 0.0 }
 0x294   : > { %vm2143_vm13 = vcmp.ge.f32.partialorder %v2111_v34, 0.0  ;;  %vm2144_vm14 = vcmp.ge.f32.partialorder %v2112_v35, 0.0  ;;  %vm2145_vm15 = vcmp.ge.f32.partialorder %v2113_v58, 0.0  ;;  %vm2146_vm0 = vcmp.ge.f32.partialorder %v2114_v17, 0.0 }
 0x295   : > { %v2171_v59 = vmul.f32 0.01, %v2107_v53  ;;  %v2172_v6 = vmul.f32 0.01, %v2108_v16  ;;  %v2173_v7 = vmul.f32 0.01, %v2109_v41 }
 0x296   : > { %v2174_v12 = vmul.f32 0.01, %v2110_v52  ;;  %v2175_v27 = vmul.f32 0.01, %v2111_v34  ;;  %v2176_v21 = vmul.f32 0.01, %v2112_v35 }
 0x297   : > { %v2177_v38 = vmul.f32 0.01, %v2113_v58  ;;  %v2178_v26 = vmul.f32 0.01, %v2114_v17  ;;  %v2203_v39 = vsel %vm2139_vm9, %v2107_v53, %v2171_v59  ;;  %v2204_v24 = vsel %vm2140_vm10, %v2108_v16, %v2172_v6 }
 0x298   : > { %v2205_v25 = vsel %vm2141_vm11, %v2109_v41, %v2173_v7  ;;  %v2206_v43 = vsel %vm2142_vm12, %v2110_v52, %v2174_v12  ;;  %v2207_v3 = vsel %vm2143_vm13, %v2111_v34, %v2175_v27  ;;  %v2208_v62 = vsel %vm2144_vm14, %v2112_v35, %v2176_v21 }
 0x299   : > { %v2209_v33 = vsel %vm2145_vm15, %v2113_v58, %v2177_v38  ;;  %v2210_v36 = vsel %vm2146_vm0, %v2114_v17, %v2178_v26  ;;  %v2649_v45 = vpack.c.bf16 %v2204_v24, %v2203_v39  ;;  %v2650_v54 = vpack.c.bf16 %v2206_v43, %v2205_v25 }
 0x29a   : > { %v2651_v55 = vpack.c.bf16 %v2208_v62, %v2207_v3  ;;  %v2652_v60 = vpack.c.bf16 %v2210_v36, %v2209_v33 }
 0x29b   : > { %2319 = vst [vmem:[%s3281_s6 + $0x60] sm:$0xff] %v2649_v45  ;;  %2320 = vst [vmem:[%s3281_s6 + $0x68] sm:$0xff] %v2650_v54 }
 0x29c   : > { %2321 = vst [vmem:[%s3281_s6 + $0x70] sm:$0xff] %v2651_v55  ;;  %2322 = vst [vmem:[%s3281_s6 + $0x78] sm:$0xff] %v2652_v60 }
 0x29d PF: > { %s12_s9 = sadd.s32 1, %s2720_s9  }
 0x29e   : > { %p9_p4 = scmp.ge.s32.totalorder %s12_s9, 4  }
 0x2a0   :  { %11 = sbr.rel (!%p9_p4) target bundleno = 1 (0x1), region = 58 }

// kernel: discriminator_forward.7
= control target key start
LH: loop header
LB: loop body
LE: loop exit
PB: predicated region body
PF: predicated region fallthrough
CT: control target
= control target key end

     0   :  { %s1682_s9 = smov 0   ;;  %s1926_s0 = inlined_call_operand.vmem [shape: bf16[2,864,128], index: 0, kind: input, shape index: {}]   ;;  %s1927_s1 = inlined_call_operand.vmem [shape: bf16[64,864], index: 1, kind: input, shape index: {}]   ;;  %s1928_s2 = inlined_call_operand.vmem [shape: bf16[2,64,128], index: 2, kind: output, shape index: {}]  }
   0x1 LB: > { %s1254_s10 = sadd.s32 4294967295, %s1665_s9   ;;  %p1258_p0 = scmp.ge.s32.totalorder %s1665_s9, 1  ;;  %s1665_s9 = sphi %s1682_s9, %s12_s9  }
   0x2   : > { %p112_p1 = scmp.lt.s32.totalorder %s1665_s9, 3 }
   0x4   : > { %p113_p2 = pnand %p1258_p0, %p112_p1 }
   0x5   : > { %p134_p3 = scmp.lt.s32.totalorder (!%p113_p2), %s1254_s10, 1  ;;  %v1583_v0 = vld [vmem:[%s1927_s1 + $0x4] ss:$28 sps:$4 sm:$0xff] (!%p113_p2)   ;;  %v1586_v1 = vld [vmem:[%s1927_s1 + $0xc] ss:$28 sps:$4 sm:$0xff] (!%p113_p2)   ;;  %vm749_vm0 = vcmask (!%p113_p2), 785408  }
   0x6   : > { %116 = sbr.rel (%p113_p2) target bundleno = 503 (0x1f7), region = 28  ;;  %794 = vmatprep.mubr.bf16.mxu0 (!%p113_p2), %v1583_v0  ;;  %859 = vmatprep.mubr.bf16.mxu1 (!%p113_p2), %v1586_v1  ;;  %v1581_v32 = vld [vmem:[%s1927_s1] ss:$28 sps:$4 sm:$0xff] (!%p113_p2)   ;;  %v1584_v34 = vld [vmem:[%s1927_s1 + $0x8] ss:$28 sps:$4 sm:$0xff] (!%p113_p2)  }
   0x7   : > { %v1592_v37 = vld [vmem:[%s1927_s1 + $0x3c] ss:$28 sps:$4 sm:$0xff] (!%p113_p2)   ;;  %v1594_v39 = vld [vmem:[%s1927_s1 + $0x44] ss:$28 sps:$4 sm:$0xff] (!%p113_p2)   ;;  %v1603_v47 = vld [vmem:[%s1927_s1 + $0x74] ss:$28 sps:$4 sm:$0xff] (!%p113_p2)  }
   0x8   : > { %v1596_v43 = vld [vmem:[%s1927_s1 + $0x38] ss:$28 sps:$4 sm:$0xff] (!%p113_p2)   ;;  %v1597_v45 = vld [vmem:[%s1927_s1 + $0x40] ss:$28 sps:$4 sm:$0xff] (!%p113_p2)   ;;  %v1608_v53 = vld [vmem:[%s1927_s1 + $0x70] ss:$28 sps:$4 sm:$0xff] (!%p113_p2)  }
   0x9   : > { %v1605_v50 = vld [vmem:[%s1927_s1 + $0x7c] ss:$28 sps:$4 sm:$0xff] (!%p113_p2)   ;;  %v1615_v59 = vld [vmem:[%s1927_s1 + $0xac] ss:$28 sps:$4 sm:$0xff] (!%p113_p2)   ;;  %v1617_v60 = vld [vmem:[%s1927_s1 + $0xb4] ss:$28 sps:$4 sm:$0xff] (!%p113_p2)  }
   0xa   : > { %v1609_v55 = vld [vmem:[%s1927_s1 + $0x78] ss:$28 sps:$4 sm:$0xff] (!%p113_p2)   ;;  %v1619_v62 = vld [vmem:[%s1927_s1 + $0xa8] ss:$28 sps:$4 sm:$0xff] (!%p113_p2)   ;;  %v1620_v0 = vld [vmem:[%s1927_s1 + $0xb0] ss:$28 sps:$4 sm:$0xff] (!%p113_p2)  }
   0xd   : > { %s1930_s10 = smov (!%p134_p3, %s1254_s10), 1 }
   0xe   : > { %s1540_s15 = smul.u32 432, %s1930_s10  ;;  %s1358_s20 = sshll.u32 %s1930_s10, 5 }
   0xf   : > { %s1908_s23 = scalar_lea.vmem %s1928_s2, %s1358_s20 }
  0x10   : > { %s1702_s18 = scalar_lea.vmem %s1926_s0, %s1540_s15 }
  0x11   : > { %v1549_v2 = vld [vmem:[%s1702_s18 + $0x40] sm:$0xff]   ;;  %v1553_v6 = vld [vmem:[%s1702_s18 + $0x48] sm:$0xff]   ;;  %v1557_v10 = vld [vmem:[%s1702_s18 + $0x50] sm:$0xff]  }
  0x12   : > { %v1550_v3 = vld [vmem:[%s1702_s18 + $0xc0] sm:$0xff]   ;;  %1390 = vmatprep.subr.bf16.mxu0 %v1549_v2  ;;  %v1554_v7 = vld [vmem:[%s1702_s18 + $0xc8] sm:$0xff]   ;;  %v1558_v11 = vld [vmem:[%s1702_s18 + $0xd0] sm:$0xff]  }
  0x13   : > { %v1551_v4 = vld [vmem:[%s1702_s18] sm:$0xff]   ;;  %1430 = vmatprep.subr.bf16.mxu1 %v1550_v3  ;;  %v1555_v8 = vld [vmem:[%s1702_s18 + $0x8] sm:$0xff]   ;;  %v1559_v12 = vld [vmem:[%s1702_s18 + $0x10] sm:$0xff]  }
  0x14   : > { %v1552_v5 = vld [vmem:[%s1702_s18 + $0x80] sm:$0xff]   ;;  %1391 = vmatpush3.bf16.msra.mxu0 %v1551_v4  ;;  %v1556_v9 = vld [vmem:[%s1702_s18 + $0x88] sm:$0xff]   ;;  %v1560_v13 = vld [vmem:[%s1702_s18 + $0x90] sm:$0xff]  }
  0x15   : > { %1431 = vmatpush3.bf16.msra.mxu1 %v1552_v5  ;;  %1392 = vmatprep.subr.bf16.mxu0 %v1553_v6  ;;  %v1561_v14 = vld [vmem:[%s1702_s18 + $0x58] sm:$0xff]   ;;  %v1565_v18 = vld [vmem:[%s1702_s18 + $0x60] sm:$0xff]   ;;  %v1569_v22 = vld [vmem:[%s1702_s18 + $0x68] sm:$0xff]  }
  0x16   : > { %1432 = vmatprep.subr.bf16.mxu1 %v1554_v7  ;;  %v1562_v15 = vld [vmem:[%s1702_s18 + $0xd8] sm:$0xff]   ;;  %v1566_v19 = vld [vmem:[%s1702_s18 + $0xe0] sm:$0xff]   ;;  %v1570_v23 = vld [vmem:[%s1702_s18 + $0xe8] sm:$0xff]  }
  0x17   : > { %v1563_v16 = vld [vmem:[%s1702_s18 + $0x18] sm:$0xff]   ;;  %v1567_v20 = vld [vmem:[%s1702_s18 + $0x20] sm:$0xff]   ;;  %v1571_v24 = vld [vmem:[%s1702_s18 + $0x28] sm:$0xff]  }
  0x18   : > { %1393 = vmatpush3.bf16.msra.mxu0 %v1555_v8  ;;  %v1564_v17 = vld [vmem:[%s1702_s18 + $0x98] sm:$0xff]   ;;  %v1568_v21 = vld [vmem:[%s1702_s18 + $0xa0] sm:$0xff]   ;;  %v1572_v25 = vld [vmem:[%s1702_s18 + $0xa8] sm:$0xff]  }
  0x19   : > { %1433 = vmatpush3.bf16.msra.mxu1 %v1556_v9  ;;  %1394 = vmatprep.subr.bf16.mxu0 %v1557_v10  ;;  %v1573_v26 = vld [vmem:[%s1702_s18 + $0x70] sm:$0xff]   ;;  %v1577_v30 = vld [vmem:[%s1702_s18 + $0x78] sm:$0xff]   ;;  %v1587_v36 = vld [vmem:[%s1702_s18 + $0x140] sm:$0xff]  }
  0x1a   : > { %1434 = vmatprep.subr.bf16.mxu1 %v1558_v11  ;;  %v1574_v27 = vld [vmem:[%s1702_s18 + $0xf0] sm:$0xff]   ;;  %v1578_v31 = vld [vmem:[%s1702_s18 + $0xf8] sm:$0xff]   ;;  %v1588_v38 = vld [vmem:[%s1702_s18 + $0x100] sm:$0xff]  }
  0x1b   : > { %v1575_v28 = vld [vmem:[%s1702_s18 + $0x30] sm:$0xff]   ;;  %v1579_v33 = vld [vmem:[%s1702_s18 + $0x38] sm:$0xff]   ;;  %v1589_v40 = vld [vmem:[%s1702_s18 + $0x148] sm:$0xff]  }
  0x1c   : > { %1395 = vmatpush3.bf16.msra.mxu0 %v1559_v12  ;;  %v1576_v29 = vld [vmem:[%s1702_s18 + $0xb0] sm:$0xff]   ;;  %v1580_v35 = vld [vmem:[%s1702_s18 + $0xb8] sm:$0xff]   ;;  %v1590_v41 = vld [vmem:[%s1702_s18 + $0x180] sm:$0xff]  }
  0x1d   : > { %1435 = vmatpush3.bf16.msra.mxu1 %v1560_v13  ;;  %1396 = vmatprep.subr.bf16.mxu0 %v1561_v14  ;;  %v1591_v42 = vld [vmem:[%s1702_s18 + $0x108] sm:$0xff]   ;;  %v1598_v44 = vld [vmem:[%s1702_s18 + $0x150] sm:$0xff]   ;;  %v1601_v49 = vld [vmem:[%s1702_s18 + $0x158] sm:$0xff]  }
  0x1e   : > { %1436 = vmatprep.subr.bf16.mxu1 %v1562_v15  ;;  %v1600_v46 = vld [vmem:[%s1702_s18 + $0x188] sm:$0xff]   ;;  %v1599_v48 = vld [vmem:[%s1702_s18 + $0x110] sm:$0xff]   ;;  %v1602_v52 = vld [vmem:[%s1702_s18 + $0x118] sm:$0xff]  }
  0x1f   : > { %v1607_v51 = vld [vmem:[%s1702_s18 + $0x190] sm:$0xff]   ;;  %v1610_v54 = vld [vmem:[%s1702_s18 + $0x160] sm:$0xff]   ;;  %v1613_v57 = vld [vmem:[%s1702_s18 + $0x198] sm:$0xff]  }
  0x20   : > { %1397 = vmatpush3.bf16.msra.mxu0 %v1563_v16  ;;  %v1611_v56 = vld [vmem:[%s1702_s18 + $0x120] sm:$0xff]   ;;  %v1612_v58 = vld [vmem:[%s1702_s18 + $0x168] sm:$0xff]   ;;  %v1621_v63 = vld [vmem:[%s1702_s18 + $0x170] sm:$0xff]  }
  0x21   : > { %1437 = vmatpush3.bf16.msra.mxu1 %v1564_v17  ;;  %1398 = vmatprep.subr.bf16.mxu0 %v1565_v18  ;;  %v1614_v61 = vld [vmem:[%s1702_s18 + $0x128] sm:$0xff]   ;;  %v1623_v1 = vld [vmem:[%s1702_s18 + $0x1a0] sm:$0xff]   ;;  %v1622_v2 = vld [vmem:[%s1702_s18 + $0x130] sm:$0xff]  }
  0x22   : > { %1438 = vmatprep.subr.bf16.mxu1 %v1566_v19  ;;  %v1624_v3 = vld [vmem:[%s1702_s18 + $0x178] sm:$0xff]   ;;  %v1626_v4 = vld [vmem:[%s1702_s18 + $0x1a8] sm:$0xff]   ;;  %v1629_v5 = vld [vmem:[%s1927_s1 + $0x14] ss:$28 sps:$4 sm:$0xff]  }
  0x23   : > { %v1630_v6 = vld [vmem:[%s1927_s1 + $0x18] ss:$28 sps:$4 sm:$0xff]   ;;  %v1627_v8 = vld [vmem:[%s1927_s1 + $0x10] ss:$28 sps:$4 sm:$0xff]   ;;  %v1638_v11 = vld [vmem:[%s1927_s1 + $0x88] ss:$28 sps:$4 sm:$0xff]  }
  0x24   : > { %1399 = vmatpush3.bf16.msra.mxu0 %v1567_v20  ;;  %v1625_v7 = vld [vmem:[%s1702_s18 + $0x138] sm:$0xff]   ;;  %v1631_v9 = vld [vmem:[%s1927_s1 + $0x50] ss:$28 sps:$4 sm:$0xff]   ;;  %v1634_v12 = vld [vmem:[%s1927_s1 + $0x48] ss:$28 sps:$4 sm:$0xff]  }
  0x25   : > { %1439 = vmatpush3.bf16.msra.mxu1 %v1568_v21  ;;  %1400 = vmatprep.subr.bf16.mxu0 %v1569_v22  ;;  %v1632_v10 = vld [vmem:[%s1927_s1 + $0x4c] ss:$28 sps:$4 sm:$0xff]   ;;  %v1635_v13 = vld [vmem:[%s1927_s1 + $0x84] ss:$28 sps:$4 sm:$0xff]   ;;  %v1640_v16 = vld [vmem:[%s1927_s1 + $0xbc] ss:$28 sps:$4 sm:$0xff]  }
  0x26   : > { %1440 = vmatprep.subr.bf16.mxu1 %v1570_v23  ;;  %v1639_v14 = vld [vmem:[%s1927_s1 + $0xc0] ss:$28 sps:$4 sm:$0xff]   ;;  %v1642_v17 = vld [vmem:[%s1927_s1 + $0xb8] ss:$28 sps:$4 sm:$0xff]  }
  0x27   : > { %v1637_v15 = vld [vmem:[%s1927_s1 + $0x80] ss:$28 sps:$4 sm:$0xff]  }
  0x28   : > { %1401 = vmatpush3.bf16.msra.mxu0 %v1571_v24 }
  0x29   : > { %1441 = vmatpush3.bf16.msra.mxu1 %v1572_v25  ;;  %1402 = vmatprep.subr.bf16.mxu0 %v1573_v26 }
  0x2a   : > { %1442 = vmatprep.subr.bf16.mxu1 %v1574_v27 }
  0x2c   : > { %1403 = vmatpush3.bf16.msra.mxu0 %v1575_v28 }
  0x2d   : > { %1443 = vmatpush3.bf16.msra.mxu1 %v1576_v29  ;;  %1404 = vmatprep.subr.bf16.mxu0 %v1577_v30 }
  0x2e   : > { %1444 = vmatprep.subr.bf16.mxu1 %v1578_v31 }
  0x30   : > { %1405 = vmatpush3.bf16.msra.mxu0 %v1579_v33 }
  0x31   : > { %1445 = vmatpush3.bf16.msra.mxu1 %v1580_v35  ;;  %1470 = vmatprep.subr.bf16.mxu0 %v1587_v36 }
  0x32   : > { %1520 = vmatprep.subr.bf16.mxu1 %v1590_v41 }
  0x33   : > { %795 = vmatmul.mubr.bf16.vlgmr.msra.gmra.mrb[0].mxu0 %v1581_v32 }
  0x34   : > { %860 = vmatmul.mubr.bf16.vlgmr.msra.gmra.mrb[0].mxu1 %v1584_v34  ;;  %1471 = vmatpush3.bf16.msra.mxu0 %v1588_v38 }
  0x35   : > { %1472 = vmatprep.subr.bf16.mxu0 %v1589_v40  ;;  %1521 = vmatpush3.bf16.msra.mxu1 %v1590_v41 }
  0x36   : > { %802 = vmatprep.mubr.bf16.mxu0 %v1592_v37  ;;  %867 = vmatprep.mubr.bf16.mxu1 %v1594_v39 }
  0x37   : > { %1522 = vmatprep.subr.bf16.mxu1 %v1600_v46 }
  0x38   : > { %1473 = vmatpush3.bf16.msra.mxu0 %v1591_v42 }
  0x39   : > { %1474 = vmatprep.subr.bf16.mxu0 %v1598_v44  ;;  %1523 = vmatpush3.bf16.msra.mxu1 %v1600_v46 }
  0x3a   : > { %1524 = vmatprep.subr.bf16.mxu1 %v1607_v51 }
  0x3b   : > { %803 = vmatmul.mubr.bf16.gmra.mrb[4].mxu0 %v1596_v43 }
  0x3c   : > { %868 = vmatmul.mubr.bf16.gmra.mrb[4].mxu1 %v1597_v45  ;;  %1475 = vmatpush3.bf16.msra.mxu0 %v1599_v48 }
  0x3d   : > { %1476 = vmatprep.subr.bf16.mxu0 %v1601_v49  ;;  %810 = vmatprep.mubr.bf16.mxu0 %v1603_v47 }
  0x3e   : > { %875 = vmatprep.mubr.bf16.mxu1 %v1605_v50  ;;  %1525 = vmatpush3.bf16.msra.mxu1 %v1607_v51 }
  0x3f   : > { %1526 = vmatprep.subr.bf16.mxu1 %v1613_v57 }
  0x40   : > { %1477 = vmatpush3.bf16.msra.mxu0 %v1602_v52 }
  0x41   : > { %1478 = vmatprep.subr.bf16.mxu0 %v1610_v54 }
  0x42   : > { %1527 = vmatpush3.bf16.msra.mxu1 %v1613_v57 }
  0x43   : > { %811 = vmatmul.mubr.bf16.gmra.mrb[8].mxu0 %v1608_v53  ;;  %1528 = vmatprep.subr.bf16.mxu1 %v1623_v1 }
  0x44   : > { %876 = vmatmul.mubr.bf16.gmra.mrb[8].mxu1 %v1609_v55  ;;  %1479 = vmatpush3.bf16.msra.mxu0 %v1611_v56 }
  0x45   : > { %1480 = vmatprep.subr.bf16.mxu0 %v1612_v58  ;;  %818 = vmatprep.mubr.bf16.mxu0 %v1615_v59 }
  0x46   : > { %883 = vmatprep.mubr.bf16.mxu1 %v1617_v60  ;;  %1529 = vmatpush3.bf16.msra.mxu1 %v1623_v1 }
  0x47   : > { %1530 = vmatprep.subr.bf16.mxu1 %v1626_v4 }
  0x48   : > { %1481 = vmatpush3.bf16.msra.mxu0 %v1614_v61 }
  0x49   : > { %1482 = vmatprep.subr.bf16.mxu0 %v1621_v63 }
  0x4a   : > { %1531 = vmatpush3.bf16.msra.mxu1 %v1626_v4 }
  0x4b   : > { %819 = vmatmul.mubr.bf16.gmra.mrb[12].mxu0 %v1619_v62 }
  0x4c   : > { %884 = vmatmul.mubr.bf16.gmra.mrb[12].mxu1 %v1620_v0  ;;  %1483 = vmatpush3.bf16.msra.mxu0 %v1622_v2 }
  0x4d   : > { %1484 = vmatprep.subr.bf16.mxu0 %v1624_v3  ;;  %924 = vmatprep.mubr.bf16.mxu0 %v1629_v5 }
  0x4e   : > { %1532 = vmatprep.mubr.msk.bf16.mxu1 %vm749_vm0, %v1630_v6 }
  0x50   : > { %1485 = vmatpush3.bf16.msra.mxu0 %v1625_v7 }
  0x53   : > { %925 = vmatmul.mubr.bf16.vlgmr.msra.gmra.mrb[16].mxu0 %v1627_v8 }
  0x54   : > { %1533 = vmatmul.mubr.msk.bf16.vlgmr.msra.gmra.mrb[16].mxu1 %vm749_vm0, %v1631_v9  ;;  %932 = vmatprep.mubr.bf16.mxu0 %v1632_v10 }
  0x55   : > { %1536 = vmatprep.mubr.msk.bf16.mxu1 %vm749_vm0, %v1638_v11 }
  0x5b   : > { %933 = vmatmul.mubr.bf16.gmra.mrb[20].mxu0 %v1634_v12 }
  0x5c   : > { %940 = vmatprep.mubr.bf16.mxu0 %v1635_v13  ;;  %1537 = vmatmul.mubr.msk.bf16.gmra.mrb[20].mxu1 %vm749_vm0, %v1639_v14 }
  0x63   : > { %941 = vmatmul.mubr.bf16.gmra.mrb[24].mxu0 %v1637_v15 }
  0x64   : > { %948 = vmatprep.mubr.bf16.mxu0 %v1640_v16 }
  0x6b   : > { %949 = vmatmul.mubr.bf16.gmra.mrb[28].mxu0 %v1642_v17 }
 0x106   : > { %v1406_v18 = vpop.f32.mrb[0].mxu0 }
 0x107   : > { %v1446_v19 = vpop.f32.mrb[0].mxu1  ;;  %v1407_v20 = vpop.f32.mrb[1].mxu0 }
 0x108   : > { %v1408_v21 = vadd.f32 %v1407_v20, %v1406_v18  ;;  %v1447_v22 = vpop.f32.mrb[1].mxu1  ;;  %v1409_v23 = vpop.f32.mrb[2].mxu0 }
 0x109   : > { %v1448_v24 = vadd.f32 %v1447_v22, %v1446_v19  ;;  %v1449_v25 = vpop.f32.mrb[2].mxu1  ;;  %v1410_v26 = vpop.f32.mrb[3].mxu0 }
 0x10a   : > { %v1411_v27 = vadd.f32 %v1410_v26, %v1409_v23  ;;  %v1450_v28 = vpop.f32.mrb[3].mxu1 }
 0x10b   : > { %v862_v29 = vadd.f32 %v1448_v24, %v1408_v21  ;;  %v1451_v30 = vadd.f32 %v1450_v28, %v1449_v25 }
 0x10d   : > { %v865_v31 = vadd.f32 %v1451_v30, %v1411_v27 }
 0x10e   : > { %v1412_v32 = vpop.f32.mrb[4].mxu0 }
 0x10f   : > { %v1452_v33 = vpop.f32.mrb[4].mxu1  ;;  %v1413_v34 = vpop.f32.mrb[5].mxu0 }
 0x110   : > { %v1414_v35 = vadd.f32 %v1413_v34, %v1412_v32  ;;  %v1453_v36 = vpop.f32.mrb[5].mxu1  ;;  %v1415_v37 = vpop.f32.mrb[6].mxu0 }
 0x111   : > { %v1454_v38 = vadd.f32 %v1453_v36, %v1452_v33  ;;  %v1455_v39 = vpop.f32.mrb[6].mxu1  ;;  %v1416_v40 = vpop.f32.mrb[7].mxu0 }
 0x112   : > { %v1417_v41 = vadd.f32 %v1416_v40, %v1415_v37  ;;  %v1456_v42 = vpop.f32.mrb[7].mxu1 }
 0x113   : > { %v870_v43 = vadd.f32 %v1454_v38, %v1414_v35  ;;  %v1457_v44 = vadd.f32 %v1456_v42, %v1455_v39 }
 0x115   : > { %v873_v45 = vadd.f32 %v1457_v44, %v1417_v41 }
 0x116   : > { %v1418_v46 = vpop.f32.mrb[8].mxu0 }
 0x117   : > { %v1458_v47 = vpop.f32.mrb[8].mxu1  ;;  %v1419_v48 = vpop.f32.mrb[9].mxu0 }
 0x118   : > { %v1420_v49 = vadd.f32 %v1419_v48, %v1418_v46  ;;  %v1459_v50 = vpop.f32.mrb[9].mxu1  ;;  %v1421_v51 = vpop.f32.mrb[10].mxu0 }
 0x119   : > { %v1460_v52 = vadd.f32 %v1459_v50, %v1458_v47  ;;  %v1461_v53 = vpop.f32.mrb[10].mxu1  ;;  %v1422_v54 = vpop.f32.mrb[11].mxu0 }
 0x11a   : > { %v1423_v55 = vadd.f32 %v1422_v54, %v1421_v51  ;;  %v1462_v56 = vpop.f32.mrb[11].mxu1 }
 0x11b   : > { %v878_v57 = vadd.f32 %v1460_v52, %v1420_v49  ;;  %v1463_v58 = vadd.f32 %v1462_v56, %v1461_v53 }
 0x11d   : > { %v881_v59 = vadd.f32 %v1463_v58, %v1423_v55 }
 0x11e   : > { %v1424_v60 = vpop.f32.mrb[12].mxu0 }
 0x11f   : > { %v1464_v61 = vpop.f32.mrb[12].mxu1  ;;  %v1425_v62 = vpop.f32.mrb[13].mxu0 }
 0x120   : > { %v1426_v63 = vadd.f32 %v1425_v62, %v1424_v60  ;;  %v1465_v0 = vpop.f32.mrb[13].mxu1  ;;  %v1427_v1 = vpop.f32.mrb[14].mxu0 }
 0x121   : > { %v1466_v2 = vadd.f32 %v1465_v0, %v1464_v61  ;;  %v1467_v3 = vpop.f32.mrb[14].mxu1  ;;  %v1428_v4 = vpop.f32.mrb[15].mxu0 }
 0x122   : > { %v1429_v5 = vadd.f32 %v1428_v4, %v1427_v1  ;;  %v1468_v6 = vpop.f32.mrb[15].mxu1 }
 0x123   : > { %v886_v7 = vadd.f32 %v1466_v2, %v1426_v63  ;;  %v1469_v8 = vadd.f32 %v1468_v6, %v1467_v3 }
 0x125   : > { %v889_v9 = vadd.f32 %v1469_v8, %v1429_v5 }
 0x126   : > { %v1486_v10 = vpop.f32.mrb[16].mxu0 }
 0x127   : > { %v1487_v11 = vpop.f32.mrb[17].mxu0  ;;  %v1534_v12 = vpop.f32.mrb[16].mxu1 }
 0x128   : > { %v1488_v13 = vadd.f32 %v1487_v11, %v1486_v10  ;;  %v1489_v14 = vpop.f32.mrb[18].mxu0  ;;  %v991_v15 = vpop.f32.mrb[17].mxu1 }
 0x129   : > { %v1490_v16 = vpop.f32.mrb[19].mxu0  ;;  %v1535_v17 = vpop.f32.mrb[18].mxu1 }
 0x12a   : > { %v1491_v18 = vadd.f32 %v1490_v16, %v1489_v14  ;;  %v927_v19 = vadd.f32 %v1488_v13, %v862_v29  ;;  %v994_v20 = vpop.f32.mrb[19].mxu1 }
 0x12c   : > { %v1840_v21 = vadd.f32 %v991_v15, %v927_v19  ;;  %v930_v22 = vadd.f32 %v1491_v18, %v865_v31 }
 0x12e   : > { %v1842_v23 = vadd.f32 %v994_v20, %v930_v22  ;;  %v1492_v24 = vpop.f32.mrb[20].mxu0  ;;  %1022 = vadd.xlane.f32.xlu0 %v1840_v21  ;;  %v1047_v38 = vmul.f32 %v1840_v21, %v1840_v21 }
 0x12f   : > { %v1493_v25 = vpop.f32.mrb[21].mxu0  ;;  %v1538_v26 = vpop.f32.mrb[20].mxu1 }
 0x130   : > { %v1494_v27 = vadd.f32 %v1493_v25, %v1492_v24  ;;  %v1495_v28 = vpop.f32.mrb[22].mxu0  ;;  %v1048_v30 = vmul.f32 %v1842_v23, %v1842_v23  ;;  %v1007_v32 = vpop.f32.mrb[21].mxu1 }
 0x131   : > { %v1496_v33 = vpop.f32.mrb[23].mxu0  ;;  %v1539_v34 = vpop.f32.mrb[22].mxu1 }
 0x132   : > { %v935_v29 = vadd.f32 %v1494_v27, %v870_v43  ;;  %v1497_v35 = vadd.f32 %v1496_v33, %v1495_v28  ;;  %1057 = vadd.xlane.f32.xlu1 %v1048_v30  ;;  %1024 = vadd.xlane.f32.xlu0 %v1842_v23  ;;  %v1010_v31 = vpop.f32.mrb[23].mxu1 }
 0x134   : > { %v938_v36 = vadd.f32 %v1497_v35, %v873_v45  ;;  %v1848_v37 = vadd.f32 %v1534_v12, %v935_v29 }
 0x136   : > { %v1498_v39 = vpop.f32.mrb[24].mxu0  ;;  %1026 = vadd.xlane.f32.xlu1 %v1848_v37  ;;  %1055 = vadd.xlane.f32.xlu0 %v1047_v38  ;;  %v1853_v40 = vadd.f32 %v1535_v17, %v938_v36  ;;  %v1049_v44 = vmul.f32 %v1848_v37, %v1848_v37 }
 0x137   : > { %v1499_v41 = vpop.f32.mrb[25].mxu0 }
 0x138   : > { %v1500_v42 = vadd.f32 %v1499_v41, %v1498_v39  ;;  %v1501_v43 = vpop.f32.mrb[26].mxu0  ;;  %v1050_v50 = vmul.f32 %v1853_v40, %v1853_v40 }
 0x139   : > { %v1502_v46 = vpop.f32.mrb[27].mxu0 }
 0x13a   : > { %v1503_v47 = vadd.f32 %v1502_v46, %v1501_v43  ;;  %1028 = vadd.xlane.f32.xlu1 %v1853_v40  ;;  %1059 = vadd.xlane.f32.xlu0 %v1049_v44  ;;  %v943_v45 = vadd.f32 %v1500_v42, %v878_v57 }
 0x13c   : > { %v1858_v48 = vadd.f32 %v1007_v32, %v943_v45  ;;  %v946_v49 = vadd.f32 %v1503_v47, %v881_v59 }
 0x13e   : > { %v1862_v51 = vadd.f32 %v1010_v31, %v946_v49  ;;  %v1504_v52 = vpop.f32.mrb[28].mxu0  ;;  %1061 = vadd.xlane.f32.xlu1 %v1050_v50  ;;  %1030 = vadd.xlane.f32.xlu0 %v1858_v48  ;;  %v1051_v56 = vmul.f32 %v1858_v48, %v1858_v48 }
 0x13f   : > { %v1505_v53 = vpop.f32.mrb[29].mxu0 }
 0x140   : > { %v1506_v54 = vadd.f32 %v1505_v53, %v1504_v52  ;;  %v1507_v55 = vpop.f32.mrb[30].mxu0  ;;  %v1052_v61 = vmul.f32 %v1862_v51, %v1862_v51 }
 0x141   : > { %v1508_v58 = vpop.f32.mrb[31].mxu0 }
 0x142   : > { %v951_v57 = vadd.f32 %v1506_v54, %v886_v7  ;;  %v1509_v60 = vadd.f32 %v1508_v58, %v1507_v55  ;;  %1032 = vadd.xlane.f32.xlu1 %v1862_v51  ;;  %1063 = vadd.xlane.f32.xlu0 %v1051_v56 }
 0x144   : > { %v954_v59 = vadd.f32 %v1509_v60, %v889_v9  ;;  %v1870_v62 = vadd.f32 %v1538_v26, %v951_v57 }
 0x146   : > { %1065 = vadd.xlane.f32.xlu1 %v1052_v61  ;;  %1034 = vadd.xlane.f32.xlu0 %v1870_v62  ;;  %v1873_v63 = vadd.f32 %v1539_v34, %v954_v59  ;;  %v1053_v0 = vmul.f32 %v1870_v62, %v1870_v62 }
 0x148   : > { %v1054_v1 = vmul.f32 %v1873_v63, %v1873_v63 }
 0x14a   : > { %1036 = vadd.xlane.f32.xlu1 %v1873_v63  ;;  %1067 = vadd.xlane.f32.xlu0 %v1053_v0 }
 0x14e   : > { %1069 = vadd.xlane.f32.xlu1 %v1054_v1 }
 0x1bb   : > { %v1023_v2 = vpop.xlane.xlu0 %1022 }
 0x1bc   : > { %v1039_v5 = vmul.f32 0.0078125, %v1023_v2 }
 0x1be   : > { %v1079_v11 = vmul.f32 %v1039_v5, %v1039_v5  ;;  %v1119_v56 = vsub.f32 %v1840_v21, %v1039_v5 }
 0x1bf   : > { %v1058_v3 = vpop.xlane.xlu1 %1057  ;;  %v1025_v4 = vpop.xlane.xlu0 %1024 }
 0x1c0   : > { %v1040_v6 = vmul.f32 0.0078125, %v1025_v4  ;;  %v1072_v7 = vmul.f32 0.0078125, %v1058_v3 }
 0x1c2   : > { %v1080_v8 = vmul.f32 %v1040_v6, %v1040_v6  ;;  %v1120_v47 = vsub.f32 %v1842_v23, %v1040_v6 }
 0x1c3   : > { %v1027_v9 = vpop.xlane.xlu1 %1026  ;;  %v1056_v10 = vpop.xlane.xlu0 %1055 }
 0x1c4   : > { %v1088_v12 = vsub.f32 %v1072_v7, %v1080_v8  ;;  %v1071_v13 = vmul.f32 0.0078125, %v1056_v10  ;;  %v1880_v14 = vmul.f32 0.0078125, %v1027_v9 }
 0x1c6   : > { %v1096_v15 = vmax.f32 %v1088_v12, 0.0  ;;  %v1087_v16 = vsub.f32 %v1071_v13, %v1079_v11  ;;  %v1081_v25 = vmul.f32 %v1880_v14, %v1880_v14  ;;  %v1121_v21 = vsub.f32 %v1848_v37, %v1880_v14 }
 0x1c7   : > { %v1029_v17 = vpop.xlane.xlu1 %1028  ;;  %v1060_v18 = vpop.xlane.xlu0 %1059 }
 0x1c8   : > { %v1104_v19 = vadd.f32 1e-05, %v1096_v15  ;;  %v1095_v20 = vmax.f32 %v1087_v16, 0.0  ;;  %v1882_v22 = vmul.f32 0.0078125, %v1029_v17  ;;  %v1073_v24 = vmul.f32 0.0078125, %v1060_v18 }
 0x1ca   : > { %1643 = vrsqrt.f32 %v1104_v19  ;;  %v1103_v26 = vadd.f32 1e-05, %v1095_v20  ;;  %v1089_v27 = vsub.f32 %v1073_v24, %v1081_v25  ;;  %v1082_v32 = vmul.f32 %v1882_v22, %v1882_v22 }
 0x1cb   : > { %v1062_v28 = vpop.xlane.xlu1 %1061  ;;  %v1031_v30 = vpop.xlane.xlu0 %1030  ;;  %v1122_v17 = vsub.f32 %v1853_v40, %v1882_v22 }
 0x1cc   : > { %1645 = vrsqrt.f32 %v1103_v26  ;;  %v1074_v33 = vmul.f32 0.0078125, %v1062_v28  ;;  %v1888_v34 = vmul.f32 0.0078125, %v1031_v30  ;;  %v1097_v29 = vmax.f32 %v1089_v27, 0.0 }
 0x1ce   : > { %v1090_v35 = vsub.f32 %v1074_v33, %v1082_v32  ;;  %v1105_v31 = vadd.f32 1e-05, %v1097_v29  ;;  %v1083_v41 = vmul.f32 %v1888_v34, %v1888_v34  ;;  %v1123_v27 = vsub.f32 %v1858_v48, %v1888_v34 }
 0x1cf   : > { %v1033_v36 = vpop.xlane.xlu1 %1032  ;;  %v1064_v38 = vpop.xlane.xlu0 %1063 }
 0x1d0   : > { %v1098_v39 = vmax.f32 %v1090_v35, 0.0  ;;  %v1892_v42 = vmul.f32 0.0078125, %v1033_v36  ;;  %v1075_v43 = vmul.f32 0.0078125, %v1064_v38  ;;  %1647 = vrsqrt.f32 %v1105_v31 }
 0x1d2   : > { %v1106_v44 = vadd.f32 1e-05, %v1098_v39  ;;  %v1091_v46 = vsub.f32 %v1075_v43, %v1083_v41  ;;  %v1084_v45 = vmul.f32 %v1892_v42, %v1892_v42  ;;  %v1124_v35 = vsub.f32 %v1862_v51, %v1892_v42 }
 0x1d3   : > { %v1066_v49 = vpop.xlane.xlu1 %1065  ;;  %v1035_v50 = vpop.xlane.xlu0 %1034 }
 0x1d4   : > { %v1644_v52 = vpop.eup %1643  ;;  %1649 = vrsqrt.f32 %v1106_v44  ;;  %v1099_v53 = vmax.f32 %v1091_v46, 0.0  ;;  %v1076_v54 = vmul.f32 0.0078125, %v1066_v49  ;;  %v1897_v55 = vmul.f32 0.0078125, %v1035_v50 }
 0x1d5   : > { %v1128_v58 = vmul.f32 %v1644_v52, %v1120_v47 }
 0x1d6   : > { %v1646_v57 = vpop.eup %1645  ;;  %v1107_v60 = vadd.f32 1e-05, %v1099_v53  ;;  %v1092_v59 = vsub.f32 %v1076_v54, %v1084_v45  ;;  %v1085_v0 = vmul.f32 %v1897_v55, %v1897_v55  ;;  %v1125_v34 = vsub.f32 %v1870_v62, %v1897_v55 }
 0x1d7   : > { %v1144_v61 = vmul.f32 0.01, %v1128_v58  ;;  %v1127_v23 = vmul.f32 %v1646_v57, %v1119_v56  ;;  %v1037_v1 = vpop.xlane.xlu1 %1036  ;;  %v1068_v2 = vpop.xlane.xlu0 %1067  ;;  %vm1136_vm1 = vcmp.ge.f32.partialorder %v1128_v58, 0.0 }
 0x1d8   : > { %1651 = vrsqrt.f32 %v1107_v60  ;;  %v1100_v3 = vmax.f32 %v1092_v59, 0.0  ;;  %v1077_v4 = vmul.f32 0.0078125, %v1068_v2  ;;  %v1046_v7 = vmul.f32 0.0078125, %v1037_v1 }
 0x1d9   : > { %vm1135_vm2 = vcmp.ge.f32.partialorder %v1127_v23, 0.0  ;;  %v1143_v6 = vmul.f32 0.01, %v1127_v23  ;;  %v1152_v10 = vsel %vm1136_vm1, %v1128_v58, %v1144_v61 }
 0x1da   : > { %v1108_v5 = vadd.f32 1e-05, %v1100_v3  ;;  %v1093_v8 = vsub.f32 %v1077_v4, %v1085_v0  ;;  %v1648_v9 = vpop.eup %1647  ;;  %v1086_v37 = vmul.f32 %v1046_v7, %v1046_v7  ;;  %v1126_v51 = vsub.f32 %v1873_v63, %v1046_v7 }
 0x1db   : > { %v1151_v11 = vsel %vm1135_vm2, %v1127_v23, %v1143_v6  ;;  %v1070_v12 = vpop.xlane.xlu1 %1069  ;;  %v1129_v15 = vmul.f32 %v1648_v9, %v1121_v21 }
 0x1dc   : > { %v1370_v13 = vpack.c.bf16 %v1152_v10, %v1151_v11  ;;  %1653 = vrsqrt.f32 %v1108_v5  ;;  %v1101_v16 = vmax.f32 %v1093_v8, 0.0  ;;  %v1078_v14 = vmul.f32 0.0078125, %v1070_v12 }
 0x1dd   : > { %v1145_v20 = vmul.f32 0.01, %v1129_v15  ;;  %vm1137_vm3 = vcmp.ge.f32.partialorder %v1129_v15, 0.0 }
 0x1de   : > { %v1650_v18 = vpop.eup %1649  ;;  %1371 = vst [vmem:[%s1908_s23] sm:$0xff] %v1370_v13   ;;  %v1109_v19 = vadd.f32 1e-05, %v1101_v16  ;;  %v1094_v25 = vsub.f32 %v1078_v14, %v1086_v37 }
 0x1df   : > { %v1130_v24 = vmul.f32 %v1650_v18, %v1122_v17  ;;  %v1153_v32 = vsel %vm1137_vm3, %v1129_v15, %v1145_v20 }
 0x1e0   : > { %1655 = vrsqrt.f32 %v1109_v19  ;;  %v1102_v28 = vmax.f32 %v1094_v25, 0.0 }
 0x1e1   : > { %vm1138_vm4 = vcmp.ge.f32.partialorder %v1130_v24, 0.0  ;;  %v1146_v26 = vmul.f32 0.01, %v1130_v24 }
 0x1e2   : > { %v1652_v30 = vpop.eup %1651  ;;  %v1110_v33 = vadd.f32 1e-05, %v1102_v28 }
 0x1e3   : > { %v1154_v40 = vsel %vm1138_vm4, %v1130_v24, %v1146_v26  ;;  %v1131_v22 = vmul.f32 %v1652_v30, %v1123_v27 }
 0x1e4   : > { %v1375_v29 = vpack.c.bf16 %v1154_v40, %v1153_v32  ;;  %1657 = vrsqrt.f32 %v1110_v33 }
 0x1e5   : > { %v1147_v36 = vmul.f32 0.01, %v1131_v22  ;;  %vm1139_vm5 = vcmp.ge.f32.partialorder %v1131_v22, 0.0 }
 0x1e6   : > { %v1654_v31 = vpop.eup %1653  ;;  %1387 = vst [vmem:[%s1908_s23 + $0x8] sm:$0xff] %v1375_v29  }
 0x1e7   : > { %v1132_v38 = vmul.f32 %v1654_v31, %v1124_v35  ;;  %v1155_v41 = vsel %vm1139_vm5, %v1131_v22, %v1147_v36 }
 0x1e9   : > { %vm1140_vm6 = vcmp.ge.f32.partialorder %v1132_v38, 0.0  ;;  %v1148_v39 = vmul.f32 0.01, %v1132_v38 }
 0x1ea   : > { %v1656_v48 = vpop.eup %1655 }
 0x1eb   : > { %v1156_v43 = vsel %vm1140_vm6, %v1132_v38, %v1148_v39  ;;  %v1133_v46 = vmul.f32 %v1656_v48, %v1125_v34 }
 0x1ec   : > { %v1380_v44 = vpack.c.bf16 %v1156_v43, %v1155_v41 }
 0x1ed   : > { %v1149_v47 = vmul.f32 0.01, %v1133_v46  ;;  %vm1141_vm7 = vcmp.ge.f32.partialorder %v1133_v46, 0.0 }
 0x1ee   : > { %1388 = vst [vmem:[%s1908_s23 + $0x10] sm:$0xff] %v1380_v44   ;;  %v1658_v42 = vpop.eup %1657 }
 0x1ef   : > { %v1134_v45 = vmul.f32 %v1658_v42, %v1126_v51  ;;  %v1157_v50 = vsel %vm1141_vm7, %v1133_v46, %v1149_v47 }
 0x1f1   : > { %vm1142_vm8 = vcmp.ge.f32.partialorder %v1134_v45, 0.0  ;;  %v1150_v49 = vmul.f32 0.01, %v1134_v45 }
 0x1f3   : > { %v1158_v52 = vsel %vm1142_vm8, %v1134_v45, %v1150_v49 }
 0x1f4   : > { %v1385_v53 = vpack.c.bf16 %v1158_v52, %v1157_v50 }
 0x1f6   : > { %1389 = vst [vmem:[%s1908_s23 + $0x18] sm:$0xff] %v1385_v53  }
 0x1f7 PF: > { %s12_s9 = sadd.s32 1, %s1665_s9  }
 0x1f8   : > { %p9_p4 = scmp.ge.s32.totalorder %s12_s9, 4  }
 0x1fa   :  { %11 = sbr.rel (!%p9_p4) target bundleno = 1 (0x1), region = 58 }

// kernel: discriminator_forward.8
= control target key start
LH: loop header
LB: loop body
LE: loop exit
PB: predicated region body
PF: predicated region fallthrough
CT: control target
= control target key end

     0   :  { %s3832_s9 = smov 0   ;;  %s4669_s0 = inlined_call_operand.vmem [shape: bf16[2,1728,16], index: 0, kind: input, shape index: {}]   ;;  %s4670_s1 = inlined_call_operand.vmem [shape: bf16[128,1728], index: 1, kind: input, shape index: {}]   ;;  %s4671_s2 = inlined_call_operand.vmem [shape: bf16[2,128,16], index: 2, kind: output, shape index: {}]  }
   0x1 LB: > { %s2819_s10 = sadd.s32 4294967295, %s3814_s9   ;;  %p2823_p0 = scmp.ge.s32.totalorder %s3814_s9, 1  ;;  %s3814_s9 = sphi %s3832_s9, %s12_s9  }
   0x2   : > { %p112_p1 = scmp.lt.s32.totalorder %s3814_s9, 3 }
   0x4   : > { %p113_p2 = pnand %p2823_p0, %p112_p1 }
   0x5   : > { %p134_p3 = scmp.lt.s32.totalorder (!%p113_p2), %s2819_s10, 1  ;;  %v3518_v0 = vld [vmem:[%s4670_s1 + $0x1c4] ss:$56 sps:$4 sm:$0xff] (!%p113_p2)   ;;  %v3516_v19 = vld [vmem:[%s4670_s1 + $0x1c0] ss:$56 sps:$4 sm:$0xff] (!%p113_p2)   ;;  %vm1673_vm0 = vcmask (!%p113_p2), 523264  }
   0x6   : > { %116 = sbr.rel (%p113_p2) target bundleno = 663 (0x297), region = 28  ;;  %v3522_v1 = vld [vmem:[%s4670_s1 + $0x4] ss:$56 sps:$4 sm:$0xff] (!%p113_p2)   ;;  %1762 = vmatprep.mubr.bf16.mxu1 (!%p113_p2), %v3518_v0  ;;  %v3520_v20 = vld [vmem:[%s4670_s1] ss:$56 sps:$4 sm:$0xff] (!%p113_p2)   ;;  %vm2377_vm1 = vcmask (!%p113_p2), 130048  }
   0x7   : > { %1730 = vmatprep.mubr.bf16.mxu0 (!%p113_p2), %v3522_v1  ;;  %v3529_v25 = vld [vmem:[%s4670_s1 + $0x234] ss:$56 sps:$4 sm:$0xff] (!%p113_p2)   ;;  %v3532_v31 = vld [vmem:[%s4670_s1 + $0x230] ss:$56 sps:$4 sm:$0xff] (!%p113_p2)   ;;  %v3543_v37 = vld [vmem:[%s4670_s1 + $0x2a4] ss:$56 sps:$4 sm:$0xff] (!%p113_p2)  }
   0x8   : > { %v3534_v27 = vld [vmem:[%s4670_s1 + $0x74] ss:$56 sps:$4 sm:$0xff] (!%p113_p2)   ;;  %v3537_v32 = vld [vmem:[%s4670_s1 + $0x70] ss:$56 sps:$4 sm:$0xff] (!%p113_p2)   ;;  %v3548_v40 = vld [vmem:[%s4670_s1 + $0xe4] ss:$56 sps:$4 sm:$0xff] (!%p113_p2)  }
   0x9   : > { %v3546_v43 = vld [vmem:[%s4670_s1 + $0x2a0] ss:$56 sps:$4 sm:$0xff] (!%p113_p2)   ;;  %v3557_v50 = vld [vmem:[%s4670_s1 + $0x314] ss:$56 sps:$4 sm:$0xff] (!%p113_p2)   ;;  %v3560_v55 = vld [vmem:[%s4670_s1 + $0x310] ss:$56 sps:$4 sm:$0xff] (!%p113_p2)  }
   0xa   : > { %v3551_v46 = vld [vmem:[%s4670_s1 + $0xe0] ss:$56 sps:$4 sm:$0xff] (!%p113_p2)   ;;  %v3562_v51 = vld [vmem:[%s4670_s1 + $0x154] ss:$56 sps:$4 sm:$0xff] (!%p113_p2)   ;;  %v3565_v56 = vld [vmem:[%s4670_s1 + $0x150] ss:$56 sps:$4 sm:$0xff] (!%p113_p2)  }
   0xb   : > { %v3573_v62 = vld [vmem:[%s4670_s1 + $0xc] ss:$56 sps:$4 sm:$0xff] (!%p113_p2)   ;;  %vm2747_vm2 = vcmask (!%p113_p2), 125952  }
   0xc   : > { %v3578_v63 = vld [vmem:[%s4670_s1 + $0x14] ss:$56 sps:$4 sm:$0xff] (!%p113_p2)  }
   0xd   : > { %s4673_s10 = smov (!%p134_p3, %s2819_s10), 1 }
   0xe   : > { %s3490_s15 = smul.u32 864, %s4673_s10  ;;  %s3073_s8 = sshll.u32 %s4673_s10, 6 }
   0xf   : > { %s4573_s13 = scalar_lea.vmem %s4671_s2, %s3073_s8 }
  0x10   : > { %s3852_s18 = scalar_lea.vmem %s4669_s0, %s3490_s15 }
  0x11   : > { %v3500_v2 = vld [vmem:[%s3852_s18 + $0x40] sm:$0xff]   ;;  %v3502_v4 = vld [vmem:[%s3852_s18 + $0x48] sm:$0xff]   ;;  %v3504_v6 = vld [vmem:[%s3852_s18 + $0x50] sm:$0xff]  }
  0x12   : > { %v3501_v3 = vld [vmem:[%s3852_s18] sm:$0xff]   ;;  %3474 = vmatprep.subr.bf16.mxu1 %v3500_v2  ;;  %3090 = vmatprep.subr.bf16.mxu0 %v3500_v2  ;;  %v3503_v5 = vld [vmem:[%s3852_s18 + $0x8] sm:$0xff]   ;;  %v3505_v7 = vld [vmem:[%s3852_s18 + $0x10] sm:$0xff]  }
  0x13   : > { %3482 = vmatpush3.bf16.msra.mxu1 %v3501_v3  ;;  %3091 = vmatpush3.bf16.msra.mxu0 %v3501_v3  ;;  %v3506_v8 = vld [vmem:[%s3852_s18 + $0x58] sm:$0xff]   ;;  %v3508_v10 = vld [vmem:[%s3852_s18 + $0x60] sm:$0xff]   ;;  %v3510_v12 = vld [vmem:[%s3852_s18 + $0x68] sm:$0xff]  }
  0x14   : > { %3475 = vmatprep.subr.bf16.mxu1 %v3502_v4  ;;  %3092 = vmatprep.subr.bf16.mxu0 %v3502_v4  ;;  %v3507_v9 = vld [vmem:[%s3852_s18 + $0x18] sm:$0xff]   ;;  %v3509_v11 = vld [vmem:[%s3852_s18 + $0x20] sm:$0xff]   ;;  %v3511_v13 = vld [vmem:[%s3852_s18 + $0x28] sm:$0xff]  }
  0x15   : > { %v3512_v14 = vld [vmem:[%s3852_s18 + $0x70] sm:$0xff]   ;;  %v3514_v16 = vld [vmem:[%s3852_s18 + $0x78] sm:$0xff]   ;;  %v3519_v18 = vld [vmem:[%s3852_s18 + $0xc0] sm:$0xff]  }
  0x16   : > { %v3513_v15 = vld [vmem:[%s3852_s18 + $0x30] sm:$0xff]   ;;  %v3515_v17 = vld [vmem:[%s3852_s18 + $0x38] sm:$0xff]   ;;  %v3524_v21 = vld [vmem:[%s3852_s18 + $0x140] sm:$0xff]  }
  0x17   : > { %3483 = vmatpush3.bf16.msra.mxu1 %v3503_v5  ;;  %3093 = vmatpush3.bf16.msra.mxu0 %v3503_v5  ;;  %v3523_v22 = vld [vmem:[%s3852_s18 + $0x80] sm:$0xff]   ;;  %v3526_v24 = vld [vmem:[%s3852_s18 + $0xc8] sm:$0xff]   ;;  %v3533_v30 = vld [vmem:[%s3852_s18 + $0xd0] sm:$0xff]  }
  0x18   : > { %3476 = vmatprep.subr.bf16.mxu1 %v3504_v6  ;;  %3094 = vmatprep.subr.bf16.mxu0 %v3504_v6  ;;  %v3525_v23 = vld [vmem:[%s3852_s18 + $0x100] sm:$0xff]   ;;  %v3528_v26 = vld [vmem:[%s3852_s18 + $0x148] sm:$0xff]   ;;  %v3538_v33 = vld [vmem:[%s3852_s18 + $0x150] sm:$0xff]  }
  0x19   : > { %v3527_v28 = vld [vmem:[%s3852_s18 + $0x88] sm:$0xff]   ;;  %v3536_v34 = vld [vmem:[%s3852_s18 + $0x90] sm:$0xff]   ;;  %v3540_v36 = vld [vmem:[%s3852_s18 + $0xd8] sm:$0xff]  }
  0x1a   : > { %v3531_v29 = vld [vmem:[%s3852_s18 + $0x108] sm:$0xff]   ;;  %v3539_v35 = vld [vmem:[%s3852_s18 + $0x110] sm:$0xff]   ;;  %v3542_v38 = vld [vmem:[%s3852_s18 + $0x158] sm:$0xff]  }
  0x1b   : > { %3484 = vmatpush3.bf16.msra.mxu1 %v3505_v7  ;;  %3095 = vmatpush3.bf16.msra.mxu0 %v3505_v7  ;;  %v3541_v39 = vld [vmem:[%s3852_s18 + $0x98] sm:$0xff]   ;;  %v3547_v42 = vld [vmem:[%s3852_s18 + $0xe0] sm:$0xff]   ;;  %v3554_v48 = vld [vmem:[%s3852_s18 + $0xe8] sm:$0xff]  }
  0x1c   : > { %3477 = vmatprep.subr.bf16.mxu1 %v3506_v8  ;;  %3096 = vmatprep.subr.bf16.mxu0 %v3506_v8  ;;  %v3545_v41 = vld [vmem:[%s3852_s18 + $0x118] sm:$0xff]   ;;  %v3552_v44 = vld [vmem:[%s3852_s18 + $0x160] sm:$0xff]   ;;  %v3556_v49 = vld [vmem:[%s3852_s18 + $0x168] sm:$0xff]  }
  0x1d   : > { %v3550_v45 = vld [vmem:[%s3852_s18 + $0xa0] sm:$0xff]   ;;  %v3555_v52 = vld [vmem:[%s3852_s18 + $0xa8] sm:$0xff]   ;;  %v3561_v54 = vld [vmem:[%s3852_s18 + $0xf0] sm:$0xff]  }
  0x1e   : > { %v3553_v47 = vld [vmem:[%s3852_s18 + $0x120] sm:$0xff]   ;;  %v3559_v53 = vld [vmem:[%s3852_s18 + $0x128] sm:$0xff]   ;;  %v3566_v57 = vld [vmem:[%s3852_s18 + $0x170] sm:$0xff]  }
  0x1f   : > { %3485 = vmatpush3.bf16.msra.mxu1 %v3507_v9  ;;  %3097 = vmatpush3.bf16.msra.mxu0 %v3507_v9  ;;  %v3564_v58 = vld [vmem:[%s3852_s18 + $0xb0] sm:$0xff]   ;;  %v3568_v60 = vld [vmem:[%s3852_s18 + $0xf8] sm:$0xff]   ;;  %v3575_v2 = vld [vmem:[%s3852_s18 + $0x1c0] sm:$0xff]  }
  0x20   : > { %3478 = vmatprep.subr.bf16.mxu1 %v3508_v10  ;;  %3098 = vmatprep.subr.bf16.mxu0 %v3508_v10  ;;  %v3567_v59 = vld [vmem:[%s3852_s18 + $0x130] sm:$0xff]   ;;  %v3570_v61 = vld [vmem:[%s3852_s18 + $0x178] sm:$0xff]   ;;  %v3571_v3 = vld [vmem:[%s4670_s1 + $0x8] ss:$56 sps:$4 sm:$0xff]  }
  0x21   : > { %v3569_v0 = vld [vmem:[%s3852_s18 + $0xb8] sm:$0xff]   ;;  %v3576_v4 = vld [vmem:[%s4670_s1 + $0x10] ss:$56 sps:$4 sm:$0xff]   ;;  %v3580_v5 = vld [vmem:[%s3852_s18 + $0x240] sm:$0xff]  }
  0x22   : > { %v3574_v1 = vld [vmem:[%s3852_s18 + $0x138] sm:$0xff]   ;;  %v3579_v6 = vld [vmem:[%s3852_s18 + $0x180] sm:$0xff]   ;;  %v3585_v9 = vld [vmem:[%s3852_s18 + $0x1c8] sm:$0xff]  }
  0x23   : > { %3486 = vmatpush3.bf16.msra.mxu1 %v3509_v11  ;;  %3099 = vmatpush3.bf16.msra.mxu0 %v3509_v11  ;;  %v3581_v7 = vld [vmem:[%s3852_s18 + $0x200] sm:$0xff]   ;;  %v3582_v8 = vld [vmem:[%s4670_s1 + $0x7c] ss:$56 sps:$4 sm:$0xff]   ;;  %v3590_v11 = vld [vmem:[%s3852_s18 + $0x248] sm:$0xff]  }
  0x24   : > { %3479 = vmatprep.subr.bf16.mxu1 %v3510_v12  ;;  %3100 = vmatprep.subr.bf16.mxu0 %v3510_v12  ;;  %v3586_v10 = vld [vmem:[%s4670_s1 + $0x84] ss:$56 sps:$4 sm:$0xff]   ;;  %v3588_v12 = vld [vmem:[%s3852_s18 + $0x188] sm:$0xff]  }
  0x27   : > { %3487 = vmatpush3.bf16.msra.mxu1 %v3511_v13  ;;  %3101 = vmatpush3.bf16.msra.mxu0 %v3511_v13  ;;  %v3591_v13 = vld [vmem:[%s3852_s18 + $0x208] sm:$0xff]  }
  0x28   : > { %3480 = vmatprep.subr.bf16.mxu1 %v3512_v14  ;;  %3102 = vmatprep.subr.bf16.mxu0 %v3512_v14  ;;  %v3584_v14 = vld [vmem:[%s4670_s1 + $0x78] ss:$56 sps:$4 sm:$0xff]  }
  0x2b   : > { %3488 = vmatpush3.bf16.msra.mxu1 %v3513_v15  ;;  %3103 = vmatpush3.bf16.msra.mxu0 %v3513_v15  ;;  %v3595_v15 = vld [vmem:[%s3852_s18 + $0x1d0] sm:$0xff]  }
  0x2c   : > { %3481 = vmatprep.subr.bf16.mxu1 %v3514_v16  ;;  %3104 = vmatprep.subr.bf16.mxu0 %v3514_v16  ;;  %v3589_v16 = vld [vmem:[%s4670_s1 + $0x80] ss:$56 sps:$4 sm:$0xff]  }
  0x2f   : > { %3489 = vmatpush3.bf16.msra.mxu1 %v3515_v17  ;;  %3105 = vmatpush3.bf16.msra.mxu0 %v3515_v17  ;;  %v3592_v17 = vld [vmem:[%s4670_s1 + $0xec] ss:$56 sps:$4 sm:$0xff]  }
  0x30   : > { %3154 = vmatprep.subr.bf16.mxu1 %v3519_v18  ;;  %3218 = vmatprep.subr.bf16.mxu0 %v3524_v21  ;;  %v3600_v18 = vld [vmem:[%s3852_s18 + $0x250] sm:$0xff]  }
  0x31   : > { %v3601_v21 = vld [vmem:[%s3852_s18 + $0x210] sm:$0xff]  }
  0x32   : > { %1763 = vmatmul.mubr.bf16.vlgmr.msra.gmra.mrb[0].mxu1 %v3516_v19  ;;  %1731 = vmatmul.mubr.bf16.vlgmr.msra.gmra.mrb[0].mxu0 %v3520_v20  ;;  %v3596_v19 = vld [vmem:[%s4670_s1 + $0xf4] ss:$56 sps:$4 sm:$0xff]  }
  0x33   : > { %3155 = vmatpush3.bf16.msra.mxu1 %v3523_v22  ;;  %3219 = vmatpush3.bf16.msra.mxu0 %v3525_v23  ;;  %v3598_v20 = vld [vmem:[%s3852_s18 + $0x190] sm:$0xff]   ;;  %v3605_v22 = vld [vmem:[%s3852_s18 + $0x1d8] sm:$0xff]   ;;  %v3594_v23 = vld [vmem:[%s4670_s1 + $0xe8] ss:$56 sps:$4 sm:$0xff]  }
  0x34   : > { %3156 = vmatprep.subr.bf16.mxu1 %v3526_v24  ;;  %3220 = vmatprep.subr.bf16.mxu0 %v3528_v26  ;;  %v3599_v24 = vld [vmem:[%s4670_s1 + $0xf0] ss:$56 sps:$4 sm:$0xff]   ;;  %v3610_v26 = vld [vmem:[%s3852_s18 + $0x258] sm:$0xff]  }
  0x35   : > { %1770 = vmatprep.mubr.bf16.mxu1 %v3529_v25  ;;  %1738 = vmatprep.mubr.bf16.mxu0 %v3534_v27  ;;  %v3608_v25 = vld [vmem:[%s3852_s18 + $0x198] sm:$0xff]  }
  0x36   : > { %v3611_v27 = vld [vmem:[%s3852_s18 + $0x218] sm:$0xff]  }
  0x37   : > { %3157 = vmatpush3.bf16.msra.mxu1 %v3527_v28  ;;  %3221 = vmatpush3.bf16.msra.mxu0 %v3531_v29  ;;  %v3602_v28 = vld [vmem:[%s4670_s1 + $0x15c] ss:$56 sps:$4 sm:$0xff]  }
  0x38   : > { %3158 = vmatprep.subr.bf16.mxu1 %v3533_v30  ;;  %3222 = vmatprep.subr.bf16.mxu0 %v3538_v33  ;;  %v3606_v29 = vld [vmem:[%s4670_s1 + $0x164] ss:$56 sps:$4 sm:$0xff]   ;;  %v3604_v33 = vld [vmem:[%s4670_s1 + $0x158] ss:$56 sps:$4 sm:$0xff]  }
  0x39   : > { %v3615_v30 = vld [vmem:[%s3852_s18 + $0x1e0] sm:$0xff]  }
  0x3a   : > { %1771 = vmatmul.mubr.bf16.gmra.mrb[4].mxu1 %v3532_v31  ;;  %1739 = vmatmul.mubr.bf16.gmra.mrb[4].mxu0 %v3537_v32  ;;  %v3618_v31 = vld [vmem:[%s3852_s18 + $0x1a0] sm:$0xff]  }
  0x3b   : > { %3159 = vmatpush3.bf16.msra.mxu1 %v3536_v34  ;;  %3223 = vmatpush3.bf16.msra.mxu0 %v3539_v35  ;;  %v3620_v32 = vld [vmem:[%s3852_s18 + $0x260] sm:$0xff]  }
  0x3c   : > { %3160 = vmatprep.subr.bf16.mxu1 %v3540_v36  ;;  %3224 = vmatprep.subr.bf16.mxu0 %v3542_v38  ;;  %v3609_v34 = vld [vmem:[%s4670_s1 + $0x160] ss:$56 sps:$4 sm:$0xff]   ;;  %v3612_v36 = vld [vmem:[%s4670_s1 + $0x1cc] ss:$56 sps:$4 sm:$0xff]  }
  0x3d   : > { %1778 = vmatprep.mubr.bf16.mxu1 %v3543_v37  ;;  %1746 = vmatprep.mubr.bf16.mxu0 %v3548_v40  ;;  %v3621_v35 = vld [vmem:[%s3852_s18 + $0x220] sm:$0xff]   ;;  %v3616_v37 = vld [vmem:[%s4670_s1 + $0x1d4] ss:$56 sps:$4 sm:$0xff]  }
  0x3e   : > { %v3625_v38 = vld [vmem:[%s3852_s18 + $0x1e8] sm:$0xff]  }
  0x3f   : > { %3161 = vmatpush3.bf16.msra.mxu1 %v3541_v39  ;;  %3225 = vmatpush3.bf16.msra.mxu0 %v3545_v41  ;;  %v3628_v39 = vld [vmem:[%s3852_s18 + $0x1a8] sm:$0xff]  }
  0x40   : > { %3162 = vmatprep.subr.bf16.mxu1 %v3547_v42  ;;  %3226 = vmatprep.subr.bf16.mxu0 %v3552_v44  ;;  %v3630_v40 = vld [vmem:[%s3852_s18 + $0x268] sm:$0xff]   ;;  %v3622_v44 = vld [vmem:[%s4670_s1 + $0x23c] ss:$56 sps:$4 sm:$0xff]  }
  0x41   : > { %v3631_v41 = vld [vmem:[%s3852_s18 + $0x228] sm:$0xff]  }
  0x42   : > { %1779 = vmatmul.mubr.bf16.gmra.mrb[8].mxu1 %v3546_v43  ;;  %1747 = vmatmul.mubr.bf16.gmra.mrb[8].mxu0 %v3551_v46  ;;  %v3614_v42 = vld [vmem:[%s4670_s1 + $0x1c8] ss:$56 sps:$4 sm:$0xff]   ;;  %v3626_v46 = vld [vmem:[%s4670_s1 + $0x244] ss:$56 sps:$4 sm:$0xff]  }
  0x43   : > { %3163 = vmatpush3.bf16.msra.mxu1 %v3550_v45  ;;  %3227 = vmatpush3.bf16.msra.mxu0 %v3553_v47  ;;  %v3619_v43 = vld [vmem:[%s4670_s1 + $0x1d0] ss:$56 sps:$4 sm:$0xff]  }
  0x44   : > { %3164 = vmatprep.subr.bf16.mxu1 %v3554_v48  ;;  %3228 = vmatprep.subr.bf16.mxu0 %v3556_v49  ;;  %v3635_v45 = vld [vmem:[%s3852_s18 + $0x1f0] sm:$0xff]  }
  0x45   : > { %1786 = vmatprep.mubr.bf16.mxu1 %v3557_v50  ;;  %1754 = vmatprep.mubr.bf16.mxu0 %v3562_v51  ;;  %v3638_v47 = vld [vmem:[%s3852_s18 + $0x1b0] sm:$0xff]   ;;  %v3629_v51 = vld [vmem:[%s4670_s1 + $0x240] ss:$56 sps:$4 sm:$0xff]  }
  0x46   : > { %v3640_v48 = vld [vmem:[%s3852_s18 + $0x270] sm:$0xff]  }
  0x47   : > { %3165 = vmatpush3.bf16.msra.mxu1 %v3555_v52  ;;  %3229 = vmatpush3.bf16.msra.mxu0 %v3559_v53  ;;  %v3641_v49 = vld [vmem:[%s3852_s18 + $0x230] sm:$0xff]   ;;  %v3645_v52 = vld [vmem:[%s3852_s18 + $0x1f8] sm:$0xff]   ;;  %v3632_v53 = vld [vmem:[%s4670_s1 + $0x2ac] ss:$56 sps:$4 sm:$0xff]  }
  0x48   : > { %3166 = vmatprep.subr.bf16.mxu1 %v3561_v54  ;;  %3230 = vmatprep.subr.bf16.mxu0 %v3566_v57  ;;  %v3624_v50 = vld [vmem:[%s4670_s1 + $0x238] ss:$56 sps:$4 sm:$0xff]   ;;  %v3636_v54 = vld [vmem:[%s4670_s1 + $0x2b4] ss:$56 sps:$4 sm:$0xff]  }
  0x49   : > { %v3651_v57 = vld [vmem:[%s3852_s18 + $0x238] sm:$0xff]  }
  0x4a   : > { %1787 = vmatmul.mubr.bf16.gmra.mrb[12].mxu1 %v3560_v55  ;;  %1755 = vmatmul.mubr.bf16.gmra.mrb[12].mxu0 %v3565_v56  ;;  %v3648_v55 = vld [vmem:[%s3852_s18 + $0x1b8] sm:$0xff]  }
  0x4b   : > { %3167 = vmatpush3.bf16.msra.mxu1 %v3564_v58  ;;  %3231 = vmatpush3.bf16.msra.mxu0 %v3567_v59  ;;  %v3650_v56 = vld [vmem:[%s3852_s18 + $0x278] sm:$0xff]   ;;  %v3655_v58 = vld [vmem:[%s3852_s18 + $0x2c0] sm:$0xff]  }
  0x4c   : > { %3168 = vmatprep.subr.bf16.mxu1 %v3568_v60  ;;  %3232 = vmatprep.subr.bf16.mxu0 %v3570_v61  ;;  %v3634_v59 = vld [vmem:[%s4670_s1 + $0x2a8] ss:$56 sps:$4 sm:$0xff]   ;;  %v3816_v60 = vmov 0  }
  0x4d   : > { %1827 = vmatprep.mubr.bf16.mxu1 %v3573_v62  ;;  %1924 = vmatprep.mubr.bf16.mxu0 %v3578_v63  ;;  %v3639_v61 = vld [vmem:[%s4670_s1 + $0x2b0] ss:$56 sps:$4 sm:$0xff]   ;;  %v3642_v62 = vld [vmem:[%s4670_s1 + $0x31c] ss:$56 sps:$4 sm:$0xff]  }
  0x4e   : > { %v3646_v63 = vld [vmem:[%s4670_s1 + $0x324] ss:$56 sps:$4 sm:$0xff]  }
  0x4f   : > { %3169 = vmatpush3.bf16.msra.mxu1 %v3569_v0  ;;  %3233 = vmatpush3.bf16.msra.mxu0 %v3574_v1  ;;  %v3644_v0 = vld [vmem:[%s4670_s1 + $0x318] ss:$56 sps:$4 sm:$0xff]  }
  0x50   : > { %3282 = vmatprep.subr.bf16.mxu1 %v3575_v2  ;;  %3346 = vmatprep.subr.bf16.mxu0 %v3580_v5  ;;  %v3649_v1 = vld [vmem:[%s4670_s1 + $0x320] ss:$56 sps:$4 sm:$0xff]   ;;  %v3654_v2 = vld [vmem:[%s4670_s1 + $0x1c] ss:$56 sps:$4 sm:$0xff]  }
  0x51   : > { %v3656_v5 = vld [vmem:[%s4670_s1 + $0x20] ss:$56 sps:$4 sm:$0xff]  }
  0x52   : > { %1828 = vmatmul.mubr.bf16.vlgmr.msra.gmra.mrb[16].mxu1 %v3571_v3  ;;  %1925 = vmatmul.mubr.bf16.vlgmr.msra.gmra.mrb[16].mxu0 %v3576_v4  ;;  %v3658_v3 = vld [vmem:[%s4670_s1 + $0x24] ss:$56 sps:$4 sm:$0xff]   ;;  %v3652_v4 = vld [vmem:[%s4670_s1 + $0x18] ss:$56 sps:$4 sm:$0xff]  }
  0x53   : > { %3283 = vmatpush3.bf16.msra.mxu1 %v3579_v6  ;;  %3347 = vmatpush3.bf16.msra.mxu0 %v3581_v7  ;;  %v3659_v6 = vld [vmem:[%s3852_s18 + $0x280] sm:$0xff]  }
  0x54   : > { %1835 = vmatprep.mubr.bf16.mxu1 %v3582_v8  ;;  %3284 = vmatprep.subr.bf16.mxu1 %v3585_v9  ;;  %v3660_v7 = vld [vmem:[%s3852_s18 + $0x300] sm:$0xff]   ;;  %v3664_v9 = vld [vmem:[%s3852_s18 + $0x2c8] sm:$0xff]  }
  0x55   : > { %1932 = vmatprep.mubr.bf16.mxu0 %v3586_v10  ;;  %3348 = vmatprep.subr.bf16.mxu0 %v3590_v11  ;;  %v3661_v8 = vld [vmem:[%s4670_s1 + $0x8c] ss:$56 sps:$4 sm:$0xff]  }
  0x56   : > { %v3665_v10 = vld [vmem:[%s4670_s1 + $0x94] ss:$56 sps:$4 sm:$0xff]  }
  0x57   : > { %3285 = vmatpush3.bf16.msra.mxu1 %v3588_v12  ;;  %3349 = vmatpush3.bf16.msra.mxu0 %v3591_v13  ;;  %v3667_v11 = vld [vmem:[%s3852_s18 + $0x288] sm:$0xff]  }
  0x58   : > { %3286 = vmatprep.subr.bf16.mxu1 %v3595_v15  ;;  %3350 = vmatprep.subr.bf16.mxu0 %v3600_v18  ;;  %v3669_v12 = vld [vmem:[%s3852_s18 + $0x308] sm:$0xff]   ;;  %v3676_v18 = vld [vmem:[%s3852_s18 + $0x290] sm:$0xff]  }
  0x59   : > { %v3663_v13 = vld [vmem:[%s4670_s1 + $0x88] ss:$56 sps:$4 sm:$0xff]  }
  0x5a   : > { %1836 = vmatmul.mubr.bf16.gmra.mrb[20].mxu1 %v3584_v14  ;;  %1933 = vmatmul.mubr.bf16.gmra.mrb[20].mxu0 %v3589_v16  ;;  %v3673_v14 = vld [vmem:[%s3852_s18 + $0x2d0] sm:$0xff]  }
  0x5b   : > { %1843 = vmatprep.mubr.bf16.mxu1 %v3592_v17  ;;  %1940 = vmatprep.mubr.bf16.mxu0 %v3596_v19  ;;  %v3668_v15 = vld [vmem:[%s4670_s1 + $0x90] ss:$56 sps:$4 sm:$0xff]   ;;  %v3670_v16 = vld [vmem:[%s4670_s1 + $0xfc] ss:$56 sps:$4 sm:$0xff]  }
  0x5c   : > { %3287 = vmatpush3.bf16.msra.mxu1 %v3598_v20  ;;  %3351 = vmatpush3.bf16.msra.mxu0 %v3601_v21  ;;  %v3674_v17 = vld [vmem:[%s4670_s1 + $0x104] ss:$56 sps:$4 sm:$0xff]   ;;  %v3677_v19 = vld [vmem:[%s3852_s18 + $0x310] sm:$0xff]  }
  0x5d   : > { %3288 = vmatprep.subr.bf16.mxu1 %v3605_v22  ;;  %3352 = vmatprep.subr.bf16.mxu0 %v3610_v26  ;;  %v3683_v20 = vld [vmem:[%s3852_s18 + $0x2d8] sm:$0xff]   ;;  %v3692_v26 = vld [vmem:[%s3852_s18 + $0x2e0] sm:$0xff]  }
  0x5e   : > { %v3679_v21 = vld [vmem:[%s3852_s18 + $0x318] sm:$0xff]  }
  0x5f   : > { %v3672_v22 = vld [vmem:[%s4670_s1 + $0xf8] ss:$56 sps:$4 sm:$0xff]  }
  0x60   : > { %3289 = vmatpush3.bf16.msra.mxu1 %v3608_v25  ;;  %3353 = vmatpush3.bf16.msra.mxu0 %v3611_v27  ;;  %v3680_v25 = vld [vmem:[%s4670_s1 + $0x16c] ss:$56 sps:$4 sm:$0xff]  }
  0x61   : > { %3290 = vmatprep.subr.bf16.mxu1 %v3615_v30  ;;  %3354 = vmatprep.subr.bf16.mxu0 %v3620_v32  ;;  %v3684_v27 = vld [vmem:[%s4670_s1 + $0x174] ss:$56 sps:$4 sm:$0xff]   ;;  %v3687_v32 = vld [vmem:[%s4670_s1 + $0x170] ss:$56 sps:$4 sm:$0xff]  }
  0x62   : > { %1844 = vmatmul.mubr.bf16.gmra.mrb[24].mxu1 %v3594_v23  ;;  %1941 = vmatmul.mubr.bf16.gmra.mrb[24].mxu0 %v3599_v24  ;;  %v3678_v23 = vld [vmem:[%s4670_s1 + $0x100] ss:$56 sps:$4 sm:$0xff]   ;;  %v3702_v30 = vld [vmem:[%s3852_s18 + $0x2e8] sm:$0xff]  }
  0x63   : > { %1851 = vmatprep.mubr.bf16.mxu1 %v3602_v28  ;;  %1948 = vmatprep.mubr.bf16.mxu0 %v3606_v29  ;;  %v3686_v24 = vld [vmem:[%s3852_s18 + $0x298] sm:$0xff]   ;;  %v3688_v28 = vld [vmem:[%s3852_s18 + $0x320] sm:$0xff]  }
  0x64   : > { %3291 = vmatpush3.bf16.msra.mxu1 %v3618_v31  ;;  %3355 = vmatpush3.bf16.msra.mxu0 %v3621_v35  ;;  %v3695_v29 = vld [vmem:[%s3852_s18 + $0x2a0] sm:$0xff]   ;;  %v3689_v35 = vld [vmem:[%s4670_s1 + $0x1dc] ss:$56 sps:$4 sm:$0xff]  }
  0x65   : > { %3292 = vmatprep.subr.bf16.mxu1 %v3625_v38  ;;  %3356 = vmatprep.subr.bf16.mxu0 %v3630_v40  ;;  %v3682_v31 = vld [vmem:[%s4670_s1 + $0x168] ss:$56 sps:$4 sm:$0xff]   ;;  %v3698_v38 = vld [vmem:[%s3852_s18 + $0x330] sm:$0xff]   ;;  %v3721_v40 = vld [vmem:[%s3852_s18 + $0x2f8] sm:$0xff]  }
  0x68   : > { %3293 = vmatpush3.bf16.msra.mxu1 %v3628_v39  ;;  %3357 = vmatpush3.bf16.msra.mxu0 %v3631_v41  ;;  %v3714_v39 = vld [vmem:[%s3852_s18 + $0x2b0] sm:$0xff]   ;;  %v3707_v41 = vld [vmem:[%s3852_s18 + $0x338] sm:$0xff]  }
  0x69   : > { %3294 = vmatprep.subr.bf16.mxu1 %v3635_v45  ;;  %3358 = vmatprep.subr.bf16.mxu0 %v3640_v48  ;;  %v3699_v45 = vld [vmem:[%s4670_s1 + $0x24c] ss:$56 sps:$4 sm:$0xff]  }
  0x6a   : > { %1852 = vmatmul.mubr.bf16.gmra.mrb[28].mxu1 %v3604_v33  ;;  %1949 = vmatmul.mubr.bf16.gmra.mrb[28].mxu0 %v3609_v34  ;;  %v3696_v33 = vld [vmem:[%s3852_s18 + $0x328] sm:$0xff]  }
  0x6b   : > { %1859 = vmatprep.mubr.bf16.mxu1 %v3612_v36  ;;  %1956 = vmatprep.mubr.bf16.mxu0 %v3616_v37  ;;  %v3705_v34 = vld [vmem:[%s3852_s18 + $0x2a8] sm:$0xff]   ;;  %v3711_v36 = vld [vmem:[%s3852_s18 + $0x2f0] sm:$0xff]   ;;  %v3693_v37 = vld [vmem:[%s4670_s1 + $0x1e4] ss:$56 sps:$4 sm:$0xff]  }
  0x6c   : > { %3295 = vmatpush3.bf16.msra.mxu1 %v3638_v47  ;;  %3359 = vmatpush3.bf16.msra.mxu0 %v3641_v49  ;;  %v3715_v47 = vld [vmem:[%s3852_s18 + $0x340] sm:$0xff]   ;;  %v3717_v48 = vld [vmem:[%s3852_s18 + $0x348] sm:$0xff]  }
  0x6d   : > { %3296 = vmatprep.subr.bf16.mxu1 %v3645_v52  ;;  %3360 = vmatprep.subr.bf16.mxu0 %v3650_v56  ;;  %v3701_v49 = vld [vmem:[%s4670_s1 + $0x248] ss:$56 sps:$4 sm:$0xff]   ;;  %v3712_v52 = vld [vmem:[%s4670_s1 + $0x2c4] ss:$56 sps:$4 sm:$0xff]  }
  0x6e   : > { %v3716_v56 = vld [vmem:[%s4670_s1 + $0x2c0] ss:$56 sps:$4 sm:$0xff]  }
  0x70   : > { %3297 = vmatpush3.bf16.msra.mxu1 %v3648_v55  ;;  %3361 = vmatpush3.bf16.msra.mxu0 %v3651_v57  ;;  %v3710_v55 = vld [vmem:[%s4670_s1 + $0x2b8] ss:$56 sps:$4 sm:$0xff]   ;;  %v3718_v57 = vld [vmem:[%s4670_s1 + $0x32c] ss:$56 sps:$4 sm:$0xff]  }
  0x71   : > { %3410 = vmatprep.subr.bf16.mxu1 %v3655_v58  ;;  %2280 = vmatprep.subr.bf16.mxu0 %v3816_v60  ;;  %v3722_v58 = vld [vmem:[%s4670_s1 + $0x334] ss:$56 sps:$4 sm:$0xff]  }
  0x72   : > { %1860 = vmatmul.mubr.bf16.gmra.mrb[32].mxu1 %v3614_v42  ;;  %1957 = vmatmul.mubr.bf16.gmra.mrb[32].mxu0 %v3619_v43  ;;  %v3724_v42 = vld [vmem:[%s3852_s18 + $0x2b8] sm:$0xff]  }
  0x73   : > { %1867 = vmatprep.mubr.bf16.mxu1 %v3622_v44  ;;  %1964 = vmatprep.mubr.bf16.mxu0 %v3626_v46  ;;  %v3691_v43 = vld [vmem:[%s4670_s1 + $0x1d8] ss:$56 sps:$4 sm:$0xff]   ;;  %v3703_v46 = vld [vmem:[%s4670_s1 + $0x254] ss:$56 sps:$4 sm:$0xff]  }
  0x74   : > { %v3697_v44 = vld [vmem:[%s4670_s1 + $0x1e0] ss:$56 sps:$4 sm:$0xff]  }
  0x7a   : > { %1868 = vmatmul.mubr.bf16.gmra.mrb[36].mxu1 %v3624_v50  ;;  %1965 = vmatmul.mubr.bf16.gmra.mrb[36].mxu0 %v3629_v51  ;;  %v3706_v50 = vld [vmem:[%s4670_s1 + $0x250] ss:$56 sps:$4 sm:$0xff]   ;;  %v3708_v51 = vld [vmem:[%s4670_s1 + $0x2bc] ss:$56 sps:$4 sm:$0xff]  }
  0x7b   : > { %1875 = vmatprep.mubr.bf16.mxu1 %v3632_v53  ;;  %1972 = vmatprep.mubr.bf16.mxu0 %v3636_v54  ;;  %v3726_v53 = vld [vmem:[%s3852_s18 + $0x350] sm:$0xff]   ;;  %v3730_v54 = vld [vmem:[%s3852_s18 + $0x358] sm:$0xff]  }
  0x82   : > { %1876 = vmatmul.mubr.bf16.gmra.mrb[40].mxu1 %v3634_v59  ;;  %1973 = vmatmul.mubr.bf16.gmra.mrb[40].mxu0 %v3639_v61  ;;  %v3720_v59 = vld [vmem:[%s4670_s1 + $0x328] ss:$56 sps:$4 sm:$0xff]   ;;  %v3729_v61 = vld [vmem:[%s4670_s1 + $0x2c] ss:$56 sps:$4 sm:$0xff]  }
  0x83   : > { %1883 = vmatprep.mubr.bf16.mxu1 %v3642_v62  ;;  %1980 = vmatprep.mubr.bf16.mxu0 %v3646_v63  ;;  %v3733_v62 = vld [vmem:[%s4670_s1 + $0x34] ss:$56 sps:$4 sm:$0xff]   ;;  %v3727_v63 = vld [vmem:[%s4670_s1 + $0x28] ss:$56 sps:$4 sm:$0xff]  }
  0x8a   : > { %1884 = vmatmul.mubr.bf16.gmra.mrb[44].mxu1 %v3644_v0  ;;  %1981 = vmatmul.mubr.bf16.gmra.mrb[44].mxu0 %v3649_v1  ;;  %v3731_v0 = vld [vmem:[%s4670_s1 + $0x30] ss:$56 sps:$4 sm:$0xff]   ;;  %v3734_v1 = vld [vmem:[%s4670_s1 + $0x9c] ss:$56 sps:$4 sm:$0xff]  }
  0x8b   : > { %2021 = vmatprep.mubr.bf16.mxu1 %v3654_v2  ;;  %2118 = vmatprep.mubr.bf16.mxu0 %v3658_v3  ;;  %v3737_v2 = vld [vmem:[%s4670_s1 + $0xa4] ss:$56 sps:$4 sm:$0xff]   ;;  %v3736_v3 = vld [vmem:[%s4670_s1 + $0x98] ss:$56 sps:$4 sm:$0xff]  }
  0x92   : > { %2022 = vmatmul.mubr.bf16.vlgmr.msra.gmra.mrb[48].mxu1 %v3652_v4  ;;  %2119 = vmatmul.mubr.bf16.vlgmr.msra.gmra.mrb[48].mxu0 %v3656_v5  ;;  %v3739_v4 = vld [vmem:[%s4670_s1 + $0xa0] ss:$56 sps:$4 sm:$0xff]   ;;  %v3740_v5 = vld [vmem:[%s4670_s1 + $0x10c] ss:$56 sps:$4 sm:$0xff]  }
  0x93   : > { %3411 = vmatpush3.bf16.msra.mxu1 %v3659_v6  ;;  %2281 = vmatpush1.bf16.msra.mxu0 %v3660_v7  ;;  %v3743_v6 = vld [vmem:[%s4670_s1 + $0x114] ss:$56 sps:$4 sm:$0xff]   ;;  %v3742_v7 = vld [vmem:[%s4670_s1 + $0x108] ss:$56 sps:$4 sm:$0xff]  }
  0x94   : > { %2029 = vmatprep.mubr.bf16.mxu1 %v3661_v8  ;;  %3412 = vmatprep.subr.bf16.mxu1 %v3664_v9  ;;  %v3745_v8 = vld [vmem:[%s4670_s1 + $0x110] ss:$56 sps:$4 sm:$0xff]   ;;  %v3746_v9 = vld [vmem:[%s4670_s1 + $0x17c] ss:$56 sps:$4 sm:$0xff]  }
  0x95   : > { %2126 = vmatprep.mubr.bf16.mxu0 %v3665_v10  ;;  %2282 = vmatprep.subr.bf16.mxu0 %v3816_v60  ;;  %v3749_v10 = vld [vmem:[%s4670_s1 + $0x184] ss:$56 sps:$4 sm:$0xff]  }
  0x97   : > { %3413 = vmatpush3.bf16.msra.mxu1 %v3667_v11  ;;  %2283 = vmatpush1.bf16.msra.mxu0 %v3669_v12  ;;  %v3748_v11 = vld [vmem:[%s4670_s1 + $0x178] ss:$56 sps:$4 sm:$0xff]  }
  0x98   : > { %3414 = vmatprep.subr.bf16.mxu1 %v3673_v14  ;;  %2284 = vmatprep.subr.bf16.mxu0 %v3816_v60  ;;  %v3751_v12 = vld [vmem:[%s4670_s1 + $0x180] ss:$56 sps:$4 sm:$0xff]   ;;  %v3755_v14 = vld [vmem:[%s4670_s1 + $0x1f4] ss:$56 sps:$4 sm:$0xff]  }
  0x9a   : > { %2030 = vmatmul.mubr.bf16.gmra.mrb[52].mxu1 %v3663_v13  ;;  %2127 = vmatmul.mubr.bf16.gmra.mrb[52].mxu0 %v3668_v15  ;;  %v3752_v13 = vld [vmem:[%s4670_s1 + $0x1ec] ss:$56 sps:$4 sm:$0xff]   ;;  %v3754_v15 = vld [vmem:[%s4670_s1 + $0x1e8] ss:$56 sps:$4 sm:$0xff]  }
  0x9b   : > { %2037 = vmatprep.mubr.bf16.mxu1 %v3670_v16  ;;  %2134 = vmatprep.mubr.bf16.mxu0 %v3674_v17  ;;  %v3757_v16 = vld [vmem:[%s4670_s1 + $0x1f0] ss:$56 sps:$4 sm:$0xff]   ;;  %v3758_v17 = vld [vmem:[%s4670_s1 + $0x25c] ss:$56 sps:$4 sm:$0xff]  }
  0x9c   : > { %3415 = vmatpush3.bf16.msra.mxu1 %v3676_v18  ;;  %2285 = vmatpush1.bf16.msra.mxu0 %v3677_v19  ;;  %v3761_v18 = vld [vmem:[%s4670_s1 + $0x264] ss:$56 sps:$4 sm:$0xff]   ;;  %v3760_v19 = vld [vmem:[%s4670_s1 + $0x258] ss:$56 sps:$4 sm:$0xff]  }
  0x9d   : > { %2286 = vmatprep.subr.bf16.mxu0 %v3816_v60  ;;  %3416 = vmatprep.subr.bf16.mxu1 %v3683_v20  ;;  %v3763_v20 = vld [vmem:[%s4670_s1 + $0x260] ss:$56 sps:$4 sm:$0xff]  }
  0xa0   : > { %2287 = vmatpush1.bf16.msra.mxu0 %v3679_v21  ;;  %3417 = vmatpush3.bf16.msra.mxu1 %v3686_v24  ;;  %v3764_v21 = vld [vmem:[%s4670_s1 + $0x2cc] ss:$56 sps:$4 sm:$0xff]   ;;  %v3769_v24 = vld [vmem:[%s4670_s1 + $0x2d0] ss:$56 sps:$4 sm:$0xff]  }
  0xa1   : > { %2288 = vmatprep.subr.bf16.mxu0 %v3816_v60  ;;  %3418 = vmatprep.subr.bf16.mxu1 %v3692_v26  ;;  %v3773_v26 = vld [vmem:[%s4670_s1 + $0x344] ss:$56 sps:$4 sm:$0xff]  }
  0xa2   : > { %2038 = vmatmul.mubr.bf16.gmra.mrb[56].mxu1 %v3672_v22  ;;  %2135 = vmatmul.mubr.bf16.gmra.mrb[56].mxu0 %v3678_v23  ;;  %v3767_v22 = vld [vmem:[%s4670_s1 + $0x2d4] ss:$56 sps:$4 sm:$0xff]   ;;  %v3766_v23 = vld [vmem:[%s4670_s1 + $0x2c8] ss:$56 sps:$4 sm:$0xff]  }
  0xa3   : > { %2045 = vmatprep.mubr.bf16.mxu1 %v3680_v25  ;;  %2142 = vmatprep.mubr.bf16.mxu0 %v3684_v27  ;;  %v3770_v25 = vld [vmem:[%s4670_s1 + $0x33c] ss:$56 sps:$4 sm:$0xff]  }
  0xa4   : > { %2289 = vmatpush1.bf16.msra.mxu0 %v3688_v28  ;;  %3419 = vmatpush3.bf16.msra.mxu1 %v3695_v29 }
  0xa5   : > { %2290 = vmatprep.subr.bf16.mxu0 %v3816_v60  ;;  %3420 = vmatprep.subr.bf16.mxu1 %v3702_v30 }
  0xa8   : > { %2291 = vmatpush1.bf16.msra.mxu0 %v3696_v33  ;;  %3421 = vmatpush3.bf16.msra.mxu1 %v3705_v34 }
  0xa9   : > { %2292 = vmatprep.subr.bf16.mxu0 %v3816_v60  ;;  %3422 = vmatprep.subr.bf16.mxu1 %v3711_v36 }
  0xaa   : > { %2046 = vmatmul.mubr.bf16.gmra.mrb[60].mxu1 %v3682_v31  ;;  %2143 = vmatmul.mubr.bf16.gmra.mrb[60].mxu0 %v3687_v32  ;;  %v3772_v31 = vld [vmem:[%s4670_s1 + $0x338] ss:$56 sps:$4 sm:$0xff]  }
  0xab   : > { %2053 = vmatprep.mubr.bf16.mxu1 %v3689_v35  ;;  %2150 = vmatprep.mubr.bf16.mxu0 %v3693_v37  ;;  %v3775_v32 = vld [vmem:[%s4670_s1 + $0x340] ss:$56 sps:$4 sm:$0xff]  }
  0xac   : > { %2293 = vmatpush1.bf16.msra.mxu0 %v3698_v38  ;;  %3423 = vmatpush3.bf16.msra.mxu1 %v3714_v39 }
  0xad   : > { %2294 = vmatprep.subr.bf16.mxu0 %v3816_v60  ;;  %3424 = vmatprep.subr.bf16.mxu1 %v3721_v40 }
  0xb0   : > { %2295 = vmatpush1.bf16.msra.mxu0 %v3707_v41  ;;  %3425 = vmatpush3.bf16.msra.mxu1 %v3724_v42 }
  0xb1   : > { %2296 = vmatprep.subr.bf16.mxu0 %v3816_v60 }
  0xb2   : > { %2054 = vmatmul.mubr.bf16.gmra.mrb[64].mxu1 %v3691_v43  ;;  %2151 = vmatmul.mubr.bf16.gmra.mrb[64].mxu0 %v3697_v44 }
  0xb3   : > { %2061 = vmatprep.mubr.bf16.mxu1 %v3699_v45  ;;  %2158 = vmatprep.mubr.bf16.mxu0 %v3703_v46 }
  0xb4   : > { %2297 = vmatpush1.bf16.msra.mxu0 %v3715_v47 }
  0xb5   : > { %2298 = vmatprep.subr.bf16.mxu0 %v3816_v60 }
  0xb8   : > { %2299 = vmatpush1.bf16.msra.mxu0 %v3717_v48 }
  0xb9   : > { %2300 = vmatprep.subr.bf16.mxu0 %v3816_v60 }
  0xba   : > { %2062 = vmatmul.mubr.bf16.gmra.mrb[68].mxu1 %v3701_v49  ;;  %2159 = vmatmul.mubr.bf16.gmra.mrb[68].mxu0 %v3706_v50 }
  0xbb   : > { %2069 = vmatprep.mubr.bf16.mxu1 %v3708_v51  ;;  %2166 = vmatprep.mubr.bf16.mxu0 %v3712_v52 }
  0xbc   : > { %2301 = vmatpush1.bf16.msra.mxu0 %v3726_v53 }
  0xbd   : > { %2302 = vmatprep.subr.bf16.mxu0 %v3816_v60  ;;  %v3725_v60 = vld [vmem:[%s4670_s1 + $0x330] ss:$56 sps:$4 sm:$0xff]  }
  0xc0   : > { %2303 = vmatpush1.bf16.msra.mxu0 %v3730_v54 }
  0xc2   : > { %2070 = vmatmul.mubr.bf16.gmra.mrb[72].mxu1 %v3710_v55  ;;  %2167 = vmatmul.mubr.bf16.gmra.mrb[72].mxu0 %v3716_v56 }
  0xc3   : > { %2077 = vmatprep.mubr.bf16.mxu1 %v3718_v57  ;;  %2174 = vmatprep.mubr.bf16.mxu0 %v3722_v58 }
  0xca   : > { %2078 = vmatmul.mubr.bf16.gmra.mrb[76].mxu1 %v3720_v59  ;;  %2175 = vmatmul.mubr.bf16.gmra.mrb[76].mxu0 %v3725_v60 }
  0xcb   : > { %2215 = vmatprep.mubr.bf16.mxu1 %v3729_v61  ;;  %3047 = vmatprep.mubr.msk.bf16.mxu0 %vm1673_vm0, %v3733_v62 }
  0xd2   : > { %2216 = vmatmul.mubr.bf16.vlgmr.msra.gmra.mrb[80].mxu1 %v3727_v63  ;;  %2313 = vmatmul.mubr.bf16.vlgmr.msra.gmra.mrb[80].mxu0 %v3731_v0 }
  0xd3   : > { %2223 = vmatprep.mubr.bf16.mxu1 %v3734_v1  ;;  %3048 = vmatprep.mubr.msk.bf16.mxu0 %vm1673_vm0, %v3737_v2 }
  0xda   : > { %2224 = vmatmul.mubr.bf16.gmra.mrb[84].mxu1 %v3736_v3  ;;  %2321 = vmatmul.mubr.bf16.gmra.mrb[84].mxu0 %v3739_v4 }
  0xdb   : > { %2231 = vmatprep.mubr.bf16.mxu1 %v3740_v5  ;;  %3049 = vmatprep.mubr.msk.bf16.mxu0 %vm1673_vm0, %v3743_v6 }
  0xe2   : > { %2232 = vmatmul.mubr.bf16.gmra.mrb[88].mxu1 %v3742_v7  ;;  %2329 = vmatmul.mubr.bf16.gmra.mrb[88].mxu0 %v3745_v8 }
  0xe3   : > { %2239 = vmatprep.mubr.bf16.mxu1 %v3746_v9  ;;  %3050 = vmatprep.mubr.msk.bf16.mxu0 %vm1673_vm0, %v3749_v10 }
  0xea   : > { %2240 = vmatmul.mubr.bf16.gmra.mrb[92].mxu1 %v3748_v11  ;;  %2337 = vmatmul.mubr.bf16.gmra.mrb[92].mxu0 %v3751_v12 }
  0xeb   : > { %2247 = vmatprep.mubr.bf16.mxu1 %v3752_v13  ;;  %3051 = vmatprep.mubr.msk.bf16.mxu0 %vm1673_vm0, %v3755_v14 }
  0xf2   : > { %2248 = vmatmul.mubr.bf16.gmra.mrb[96].mxu1 %v3754_v15  ;;  %2345 = vmatmul.mubr.bf16.gmra.mrb[96].mxu0 %v3757_v16 }
  0xf3   : > { %2255 = vmatprep.mubr.bf16.mxu1 %v3758_v17  ;;  %3052 = vmatprep.mubr.msk.bf16.mxu0 %vm1673_vm0, %v3761_v18 }
  0xfa   : > { %2256 = vmatmul.mubr.bf16.gmra.mrb[100].mxu1 %v3760_v19  ;;  %2353 = vmatmul.mubr.bf16.gmra.mrb[100].mxu0 %v3763_v20 }
  0xfb   : > { %2263 = vmatprep.mubr.bf16.mxu1 %v3764_v21  ;;  %3053 = vmatprep.mubr.msk.bf16.mxu0 %vm1673_vm0, %v3767_v22 }
 0x102   : > { %2264 = vmatmul.mubr.bf16.gmra.mrb[104].mxu1 %v3766_v23  ;;  %2361 = vmatmul.mubr.bf16.gmra.mrb[104].mxu0 %v3769_v24 }
 0x103   : > { %2271 = vmatprep.mubr.bf16.mxu1 %v3770_v25  ;;  %3054 = vmatprep.mubr.msk.bf16.mxu0 %vm1673_vm0, %v3773_v26 }
 0x105   : > { %v3130_v27 = vpop.f32.mrb[0].mxu1  ;;  %v3106_v28 = vpop.f32.mrb[0].mxu0 }
 0x106   : > { %v3131_v29 = vpop.f32.mrb[1].mxu1  ;;  %v3107_v30 = vpop.f32.mrb[1].mxu0 }
 0x107   : > { %v4312_v33 = vadd.f32 %v3131_v29, %v3130_v27  ;;  %v3133_v34 = vpop.f32.mrb[2].mxu1  ;;  %v3108_v35 = vadd.f32 %v3107_v30, %v3106_v28  ;;  %v3109_v36 = vpop.f32.mrb[2].mxu0 }
 0x108   : > { %v3134_v37 = vpop.f32.mrb[3].mxu1  ;;  %v3110_v38 = vpop.f32.mrb[3].mxu0 }
 0x109   : > { %v4314_v39 = vadd.f32 %v3134_v37, %v3133_v34  ;;  %v3111_v40 = vadd.f32 %v3110_v38, %v3109_v36 }
 0x10a   : > { %2272 = vmatmul.mubr.bf16.gmra.mrb[108].mxu1 %v3772_v31  ;;  %2369 = vmatmul.mubr.bf16.gmra.mrb[108].mxu0 %v3775_v32 }
 0x10d   : > { %v3136_v41 = vpop.f32.mrb[4].mxu1  ;;  %v3112_v42 = vpop.f32.mrb[4].mxu0 }
 0x10e   : > { %v3137_v43 = vpop.f32.mrb[5].mxu1  ;;  %v3113_v44 = vpop.f32.mrb[5].mxu0 }
 0x10f   : > { %v4316_v45 = vadd.f32 %v3137_v43, %v3136_v41  ;;  %v3139_v46 = vpop.f32.mrb[6].mxu1  ;;  %v3114_v47 = vadd.f32 %v3113_v44, %v3112_v42  ;;  %v3115_v48 = vpop.f32.mrb[6].mxu0 }
 0x110   : > { %v3140_v49 = vpop.f32.mrb[7].mxu1  ;;  %v3116_v50 = vpop.f32.mrb[7].mxu0 }
 0x111   : > { %v4318_v51 = vadd.f32 %v3140_v49, %v3139_v46  ;;  %v3117_v52 = vadd.f32 %v3116_v50, %v3115_v48 }
 0x115   : > { %v3142_v53 = vpop.f32.mrb[8].mxu1  ;;  %v3118_v54 = vpop.f32.mrb[8].mxu0 }
 0x116   : > { %v3143_v55 = vpop.f32.mrb[9].mxu1  ;;  %v3119_v56 = vpop.f32.mrb[9].mxu0 }
 0x117   : > { %v4320_v57 = vadd.f32 %v3143_v55, %v3142_v53  ;;  %v3145_v58 = vpop.f32.mrb[10].mxu1  ;;  %v3120_v59 = vadd.f32 %v3119_v56, %v3118_v54  ;;  %v3121_v60 = vpop.f32.mrb[10].mxu0 }
 0x118   : > { %v3146_v61 = vpop.f32.mrb[11].mxu1  ;;  %v3122_v62 = vpop.f32.mrb[11].mxu0 }
 0x119   : > { %v4322_v63 = vadd.f32 %v3146_v61, %v3145_v58  ;;  %v3123_v0 = vadd.f32 %v3122_v62, %v3121_v60 }
 0x11d   : > { %v3148_v1 = vpop.f32.mrb[12].mxu1  ;;  %v3124_v2 = vpop.f32.mrb[12].mxu0 }
 0x11e   : > { %v3149_v3 = vpop.f32.mrb[13].mxu1  ;;  %v3125_v4 = vpop.f32.mrb[13].mxu0 }
 0x11f   : > { %v4324_v5 = vadd.f32 %v3149_v3, %v3148_v1  ;;  %v3151_v6 = vpop.f32.mrb[14].mxu1  ;;  %v4326_v7 = vadd.f32 %v3125_v4, %v3124_v2  ;;  %v3127_v8 = vpop.f32.mrb[14].mxu0 }
 0x120   : > { %v3152_v9 = vpop.f32.mrb[15].mxu1  ;;  %v3128_v10 = vpop.f32.mrb[15].mxu0 }
 0x121   : > { %v4328_v11 = vadd.f32 %v3152_v9, %v3151_v6  ;;  %v3129_v12 = vadd.f32 %v3128_v10, %v3127_v8 }
 0x125   : > { %v3170_v13 = vpop.f32.mrb[16].mxu1  ;;  %v3234_v14 = vpop.f32.mrb[16].mxu0 }
 0x126   : > { %v3171_v15 = vpop.f32.mrb[17].mxu1  ;;  %v3235_v16 = vpop.f32.mrb[17].mxu0 }
 0x127   : > { %v3172_v17 = vadd.f32 %v3171_v15, %v3170_v13  ;;  %v3173_v18 = vpop.f32.mrb[18].mxu1  ;;  %v3236_v19 = vadd.f32 %v3235_v16, %v3234_v14  ;;  %v3237_v20 = vpop.f32.mrb[18].mxu0 }
 0x128   : > { %v3174_v21 = vpop.f32.mrb[19].mxu1  ;;  %v3238_v22 = vpop.f32.mrb[19].mxu0 }
 0x129   : > { %v1830_v23 = vadd.f32 %v3172_v17, %v3108_v35  ;;  %v3175_v24 = vadd.f32 %v3174_v21, %v3173_v18  ;;  %v3239_v25 = vadd.f32 %v3238_v22, %v3237_v20 }
 0x12b   : > { %v1833_v26 = vadd.f32 %v3175_v24, %v3111_v40  ;;  %v4330_v27 = vadd.f32 %v3236_v19, %v1830_v23 }
 0x12d   : > { %v4332_v28 = vadd.f32 %v3239_v25, %v1833_v26  ;;  %v3176_v29 = vpop.f32.mrb[20].mxu1  ;;  %v3240_v30 = vpop.f32.mrb[20].mxu0 }
 0x12e   : > { %v3177_v31 = vpop.f32.mrb[21].mxu1  ;;  %v3241_v32 = vpop.f32.mrb[21].mxu0 }
 0x12f   : > { %v3178_v34 = vadd.f32 %v3177_v31, %v3176_v29  ;;  %v3179_v36 = vpop.f32.mrb[22].mxu1  ;;  %v3242_v37 = vadd.f32 %v3241_v32, %v3240_v30  ;;  %v3243_v38 = vpop.f32.mrb[22].mxu0 }
 0x130   : > { %v3180_v41 = vpop.f32.mrb[23].mxu1  ;;  %v3244_v42 = vpop.f32.mrb[23].mxu0 }
 0x131   : > { %v1838_v43 = vadd.f32 %v3178_v34, %v3114_v47  ;;  %v3181_v44 = vadd.f32 %v3180_v41, %v3179_v36  ;;  %v3245_v35 = vadd.f32 %v3244_v42, %v3243_v38 }
 0x133   : > { %v1841_v46 = vadd.f32 %v3181_v44, %v3117_v52  ;;  %v4334_v48 = vadd.f32 %v3242_v37, %v1838_v43 }
 0x135   : > { %v4336_v40 = vadd.f32 %v3245_v35, %v1841_v46  ;;  %v3182_v49 = vpop.f32.mrb[24].mxu1  ;;  %v3246_v50 = vpop.f32.mrb[24].mxu0 }
 0x136   : > { %v3183_v53 = vpop.f32.mrb[25].mxu1  ;;  %v3247_v54 = vpop.f32.mrb[25].mxu0 }
 0x137   : > { %v3184_v55 = vadd.f32 %v3183_v53, %v3182_v49  ;;  %v3185_v56 = vpop.f32.mrb[26].mxu1  ;;  %v3248_v58 = vadd.f32 %v3247_v54, %v3246_v50  ;;  %v3249_v60 = vpop.f32.mrb[26].mxu0 }
 0x138   : > { %v3186_v61 = vpop.f32.mrb[27].mxu1  ;;  %v3250_v62 = vpop.f32.mrb[27].mxu0 }
 0x139   : > { %v1846_v1 = vadd.f32 %v3184_v55, %v3120_v59  ;;  %v3187_v2 = vadd.f32 %v3186_v61, %v3185_v56  ;;  %v3251_v47 = vadd.f32 %v3250_v62, %v3249_v60 }
 0x13b   : > { %v1849_v3 = vadd.f32 %v3187_v2, %v3123_v0  ;;  %v4338_v4 = vadd.f32 %v3248_v58, %v1846_v1 }
 0x13d   : > { %v4340_v52 = vadd.f32 %v3251_v47, %v1849_v3  ;;  %v3188_v6 = vpop.f32.mrb[28].mxu1  ;;  %v3252_v8 = vpop.f32.mrb[28].mxu0 }
 0x13e   : > { %v3189_v9 = vpop.f32.mrb[29].mxu1  ;;  %v3253_v10 = vpop.f32.mrb[29].mxu0 }
 0x13f   : > { %v3190_v13 = vadd.f32 %v3189_v9, %v3188_v6  ;;  %v3191_v14 = vpop.f32.mrb[30].mxu1  ;;  %v3254_v15 = vadd.f32 %v3253_v10, %v3252_v8  ;;  %v3255_v16 = vpop.f32.mrb[30].mxu0 }
 0x140   : > { %v3192_v17 = vpop.f32.mrb[31].mxu1  ;;  %v3256_v18 = vpop.f32.mrb[31].mxu0 }
 0x141   : > { %v1854_v19 = vadd.f32 %v3190_v13, %v4326_v7  ;;  %v3193_v59 = vadd.f32 %v3192_v17, %v3191_v14  ;;  %v3257_v20 = vadd.f32 %v3256_v18, %v3255_v16 }
 0x143   : > { %v1857_v21 = vadd.f32 %v3193_v59, %v3129_v12  ;;  %v4343_v0 = vadd.f32 %v3254_v15, %v1854_v19 }
 0x145   : > { %v4345_v22 = vadd.f32 %v3257_v20, %v1857_v21  ;;  %v3194_v23 = vpop.f32.mrb[32].mxu1  ;;  %v3258_v24 = vpop.f32.mrb[32].mxu0 }
 0x146   : > { %v3195_v25 = vpop.f32.mrb[33].mxu1  ;;  %v3259_v26 = vpop.f32.mrb[33].mxu0 }
 0x147   : > { %v3196_v29 = vadd.f32 %v3195_v25, %v3194_v23  ;;  %v3197_v30 = vpop.f32.mrb[34].mxu1  ;;  %v3260_v31 = vadd.f32 %v3259_v26, %v3258_v24  ;;  %v3261_v32 = vpop.f32.mrb[34].mxu0 }
 0x148   : > { %v3198_v34 = vpop.f32.mrb[35].mxu1  ;;  %v3262_v36 = vpop.f32.mrb[35].mxu0 }
 0x149   : > { %v1862_v37 = vadd.f32 %v3196_v29, %v4312_v33  ;;  %v3199_v7 = vadd.f32 %v3198_v34, %v3197_v30  ;;  %v3263_v38 = vadd.f32 %v3262_v36, %v3261_v32 }
 0x14b   : > { %v1865_v12 = vadd.f32 %v3199_v7, %v4314_v39  ;;  %v4349_v41 = vadd.f32 %v3260_v31, %v1862_v37 }
 0x14d   : > { %v4351_v42 = vadd.f32 %v3263_v38, %v1865_v12  ;;  %v3200_v43 = vpop.f32.mrb[36].mxu1  ;;  %v3264_v44 = vpop.f32.mrb[36].mxu0 }
 0x14e   : > { %v3201_v35 = vpop.f32.mrb[37].mxu1  ;;  %v3265_v46 = vpop.f32.mrb[37].mxu0 }
 0x14f   : > { %v3202_v49 = vadd.f32 %v3201_v35, %v3200_v43  ;;  %v3203_v50 = vpop.f32.mrb[38].mxu1  ;;  %v3266_v53 = vadd.f32 %v3265_v46, %v3264_v44  ;;  %v3267_v54 = vpop.f32.mrb[38].mxu0 }
 0x150   : > { %v3204_v55 = vpop.f32.mrb[39].mxu1  ;;  %v3268_v56 = vpop.f32.mrb[39].mxu0 }
 0x151   : > { %v1870_v33 = vadd.f32 %v3202_v49, %v4316_v45  ;;  %v3205_v58 = vadd.f32 %v3204_v55, %v3203_v50  ;;  %v3269_v60 = vadd.f32 %v3268_v56, %v3267_v54 }
 0x153   : > { %v1873_v39 = vadd.f32 %v3205_v58, %v4318_v51  ;;  %v4355_v61 = vadd.f32 %v3266_v53, %v1870_v33 }
 0x155   : > { %v4357_v62 = vadd.f32 %v3269_v60, %v1873_v39  ;;  %v3206_v1 = vpop.f32.mrb[40].mxu1  ;;  %v3270_v2 = vpop.f32.mrb[40].mxu0 }
 0x156   : > { %v3207_v47 = vpop.f32.mrb[41].mxu1  ;;  %v3271_v3 = vpop.f32.mrb[41].mxu0 }
 0x157   : > { %v3208_v6 = vadd.f32 %v3207_v47, %v3206_v1  ;;  %v3209_v8 = vpop.f32.mrb[42].mxu1  ;;  %v3272_v9 = vadd.f32 %v3271_v3, %v3270_v2  ;;  %v3273_v10 = vpop.f32.mrb[42].mxu0 }
 0x158   : > { %v3210_v13 = vpop.f32.mrb[43].mxu1  ;;  %v3274_v14 = vpop.f32.mrb[43].mxu0 }
 0x159   : > { %v1878_v45 = vadd.f32 %v3208_v6, %v4320_v57  ;;  %v3211_v15 = vadd.f32 %v3210_v13, %v3209_v8  ;;  %v3275_v16 = vadd.f32 %v3274_v14, %v3273_v10 }
 0x15b   : > { %v1881_v51 = vadd.f32 %v3211_v15, %v4322_v63  ;;  %v4361_v17 = vadd.f32 %v3272_v9, %v1878_v45 }
 0x15d   : > { %v4363_v18 = vadd.f32 %v3275_v16, %v1881_v51  ;;  %v3212_v19 = vpop.f32.mrb[44].mxu1  ;;  %v3276_v59 = vpop.f32.mrb[44].mxu0 }
 0x15e   : > { %v3213_v20 = vpop.f32.mrb[45].mxu1  ;;  %v3277_v21 = vpop.f32.mrb[45].mxu0 }
 0x15f   : > { %v3214_v23 = vadd.f32 %v3213_v20, %v3212_v19  ;;  %v3215_v24 = vpop.f32.mrb[46].mxu1  ;;  %v3278_v25 = vadd.f32 %v3277_v21, %v3276_v59  ;;  %v3279_v26 = vpop.f32.mrb[46].mxu0 }
 0x160   : > { %v3216_v29 = vpop.f32.mrb[47].mxu1  ;;  %v3280_v30 = vpop.f32.mrb[47].mxu0 }
 0x161   : > { %v1886_v57 = vadd.f32 %v3214_v23, %v4324_v5  ;;  %v3217_v31 = vadd.f32 %v3216_v29, %v3215_v24  ;;  %v3281_v32 = vadd.f32 %v3280_v30, %v3279_v26 }
 0x163   : > { %v1889_v63 = vadd.f32 %v3217_v31, %v4328_v11  ;;  %v4367_v34 = vadd.f32 %v3278_v25, %v1886_v57 }
 0x165   : > { %v4369_v36 = vadd.f32 %v3281_v32, %v1889_v63  ;;  %v3298_v37 = vpop.f32.mrb[48].mxu1  ;;  %v3362_v7 = vpop.f32.mrb[48].mxu0 }
 0x166   : > { %v3299_v38 = vpop.f32.mrb[49].mxu1  ;;  %v3363_v12 = vpop.f32.mrb[49].mxu0 }
 0x167   : > { %v3300_v43 = vadd.f32 %v3299_v38, %v3298_v37  ;;  %v3301_v44 = vpop.f32.mrb[50].mxu1  ;;  %v3364_v35 = vadd.f32 %v3363_v12, %v3362_v7  ;;  %v3365_v46 = vpop.f32.mrb[50].mxu0 }
 0x168   : > { %v3302_v49 = vpop.f32.mrb[51].mxu1  ;;  %v3366_v50 = vpop.f32.mrb[51].mxu0 }
 0x169   : > { %v2024_v5 = vadd.f32 %v3300_v43, %v4330_v27  ;;  %v3303_v53 = vadd.f32 %v3302_v49, %v3301_v44  ;;  %v3367_v54 = vadd.f32 %v3366_v50, %v3365_v46 }
 0x16b   : > { %v2027_v11 = vadd.f32 %v3303_v53, %v4332_v28  ;;  %v4373_v55 = vadd.f32 %v3364_v35, %v2024_v5 }
 0x16d   : > { %v4375_v56 = vadd.f32 %v3367_v54, %v2027_v11  ;;  %v3304_v33 = vpop.f32.mrb[52].mxu1  ;;  %v3368_v58 = vpop.f32.mrb[52].mxu0 }
 0x16e   : > { %v3305_v60 = vpop.f32.mrb[53].mxu1  ;;  %v3369_v39 = vpop.f32.mrb[53].mxu0 }
 0x16f   : > { %v3306_v1 = vadd.f32 %v3305_v60, %v3304_v33  ;;  %v3307_v2 = vpop.f32.mrb[54].mxu1  ;;  %v3370_v47 = vadd.f32 %v3369_v39, %v3368_v58  ;;  %v3371_v3 = vpop.f32.mrb[54].mxu0 }
 0x170   : > { %v3308_v6 = vpop.f32.mrb[55].mxu1  ;;  %v3372_v8 = vpop.f32.mrb[55].mxu0 }
 0x171   : > { %v2032_v27 = vadd.f32 %v3306_v1, %v4334_v48  ;;  %v3309_v9 = vadd.f32 %v3308_v6, %v3307_v2  ;;  %v3373_v10 = vadd.f32 %v3372_v8, %v3371_v3 }
 0x173   : > { %v2035_v28 = vadd.f32 %v3309_v9, %v4336_v40  ;;  %v4379_v13 = vadd.f32 %v3370_v47, %v2032_v27 }
 0x175   : > { %v4381_v14 = vadd.f32 %v3373_v10, %v2035_v28  ;;  %v3310_v45 = vpop.f32.mrb[56].mxu1  ;;  %v3374_v15 = vpop.f32.mrb[56].mxu0 }
 0x176   : > { %v3311_v16 = vpop.f32.mrb[57].mxu1  ;;  %v3375_v51 = vpop.f32.mrb[57].mxu0 }
 0x177   : > { %v3312_v19 = vadd.f32 %v3311_v16, %v3310_v45  ;;  %v3313_v59 = vpop.f32.mrb[58].mxu1  ;;  %v3376_v20 = vadd.f32 %v3375_v51, %v3374_v15  ;;  %v3377_v21 = vpop.f32.mrb[58].mxu0 }
 0x178   : > { %v3314_v23 = vpop.f32.mrb[59].mxu1  ;;  %v3378_v24 = vpop.f32.mrb[59].mxu0 }
 0x179   : > { %v2040_v48 = vadd.f32 %v3312_v19, %v4338_v4  ;;  %v3315_v25 = vadd.f32 %v3314_v23, %v3313_v59  ;;  %v3379_v26 = vadd.f32 %v3378_v24, %v3377_v21 }
 0x17b   : > { %v2043_v40 = vadd.f32 %v3315_v25, %v4340_v52  ;;  %v4385_v29 = vadd.f32 %v3376_v20, %v2040_v48 }
 0x17d   : > { %v4387_v30 = vadd.f32 %v3379_v26, %v2043_v40  ;;  %v3316_v57 = vpop.f32.mrb[60].mxu1  ;;  %v3380_v31 = vpop.f32.mrb[60].mxu0 }
 0x17e   : > { %v3317_v32 = vpop.f32.mrb[61].mxu1  ;;  %v3381_v63 = vpop.f32.mrb[61].mxu0 }
 0x17f   : > { %v3318_v37 = vadd.f32 %v3317_v32, %v3316_v57  ;;  %v3319_v7 = vpop.f32.mrb[62].mxu1  ;;  %v3382_v38 = vadd.f32 %v3381_v63, %v3380_v31  ;;  %v3383_v12 = vpop.f32.mrb[62].mxu0 }
 0x180   : > { %v3320_v43 = vpop.f32.mrb[63].mxu1  ;;  %v3384_v44 = vpop.f32.mrb[63].mxu0 }
 0x181   : > { %v2048_v4 = vadd.f32 %v3318_v37, %v4343_v0  ;;  %v3321_v35 = vadd.f32 %v3320_v43, %v3319_v7  ;;  %v3385_v46 = vadd.f32 %v3384_v44, %v3383_v12 }
 0x183   : > { %v2051_v52 = vadd.f32 %v3321_v35, %v4345_v22  ;;  %v4391_v49 = vadd.f32 %v3382_v38, %v2048_v4 }
 0x185   : > { %v4393_v50 = vadd.f32 %v3385_v46, %v2051_v52  ;;  %v3322_v5 = vpop.f32.mrb[64].mxu1  ;;  %v3386_v53 = vpop.f32.mrb[64].mxu0 }
 0x186   : > { %v3323_v54 = vpop.f32.mrb[65].mxu1  ;;  %v3387_v11 = vpop.f32.mrb[65].mxu0 }
 0x187   : > { %v3324_v33 = vadd.f32 %v3323_v54, %v3322_v5  ;;  %v3325_v58 = vpop.f32.mrb[66].mxu1  ;;  %v3388_v60 = vadd.f32 %v3387_v11, %v3386_v53  ;;  %v3389_v39 = vpop.f32.mrb[66].mxu0 }
 0x188   : > { %v3326_v1 = vpop.f32.mrb[67].mxu1  ;;  %v3390_v2 = vpop.f32.mrb[67].mxu0 }
 0x189   : > { %v2056_v0 = vadd.f32 %v3324_v33, %v4349_v41  ;;  %v3327_v47 = vadd.f32 %v3326_v1, %v3325_v58  ;;  %v3391_v3 = vadd.f32 %v3390_v2, %v3389_v39 }
 0x18b   : > { %v2059_v22 = vadd.f32 %v3327_v47, %v4351_v42  ;;  %v4397_v6 = vadd.f32 %v3388_v60, %v2056_v0 }
 0x18d   : > { %v4399_v8 = vadd.f32 %v3391_v3, %v2059_v22  ;;  %v3328_v27 = vpop.f32.mrb[68].mxu1  ;;  %v3392_v9 = vpop.f32.mrb[68].mxu0 }
 0x18e   : > { %v3329_v10 = vpop.f32.mrb[69].mxu1  ;;  %v3393_v28 = vpop.f32.mrb[69].mxu0 }
 0x18f   : > { %v3330_v45 = vadd.f32 %v3329_v10, %v3328_v27  ;;  %v3331_v15 = vpop.f32.mrb[70].mxu1  ;;  %v3394_v16 = vadd.f32 %v3393_v28, %v3392_v9  ;;  %v3395_v51 = vpop.f32.mrb[70].mxu0 }
 0x190   : > { %v3332_v19 = vpop.f32.mrb[71].mxu1  ;;  %v3396_v59 = vpop.f32.mrb[71].mxu0 }
 0x191   : > { %v2064_v41 = vadd.f32 %v3330_v45, %v4355_v61  ;;  %v3333_v20 = vadd.f32 %v3332_v19, %v3331_v15  ;;  %v3397_v21 = vadd.f32 %v3396_v59, %v3395_v51 }
 0x193   : > { %v2067_v42 = vadd.f32 %v3333_v20, %v4357_v62  ;;  %v4403_v23 = vadd.f32 %v3394_v16, %v2064_v41 }
 0x195   : > { %v4405_v24 = vadd.f32 %v3397_v21, %v2067_v42  ;;  %v3334_v48 = vpop.f32.mrb[72].mxu1  ;;  %v3398_v25 = vpop.f32.mrb[72].mxu0 }
 0x196   : > { %v3335_v26 = vpop.f32.mrb[73].mxu1  ;;  %v3399_v40 = vpop.f32.mrb[73].mxu0 }
 0x197   : > { %v3336_v57 = vadd.f32 %v3335_v26, %v3334_v48  ;;  %v3337_v31 = vpop.f32.mrb[74].mxu1  ;;  %v3400_v32 = vadd.f32 %v3399_v40, %v3398_v25  ;;  %v3401_v63 = vpop.f32.mrb[74].mxu0 }
 0x198   : > { %v3338_v37 = vpop.f32.mrb[75].mxu1  ;;  %v3402_v7 = vpop.f32.mrb[75].mxu0 }
 0x199   : > { %v2072_v61 = vadd.f32 %v3336_v57, %v4361_v17  ;;  %v3339_v38 = vadd.f32 %v3338_v37, %v3337_v31  ;;  %v3403_v12 = vadd.f32 %v3402_v7, %v3401_v63 }
 0x19b   : > { %v2075_v62 = vadd.f32 %v3339_v38, %v4363_v18  ;;  %v4409_v43 = vadd.f32 %v3400_v32, %v2072_v61 }
 0x19d   : > { %v4411_v44 = vadd.f32 %v3403_v12, %v2075_v62  ;;  %v3340_v4 = vpop.f32.mrb[76].mxu1  ;;  %v3404_v35 = vpop.f32.mrb[76].mxu0 }
 0x19e   : > { %v3341_v46 = vpop.f32.mrb[77].mxu1  ;;  %v3405_v52 = vpop.f32.mrb[77].mxu0 }
 0x19f   : > { %v3342_v5 = vadd.f32 %v3341_v46, %v3340_v4  ;;  %v3343_v53 = vpop.f32.mrb[78].mxu1  ;;  %v3406_v54 = vadd.f32 %v3405_v52, %v3404_v35  ;;  %v3407_v11 = vpop.f32.mrb[78].mxu0 }
 0x1a0   : > { %v3344_v33 = vpop.f32.mrb[79].mxu1  ;;  %v3408_v58 = vpop.f32.mrb[79].mxu0 }
 0x1a1   : > { %v2080_v17 = vadd.f32 %v3342_v5, %v4367_v34  ;;  %v3345_v60 = vadd.f32 %v3344_v33, %v3343_v53  ;;  %v3409_v39 = vadd.f32 %v3408_v58, %v3407_v11 }
 0x1a3   : > { %v2083_v18 = vadd.f32 %v3345_v60, %v4369_v36  ;;  %v4415_v1 = vadd.f32 %v3406_v54, %v2080_v17 }
 0x1a5   : > { %v4417_v2 = vadd.f32 %v3409_v39, %v2083_v18  ;;  %v3426_v0 = vpop.f32.mrb[80].mxu1  ;;  %v2314_v47 = vpop.f32.mrb[80].mxu0 }
 0x1a6   : > { %v3427_v3 = vpop.f32.mrb[81].mxu1  ;;  %v2316_v22 = vpop.f32.mrb[81].mxu0 }
 0x1a7   : > { %v3428_v27 = vadd.f32 %v3427_v3, %v3426_v0  ;;  %v3429_v9 = vpop.f32.mrb[82].mxu1  ;;  %v2317_v10 = vpop.f32.mrb[82].mxu0 }
 0x1a8   : > { %v3430_v28 = vpop.f32.mrb[83].mxu1  ;;  %v2319_v45 = vpop.f32.mrb[83].mxu0 }
 0x1a9   : > { %v3431_v15 = vadd.f32 %v3430_v28, %v3429_v9  ;;  %v2218_v34 = vadd.f32 %v3428_v27, %v4373_v55 }
 0x1ab   : > { %v4420_v16 = vadd.f32 %v2314_v47, %v2218_v34  ;;  %v2221_v36 = vadd.f32 %v3431_v15, %v4375_v56 }
 0x1ad   : > { %v4423_v51 = vadd.f32 %v2317_v10, %v2221_v36  ;;  %v3432_v19 = vpop.f32.mrb[84].mxu1  ;;  %v2378_v59 = vsel %vm2377_vm1, %v4420_v16, 0.0  ;;  %v2322_v41 = vpop.f32.mrb[84].mxu0  ;;  %v2443_v56 = vmul.f32 %v4420_v16, %v4420_v16 }
 0x1ae   : > { %v3433_v20 = vpop.f32.mrb[85].mxu1  ;;  %2379 = vadd.xlane.f32.xlu0 %v2378_v59  ;;  %v2324_v21 = vpop.f32.mrb[85].mxu0 }
 0x1af   : > { %v3434_v42 = vadd.f32 %v3433_v20, %v3432_v19  ;;  %v3435_v48 = vpop.f32.mrb[86].mxu1  ;;  %v2325_v25 = vpop.f32.mrb[86].mxu0  ;;  %v2444_v55 = vmul.f32 %v4423_v51, %v4423_v51  ;;  %v2381_v63 = vsel %vm2377_vm1, %v4423_v51, 0.0  ;;  %v2459_v62 = vsel %vm2377_vm1, %v2443_v56, 0.0 }
 0x1b0   : > { %v3436_v26 = vpop.f32.mrb[87].mxu1  ;;  %v2327_v40 = vpop.f32.mrb[87].mxu0 }
 0x1b1   : > { %v3437_v57 = vadd.f32 %v3436_v26, %v3435_v48  ;;  %v2226_v31 = vadd.f32 %v3434_v42, %v4379_v13  ;;  %v2462_v32 = vsel %vm2377_vm1, %v2444_v55, 0.0 }
 0x1b2   : > { %2463 = vadd.xlane.f32.xlu1 %v2462_v32  ;;  %2382 = vadd.xlane.f32.xlu0 %v2381_v63 }
 0x1b3   : > { %v4435_v37 = vadd.f32 %v2322_v41, %v2226_v31  ;;  %v2229_v7 = vadd.f32 %v3437_v57, %v4381_v14 }
 0x1b5   : > { %v4438_v61 = vadd.f32 %v2325_v25, %v2229_v7  ;;  %v3438_v38 = vpop.f32.mrb[88].mxu1  ;;  %v2384_v12 = vsel %vm2377_vm1, %v4435_v37, 0.0  ;;  %v2330_v13 = vpop.f32.mrb[88].mxu0  ;;  %v2445_v4 = vmul.f32 %v4435_v37, %v4435_v37 }
 0x1b6   : > { %v3439_v35 = vpop.f32.mrb[89].mxu1  ;;  %2385 = vadd.xlane.f32.xlu1 %v2384_v12  ;;  %2460 = vadd.xlane.f32.xlu0 %v2459_v62  ;;  %v2332_v46 = vpop.f32.mrb[89].mxu0 }
 0x1b7   : > { %v3440_v52 = vadd.f32 %v3439_v35, %v3438_v38  ;;  %v3441_v5 = vpop.f32.mrb[90].mxu1  ;;  %v2333_v53 = vpop.f32.mrb[90].mxu0  ;;  %v2387_v54 = vsel %vm2377_vm1, %v4438_v61, 0.0  ;;  %v2465_v17 = vsel %vm2377_vm1, %v2445_v4, 0.0  ;;  %v2446_v60 = vmul.f32 %v4438_v61, %v4438_v61 }
 0x1b8   : > { %v3442_v14 = vpop.f32.mrb[91].mxu1  ;;  %v2335_v11 = vpop.f32.mrb[91].mxu0 }
 0x1b9   : > { %v3443_v33 = vadd.f32 %v3442_v14, %v3441_v5  ;;  %v2234_v58 = vadd.f32 %v3440_v52, %v4385_v29  ;;  %v2468_v3 = vsel %vm2377_vm1, %v2446_v60, 0.0 }
 0x1ba   : > { %2388 = vadd.xlane.f32.xlu1 %v2387_v54  ;;  %2466 = vadd.xlane.f32.xlu0 %v2465_v17 }
 0x1bb   : > { %v4451_v39 = vadd.f32 %v2330_v13, %v2234_v58  ;;  %v2237_v18 = vadd.f32 %v3443_v33, %v4387_v30 }
 0x1bd   : > { %v4454_v0 = vadd.f32 %v2333_v53, %v2237_v18  ;;  %v3444_v47 = vpop.f32.mrb[92].mxu1  ;;  %v2390_v22 = vsel %vm2377_vm1, %v4451_v39, 0.0  ;;  %v2338_v29 = vpop.f32.mrb[92].mxu0  ;;  %v2447_v27 = vmul.f32 %v4451_v39, %v4451_v39 }
 0x1be   : > { %v3445_v9 = vpop.f32.mrb[93].mxu1  ;;  %2469 = vadd.xlane.f32.xlu1 %v2468_v3  ;;  %2391 = vadd.xlane.f32.xlu0 %v2390_v22  ;;  %v2340_v10 = vpop.f32.mrb[93].mxu0 }
 0x1bf   : > { %v3446_v28 = vadd.f32 %v3445_v9, %v3444_v47  ;;  %v3447_v45 = vpop.f32.mrb[94].mxu1  ;;  %v2341_v15 = vpop.f32.mrb[94].mxu0  ;;  %v2393_v34 = vsel %vm2377_vm1, %v4454_v0, 0.0  ;;  %v2471_v41 = vsel %vm2377_vm1, %v2447_v27, 0.0  ;;  %v2448_v20 = vmul.f32 %v4454_v0, %v4454_v0 }
 0x1c0   : > { %v3448_v30 = vpop.f32.mrb[95].mxu1  ;;  %v2343_v36 = vpop.f32.mrb[95].mxu0 }
 0x1c1   : > { %v3449_v19 = vadd.f32 %v3448_v30, %v3447_v45  ;;  %v2242_v59 = vadd.f32 %v3446_v28, %v4391_v49  ;;  %v2474_v55 = vsel %vm2377_vm1, %v2448_v20, 0.0 }
 0x1c2   : > { %2394 = vadd.xlane.f32.xlu1 %v2393_v34  ;;  %2472 = vadd.xlane.f32.xlu0 %v2471_v41 }
 0x1c3   : > { %v4467_v21 = vadd.f32 %v2338_v29, %v2242_v59  ;;  %v2245_v42 = vadd.f32 %v3449_v19, %v4393_v50 }
 0x1c5   : > { %v4470_v48 = vadd.f32 %v2341_v15, %v2245_v42  ;;  %v3450_v25 = vpop.f32.mrb[96].mxu1  ;;  %v2396_v26 = vsel %vm2377_vm1, %v4467_v21, 0.0  ;;  %v2346_v49 = vpop.f32.mrb[96].mxu0  ;;  %v2449_v40 = vmul.f32 %v4467_v21, %v4467_v21 }
 0x1c6   : > { %v3451_v56 = vpop.f32.mrb[97].mxu1  ;;  %2475 = vadd.xlane.f32.xlu1 %v2474_v55  ;;  %2397 = vadd.xlane.f32.xlu0 %v2396_v26  ;;  %v2348_v57 = vpop.f32.mrb[97].mxu0 }
 0x1c7   : > { %v3452_v31 = vadd.f32 %v3451_v56, %v3450_v25  ;;  %v3453_v32 = vpop.f32.mrb[98].mxu1  ;;  %v2349_v63 = vpop.f32.mrb[98].mxu0  ;;  %v2399_v7 = vsel %vm2377_vm1, %v4470_v48, 0.0  ;;  %v2477_v13 = vsel %vm2377_vm1, %v2449_v40, 0.0  ;;  %v2450_v4 = vmul.f32 %v4470_v48, %v4470_v48 }
 0x1c8   : > { %v3454_v50 = vpop.f32.mrb[99].mxu1  ;;  %v2351_v38 = vpop.f32.mrb[99].mxu0 }
 0x1c9   : > { %v3455_v12 = vadd.f32 %v3454_v50, %v3453_v32  ;;  %v2250_v62 = vadd.f32 %v3452_v31, %v4397_v6  ;;  %v2480_v53 = vsel %vm2377_vm1, %v2450_v4, 0.0 }
 0x1ca   : > { %2400 = vadd.xlane.f32.xlu1 %v2399_v7  ;;  %2478 = vadd.xlane.f32.xlu0 %v2477_v13 }
 0x1cb   : > { %v4483_v35 = vadd.f32 %v2346_v49, %v2250_v62  ;;  %v2253_v46 = vadd.f32 %v3455_v12, %v4399_v8 }
 0x1cd   : > { %v4486_v52 = vadd.f32 %v2349_v63, %v2253_v46  ;;  %v3456_v5 = vpop.f32.mrb[100].mxu1  ;;  %v2402_v14 = vsel %vm2377_vm1, %v4483_v35, 0.0  ;;  %v2354_v6 = vpop.f32.mrb[100].mxu0  ;;  %v2451_v54 = vmul.f32 %v4483_v35, %v4483_v35 }
 0x1ce   : > { %v3457_v11 = vpop.f32.mrb[101].mxu1  ;;  %2481 = vadd.xlane.f32.xlu1 %v2480_v53  ;;  %2403 = vadd.xlane.f32.xlu0 %v2402_v14  ;;  %v2356_v33 = vpop.f32.mrb[101].mxu0 }
 0x1cf   : > { %v3458_v58 = vadd.f32 %v3457_v11, %v3456_v5  ;;  %v3459_v17 = vpop.f32.mrb[102].mxu1  ;;  %v2357_v60 = vpop.f32.mrb[102].mxu0  ;;  %v2405_v18 = vsel %vm2377_vm1, %v4486_v52, 0.0  ;;  %v2483_v29 = vsel %vm2377_vm1, %v2451_v54, 0.0  ;;  %v2452_v27 = vmul.f32 %v4486_v52, %v4486_v52 }
 0x1d0   : > { %v3460_v8 = vpop.f32.mrb[103].mxu1  ;;  %v2359_v47 = vpop.f32.mrb[103].mxu0 }
 0x1d1   : > { %v3461_v3 = vadd.f32 %v3460_v8, %v3459_v17  ;;  %v2258_v22 = vadd.f32 %v3458_v58, %v4403_v23  ;;  %v2486_v15 = vsel %vm2377_vm1, %v2452_v27, 0.0 }
 0x1d2   : > { %2406 = vadd.xlane.f32.xlu1 %v2405_v18  ;;  %2484 = vadd.xlane.f32.xlu0 %v2483_v29 }
 0x1d3   : > { %v4499_v9 = vadd.f32 %v2354_v6, %v2258_v22  ;;  %v2261_v10 = vadd.f32 %v3461_v3, %v4405_v24 }
 0x1d5   : > { %v4502_v28 = vadd.f32 %v2357_v60, %v2261_v10  ;;  %v3462_v45 = vpop.f32.mrb[104].mxu1  ;;  %v2408_v30 = vsel %vm2377_vm1, %v4499_v9, 0.0  ;;  %v2362_v23 = vpop.f32.mrb[104].mxu0  ;;  %v2453_v34 = vmul.f32 %v4499_v9, %v4499_v9 }
 0x1d6   : > { %v3463_v36 = vpop.f32.mrb[105].mxu1  ;;  %2487 = vadd.xlane.f32.xlu1 %v2486_v15  ;;  %2409 = vadd.xlane.f32.xlu0 %v2408_v30  ;;  %v2364_v19 = vpop.f32.mrb[105].mxu0 }
 0x1d7   : > { %v3464_v59 = vadd.f32 %v3463_v36, %v3462_v45  ;;  %v3465_v41 = vpop.f32.mrb[106].mxu1  ;;  %v2365_v20 = vpop.f32.mrb[106].mxu0  ;;  %v2411_v42 = vsel %vm2377_vm1, %v4502_v28, 0.0  ;;  %v2489_v49 = vsel %vm2377_vm1, %v2453_v34, 0.0  ;;  %v2454_v40 = vmul.f32 %v4502_v28, %v4502_v28 }
 0x1d8   : > { %v3466_v24 = vpop.f32.mrb[107].mxu1  ;;  %v2367_v25 = vpop.f32.mrb[107].mxu0 }
 0x1d9   : > { %v3467_v55 = vadd.f32 %v3466_v24, %v3465_v41  ;;  %v2266_v26 = vadd.f32 %v3464_v59, %v4409_v43  ;;  %v2492_v63 = vsel %vm2377_vm1, %v2454_v40, 0.0 }
 0x1da   : > { %2412 = vadd.xlane.f32.xlu1 %v2411_v42  ;;  %2490 = vadd.xlane.f32.xlu0 %v2489_v49 }
 0x1db   : > { %v4515_v56 = vadd.f32 %v2362_v23, %v2266_v26  ;;  %v2269_v57 = vadd.f32 %v3467_v55, %v4411_v44 }
 0x1dd   : > { %v4518_v31 = vadd.f32 %v2365_v20, %v2269_v57  ;;  %v3468_v32 = vpop.f32.mrb[108].mxu1  ;;  %v2414_v50 = vsel %vm2377_vm1, %v4515_v56, 0.0  ;;  %v2370_v43 = vpop.f32.mrb[108].mxu0  ;;  %v2455_v7 = vmul.f32 %v4515_v56, %v4515_v56 }
 0x1de   : > { %v3469_v38 = vpop.f32.mrb[109].mxu1  ;;  %2493 = vadd.xlane.f32.xlu1 %v2492_v63  ;;  %2415 = vadd.xlane.f32.xlu0 %v2414_v50  ;;  %v2372_v12 = vpop.f32.mrb[109].mxu0 }
 0x1df   : > { %v3470_v62 = vadd.f32 %v3469_v38, %v3468_v32  ;;  %v3471_v13 = vpop.f32.mrb[110].mxu1  ;;  %v2373_v4 = vpop.f32.mrb[110].mxu0  ;;  %v2417_v46 = vsel %vm2377_vm1, %v4518_v31, 0.0  ;;  %v2495_v6 = vsel %vm2377_vm1, %v2455_v7, 0.0  ;;  %v2456_v54 = vmul.f32 %v4518_v31, %v4518_v31 }
 0x1e0   : > { %v3472_v44 = vpop.f32.mrb[111].mxu1  ;;  %v2375_v5 = vpop.f32.mrb[111].mxu0 }
 0x1e1   : > { %v3473_v53 = vadd.f32 %v3472_v44, %v3471_v13  ;;  %v2274_v14 = vadd.f32 %v3470_v62, %v4415_v1  ;;  %v2498_v17 = vsel %vm2377_vm1, %v2456_v54, 0.0 }
 0x1e2   : > { %2418 = vadd.xlane.f32.xlu1 %v2417_v46  ;;  %2496 = vadd.xlane.f32.xlu0 %v2495_v6 }
 0x1e3   : > { %v4531_v11 = vadd.f32 %v2370_v43, %v2274_v14  ;;  %v2277_v33 = vadd.f32 %v3473_v53, %v4417_v2 }
 0x1e5   : > { %v4534_v58 = vadd.f32 %v2373_v4, %v2277_v33  ;;  %v2420_v60 = vsel %vm2377_vm1, %v4531_v11, 0.0  ;;  %v2457_v1 = vmul.f32 %v4531_v11, %v4531_v11 }
 0x1e6   : > { %2499 = vadd.xlane.f32.xlu1 %v2498_v17  ;;  %2421 = vadd.xlane.f32.xlu0 %v2420_v60 }
 0x1e7   : > { %v2423_v8 = vsel %vm2377_vm1, %v4534_v58, 0.0  ;;  %v2501_v18 = vsel %vm2377_vm1, %v2457_v1, 0.0  ;;  %v2458_v2 = vmul.f32 %v4534_v58, %v4534_v58 }
 0x1e9   : > { %v2504_v47 = vsel %vm2377_vm1, %v2458_v2, 0.0 }
 0x1ea   : > { %2424 = vadd.xlane.f32.xlu1 %v2423_v8  ;;  %2502 = vadd.xlane.f32.xlu0 %v2501_v18 }
 0x1ee   : > { %2505 = vadd.xlane.f32.xlu1 %v2504_v47 }
 0x23b   : > { %v2380_v3 = vpop.xlane.xlu0 %2379 }
 0x23c   : > { %v2427_v27 = vmul.f32 0.0625, %v2380_v3 }
 0x23e   : > { %v2523_v34 = vmul.f32 %v2427_v27, %v2427_v27  ;;  %v2603_v47 = vsub.f32 %v4420_v16, %v2427_v27 }
 0x23f   : > { %v2464_v22 = vpop.xlane.xlu1 %2463  ;;  %v2383_v29 = vpop.xlane.xlu0 %2382 }
 0x240   : > { %v2428_v10 = vmul.f32 0.0625, %v2383_v29  ;;  %v2508_v45 = vmul.f32 0.0625, %v2464_v22 }
 0x242   : > { %v2524_v15 = vmul.f32 %v2428_v10, %v2428_v10  ;;  %v2604_v33 = vsub.f32 %v4423_v51, %v2428_v10 }
 0x243   : > { %v2386_v30 = vpop.xlane.xlu1 %2385  ;;  %v2461_v23 = vpop.xlane.xlu0 %2460 }
 0x244   : > { %v2540_v36 = vsub.f32 %v2508_v45, %v2524_v15  ;;  %v2507_v19 = vmul.f32 0.0625, %v2461_v23  ;;  %v4547_v59 = vmul.f32 0.0625, %v2386_v30 }
 0x246   : > { %v2556_v41 = vmax.f32 %v2540_v36, 0.0  ;;  %v2539_v20 = vsub.f32 %v2507_v19, %v2523_v34  ;;  %v2525_v40 = vmul.f32 %v4547_v59, %v4547_v59 }
 0x247   : > { %v2389_v24 = vpop.xlane.xlu1 %2388  ;;  %v2467_v42 = vpop.xlane.xlu0 %2466 }
 0x248   : > { %v2572_v25 = vadd.f32 1e-05, %v2556_v41  ;;  %v2555_v55 = vmax.f32 %v2539_v20, 0.0  ;;  %v4549_v26 = vmul.f32 0.0625, %v2389_v24  ;;  %v2509_v49 = vmul.f32 0.0625, %v2467_v42 }
 0x249   : > { %v2605_v24 = vsub.f32 %v4435_v37, %v4547_v59 }
 0x24a   : > { %3776 = vrsqrt.f32 %v2572_v25  ;;  %v2571_v57 = vadd.f32 1e-05, %v2555_v55  ;;  %v2541_v32 = vsub.f32 %v2509_v49, %v2525_v40  ;;  %v2526_v43 = vmul.f32 %v4549_v26, %v4549_v26 }
 0x24b   : > { %v2470_v63 = vpop.xlane.xlu1 %2469  ;;  %v2392_v50 = vpop.xlane.xlu0 %2391 }
 0x24c   : > { %3778 = vrsqrt.f32 %v2571_v57  ;;  %v2510_v7 = vmul.f32 0.0625, %v2470_v63  ;;  %v4555_v38 = vmul.f32 0.0625, %v2392_v50  ;;  %v2557_v12 = vmax.f32 %v2541_v32, 0.0 }
 0x24e   : > { %v2542_v62 = vsub.f32 %v2510_v7, %v2526_v43  ;;  %v2573_v13 = vadd.f32 1e-05, %v2557_v12  ;;  %v2527_v5 = vmul.f32 %v4555_v38, %v4555_v38  ;;  %v2606_v7 = vsub.f32 %v4438_v61, %v4549_v26 }
 0x24f   : > { %v2395_v4 = vpop.xlane.xlu1 %2394  ;;  %v2473_v44 = vpop.xlane.xlu0 %2472 }
 0x250   : > { %v2558_v46 = vmax.f32 %v2542_v62, 0.0  ;;  %v4559_v53 = vmul.f32 0.0625, %v2395_v4  ;;  %v2511_v14 = vmul.f32 0.0625, %v2473_v44  ;;  %3780 = vrsqrt.f32 %v2573_v13 }
 0x251   : > { %v2607_v44 = vsub.f32 %v4451_v39, %v4555_v38 }
 0x252   : > { %v2574_v6 = vadd.f32 1e-05, %v2558_v46  ;;  %v2543_v54 = vsub.f32 %v2511_v14, %v2527_v5  ;;  %v2528_v8 = vmul.f32 %v4559_v53, %v4559_v53 }
 0x253   : > { %v2476_v17 = vpop.xlane.xlu1 %2475  ;;  %v2398_v60 = vpop.xlane.xlu0 %2397 }
 0x254   : > { %v3777_v1 = vpop.eup %3776  ;;  %3782 = vrsqrt.f32 %v2574_v6  ;;  %v2559_v18 = vmax.f32 %v2543_v54, 0.0  ;;  %v2512_v2 = vmul.f32 0.0625, %v2476_v17  ;;  %v4565_v22 = vmul.f32 0.0625, %v2398_v60 }
 0x255   : > { %v2620_v3 = vmul.f32 %v3777_v1, %v2604_v33 }
 0x256   : > { %v3779_v29 = vpop.eup %3778  ;;  %v2575_v45 = vadd.f32 1e-05, %v2559_v18  ;;  %v2544_v15 = vsub.f32 %v2512_v2, %v2528_v8  ;;  %v2529_v41 = vmul.f32 %v4565_v22, %v4565_v22 }
 0x257   : > { %vm2636_vm3 = vcmp.ge.f32.partialorder %v2620_v3, 0.0  ;;  %v2652_v51 = vmul.f32 0.01, %v2620_v3  ;;  %v2619_v10 = vmul.f32 %v3779_v29, %v2603_v47  ;;  %v2401_v30 = vpop.xlane.xlu1 %2400  ;;  %v2479_v23 = vpop.xlane.xlu0 %2478 }
 0x258   : > { %3784 = vrsqrt.f32 %v2575_v45  ;;  %v2560_v34 = vmax.f32 %v2544_v15, 0.0  ;;  %v4568_v36 = vmul.f32 0.0625, %v2401_v30  ;;  %v2513_v19 = vmul.f32 0.0625, %v2479_v23 }
 0x259   : > { %v2668_v16 = vsel %vm2636_vm3, %v2620_v3, %v2652_v51  ;;  %vm2635_vm4 = vcmp.ge.f32.partialorder %v2619_v10, 0.0  ;;  %v2651_v27 = vmul.f32 0.01, %v2619_v10  ;;  %v2608_v51 = vsub.f32 %v4454_v0, %v4559_v53 }
 0x25a   : > { %v3075_v20 = vpack.c.bf16 %v2668_v16, %v2668_v16  ;;  %v2576_v42 = vadd.f32 1e-05, %v2560_v34  ;;  %v3781_v25 = vpop.eup %3780  ;;  %v2530_v49 = vmul.f32 %v4568_v36, %v4568_v36  ;;  %v2545_v40 = vsub.f32 %v2513_v19, %v2529_v41 }
 0x25b   : > { %v2667_v55 = vsel %vm2635_vm4, %v2619_v10, %v2651_v27  ;;  %v2482_v57 = vpop.xlane.xlu1 %2481  ;;  %v2404_v32 = vpop.xlane.xlu0 %2403  ;;  %v2621_v50 = vmul.f32 %v3781_v25, %v2605_v24 }
 0x25c   : > { %2749 = vst.msk [vmem:[%s4573_s13 + $0x4] sm:$0xf] %vm2747_vm2, %v3075_v20  ;;  %v3074_v63 = vpack.c.bf16 %v2667_v55, %v2667_v55  ;;  %3786 = vrsqrt.f32 %v2576_v42  ;;  %v2514_v43 = vmul.f32 0.0625, %v2482_v57  ;;  %v2561_v37 = vmax.f32 %v2545_v40, 0.0 }
 0x25d   : > { %v4585_v59 = vmul.f32 0.0625, %v2404_v32  ;;  %vm2637_vm5 = vcmp.ge.f32.partialorder %v2621_v50, 0.0  ;;  %v2653_v62 = vmul.f32 0.01, %v2621_v50 }
 0x25e   : > { %v3783_v12 = vpop.eup %3782  ;;  %2748 = vst.msk [vmem:[%s4573_s13] sm:$0xf] %vm2747_vm2, %v3074_v63  ;;  %v2546_v13 = vsub.f32 %v2514_v43, %v2530_v49  ;;  %v2577_v46 = vadd.f32 1e-05, %v2561_v37  ;;  %v2609_v49 = vsub.f32 %v4467_v21, %v4565_v22 }
 0x25f   : > { %v2622_v4 = vmul.f32 %v3783_v12, %v2606_v7  ;;  %v2531_v5 = vmul.f32 %v4585_v59, %v4585_v59  ;;  %v2407_v14 = vpop.xlane.xlu1 %2406  ;;  %v2485_v61 = vpop.xlane.xlu0 %2484  ;;  %v2669_v26 = vsel %vm2637_vm5, %v2621_v50, %v2653_v62 }
 0x260   : > { %v2562_v6 = vmax.f32 %v2546_v13, 0.0  ;;  %v4593_v54 = vmul.f32 0.0625, %v2407_v14  ;;  %v2515_v33 = vmul.f32 0.0625, %v2485_v61  ;;  %v3076_v17 = vpack.c.bf16 %v2669_v26, %v2669_v26 }
 0x261   : > { %vm2638_vm6 = vcmp.ge.f32.partialorder %v2622_v4, 0.0  ;;  %v2654_v60 = vmul.f32 0.01, %v2622_v4  ;;  %3788 = vrsqrt.f32 %v2577_v46  ;;  %v2610_v13 = vsub.f32 %v4470_v48, %v4568_v36 }
 0x262   : > { %v3785_v1 = vpop.eup %3784  ;;  %v2578_v8 = vadd.f32 1e-05, %v2562_v6  ;;  %v2547_v18 = vsub.f32 %v2515_v33, %v2531_v5  ;;  %2750 = vst.msk [vmem:[%s4573_s13 + $0x8] sm:$0xf] %vm2747_vm2, %v3076_v17  ;;  %v2532_v2 = vmul.f32 %v4593_v54, %v4593_v54  ;;  %v2611_v14 = vsub.f32 %v4483_v35, %v4585_v59 }
 0x263   : > { %v2670_v39 = vsel %vm2638_vm6, %v2622_v4, %v2654_v60  ;;  %v2623_v38 = vmul.f32 %v3785_v1, %v2607_v44  ;;  %v2488_v47 = vpop.xlane.xlu1 %2487  ;;  %v2410_v3 = vpop.xlane.xlu0 %2409 }
 0x264   : > { %v3077_v29 = vpack.c.bf16 %v2670_v39, %v2670_v39  ;;  %3790 = vrsqrt.f32 %v2578_v8  ;;  %v2563_v45 = vmax.f32 %v2547_v18, 0.0  ;;  %v2516_v15 = vmul.f32 0.0625, %v2488_v47 }
 0x265   : > { %vm2639_vm7 = vcmp.ge.f32.partialorder %v2623_v38, 0.0  ;;  %v2655_v10 = vmul.f32 0.01, %v2623_v38  ;;  %v4601_v30 = vmul.f32 0.0625, %v2410_v3 }
 0x266   : > { %v3787_v23 = vpop.eup %3786  ;;  %2751 = vst.msk [vmem:[%s4573_s13 + $0xc] sm:$0xf] %vm2747_vm2, %v3077_v29  ;;  %v2579_v34 = vadd.f32 1e-05, %v2563_v45  ;;  %v2548_v19 = vsub.f32 %v2516_v15, %v2532_v2 }
 0x267   : > { %v2671_v16 = vsel %vm2639_vm7, %v2623_v38, %v2655_v10  ;;  %v2624_v27 = vmul.f32 %v3787_v23, %v2608_v51  ;;  %v2413_v41 = vpop.xlane.xlu1 %2412  ;;  %v2491_v20 = vpop.xlane.xlu0 %2490  ;;  %v2533_v53 = vmul.f32 %v4601_v30, %v4601_v30  ;;  %v2612_v51 = vsub.f32 %v4486_v52, %v4593_v54 }
 0x268   : > { %v3078_v24 = vpack.c.bf16 %v2671_v16, %v2671_v16  ;;  %3792 = vrsqrt.f32 %v2579_v34  ;;  %v2564_v42 = vmax.f32 %v2548_v19, 0.0  ;;  %v4605_v25 = vmul.f32 0.0625, %v2413_v41 }
 0x269   : > { %vm2640_vm8 = vcmp.ge.f32.partialorder %v2624_v27, 0.0  ;;  %v2656_v0 = vmul.f32 0.01, %v2624_v27  ;;  %v2517_v55 = vmul.f32 0.0625, %v2491_v20 }
 0x26a   : > { %2752 = vst.msk [vmem:[%s4573_s13 + $0x10] sm:$0xf] %vm2747_vm2, %v3078_v24  ;;  %v2580_v40 = vadd.f32 1e-05, %v2564_v42  ;;  %v2534_v63 = vmul.f32 %v4605_v25, %v4605_v25 }
 0x26b   : > { %v3789_v57 = vpop.eup %3788  ;;  %v2672_v32 = vsel %vm2640_vm8, %v2624_v27, %v2656_v0  ;;  %v2549_v50 = vsub.f32 %v2517_v55, %v2533_v53  ;;  %v2494_v43 = vpop.xlane.xlu1 %2493 }
 0x26c   : > { %v2416_v7 = vpop.xlane.xlu0 %2415  ;;  %v3079_v37 = vpack.c.bf16 %v2672_v32, %v2672_v32  ;;  %v2625_v12 = vmul.f32 %v3789_v57, %v2609_v49  ;;  %3794 = vrsqrt.f32 %v2580_v40  ;;  %v2518_v62 = vmul.f32 0.0625, %v2494_v43 }
 0x26d   : > { %v2565_v4 = vmax.f32 %v2549_v50, 0.0  ;;  %v4617_v44 = vmul.f32 0.0625, %v2416_v7  ;;  %v2613_v49 = vsub.f32 %v4499_v9, %v4601_v30 }
 0x26e   : > { %v3791_v21 = vpop.eup %3790  ;;  %2753 = vst.msk [vmem:[%s4573_s13 + $0x14] sm:$0xf] %vm2747_vm2, %v3079_v37  ;;  %vm2641_vm9 = vcmp.ge.f32.partialorder %v2625_v12, 0.0  ;;  %v2657_v22 = vmul.f32 0.01, %v2625_v12  ;;  %v2550_v46 = vsub.f32 %v2518_v62, %v2534_v63  ;;  %v2614_v62 = vsub.f32 %v4502_v28, %v4605_v25 }
 0x26f   : > { %v2626_v5 = vmul.f32 %v3791_v21, %v2610_v13  ;;  %v2581_v61 = vadd.f32 1e-05, %v2565_v4  ;;  %v2535_v26 = vmul.f32 %v4617_v44, %v4617_v44  ;;  %v2419_v6 = vpop.xlane.xlu1 %2418 }
 0x270   : > { %v2497_v48 = vpop.xlane.xlu0 %2496  ;;  %v2673_v36 = vsel %vm2641_vm9, %v2625_v12, %v2657_v22  ;;  %v2566_v33 = vmax.f32 %v2550_v46, 0.0  ;;  %v4625_v17 = vmul.f32 0.0625, %v2419_v6 }
 0x271   : > { %v2519_v60 = vmul.f32 0.0625, %v2497_v48  ;;  %v3080_v1 = vpack.c.bf16 %v2673_v36, %v2673_v36  ;;  %vm2642_vm10 = vcmp.ge.f32.partialorder %v2626_v5, 0.0  ;;  %v2658_v8 = vmul.f32 0.01, %v2626_v5 }
 0x272   : > { %3796 = vrsqrt.f32 %v2581_v61  ;;  %v3793_v18 = vpop.eup %3792  ;;  %v2582_v39 = vadd.f32 1e-05, %v2566_v33  ;;  %v2536_v2 = vmul.f32 %v4625_v17, %v4625_v17  ;;  %v2616_v33 = vsub.f32 %v4518_v31, %v4625_v17 }
 0x273   : > { %v2551_v38 = vsub.f32 %v2519_v60, %v2535_v26  ;;  %2754 = vst.msk [vmem:[%s4573_s13 + $0x18] sm:$0xf] %vm2747_vm2, %v3080_v1  ;;  %v2674_v35 = vsel %vm2642_vm10, %v2626_v5, %v2658_v8  ;;  %v2627_v59 = vmul.f32 %v3793_v18, %v2611_v14  ;;  %v2500_v47 = vpop.xlane.xlu1 %2499  ;;  %v2615_v5 = vsub.f32 %v4515_v56, %v4617_v44 }
 0x274   : > { %v2422_v3 = vpop.xlane.xlu0 %2421  ;;  %v3081_v29 = vpack.c.bf16 %v2674_v35, %v2674_v35  ;;  %3798 = vrsqrt.f32 %v2582_v39  ;;  %v2520_v15 = vmul.f32 0.0625, %v2500_v47 }
 0x275   : > { %v2567_v45 = vmax.f32 %v2551_v38, 0.0  ;;  %vm2643_vm11 = vcmp.ge.f32.partialorder %v2627_v59, 0.0  ;;  %v2659_v10 = vmul.f32 0.01, %v2627_v59  ;;  %v4633_v23 = vmul.f32 0.0625, %v2422_v3 }
 0x276   : > { %v3795_v34 = vpop.eup %3794  ;;  %2755 = vst.msk [vmem:[%s4573_s13 + $0x1c] sm:$0xf] %vm2747_vm2, %v3081_v29  ;;  %v2552_v16 = vsub.f32 %v2520_v15, %v2536_v2 }
 0x277   : > { %v2583_v19 = vadd.f32 1e-05, %v2567_v45  ;;  %v2675_v27 = vsel %vm2643_vm11, %v2627_v59, %v2659_v10  ;;  %v2628_v41 = vmul.f32 %v3795_v34, %v2612_v51  ;;  %v2425_v20 = vpop.xlane.xlu1 %2424  ;;  %v2537_v54 = vmul.f32 %v4633_v23, %v4633_v23 }
 0x278   : > { %v2503_v24 = vpop.xlane.xlu0 %2502  ;;  %v3082_v42 = vpack.c.bf16 %v2675_v27, %v2675_v27  ;;  %v2568_v0 = vmax.f32 %v2552_v16, 0.0  ;;  %v2442_v53 = vmul.f32 0.0625, %v2425_v20  ;;  %v2617_v39 = vsub.f32 %v4531_v11, %v4633_v23 }
 0x279   : > { %3800 = vrsqrt.f32 %v2583_v19  ;;  %vm2644_vm12 = vcmp.ge.f32.partialorder %v2628_v41, 0.0  ;;  %v2660_v52 = vmul.f32 0.01, %v2628_v41  ;;  %v2521_v55 = vmul.f32 0.0625, %v2503_v24 }
 0x27a   : > { %2756 = vst.msk [vmem:[%s4573_s13 + $0x20] sm:$0xf] %vm2747_vm2, %v3082_v42  ;;  %v2584_v40 = vadd.f32 1e-05, %v2568_v0  ;;  %v2538_v63 = vmul.f32 %v2442_v53, %v2442_v53  ;;  %v2618_v59 = vsub.f32 %v4534_v58, %v2442_v53 }
 0x27b   : > { %v2676_v32 = vsel %vm2644_vm12, %v2628_v41, %v2660_v52  ;;  %v2553_v50 = vsub.f32 %v2521_v55, %v2537_v54  ;;  %v2506_v43 = vpop.xlane.xlu1 %2505 }
 0x27c   : > { %v3797_v57 = vpop.eup %3796  ;;  %v3083_v7 = vpack.c.bf16 %v2676_v32, %v2676_v32  ;;  %3802 = vrsqrt.f32 %v2584_v40  ;;  %v2522_v12 = vmul.f32 0.0625, %v2506_v43 }
 0x27d   : > { %v2629_v37 = vmul.f32 %v3797_v57, %v2613_v49  ;;  %v2569_v13 = vmax.f32 %v2553_v50, 0.0 }
 0x27e   : > { %v3799_v4 = vpop.eup %3798  ;;  %2757 = vst.msk [vmem:[%s4573_s13 + $0x24] sm:$0xf] %vm2747_vm2, %v3083_v7  ;;  %v2554_v30 = vsub.f32 %v2522_v12, %v2538_v63 }
 0x27f   : > { %vm2645_vm13 = vcmp.ge.f32.partialorder %v2629_v37, 0.0  ;;  %v2661_v9 = vmul.f32 0.01, %v2629_v37  ;;  %v2630_v21 = vmul.f32 %v3799_v4, %v2614_v62  ;;  %v2585_v22 = vadd.f32 1e-05, %v2569_v13 }
 0x280   : > { %v2570_v14 = vmax.f32 %v2554_v30, 0.0 }
 0x281   : > { %v2677_v46 = vsel %vm2645_vm13, %v2629_v37, %v2661_v9  ;;  %vm2646_vm14 = vcmp.ge.f32.partialorder %v2630_v21, 0.0  ;;  %v2662_v26 = vmul.f32 0.01, %v2630_v21  ;;  %3804 = vrsqrt.f32 %v2585_v22 }
 0x282   : > { %v3084_v61 = vpack.c.bf16 %v2677_v46, %v2677_v46  ;;  %v2586_v25 = vadd.f32 1e-05, %v2570_v14 }
 0x283   : > { %v3801_v28 = vpop.eup %3800  ;;  %v2678_v6 = vsel %vm2646_vm14, %v2630_v21, %v2662_v26 }
 0x284   : > { %2758 = vst.msk [vmem:[%s4573_s13 + $0x28] sm:$0xf] %vm2747_vm2, %v3084_v61  ;;  %v2631_v48 = vmul.f32 %v3801_v28, %v2615_v5  ;;  %v3085_v36 = vpack.c.bf16 %v2678_v6, %v2678_v6  ;;  %3806 = vrsqrt.f32 %v2586_v25 }
 0x286   : > { %vm2647_vm15 = vcmp.ge.f32.partialorder %v2631_v48, 0.0  ;;  %v2663_v56 = vmul.f32 0.01, %v2631_v48  ;;  %v3803_v44 = vpop.eup %3802  ;;  %2759 = vst.msk [vmem:[%s4573_s13 + $0x2c] sm:$0xf] %vm2747_vm2, %v3085_v36 }
 0x287   : > { %v2632_v1 = vmul.f32 %v3803_v44, %v2616_v33 }
 0x288   : > { %v2679_v60 = vsel %vm2647_vm15, %v2631_v48, %v2663_v56 }
 0x289   : > { %v3086_v8 = vpack.c.bf16 %v2679_v60, %v2679_v60  ;;  %vm2648_vm0 = vcmp.ge.f32.partialorder %v2632_v1, 0.0  ;;  %v2664_v18 = vmul.f32 0.01, %v2632_v1 }
 0x28b   : > { %2760 = vst.msk [vmem:[%s4573_s13 + $0x30] sm:$0xf] %vm2747_vm2, %v3086_v8  ;;  %v3805_v38 = vpop.eup %3804  ;;  %v2680_v35 = vsel %vm2648_vm0, %v2632_v1, %v2664_v18 }
 0x28c   : > { %v3087_v31 = vpack.c.bf16 %v2680_v35, %v2680_v35  ;;  %v2633_v17 = vmul.f32 %v3805_v38, %v2617_v39 }
 0x28e   : > { %v3807_v2 = vpop.eup %3806  ;;  %2761 = vst.msk [vmem:[%s4573_s13 + $0x34] sm:$0xf] %vm2747_vm2, %v3087_v31  ;;  %vm2649_vm1 = vcmp.ge.f32.partialorder %v2633_v17, 0.0  ;;  %v2665_v47 = vmul.f32 0.01, %v2633_v17 }
 0x28f   : > { %v2634_v3 = vmul.f32 %v3807_v2, %v2618_v59 }
 0x290   : > { %v2681_v29 = vsel %vm2649_vm1, %v2633_v17, %v2665_v47 }
 0x291   : > { %v3088_v45 = vpack.c.bf16 %v2681_v29, %v2681_v29  ;;  %vm2650_vm3 = vcmp.ge.f32.partialorder %v2634_v3, 0.0  ;;  %v2666_v15 = vmul.f32 0.01, %v2634_v3 }
 0x293   : > { %2762 = vst.msk [vmem:[%s4573_s13 + $0x38] sm:$0xf] %vm2747_vm2, %v3088_v45  ;;  %v2682_v11 = vsel %vm2650_vm3, %v2634_v3, %v2666_v15 }
 0x294   : > { %v3089_v51 = vpack.c.bf16 %v2682_v11, %v2682_v11 }
 0x296   : > { %2763 = vst.msk [vmem:[%s4573_s13 + $0x3c] sm:$0xf] %vm2747_vm2, %v3089_v51 }
 0x297 PF: > { %s12_s9 = sadd.s32 1, %s3814_s9  }
 0x298   : > { %p9_p4 = scmp.ge.s32.totalorder %s12_s9, 4  }
 0x29a   :  { %11 = sbr.rel (!%p9_p4) target bundleno = 1 (0x1), region = 58 }

// kernel: discriminator_forward.9
= control target key start
LH: loop header
LB: loop body
LE: loop exit
PB: predicated region body
PF: predicated region fallthrough
CT: control target
= control target key end

     0   :  { %7 = vsyncpa [#allocation3], 0  ;;  %s6490_s0 = inlined_call_operand.vmem [shape: bf16[2,2,3456], index: 0, kind: input, shape index: {}]   ;;  %s6491_s1 = inlined_call_operand.vmem [shape: bf16[3456,256], index: 1, kind: input, shape index: {}]   ;;  %s6492_s2 = inlined_call_operand.hbm [shape: f32[2,1,256], index: 2, kind: output, shape index: {}]  }
   0x1   :  { %9 = vsyncpa [#allocation3 + $0x1], 0  ;;  %s4961_s9 = smov 0   ;;  %s4963_s10 = smov 0  }
   0x2   :  { %s4965_s11 = smov 0   ;;  %s4967_s12 = smov 0  }
   0x3 LB: > { %s4982_s13 = sadd.s32 4294967295, %s4941_s12   ;;  %s3686_s14 = sadd.s32 4294967294, %s4941_s12   ;;  %s4941_s12 = sphi %s4967_s12, %s6498_s12   ;;  %s4937_s11 = sphi %s4965_s11, %s6497_s11   ;;  %s4933_s10 = sphi %s4963_s10, %s6496_s10   ;;  %s4929_s9 = sphi %s4961_s9, %s6495_s9  }
   0x4   : > { %s4986_s15 = sadd.s32 1, %s4941_s12   ;;  %s69_s16 = sadd.s32 1, %s4937_s11 }
   0x5   : > { %s66_s17 = ssub.s32 %s4941_s12, %s4986_s15  ;;  %p79_p0 = scmp.ne.s32.totalorder %s4937_s11, %s4933_s10 }
   0x6   : > { %p67_p1 = scmp.eq.s32.totalorder %s66_s17, 0  ;;  %p80_p2 = scmp.eq.s32.totalorder %s4982_s13, 1 }
   0x7   : > { %p85_p3 = scmp.ne.s32.totalorder %s4933_s10, %s4929_s9  ;;  %p86_p4 = scmp.eq.s32.totalorder %s3686_s14, 1 }
   0x8   : > { %s4997_s18 = scalar_select %p67_p1, %s4937_s11, %s69_s16  }
   0x9   : > { %p4999_p5 = por %p80_p2, %p79_p0  ;;  %p5003_p6 = por %p86_p4, %p85_p3 }
   0xa   : > { %p3689_p7 = scmp.ge.s32.totalorder %s4941_s12, 1  ;;  %p114_p8 = scmp.lt.s32.totalorder %s4941_s12, 3 }
   0xc   : > { %p115_p9 = pnand %p3689_p7, %p114_p8 }
   0xd   : > { %v4222_v0 = vld [vmem:[%s6491_s1 + $0x4] ss:$8 sps:$4 sm:$0xff] (!%p115_p9)   ;;  %v4226_v2 = vld [vmem:[%s6491_s1] ss:$8 sps:$4 sm:$0xff] (!%p115_p9)   ;;  %v4228_v4 = vld [vmem:[%s6491_s1 + $0x14] ss:$8 sps:$4 sm:$0xff] (!%p115_p9)   ;;  %v584_v40 = vlaneseq (!%p115_p9) }
   0xe   : > { %118 = sbr.rel (%p115_p9) target bundleno = 754 (0x2f2), region = 28  ;;  %v4224_v1 = vld [vmem:[%s6491_s1 + $0x704] ss:$8 sps:$4 sm:$0xff] (!%p115_p9)   ;;  %2937 = vmatprep.subr.bf16.mxu1 (!%p115_p9), %v4222_v0  ;;  %v4227_v3 = vld [vmem:[%s6491_s1 + $0x700] ss:$8 sps:$4 sm:$0xff] (!%p115_p9)   ;;  %p135_p10 = scmp.lt.s32.totalorder (!%p115_p9), %s4982_s13, 1 }
   0xf   : > { %3224 = vmatprep.subr.bf16.mxu0 (!%p115_p9), %v4224_v1  ;;  %2938 = vmatpush1.bf16.msra.mxu1 (!%p115_p9), %v4226_v2  ;;  %v4230_v5 = vld [vmem:[%s6491_s1 + $0x714] ss:$8 sps:$4 sm:$0xff] (!%p115_p9)   ;;  %v4232_v6 = vld [vmem:[%s6491_s1 + $0x10] ss:$8 sps:$4 sm:$0xff] (!%p115_p9)   ;;  %v4234_v8 = vld [vmem:[%s6491_s1 + $0x24] ss:$8 sps:$4 sm:$0xff] (!%p115_p9)  }
  0x10   : > { %3225 = vmatpush1.bf16.msra.mxu0 (!%p115_p9), %v4227_v3  ;;  %2939 = vmatprep.subr.bf16.mxu1 (!%p115_p9), %v4228_v4  ;;  %v4233_v7 = vld [vmem:[%s6491_s1 + $0x710] ss:$8 sps:$4 sm:$0xff] (!%p115_p9)   ;;  %v4236_v9 = vld [vmem:[%s6491_s1 + $0x724] ss:$8 sps:$4 sm:$0xff] (!%p115_p9)   ;;  %v4238_v10 = vld [vmem:[%s6491_s1 + $0x20] ss:$8 sps:$4 sm:$0xff] (!%p115_p9)  }
  0x11   : > { %3226 = vmatprep.subr.bf16.mxu0 (!%p115_p9), %v4230_v5  ;;  %v4239_v11 = vld [vmem:[%s6491_s1 + $0x720] ss:$8 sps:$4 sm:$0xff] (!%p115_p9)   ;;  %v4240_v12 = vld [vmem:[%s6491_s1 + $0x34] ss:$8 sps:$4 sm:$0xff] (!%p115_p9)   ;;  %v4244_v14 = vld [vmem:[%s6491_s1 + $0x30] ss:$8 sps:$4 sm:$0xff] (!%p115_p9)  }
  0x12   : > { %v4242_v13 = vld [vmem:[%s6491_s1 + $0x734] ss:$8 sps:$4 sm:$0xff] (!%p115_p9)   ;;  %v4245_v15 = vld [vmem:[%s6491_s1 + $0x730] ss:$8 sps:$4 sm:$0xff] (!%p115_p9)   ;;  %v4246_v16 = vld [vmem:[%s6491_s1 + $0x44] ss:$8 sps:$4 sm:$0xff] (!%p115_p9)  }
  0x13   : > { %2940 = vmatpush1.bf16.msra.mxu1 (!%p115_p9), %v4232_v6  ;;  %v4248_v17 = vld [vmem:[%s6491_s1 + $0x744] ss:$8 sps:$4 sm:$0xff] (!%p115_p9)   ;;  %v4250_v18 = vld [vmem:[%s6491_s1 + $0x40] ss:$8 sps:$4 sm:$0xff] (!%p115_p9)   ;;  %v4252_v20 = vld [vmem:[%s6491_s1 + $0x54] ss:$8 sps:$4 sm:$0xff] (!%p115_p9)  }
  0x14   : > { %3227 = vmatpush1.bf16.msra.mxu0 (!%p115_p9), %v4233_v7  ;;  %2941 = vmatprep.subr.bf16.mxu1 (!%p115_p9), %v4234_v8  ;;  %v4251_v19 = vld [vmem:[%s6491_s1 + $0x740] ss:$8 sps:$4 sm:$0xff] (!%p115_p9)   ;;  %v4254_v21 = vld [vmem:[%s6491_s1 + $0x754] ss:$8 sps:$4 sm:$0xff] (!%p115_p9)   ;;  %v4256_v22 = vld [vmem:[%s6491_s1 + $0x50] ss:$8 sps:$4 sm:$0xff] (!%p115_p9)  }
  0x15   : > { %3228 = vmatprep.subr.bf16.mxu0 %v4236_v9  ;;  %v4257_v23 = vld [vmem:[%s6491_s1 + $0x750] ss:$8 sps:$4 sm:$0xff]   ;;  %v4258_v24 = vld [vmem:[%s6491_s1 + $0x64] ss:$8 sps:$4 sm:$0xff]   ;;  %v4262_v26 = vld [vmem:[%s6491_s1 + $0x60] ss:$8 sps:$4 sm:$0xff]  }
  0x16   : > { %v4260_v25 = vld [vmem:[%s6491_s1 + $0x764] ss:$8 sps:$4 sm:$0xff]   ;;  %v4263_v27 = vld [vmem:[%s6491_s1 + $0x760] ss:$8 sps:$4 sm:$0xff]   ;;  %v4264_v28 = vld [vmem:[%s6491_s1 + $0x74] ss:$8 sps:$4 sm:$0xff]  }
  0x17   : > { %2942 = vmatpush1.bf16.msra.mxu1 %v4238_v10  ;;  %v4266_v29 = vld [vmem:[%s6491_s1 + $0x774] ss:$8 sps:$4 sm:$0xff]   ;;  %v4268_v30 = vld [vmem:[%s6491_s1 + $0x70] ss:$8 sps:$4 sm:$0xff]   ;;  %v4270_v32 = vld [vmem:[%s6491_s1 + $0x84] ss:$8 sps:$4 sm:$0xff]  }
  0x18   : > { %3229 = vmatpush1.bf16.msra.mxu0 %v4239_v11  ;;  %2943 = vmatprep.subr.bf16.mxu1 %v4240_v12  ;;  %v4269_v31 = vld [vmem:[%s6491_s1 + $0x770] ss:$8 sps:$4 sm:$0xff]   ;;  %v4272_v33 = vld [vmem:[%s6491_s1 + $0x784] ss:$8 sps:$4 sm:$0xff]   ;;  %v4274_v34 = vld [vmem:[%s6491_s1 + $0x80] ss:$8 sps:$4 sm:$0xff]  }
  0x19   : > { %3230 = vmatprep.subr.bf16.mxu0 %v4242_v13  ;;  %v4275_v35 = vld [vmem:[%s6491_s1 + $0x780] ss:$8 sps:$4 sm:$0xff]   ;;  %v4276_v36 = vld [vmem:[%s6491_s1 + $0x94] ss:$8 sps:$4 sm:$0xff]   ;;  %s136_s21 = scalar_select %p135_p10, %s4982_s13, 1  ;;  %v585_v46 = vshrl.u32 %v584_v40, 7 }
  0x1a   : > { %v4278_v37 = vld [vmem:[%s6491_s1 + $0x794] ss:$8 sps:$4 sm:$0xff]   ;;  %v4943_v38 = vmov 1966171168   ;;  %v4280_v41 = vld [vmem:[%s6491_s1 + $0x90] ss:$8 sps:$4 sm:$0xff]  }
  0x1b   : > { %2944 = vmatpush1.bf16.msra.mxu1 %v4244_v14  ;;  %v582_v39 = vunpack.c.l.s4 %v4943_v38  ;;  %v4281_v42 = vld [vmem:[%s6491_s1 + $0x790] ss:$8 sps:$4 sm:$0xff]   ;;  %v4282_v43 = vld [vmem:[%s6491_s1 + $0xa4] ss:$8 sps:$4 sm:$0xff]   ;;  %s4180_s30 = smul.u32 27, %s136_s21  ;;  %vm3511_vm0 = vcmask 1041408  }
  0x1c   : > { %3231 = vmatpush1.bf16.msra.mxu0 %v4245_v15  ;;  %2945 = vmatprep.subr.bf16.mxu1 %v4246_v16  ;;  %v4284_v44 = vld [vmem:[%s6491_s1 + $0x7a4] ss:$8 sps:$4 sm:$0xff]   ;;  %v4286_v47 = vld [vmem:[%s6491_s1 + $0xa0] ss:$8 sps:$4 sm:$0xff]   ;;  %v4288_v49 = vld [vmem:[%s6491_s1 + $0xb4] ss:$8 sps:$4 sm:$0xff]  }
  0x1d   : > { %3232 = vmatprep.subr.bf16.mxu0 %v4248_v17  ;;  %v583_v45 = vunpack.c.0.s8 %v582_v39  ;;  %v4287_v48 = vld [vmem:[%s6491_s1 + $0x7a0] ss:$8 sps:$4 sm:$0xff]   ;;  %v4290_v50 = vld [vmem:[%s6491_s1 + $0x7b4] ss:$8 sps:$4 sm:$0xff]   ;;  %s5153_s22 = scalar_lea.vmem %s6490_s0, %s4180_s30  ;;  %v4292_v53 = vld [vmem:[%s6491_s1 + $0xb0] ss:$8 sps:$4 sm:$0xff]  }
  0x1e   : > { %v5158_v52 = vld [vmem:[%s5153_s22] sm:$0xff]  ;;  %v4293_v55 = vld [vmem:[%s6491_s1 + $0x7b0] ss:$8 sps:$4 sm:$0xff]   ;;  %v141_v56 = vld [vmem:[%s5153_s22 + $0x8] sm:$0xff]  ;;  %s132_s27 = sand.u32 1, %s4933_s10   ;;  %s4129_s29 = sshll.u32 %s4982_s13, 5 }
  0x1f   : > { %2946 = vmatpush1.bf16.msra.mxu1 %v4250_v18  ;;  %v5155_v51 = vsub.s32 %v583_v45, %v585_v46  ;;  %v4294_v57 = vld [vmem:[%s6491_s1 + $0xc4] ss:$8 sps:$4 sm:$0xff]   ;;  %v629_v60 = vcombine.high %v141_v56, %v141_v56  ;;  %v4298_v63 = vld [vmem:[%s6491_s1 + $0xc0] ss:$8 sps:$4 sm:$0xff]   ;;  %v4300_v1 = vld [vmem:[%s6491_s1 + $0xd4] ss:$8 sps:$4 sm:$0xff]   ;;  %s6448_s6 = scalar_lea.hbm %s6492_s2, %s4129_s29 }
  0x20   : > { %3233 = vmatpush1.bf16.msra.mxu0 %v4251_v19  ;;  %2947 = vmatprep.subr.bf16.mxu1 %v4252_v20  ;;  %v4296_v58 = vld [vmem:[%s6491_s1 + $0x7c4] ss:$8 sps:$4 sm:$0xff]   ;;  %v4299_v0 = vld [vmem:[%s6491_s1 + $0x7c0] ss:$8 sps:$4 sm:$0xff]   ;;  %v4302_v2 = vld [vmem:[%s6491_s1 + $0x7d4] ss:$8 sps:$4 sm:$0xff]  }
  0x21   : > { %3234 = vmatprep.subr.bf16.mxu0 %v4254_v21  ;;  %v587_v54 = vrot.slane %v5158_v52, %v5155_v51  ;;  %v643_v62 = vrot.slane %v629_v60, %v5155_v51  ;;  %v4304_v5 = vld [vmem:[%s6491_s1 + $0xd0] ss:$8 sps:$4 sm:$0xff]   ;;  %v4306_v7 = vld [vmem:[%s6491_s1 + $0xe4] ss:$8 sps:$4 sm:$0xff]   ;;  %v4310_v10 = vld [vmem:[%s6491_s1 + $0xe0] ss:$8 sps:$4 sm:$0xff]  }
  0x22   : > { %v4305_v6 = vld [vmem:[%s6491_s1 + $0x7d0] ss:$8 sps:$4 sm:$0xff]   ;;  %v4308_v8 = vld [vmem:[%s6491_s1 + $0x7e4] ss:$8 sps:$4 sm:$0xff]   ;;  %v4311_v11 = vld [vmem:[%s6491_s1 + $0x7e0] ss:$8 sps:$4 sm:$0xff]  }
  0x23   : > { %2948 = vmatpush1.bf16.msra.mxu1 %v4256_v22  ;;  %v595_v59 = vcombine.high %v587_v54, %v587_v54  ;;  %v645_v3 = vcombine.high %v643_v62, %v643_v62  ;;  %v4312_v12 = vld [vmem:[%s6491_s1 + $0xf4] ss:$8 sps:$4 sm:$0xff]   ;;  %v5219_v14 = vrot.slane %v643_v62, %v5155_v51  ;;  %v4316_v15 = vld [vmem:[%s6491_s1 + $0xf0] ss:$8 sps:$4 sm:$0xff]   ;;  %v4321_v17 = vld [vmem:[%s6491_s1 + $0x104] ss:$8 sps:$4 sm:$0xff]   ;;  %v5234_v19 = vrot.slane %v587_v54, %v5155_v51 }
  0x24   : > { %3235 = vmatpush1.bf16.msra.mxu0 %v4257_v23  ;;  %2949 = vmatprep.subr.bf16.mxu1 %v4258_v24  ;;  %v4314_v13 = vld [vmem:[%s6491_s1 + $0x7f4] ss:$8 sps:$4 sm:$0xff]   ;;  %v4317_v16 = vld [vmem:[%s6491_s1 + $0x7f0] ss:$8 sps:$4 sm:$0xff]   ;;  %v4325_v18 = vld [vmem:[%s6491_s1 + $0x804] ss:$8 sps:$4 sm:$0xff]  }
  0x25   : > { %3236 = vmatprep.subr.bf16.mxu0 %v4260_v25  ;;  %v617_v61 = vrot.slane %v595_v59, %v5155_v51  ;;  %v5190_v4 = vrot.slane %v645_v3, %v5155_v51  ;;  %v675_v20 = vcombine.high %v5219_v14, %v5219_v14  ;;  %v4319_v21 = vld [vmem:[%s6491_s1 + $0x100] ss:$8 sps:$4 sm:$0xff]   ;;  %v4328_v23 = vld [vmem:[%s6491_s1 + $0x114] ss:$8 sps:$4 sm:$0xff]   ;;  %v4358_v45 = vld [vmem:[%s6491_s1 + $0x164] ss:$8 sps:$4 sm:$0xff]  }
  0x26   : > { %v4323_v22 = vld [vmem:[%s6491_s1 + $0x800] ss:$8 sps:$4 sm:$0xff]   ;;  %v4331_v24 = vld [vmem:[%s6491_s1 + $0x814] ss:$8 sps:$4 sm:$0xff]   ;;  %v4361_v46 = vld [vmem:[%s6491_s1 + $0x864] ss:$8 sps:$4 sm:$0xff]  }
  0x27   : > { %2950 = vmatpush1.bf16.msra.mxu1 %v4262_v26  ;;  %2969 = vmatprep.mubr.bf16.mxu1 %v617_v61  ;;  %v677_v9 = vcombine.high %v5190_v4, %v5190_v4  ;;  %v627_v25 = vcombine.high %v617_v61, %v617_v61  ;;  %v4326_v26 = vld [vmem:[%s6491_s1 + $0x110] ss:$8 sps:$4 sm:$0xff]   ;;  %v4344_v38 = vld [vmem:[%s6491_s1 + $0x140] ss:$8 sps:$4 sm:$0xff]   ;;  %v4367_v54 = vld [vmem:[%s6491_s1 + $0x874] ss:$8 sps:$4 sm:$0xff]  }
  0x28   : > { %3237 = vmatpush1.bf16.msra.mxu0 %v4263_v27  ;;  %2951 = vmatprep.subr.bf16.mxu1 %v4264_v28  ;;  %v4329_v27 = vld [vmem:[%s6491_s1 + $0x810] ss:$8 sps:$4 sm:$0xff]   ;;  %v4334_v28 = vld [vmem:[%s6491_s1 + $0x124] ss:$8 sps:$4 sm:$0xff]   ;;  %v4347_v39 = vld [vmem:[%s6491_s1 + $0x840] ss:$8 sps:$4 sm:$0xff]  }
  0x29   : > { %3238 = vmatprep.subr.bf16.mxu0 %v4266_v29  ;;  %3256 = vmatprep.mubr.bf16.mxu0 %v677_v9  ;;  %v4337_v29 = vld [vmem:[%s6491_s1 + $0x824] ss:$8 sps:$4 sm:$0xff]   ;;  %v4362_v56 = vld [vmem:[%s6491_s1 + $0x170] ss:$8 sps:$4 sm:$0xff]   ;;  %v4368_v61 = vld [vmem:[%s6491_s1 + $0x180] ss:$8 sps:$4 sm:$0xff]  }
  0x2a   : > { %v4373_v60 = vld [vmem:[%s6491_s1 + $0x884] ss:$8 sps:$4 sm:$0xff]   ;;  %v4371_v62 = vld [vmem:[%s6491_s1 + $0x880] ss:$8 sps:$4 sm:$0xff]   ;;  %v4391_v9 = vld [vmem:[%s6491_s1 + $0x8b4] ss:$8 sps:$4 sm:$0xff]  }
  0x2b   : > { %2952 = vmatpush1.bf16.msra.mxu1 %v4268_v30  ;;  %v4332_v30 = vld [vmem:[%s6491_s1 + $0x120] ss:$8 sps:$4 sm:$0xff]   ;;  %v4382_v3 = vld [vmem:[%s6491_s1 + $0x1a4] ss:$8 sps:$4 sm:$0xff]   ;;  %s3690_s28 = sshll.u32 %s132_s27, 1  ;;  %vm3609_vm5 = vcmp.lt.s32.totalorder %v584_v40, 256 }
  0x2c   : > { %3239 = vmatpush1.bf16.msra.mxu0 %v4269_v31  ;;  %2953 = vmatprep.subr.bf16.mxu1 %v4270_v32  ;;  %v4335_v31 = vld [vmem:[%s6491_s1 + $0x820] ss:$8 sps:$4 sm:$0xff]   ;;  %v4340_v32 = vld [vmem:[%s6491_s1 + $0x134] ss:$8 sps:$4 sm:$0xff]   ;;  %s134_s30 = scalar_lea.vmem [#allocation2], %s3690_s28  ;;  %s3613_s13 = scalar_lea.sflag [#allocation3], %s132_s27 }
  0x2d   : > { %3240 = vmatprep.subr.bf16.mxu0 %v4272_v33  ;;  %v4343_v33 = vld [vmem:[%s6491_s1 + $0x834] ss:$8 sps:$4 sm:$0xff]   ;;  %s3627_s3 = sshll.u32 %s134_s30, 4  ;;  %s4945_s7 = smov [#allocation2]   ;;  %s6450_s3 = int_to_ptr.vmem [resolvable:$true] %s3627_s3 }
  0x2e   : > { %s4883_s8 = sshll.u32 %s4945_s7, 4  ;;  %s4884_s8 = int_to_ptr.vmem [resolvable:$false] %s4883_s8 }
  0x2f   : > { %2954 = vmatpush1.bf16.msra.mxu1 %v4274_v34  ;;  %v4338_v34 = vld [vmem:[%s6491_s1 + $0x130] ss:$8 sps:$4 sm:$0xff]   ;;  %s4885_s14 = scalar_lea.vmem %s4884_s8, 64  ;;  %p4886_p0 = scmp.lt.s32.totalorder %s6450_s3, %s4884_s8 }
  0x30   : > { %3241 = vmatpush1.bf16.msra.mxu0 %v4275_v35  ;;  %2955 = vmatprep.subr.bf16.mxu1 %v4276_v36  ;;  %v4341_v35 = vld [vmem:[%s6491_s1 + $0x830] ss:$8 sps:$4 sm:$0xff]   ;;  %v4346_v36 = vld [vmem:[%s6491_s1 + $0x144] ss:$8 sps:$4 sm:$0xff]  }
  0x31   : > { %3242 = vmatprep.subr.bf16.mxu0 %v4278_v37  ;;  %v4349_v37 = vld [vmem:[%s6491_s1 + $0x844] ss:$8 sps:$4 sm:$0xff]  }
  0x33   : > { %2956 = vmatpush1.bf16.msra.mxu1 %v4280_v41  ;;  %v4352_v41 = vld [vmem:[%s6491_s1 + $0x154] ss:$8 sps:$4 sm:$0xff]  }
  0x34   : > { %3243 = vmatpush1.bf16.msra.mxu0 %v4281_v42  ;;  %2957 = vmatprep.subr.bf16.mxu1 %v4282_v43  ;;  %v4355_v42 = vld [vmem:[%s6491_s1 + $0x854] ss:$8 sps:$4 sm:$0xff]   ;;  %v4350_v43 = vld [vmem:[%s6491_s1 + $0x150] ss:$8 sps:$4 sm:$0xff]  }
  0x35   : > { %3244 = vmatprep.subr.bf16.mxu0 %v4284_v44  ;;  %v4353_v44 = vld [vmem:[%s6491_s1 + $0x850] ss:$8 sps:$4 sm:$0xff]  }
  0x37   : > { %2958 = vmatpush1.bf16.msra.mxu1 %v4286_v47  ;;  %v4356_v47 = vld [vmem:[%s6491_s1 + $0x160] ss:$8 sps:$4 sm:$0xff]  }
  0x38   : > { %3245 = vmatpush1.bf16.msra.mxu0 %v4287_v48  ;;  %2959 = vmatprep.subr.bf16.mxu1 %v4288_v49  ;;  %v5315_v48 = vld [vmem:[%s5153_s22 + $0x10] sm:$0xff]  ;;  %v4359_v49 = vld [vmem:[%s6491_s1 + $0x860] ss:$8 sps:$4 sm:$0xff]  }
  0x39   : > { %3246 = vmatprep.subr.bf16.mxu0 %v4290_v50  ;;  %v4364_v50 = vld [vmem:[%s6491_s1 + $0x174] ss:$8 sps:$4 sm:$0xff]  }
  0x3b   : > { %2960 = vmatpush1.bf16.msra.mxu1 %v4292_v53  ;;  %v5325_v53 = vrot.slane %v5315_v48, %v5155_v51 }
  0x3c   : > { %3247 = vmatpush1.bf16.msra.mxu0 %v4293_v55  ;;  %2961 = vmatprep.subr.bf16.mxu1 %v4294_v57  ;;  %v4365_v57 = vld [vmem:[%s6491_s1 + $0x870] ss:$8 sps:$4 sm:$0xff]  }
  0x3d   : > { %3248 = vmatprep.subr.bf16.mxu0 %v4296_v58  ;;  %v693_v55 = vcombine.high %v5325_v53, %v5325_v53  ;;  %v4370_v58 = vld [vmem:[%s6491_s1 + $0x184] ss:$8 sps:$4 sm:$0xff]  }
  0x3f   : > { %2962 = vmatpush1.bf16.msra.mxu1 %v4298_v63  ;;  %v5342_v59 = vrot.slane %v693_v55, %v5155_v51  ;;  %v4376_v63 = vld [vmem:[%s6491_s1 + $0x194] ss:$8 sps:$4 sm:$0xff]   ;;  %v4442_v55 = vld [vmem:[%s6491_s1 + $0x244] ss:$8 sps:$4 sm:$0xff]  }
  0x40   : > { %3249 = vmatpush1.bf16.msra.mxu0 %v4299_v0  ;;  %2963 = vmatprep.subr.bf16.mxu1 %v4300_v1  ;;  %v4379_v0 = vld [vmem:[%s6491_s1 + $0x894] ss:$8 sps:$4 sm:$0xff]   ;;  %v4374_v1 = vld [vmem:[%s6491_s1 + $0x190] ss:$8 sps:$4 sm:$0xff]  }
  0x41   : > { %3250 = vmatprep.subr.bf16.mxu0 %v4302_v2  ;;  %v4377_v2 = vld [vmem:[%s6491_s1 + $0x890] ss:$8 sps:$4 sm:$0xff]  }
  0x43   : > { %2964 = vmatpush1.bf16.msra.mxu1 %v4304_v5  ;;  %v4385_v5 = vld [vmem:[%s6491_s1 + $0x8a4] ss:$8 sps:$4 sm:$0xff]  }
  0x44   : > { %3251 = vmatpush1.bf16.msra.mxu0 %v4305_v6  ;;  %2965 = vmatprep.subr.bf16.mxu1 %v4306_v7  ;;  %v4380_v6 = vld [vmem:[%s6491_s1 + $0x1a0] ss:$8 sps:$4 sm:$0xff]  }
  0x45   : > { %3252 = vmatprep.subr.bf16.mxu0 %v4308_v8  ;;  %v4383_v7 = vld [vmem:[%s6491_s1 + $0x8a0] ss:$8 sps:$4 sm:$0xff]   ;;  %v4388_v8 = vld [vmem:[%s6491_s1 + $0x1b4] ss:$8 sps:$4 sm:$0xff]  }
  0x47   : > { %2966 = vmatpush1.bf16.msra.mxu1 %v4310_v10  ;;  %v4386_v10 = vld [vmem:[%s6491_s1 + $0x1b0] ss:$8 sps:$4 sm:$0xff]  }
  0x48   : > { %3253 = vmatpush1.bf16.msra.mxu0 %v4311_v11  ;;  %2967 = vmatprep.subr.bf16.mxu1 %v4312_v12  ;;  %v4389_v11 = vld [vmem:[%s6491_s1 + $0x8b0] ss:$8 sps:$4 sm:$0xff]   ;;  %v4394_v12 = vld [vmem:[%s6491_s1 + $0x1c4] ss:$8 sps:$4 sm:$0xff]  }
  0x49   : > { %3254 = vmatprep.subr.bf16.mxu0 %v4314_v13  ;;  %v4397_v13 = vld [vmem:[%s6491_s1 + $0x8c4] ss:$8 sps:$4 sm:$0xff]  }
  0x4b   : > { %2968 = vmatpush1.bf16.msra.mxu1 %v4316_v15  ;;  %v4392_v15 = vld [vmem:[%s6491_s1 + $0x1c0] ss:$8 sps:$4 sm:$0xff]  }
  0x4c   : > { %3255 = vmatpush1.bf16.msra.mxu0 %v4317_v16  ;;  %2978 = vmatprep.subr.bf16.mxu1 %v4321_v17  ;;  %v4395_v16 = vld [vmem:[%s6491_s1 + $0x8c0] ss:$8 sps:$4 sm:$0xff]   ;;  %v4400_v17 = vld [vmem:[%s6491_s1 + $0x1d4] ss:$8 sps:$4 sm:$0xff]  }
  0x4d   : > { %3265 = vmatprep.subr.bf16.mxu0 %v4325_v18  ;;  %v4403_v18 = vld [vmem:[%s6491_s1 + $0x8d4] ss:$8 sps:$4 sm:$0xff]  }
  0x4e   : > { %2970 = vmatmul.mubr.bf16.vlgmr.msra.gmra.mrb[0].mxu1 %v5234_v19 }
  0x4f   : > { %3257 = vmatmul.mubr.bf16.vlgmr.msra.gmra.mrb[0].mxu0 %v675_v20  ;;  %2979 = vmatpush1.bf16.msra.mxu1 %v4319_v21  ;;  %v4398_v20 = vld [vmem:[%s6491_s1 + $0x1d0] ss:$8 sps:$4 sm:$0xff]  }
  0x50   : > { %3266 = vmatpush1.bf16.msra.mxu0 %v4323_v22  ;;  %2980 = vmatprep.subr.bf16.mxu1 %v4328_v23  ;;  %v4401_v21 = vld [vmem:[%s6491_s1 + $0x8d0] ss:$8 sps:$4 sm:$0xff]   ;;  %v4406_v22 = vld [vmem:[%s6491_s1 + $0x1e4] ss:$8 sps:$4 sm:$0xff]  }
  0x51   : > { %3267 = vmatprep.subr.bf16.mxu0 %v4331_v24  ;;  %3010 = vmatprep.mubr.bf16.mxu1 %v627_v25  ;;  %v4409_v23 = vld [vmem:[%s6491_s1 + $0x8e4] ss:$8 sps:$4 sm:$0xff]   ;;  %v580_v24 = vcombine.high %v5158_v52, %v5158_v52  ;;  %v4404_v25 = vld [vmem:[%s6491_s1 + $0x1e0] ss:$8 sps:$4 sm:$0xff]   ;;  %v4415_v52 = vld [vmem:[%s6491_s1 + $0x8f4] ss:$8 sps:$4 sm:$0xff]  }
  0x52   : > { %3297 = vmatprep.mubr.bf16.mxu0 %v5342_v59 }
  0x53   : > { %2981 = vmatpush1.bf16.msra.mxu1 %v4326_v26  ;;  %v4407_v26 = vld [vmem:[%s6491_s1 + $0x8e0] ss:$8 sps:$4 sm:$0xff]  }
  0x54   : > { %3268 = vmatpush1.bf16.msra.mxu0 %v4329_v27  ;;  %2982 = vmatprep.subr.bf16.mxu1 %v4334_v28  ;;  %v4412_v27 = vld [vmem:[%s6491_s1 + $0x1f4] ss:$8 sps:$4 sm:$0xff]   ;;  %v5435_v28 = vrot.slane %v580_v24, %v5155_v51  ;;  %v4482_v24 = vld [vmem:[%s6491_s1 + $0x2b0] ss:$8 sps:$4 sm:$0xff]  }
  0x55   : > { %3269 = vmatprep.subr.bf16.mxu0 %v4337_v29  ;;  %v4410_v29 = vld [vmem:[%s6491_s1 + $0x1f0] ss:$8 sps:$4 sm:$0xff]  }
  0x57   : > { %2983 = vmatpush1.bf16.msra.mxu1 %v4332_v30  ;;  %v4413_v30 = vld [vmem:[%s6491_s1 + $0x8f0] ss:$8 sps:$4 sm:$0xff]  }
  0x58   : > { %3270 = vmatpush1.bf16.msra.mxu0 %v4335_v31  ;;  %2984 = vmatprep.subr.bf16.mxu1 %v4340_v32  ;;  %v4418_v31 = vld [vmem:[%s6491_s1 + $0x204] ss:$8 sps:$4 sm:$0xff]  }
  0x59   : > { %3271 = vmatprep.subr.bf16.mxu0 %v4343_v33  ;;  %v4421_v32 = vld [vmem:[%s6491_s1 + $0x904] ss:$8 sps:$4 sm:$0xff]   ;;  %v596_v33 = vcombine.high %v5435_v28, %v5435_v28 }
  0x5b   : > { %2985 = vmatpush1.bf16.msra.mxu1 %v4338_v34  ;;  %v625_v34 = vcombine.high %v5234_v19, %v5234_v19  ;;  %v4427_v19 = vld [vmem:[%s6491_s1 + $0x914] ss:$8 sps:$4 sm:$0xff]  }
  0x5c   : > { %3272 = vmatpush1.bf16.msra.mxu0 %v4341_v35  ;;  %2986 = vmatprep.subr.bf16.mxu1 %v4346_v36  ;;  %v4416_v35 = vld [vmem:[%s6491_s1 + $0x200] ss:$8 sps:$4 sm:$0xff]   ;;  %v5458_v36 = vrot.slane %v5325_v53, %v5155_v51  ;;  %v4434_v53 = vld [vmem:[%s6491_s1 + $0x230] ss:$8 sps:$4 sm:$0xff]  }
  0x5d   : > { %3273 = vmatprep.subr.bf16.mxu0 %v4349_v37  ;;  %v4419_v37 = vld [vmem:[%s6491_s1 + $0x900] ss:$8 sps:$4 sm:$0xff]  }
  0x5f   : > { %2987 = vmatpush1.bf16.msra.mxu1 %v4344_v38  ;;  %v4424_v38 = vld [vmem:[%s6491_s1 + $0x214] ss:$8 sps:$4 sm:$0xff]  }
  0x60   : > { %3274 = vmatpush1.bf16.msra.mxu0 %v4347_v39  ;;  %2988 = vmatprep.subr.bf16.mxu1 %v4352_v41  ;;  %v5470_v39 = vrot.slane %v596_v33, %v5155_v51  ;;  %v725_v41 = vcombine.high %v5342_v59, %v5342_v59  ;;  %v4448_v59 = vld [vmem:[%s6491_s1 + $0x254] ss:$8 sps:$4 sm:$0xff]   ;;  %v4497_v33 = vld [vmem:[%s6491_s1 + $0x9d0] ss:$8 sps:$4 sm:$0xff]  }
  0x61   : > { %3275 = vmatprep.subr.bf16.mxu0 %v4355_v42  ;;  %v4422_v42 = vld [vmem:[%s6491_s1 + $0x210] ss:$8 sps:$4 sm:$0xff]  }
  0x63   : > { %2989 = vmatpush1.bf16.msra.mxu1 %v4350_v43  ;;  %v4425_v43 = vld [vmem:[%s6491_s1 + $0x910] ss:$8 sps:$4 sm:$0xff]  }
  0x64   : > { %3276 = vmatpush1.bf16.msra.mxu0 %v4353_v44  ;;  %2990 = vmatprep.subr.bf16.mxu1 %v4358_v45  ;;  %v4430_v44 = vld [vmem:[%s6491_s1 + $0x224] ss:$8 sps:$4 sm:$0xff]  }
  0x65   : > { %3277 = vmatprep.subr.bf16.mxu0 %v4361_v46  ;;  %v4433_v45 = vld [vmem:[%s6491_s1 + $0x924] ss:$8 sps:$4 sm:$0xff]   ;;  %v4428_v46 = vld [vmem:[%s6491_s1 + $0x220] ss:$8 sps:$4 sm:$0xff]  }
  0x67   : > { %2991 = vmatpush1.bf16.msra.mxu1 %v4356_v47  ;;  %v4431_v47 = vld [vmem:[%s6491_s1 + $0x920] ss:$8 sps:$4 sm:$0xff]  }
  0x68   : > { %3278 = vmatpush1.bf16.msra.mxu0 %v4359_v49  ;;  %2992 = vmatprep.subr.bf16.mxu1 %v4364_v50  ;;  %v4436_v49 = vld [vmem:[%s6491_s1 + $0x234] ss:$8 sps:$4 sm:$0xff]  }
  0x69   : > { %3279 = vmatprep.subr.bf16.mxu0 %v4367_v54  ;;  %v4439_v50 = vld [vmem:[%s6491_s1 + $0x934] ss:$8 sps:$4 sm:$0xff]   ;;  %v4437_v54 = vld [vmem:[%s6491_s1 + $0x930] ss:$8 sps:$4 sm:$0xff]  }
  0x6b   : > { %2993 = vmatpush1.bf16.msra.mxu1 %v4362_v56  ;;  %v4445_v56 = vld [vmem:[%s6491_s1 + $0x944] ss:$8 sps:$4 sm:$0xff]  }
  0x6c   : > { %3280 = vmatpush1.bf16.msra.mxu0 %v4365_v57  ;;  %2994 = vmatprep.subr.bf16.mxu1 %v4370_v58  ;;  %v4440_v57 = vld [vmem:[%s6491_s1 + $0x240] ss:$8 sps:$4 sm:$0xff]  }
  0x6d   : > { %3281 = vmatprep.subr.bf16.mxu0 %v4373_v60  ;;  %v4443_v58 = vld [vmem:[%s6491_s1 + $0x940] ss:$8 sps:$4 sm:$0xff]   ;;  %v4451_v60 = vld [vmem:[%s6491_s1 + $0x954] ss:$8 sps:$4 sm:$0xff]  }
  0x6f   : > { %2995 = vmatpush1.bf16.msra.mxu1 %v4368_v61  ;;  %v4446_v61 = vld [vmem:[%s6491_s1 + $0x250] ss:$8 sps:$4 sm:$0xff]  }
  0x70   : > { %3282 = vmatpush1.bf16.msra.mxu0 %v4371_v62  ;;  %2996 = vmatprep.subr.bf16.mxu1 %v4376_v63  ;;  %v4449_v62 = vld [vmem:[%s6491_s1 + $0x950] ss:$8 sps:$4 sm:$0xff]   ;;  %v4454_v63 = vld [vmem:[%s6491_s1 + $0x264] ss:$8 sps:$4 sm:$0xff]  }
  0x71   : > { %3283 = vmatprep.subr.bf16.mxu0 %v4379_v0  ;;  %v4457_v0 = vld [vmem:[%s6491_s1 + $0x964] ss:$8 sps:$4 sm:$0xff]  }
  0x73   : > { %2997 = vmatpush1.bf16.msra.mxu1 %v4374_v1  ;;  %v4452_v1 = vld [vmem:[%s6491_s1 + $0x260] ss:$8 sps:$4 sm:$0xff]  }
  0x74   : > { %3284 = vmatpush1.bf16.msra.mxu0 %v4377_v2  ;;  %2998 = vmatprep.subr.bf16.mxu1 %v4382_v3  ;;  %v4455_v2 = vld [vmem:[%s6491_s1 + $0x960] ss:$8 sps:$4 sm:$0xff]   ;;  %v4460_v3 = vld [vmem:[%s6491_s1 + $0x274] ss:$8 sps:$4 sm:$0xff]  }
  0x75   : > { %3285 = vmatprep.subr.bf16.mxu0 %v4385_v5  ;;  %v4463_v5 = vld [vmem:[%s6491_s1 + $0x974] ss:$8 sps:$4 sm:$0xff]  }
  0x77   : > { %2999 = vmatpush1.bf16.msra.mxu1 %v4380_v6  ;;  %v4458_v6 = vld [vmem:[%s6491_s1 + $0x270] ss:$8 sps:$4 sm:$0xff]  }
  0x78   : > { %3286 = vmatpush1.bf16.msra.mxu0 %v4383_v7  ;;  %3000 = vmatprep.subr.bf16.mxu1 %v4388_v8  ;;  %v4461_v7 = vld [vmem:[%s6491_s1 + $0x970] ss:$8 sps:$4 sm:$0xff]   ;;  %v4466_v8 = vld [vmem:[%s6491_s1 + $0x284] ss:$8 sps:$4 sm:$0xff]  }
  0x79   : > { %3287 = vmatprep.subr.bf16.mxu0 %v4391_v9  ;;  %v4469_v9 = vld [vmem:[%s6491_s1 + $0x984] ss:$8 sps:$4 sm:$0xff]  }
  0x7b   : > { %3001 = vmatpush1.bf16.msra.mxu1 %v4386_v10  ;;  %v4464_v10 = vld [vmem:[%s6491_s1 + $0x280] ss:$8 sps:$4 sm:$0xff]  }
  0x7c   : > { %3288 = vmatpush1.bf16.msra.mxu0 %v4389_v11  ;;  %3002 = vmatprep.subr.bf16.mxu1 %v4394_v12  ;;  %v4467_v11 = vld [vmem:[%s6491_s1 + $0x980] ss:$8 sps:$4 sm:$0xff]   ;;  %v4472_v12 = vld [vmem:[%s6491_s1 + $0x294] ss:$8 sps:$4 sm:$0xff]  }
  0x7d   : > { %3289 = vmatprep.subr.bf16.mxu0 %v4397_v13  ;;  %v4475_v13 = vld [vmem:[%s6491_s1 + $0x994] ss:$8 sps:$4 sm:$0xff]  }
  0x7f   : > { %3003 = vmatpush1.bf16.msra.mxu1 %v4392_v15  ;;  %v4470_v15 = vld [vmem:[%s6491_s1 + $0x290] ss:$8 sps:$4 sm:$0xff]  }
  0x80   : > { %3290 = vmatpush1.bf16.msra.mxu0 %v4395_v16  ;;  %3004 = vmatprep.subr.bf16.mxu1 %v4400_v17  ;;  %v4473_v16 = vld [vmem:[%s6491_s1 + $0x990] ss:$8 sps:$4 sm:$0xff]   ;;  %v4478_v17 = vld [vmem:[%s6491_s1 + $0x2a4] ss:$8 sps:$4 sm:$0xff]  }
  0x81   : > { %3291 = vmatprep.subr.bf16.mxu0 %v4403_v18  ;;  %v4481_v18 = vld [vmem:[%s6491_s1 + $0x9a4] ss:$8 sps:$4 sm:$0xff]  }
  0x83   : > { %3005 = vmatpush1.bf16.msra.mxu1 %v4398_v20  ;;  %v4476_v20 = vld [vmem:[%s6491_s1 + $0x2a0] ss:$8 sps:$4 sm:$0xff]  }
  0x84   : > { %3292 = vmatpush1.bf16.msra.mxu0 %v4401_v21  ;;  %3006 = vmatprep.subr.bf16.mxu1 %v4406_v22  ;;  %v4479_v21 = vld [vmem:[%s6491_s1 + $0x9a0] ss:$8 sps:$4 sm:$0xff]   ;;  %v4484_v22 = vld [vmem:[%s6491_s1 + $0x2b4] ss:$8 sps:$4 sm:$0xff]  }
  0x85   : > { %3293 = vmatprep.subr.bf16.mxu0 %v4409_v23  ;;  %v4487_v23 = vld [vmem:[%s6491_s1 + $0x9b4] ss:$8 sps:$4 sm:$0xff]  }
  0x87   : > { %3007 = vmatpush1.bf16.msra.mxu1 %v4404_v25  ;;  %v4485_v25 = vld [vmem:[%s6491_s1 + $0x9b0] ss:$8 sps:$4 sm:$0xff]  }
  0x88   : > { %3294 = vmatpush1.bf16.msra.mxu0 %v4407_v26  ;;  %3008 = vmatprep.subr.bf16.mxu1 %v4412_v27  ;;  %v4490_v26 = vld [vmem:[%s6491_s1 + $0x2c4] ss:$8 sps:$4 sm:$0xff]  }
  0x89   : > { %3295 = vmatprep.subr.bf16.mxu0 %v4415_v52  ;;  %v4493_v27 = vld [vmem:[%s6491_s1 + $0x9c4] ss:$8 sps:$4 sm:$0xff]   ;;  %v4488_v52 = vld [vmem:[%s6491_s1 + $0x2c0] ss:$8 sps:$4 sm:$0xff]  }
  0x8b   : > { %3009 = vmatpush1.bf16.msra.mxu1 %v4410_v29  ;;  %v4491_v29 = vld [vmem:[%s6491_s1 + $0x9c0] ss:$8 sps:$4 sm:$0xff]  }
  0x8c   : > { %3296 = vmatpush1.bf16.msra.mxu0 %v4413_v30  ;;  %3019 = vmatprep.subr.bf16.mxu1 %v4418_v31  ;;  %v4496_v30 = vld [vmem:[%s6491_s1 + $0x2d4] ss:$8 sps:$4 sm:$0xff]  }
  0x8d   : > { %3306 = vmatprep.subr.bf16.mxu0 %v4421_v32  ;;  %v4499_v31 = vld [vmem:[%s6491_s1 + $0x9d4] ss:$8 sps:$4 sm:$0xff]   ;;  %v4494_v32 = vld [vmem:[%s6491_s1 + $0x2d0] ss:$8 sps:$4 sm:$0xff]  }
  0x8e   : > { %3011 = vmatmul.mubr.bf16.vlgmr.msra.gmra.mrb[0].mxu1 %v625_v34  ;;  %v4502_v34 = vld [vmem:[%s6491_s1 + $0x2e4] ss:$8 sps:$4 sm:$0xff]  }
  0x8f   : > { %3298 = vmatmul.mubr.bf16.vlgmr.msra.gmra.mrb[0].mxu0 %v5458_v36  ;;  %3020 = vmatpush1.bf16.msra.mxu1 %v4416_v35  ;;  %v4505_v35 = vld [vmem:[%s6491_s1 + $0x9e4] ss:$8 sps:$4 sm:$0xff]  }
  0x90   : > { %3307 = vmatpush1.bf16.msra.mxu0 %v4419_v37  ;;  %3021 = vmatprep.subr.bf16.mxu1 %v4424_v38  ;;  %v678_v37 = vcombine.high %v5315_v48, %v5315_v48  ;;  %v4500_v38 = vld [vmem:[%s6491_s1 + $0x2e0] ss:$8 sps:$4 sm:$0xff]   ;;  %v4511_v48 = vld [vmem:[%s6491_s1 + $0x9f4] ss:$8 sps:$4 sm:$0xff]  }
  0x91   : > { %3308 = vmatprep.subr.bf16.mxu0 %v4427_v19  ;;  %3051 = vmatprep.mubr.bf16.mxu1 %v5470_v39  ;;  %v4503_v19 = vld [vmem:[%s6491_s1 + $0x9e0] ss:$8 sps:$4 sm:$0xff]  }
  0x92   : > { %3338 = vmatprep.mubr.bf16.mxu0 %v725_v41  ;;  %v4508_v41 = vld [vmem:[%s6491_s1 + $0x2f4] ss:$8 sps:$4 sm:$0xff]  }
  0x93   : > { %3022 = vmatpush1.bf16.msra.mxu1 %v4422_v42  ;;  %v5647_v42 = vrot.slane %v678_v37, %v5155_v51  ;;  %v4581_v37 = vld [vmem:[%s6491_s1 + $0xab0] ss:$8 sps:$4 sm:$0xff]  }
  0x94   : > { %3309 = vmatpush1.bf16.msra.mxu0 %v4425_v43  ;;  %3023 = vmatprep.subr.bf16.mxu1 %v4430_v44  ;;  %v4506_v43 = vld [vmem:[%s6491_s1 + $0x2f0] ss:$8 sps:$4 sm:$0xff]  }
  0x95   : > { %3310 = vmatprep.subr.bf16.mxu0 %v4433_v45  ;;  %v4509_v44 = vld [vmem:[%s6491_s1 + $0x9f0] ss:$8 sps:$4 sm:$0xff]   ;;  %v4514_v45 = vld [vmem:[%s6491_s1 + $0x304] ss:$8 sps:$4 sm:$0xff]  }
  0x97   : > { %3024 = vmatpush1.bf16.msra.mxu1 %v4428_v46  ;;  %v4517_v46 = vld [vmem:[%s6491_s1 + $0xa04] ss:$8 sps:$4 sm:$0xff]  }
  0x98   : > { %3311 = vmatpush1.bf16.msra.mxu0 %v4431_v47  ;;  %3025 = vmatprep.subr.bf16.mxu1 %v4436_v49  ;;  %v694_v47 = vcombine.high %v5647_v42, %v5647_v42  ;;  %v4512_v49 = vld [vmem:[%s6491_s1 + $0x300] ss:$8 sps:$4 sm:$0xff]  }
  0x99   : > { %3312 = vmatprep.subr.bf16.mxu0 %v4439_v50  ;;  %v5668_v50 = vrot.slane %v5435_v28, %v5155_v51  ;;  %v4523_v28 = vld [vmem:[%s6491_s1 + $0xa14] ss:$8 sps:$4 sm:$0xff]  }
  0x9b   : > { %3026 = vmatpush1.bf16.msra.mxu1 %v4434_v53  ;;  %v723_v53 = vcombine.high %v5458_v36, %v5458_v36  ;;  %v5684_v36 = vrot.slane %v694_v47, %v5155_v51  ;;  %v4598_v47 = vld [vmem:[%s6491_s1 + $0x3e4] ss:$8 sps:$4 sm:$0xff]  }
  0x9c   : > { %3313 = vmatpush1.bf16.msra.mxu0 %v4437_v54  ;;  %3027 = vmatprep.subr.bf16.mxu1 %v4442_v55  ;;  %v4515_v54 = vld [vmem:[%s6491_s1 + $0xa00] ss:$8 sps:$4 sm:$0xff]   ;;  %v4520_v55 = vld [vmem:[%s6491_s1 + $0x314] ss:$8 sps:$4 sm:$0xff]  }
  0x9d   : > { %3314 = vmatprep.subr.bf16.mxu0 %v4445_v56  ;;  %v628_v56 = vcombine.high %v5470_v39, %v5470_v39  ;;  %v4526_v39 = vld [vmem:[%s6491_s1 + $0x324] ss:$8 sps:$4 sm:$0xff]  }
  0x9f   : > { %3028 = vmatpush1.bf16.msra.mxu1 %v4440_v57  ;;  %v4518_v57 = vld [vmem:[%s6491_s1 + $0x310] ss:$8 sps:$4 sm:$0xff]  }
  0xa0   : > { %3315 = vmatpush1.bf16.msra.mxu0 %v4443_v58  ;;  %3029 = vmatprep.subr.bf16.mxu1 %v4448_v59  ;;  %v4521_v58 = vld [vmem:[%s6491_s1 + $0xa10] ss:$8 sps:$4 sm:$0xff]   ;;  %v4529_v59 = vld [vmem:[%s6491_s1 + $0xa24] ss:$8 sps:$4 sm:$0xff]  }
  0xa1   : > { %3316 = vmatprep.subr.bf16.mxu0 %v4451_v60  ;;  %v4524_v60 = vld [vmem:[%s6491_s1 + $0x320] ss:$8 sps:$4 sm:$0xff]  }
  0xa3   : > { %3030 = vmatpush1.bf16.msra.mxu1 %v4446_v61  ;;  %v4527_v61 = vld [vmem:[%s6491_s1 + $0xa20] ss:$8 sps:$4 sm:$0xff]  }
  0xa4   : > { %3317 = vmatpush1.bf16.msra.mxu0 %v4449_v62  ;;  %3031 = vmatprep.subr.bf16.mxu1 %v4454_v63  ;;  %v4532_v62 = vld [vmem:[%s6491_s1 + $0x334] ss:$8 sps:$4 sm:$0xff]  }
  0xa5   : > { %3318 = vmatprep.subr.bf16.mxu0 %v4457_v0  ;;  %v4535_v63 = vld [vmem:[%s6491_s1 + $0xa34] ss:$8 sps:$4 sm:$0xff]   ;;  %v4530_v0 = vld [vmem:[%s6491_s1 + $0x330] ss:$8 sps:$4 sm:$0xff]  }
  0xa7   : > { %3032 = vmatpush1.bf16.msra.mxu1 %v4452_v1  ;;  %v4533_v1 = vld [vmem:[%s6491_s1 + $0xa30] ss:$8 sps:$4 sm:$0xff]  }
  0xa8   : > { %3319 = vmatpush1.bf16.msra.mxu0 %v4455_v2  ;;  %3033 = vmatprep.subr.bf16.mxu1 %v4460_v3  ;;  %v4538_v2 = vld [vmem:[%s6491_s1 + $0x344] ss:$8 sps:$4 sm:$0xff]  }
  0xa9   : > { %3320 = vmatprep.subr.bf16.mxu0 %v4463_v5  ;;  %v4541_v3 = vld [vmem:[%s6491_s1 + $0xa44] ss:$8 sps:$4 sm:$0xff]   ;;  %v4536_v5 = vld [vmem:[%s6491_s1 + $0x340] ss:$8 sps:$4 sm:$0xff]  }
  0xab   : > { %3034 = vmatpush1.bf16.msra.mxu1 %v4458_v6  ;;  %v4539_v6 = vld [vmem:[%s6491_s1 + $0xa40] ss:$8 sps:$4 sm:$0xff]  }
  0xac   : > { %3321 = vmatpush1.bf16.msra.mxu0 %v4461_v7  ;;  %3035 = vmatprep.subr.bf16.mxu1 %v4466_v8  ;;  %v4544_v7 = vld [vmem:[%s6491_s1 + $0x354] ss:$8 sps:$4 sm:$0xff]  }
  0xad   : > { %3322 = vmatprep.subr.bf16.mxu0 %v4469_v9  ;;  %v4547_v8 = vld [vmem:[%s6491_s1 + $0xa54] ss:$8 sps:$4 sm:$0xff]   ;;  %v4542_v9 = vld [vmem:[%s6491_s1 + $0x350] ss:$8 sps:$4 sm:$0xff]  }
  0xaf   : > { %3036 = vmatpush1.bf16.msra.mxu1 %v4464_v10  ;;  %v4545_v10 = vld [vmem:[%s6491_s1 + $0xa50] ss:$8 sps:$4 sm:$0xff]  }
  0xb0   : > { %3323 = vmatpush1.bf16.msra.mxu0 %v4467_v11  ;;  %3037 = vmatprep.subr.bf16.mxu1 %v4472_v12  ;;  %v4550_v11 = vld [vmem:[%s6491_s1 + $0x364] ss:$8 sps:$4 sm:$0xff]  }
  0xb1   : > { %3324 = vmatprep.subr.bf16.mxu0 %v4475_v13  ;;  %v4553_v12 = vld [vmem:[%s6491_s1 + $0xa64] ss:$8 sps:$4 sm:$0xff]   ;;  %v4548_v13 = vld [vmem:[%s6491_s1 + $0x360] ss:$8 sps:$4 sm:$0xff]  }
  0xb3   : > { %3038 = vmatpush1.bf16.msra.mxu1 %v4470_v15  ;;  %v4551_v15 = vld [vmem:[%s6491_s1 + $0xa60] ss:$8 sps:$4 sm:$0xff]  }
  0xb4   : > { %3325 = vmatpush1.bf16.msra.mxu0 %v4473_v16  ;;  %3039 = vmatprep.subr.bf16.mxu1 %v4478_v17  ;;  %v4556_v16 = vld [vmem:[%s6491_s1 + $0x374] ss:$8 sps:$4 sm:$0xff]  }
  0xb5   : > { %3326 = vmatprep.subr.bf16.mxu0 %v4481_v18  ;;  %v4559_v17 = vld [vmem:[%s6491_s1 + $0xa74] ss:$8 sps:$4 sm:$0xff]   ;;  %v4554_v18 = vld [vmem:[%s6491_s1 + $0x370] ss:$8 sps:$4 sm:$0xff]  }
  0xb7   : > { %3040 = vmatpush1.bf16.msra.mxu1 %v4476_v20  ;;  %v4557_v20 = vld [vmem:[%s6491_s1 + $0xa70] ss:$8 sps:$4 sm:$0xff]  }
  0xb8   : > { %3327 = vmatpush1.bf16.msra.mxu0 %v4479_v21  ;;  %3041 = vmatprep.subr.bf16.mxu1 %v4484_v22  ;;  %v4562_v21 = vld [vmem:[%s6491_s1 + $0x384] ss:$8 sps:$4 sm:$0xff]  }
  0xb9   : > { %3328 = vmatprep.subr.bf16.mxu0 %v4487_v23  ;;  %v4565_v22 = vld [vmem:[%s6491_s1 + $0xa84] ss:$8 sps:$4 sm:$0xff]   ;;  %v4560_v23 = vld [vmem:[%s6491_s1 + $0x380] ss:$8 sps:$4 sm:$0xff]  }
  0xbb   : > { %3042 = vmatpush1.bf16.msra.mxu1 %v4482_v24  ;;  %v4563_v24 = vld [vmem:[%s6491_s1 + $0xa80] ss:$8 sps:$4 sm:$0xff]  }
  0xbc   : > { %3329 = vmatpush1.bf16.msra.mxu0 %v4485_v25  ;;  %3043 = vmatprep.subr.bf16.mxu1 %v4490_v26  ;;  %v4568_v25 = vld [vmem:[%s6491_s1 + $0x394] ss:$8 sps:$4 sm:$0xff]  }
  0xbd   : > { %3330 = vmatprep.subr.bf16.mxu0 %v4493_v27  ;;  %v4571_v26 = vld [vmem:[%s6491_s1 + $0xa94] ss:$8 sps:$4 sm:$0xff]   ;;  %v4566_v27 = vld [vmem:[%s6491_s1 + $0x390] ss:$8 sps:$4 sm:$0xff]  }
  0xbf   : > { %3044 = vmatpush1.bf16.msra.mxu1 %v4488_v52  ;;  %v4569_v52 = vld [vmem:[%s6491_s1 + $0xa90] ss:$8 sps:$4 sm:$0xff]  }
  0xc0   : > { %3331 = vmatpush1.bf16.msra.mxu0 %v4491_v29  ;;  %3045 = vmatprep.subr.bf16.mxu1 %v4496_v30  ;;  %v4574_v29 = vld [vmem:[%s6491_s1 + $0x3a4] ss:$8 sps:$4 sm:$0xff]  }
  0xc1   : > { %3332 = vmatprep.subr.bf16.mxu0 %v4499_v31  ;;  %v4577_v30 = vld [vmem:[%s6491_s1 + $0xaa4] ss:$8 sps:$4 sm:$0xff]   ;;  %v4572_v31 = vld [vmem:[%s6491_s1 + $0x3a0] ss:$8 sps:$4 sm:$0xff]  }
  0xc3   : > { %3046 = vmatpush1.bf16.msra.mxu1 %v4494_v32  ;;  %v4575_v32 = vld [vmem:[%s6491_s1 + $0xaa0] ss:$8 sps:$4 sm:$0xff]  }
  0xc4   : > { %3333 = vmatpush1.bf16.msra.mxu0 %v4497_v33  ;;  %3047 = vmatprep.subr.bf16.mxu1 %v4502_v34  ;;  %v4580_v33 = vld [vmem:[%s6491_s1 + $0x3b4] ss:$8 sps:$4 sm:$0xff]  }
  0xc5   : > { %3334 = vmatprep.subr.bf16.mxu0 %v4505_v35  ;;  %v4583_v34 = vld [vmem:[%s6491_s1 + $0xab4] ss:$8 sps:$4 sm:$0xff]   ;;  %v4578_v35 = vld [vmem:[%s6491_s1 + $0x3b0] ss:$8 sps:$4 sm:$0xff]  }
  0xc7   : > { %3048 = vmatpush1.bf16.msra.mxu1 %v4500_v38  ;;  %v4586_v38 = vld [vmem:[%s6491_s1 + $0x3c4] ss:$8 sps:$4 sm:$0xff]  }
  0xc8   : > { %3335 = vmatpush1.bf16.msra.mxu0 %v4503_v19  ;;  %3049 = vmatprep.subr.bf16.mxu1 %v4508_v41  ;;  %v4589_v19 = vld [vmem:[%s6491_s1 + $0xac4] ss:$8 sps:$4 sm:$0xff]   ;;  %v4584_v41 = vld [vmem:[%s6491_s1 + $0x3c0] ss:$8 sps:$4 sm:$0xff]  }
  0xc9   : > { %3336 = vmatprep.subr.bf16.mxu0 %v4511_v48  ;;  %v4587_v48 = vld [vmem:[%s6491_s1 + $0xac0] ss:$8 sps:$4 sm:$0xff]  }
  0xcb   : > { %3050 = vmatpush1.bf16.msra.mxu1 %v4506_v43  ;;  %v4592_v43 = vld [vmem:[%s6491_s1 + $0x3d4] ss:$8 sps:$4 sm:$0xff]  }
  0xcc   : > { %3337 = vmatpush1.bf16.msra.mxu0 %v4509_v44  ;;  %3060 = vmatprep.subr.bf16.mxu1 %v4514_v45  ;;  %v4595_v44 = vld [vmem:[%s6491_s1 + $0xad4] ss:$8 sps:$4 sm:$0xff]   ;;  %v4590_v45 = vld [vmem:[%s6491_s1 + $0x3d0] ss:$8 sps:$4 sm:$0xff]  }
  0xcd   : > { %3347 = vmatprep.subr.bf16.mxu0 %v4517_v46  ;;  %v4593_v46 = vld [vmem:[%s6491_s1 + $0xad0] ss:$8 sps:$4 sm:$0xff]  }
  0xce   : > { %3052 = vmatmul.mubr.bf16.vlgmr.msra.gmra.mrb[0].mxu1 %v5668_v50 }
  0xcf   : > { %3339 = vmatmul.mubr.bf16.vlgmr.msra.gmra.mrb[0].mxu0 %v723_v53  ;;  %3061 = vmatpush1.bf16.msra.mxu1 %v4512_v49  ;;  %v4601_v49 = vld [vmem:[%s6491_s1 + $0xae4] ss:$8 sps:$4 sm:$0xff]   ;;  %v4596_v53 = vld [vmem:[%s6491_s1 + $0x3e0] ss:$8 sps:$4 sm:$0xff]  }
  0xd0   : > { %3348 = vmatpush1.bf16.msra.mxu0 %v4515_v54  ;;  %3062 = vmatprep.subr.bf16.mxu1 %v4520_v55  ;;  %v4599_v54 = vld [vmem:[%s6491_s1 + $0xae0] ss:$8 sps:$4 sm:$0xff]   ;;  %v4604_v55 = vld [vmem:[%s6491_s1 + $0x3f4] ss:$8 sps:$4 sm:$0xff]  }
  0xd1   : > { %3349 = vmatprep.subr.bf16.mxu0 %v4523_v28  ;;  %3092 = vmatprep.mubr.bf16.mxu1 %v628_v56  ;;  %v4607_v28 = vld [vmem:[%s6491_s1 + $0xaf4] ss:$8 sps:$4 sm:$0xff]   ;;  %v5857_v56 = vld.sshfl [vmem:[%s5153_s22 + $0x8] sm:$0xff pattern:$0x75316420] }
  0xd2   : > { %3379 = vmatprep.mubr.bf16.mxu0 %v5684_v36 }
  0xd3   : > { %3063 = vmatpush1.bf16.msra.mxu1 %v4518_v57  ;;  %v4602_v57 = vld [vmem:[%s6491_s1 + $0x3f0] ss:$8 sps:$4 sm:$0xff]  }
  0xd4   : > { %3350 = vmatpush1.bf16.msra.mxu0 %v4521_v58  ;;  %3064 = vmatprep.subr.bf16.mxu1 %v4526_v39  ;;  %v4605_v58 = vld [vmem:[%s6491_s1 + $0xaf0] ss:$8 sps:$4 sm:$0xff]   ;;  %v4610_v39 = vld [vmem:[%s6491_s1 + $0x404] ss:$8 sps:$4 sm:$0xff]  }
  0xd5   : > { %3351 = vmatprep.subr.bf16.mxu0 %v4529_v59  ;;  %v4614_v59 = vld [vmem:[%s6491_s1 + $0xb04] ss:$8 sps:$4 sm:$0xff]  }
  0xd7   : > { %3065 = vmatpush1.bf16.msra.mxu1 %v4524_v60  ;;  %v644_v60 = vcombine.high %v5857_v56, %v5857_v56 }
  0xd8   : > { %3352 = vmatpush1.bf16.msra.mxu0 %v4527_v61  ;;  %3066 = vmatprep.subr.bf16.mxu1 %v4532_v62  ;;  %v4608_v61 = vld [vmem:[%s6491_s1 + $0x400] ss:$8 sps:$4 sm:$0xff]   ;;  %v626_v62 = vcombine.high %v5668_v50, %v5668_v50  ;;  %v4620_v50 = vld [vmem:[%s6491_s1 + $0xb14] ss:$8 sps:$4 sm:$0xff]  }
  0xd9   : > { %3353 = vmatprep.subr.bf16.mxu0 %v4535_v63  ;;  %v5880_v63 = vrot.slane %v5647_v42, %v5155_v51  ;;  %v726_v42 = vcombine.high %v5684_v36, %v5684_v36  ;;  %v4626_v36 = vld [vmem:[%s6491_s1 + $0xb24] ss:$8 sps:$4 sm:$0xff]  }
  0xdb   : > { %3067 = vmatpush1.bf16.msra.mxu1 %v4530_v0  ;;  %v4612_v0 = vld [vmem:[%s6491_s1 + $0xb00] ss:$8 sps:$4 sm:$0xff]  }
  0xdc   : > { %3354 = vmatpush1.bf16.msra.mxu0 %v4533_v1  ;;  %3068 = vmatprep.subr.bf16.mxu1 %v4538_v2  ;;  %v4617_v1 = vld [vmem:[%s6491_s1 + $0x414] ss:$8 sps:$4 sm:$0xff]   ;;  %v5892_v2 = vrot.slane %v644_v60, %v5155_v51  ;;  %v4695_v60 = vld [vmem:[%s6491_s1 + $0x4e4] ss:$8 sps:$4 sm:$0xff]  }
  0xdd   : > { %3355 = vmatprep.subr.bf16.mxu0 %v4541_v3  ;;  %v4615_v3 = vld [vmem:[%s6491_s1 + $0x410] ss:$8 sps:$4 sm:$0xff]  }
  0xdf   : > { %3069 = vmatpush1.bf16.msra.mxu1 %v4536_v5  ;;  %v4618_v5 = vld [vmem:[%s6491_s1 + $0xb10] ss:$8 sps:$4 sm:$0xff]  }
  0xe0   : > { %3356 = vmatpush1.bf16.msra.mxu0 %v4539_v6  ;;  %3070 = vmatprep.subr.bf16.mxu1 %v4544_v7  ;;  %v4623_v6 = vld [vmem:[%s6491_s1 + $0x424] ss:$8 sps:$4 sm:$0xff]   ;;  %v4621_v7 = vld [vmem:[%s6491_s1 + $0x420] ss:$8 sps:$4 sm:$0xff]  }
  0xe1   : > { %3357 = vmatprep.subr.bf16.mxu0 %v4547_v8  ;;  %v4624_v8 = vld [vmem:[%s6491_s1 + $0xb20] ss:$8 sps:$4 sm:$0xff]  }
  0xe3   : > { %3071 = vmatpush1.bf16.msra.mxu1 %v4542_v9  ;;  %v4629_v9 = vld [vmem:[%s6491_s1 + $0x434] ss:$8 sps:$4 sm:$0xff]  }
  0xe4   : > { %3358 = vmatpush1.bf16.msra.mxu0 %v4545_v10  ;;  %3072 = vmatprep.subr.bf16.mxu1 %v4550_v11  ;;  %v4632_v10 = vld [vmem:[%s6491_s1 + $0xb34] ss:$8 sps:$4 sm:$0xff]   ;;  %v4627_v11 = vld [vmem:[%s6491_s1 + $0x430] ss:$8 sps:$4 sm:$0xff]  }
  0xe5   : > { %3359 = vmatprep.subr.bf16.mxu0 %v4553_v12  ;;  %v4630_v12 = vld [vmem:[%s6491_s1 + $0xb30] ss:$8 sps:$4 sm:$0xff]  }
  0xe7   : > { %3073 = vmatpush1.bf16.msra.mxu1 %v4548_v13  ;;  %v4635_v13 = vld [vmem:[%s6491_s1 + $0x444] ss:$8 sps:$4 sm:$0xff]  }
  0xe8   : > { %3360 = vmatpush1.bf16.msra.mxu0 %v4551_v15  ;;  %3074 = vmatprep.subr.bf16.mxu1 %v4556_v16  ;;  %v4638_v15 = vld [vmem:[%s6491_s1 + $0xb44] ss:$8 sps:$4 sm:$0xff]   ;;  %v4633_v16 = vld [vmem:[%s6491_s1 + $0x440] ss:$8 sps:$4 sm:$0xff]  }
  0xe9   : > { %3361 = vmatprep.subr.bf16.mxu0 %v4559_v17  ;;  %v4636_v17 = vld [vmem:[%s6491_s1 + $0xb40] ss:$8 sps:$4 sm:$0xff]  }
  0xeb   : > { %3075 = vmatpush1.bf16.msra.mxu1 %v4554_v18  ;;  %v4641_v18 = vld [vmem:[%s6491_s1 + $0x454] ss:$8 sps:$4 sm:$0xff]  }
  0xec   : > { %3362 = vmatpush1.bf16.msra.mxu0 %v4557_v20  ;;  %3076 = vmatprep.subr.bf16.mxu1 %v4562_v21  ;;  %v4644_v20 = vld [vmem:[%s6491_s1 + $0xb54] ss:$8 sps:$4 sm:$0xff]   ;;  %v4639_v21 = vld [vmem:[%s6491_s1 + $0x450] ss:$8 sps:$4 sm:$0xff]  }
  0xed   : > { %3363 = vmatprep.subr.bf16.mxu0 %v4565_v22  ;;  %v4642_v22 = vld [vmem:[%s6491_s1 + $0xb50] ss:$8 sps:$4 sm:$0xff]  }
  0xef   : > { %3077 = vmatpush1.bf16.msra.mxu1 %v4560_v23  ;;  %v4647_v23 = vld [vmem:[%s6491_s1 + $0x464] ss:$8 sps:$4 sm:$0xff]  }
  0xf0   : > { %3364 = vmatpush1.bf16.msra.mxu0 %v4563_v24  ;;  %3078 = vmatprep.subr.bf16.mxu1 %v4568_v25  ;;  %v4650_v24 = vld [vmem:[%s6491_s1 + $0xb64] ss:$8 sps:$4 sm:$0xff]   ;;  %v4645_v25 = vld [vmem:[%s6491_s1 + $0x460] ss:$8 sps:$4 sm:$0xff]  }
  0xf1   : > { %3365 = vmatprep.subr.bf16.mxu0 %v4571_v26  ;;  %v4648_v26 = vld [vmem:[%s6491_s1 + $0xb60] ss:$8 sps:$4 sm:$0xff]  }
  0xf3   : > { %3079 = vmatpush1.bf16.msra.mxu1 %v4566_v27  ;;  %v4653_v27 = vld [vmem:[%s6491_s1 + $0x474] ss:$8 sps:$4 sm:$0xff]  }
  0xf4   : > { %3366 = vmatpush1.bf16.msra.mxu0 %v4569_v52  ;;  %3080 = vmatprep.subr.bf16.mxu1 %v4574_v29  ;;  %v4656_v52 = vld [vmem:[%s6491_s1 + $0xb74] ss:$8 sps:$4 sm:$0xff]   ;;  %v4651_v29 = vld [vmem:[%s6491_s1 + $0x470] ss:$8 sps:$4 sm:$0xff]  }
  0xf5   : > { %3367 = vmatprep.subr.bf16.mxu0 %v4577_v30  ;;  %v4654_v30 = vld [vmem:[%s6491_s1 + $0xb70] ss:$8 sps:$4 sm:$0xff]  }
  0xf7   : > { %3081 = vmatpush1.bf16.msra.mxu1 %v4572_v31  ;;  %v4659_v31 = vld [vmem:[%s6491_s1 + $0x484] ss:$8 sps:$4 sm:$0xff]  }
  0xf8   : > { %3368 = vmatpush1.bf16.msra.mxu0 %v4575_v32  ;;  %3082 = vmatprep.subr.bf16.mxu1 %v4580_v33  ;;  %v4662_v32 = vld [vmem:[%s6491_s1 + $0xb84] ss:$8 sps:$4 sm:$0xff]   ;;  %v4657_v33 = vld [vmem:[%s6491_s1 + $0x480] ss:$8 sps:$4 sm:$0xff]  }
  0xf9   : > { %3369 = vmatprep.subr.bf16.mxu0 %v4583_v34  ;;  %v4660_v34 = vld [vmem:[%s6491_s1 + $0xb80] ss:$8 sps:$4 sm:$0xff]  }
  0xfb   : > { %3083 = vmatpush1.bf16.msra.mxu1 %v4578_v35  ;;  %v4665_v35 = vld [vmem:[%s6491_s1 + $0x494] ss:$8 sps:$4 sm:$0xff]  }
  0xfc   : > { %3370 = vmatpush1.bf16.msra.mxu0 %v4581_v37  ;;  %3084 = vmatprep.subr.bf16.mxu1 %v4586_v38  ;;  %v4668_v37 = vld [vmem:[%s6491_s1 + $0xb94] ss:$8 sps:$4 sm:$0xff]   ;;  %v4663_v38 = vld [vmem:[%s6491_s1 + $0x490] ss:$8 sps:$4 sm:$0xff]  }
  0xfd   : > { %3371 = vmatprep.subr.bf16.mxu0 %v4589_v19  ;;  %v4666_v19 = vld [vmem:[%s6491_s1 + $0xb90] ss:$8 sps:$4 sm:$0xff]  }
  0xff   : > { %3085 = vmatpush1.bf16.msra.mxu1 %v4584_v41  ;;  %v4671_v41 = vld [vmem:[%s6491_s1 + $0x4a4] ss:$8 sps:$4 sm:$0xff]  }
 0x100   : > { %3372 = vmatpush1.bf16.msra.mxu0 %v4587_v48  ;;  %3086 = vmatprep.subr.bf16.mxu1 %v4592_v43  ;;  %v4674_v48 = vld [vmem:[%s6491_s1 + $0xba4] ss:$8 sps:$4 sm:$0xff]   ;;  %v4669_v43 = vld [vmem:[%s6491_s1 + $0x4a0] ss:$8 sps:$4 sm:$0xff]  }
 0x101   : > { %3373 = vmatprep.subr.bf16.mxu0 %v4595_v44  ;;  %v4672_v44 = vld [vmem:[%s6491_s1 + $0xba0] ss:$8 sps:$4 sm:$0xff]  }
 0x103   : > { %3087 = vmatpush1.bf16.msra.mxu1 %v4590_v45  ;;  %v4677_v45 = vld [vmem:[%s6491_s1 + $0x4b4] ss:$8 sps:$4 sm:$0xff]  }
 0x104   : > { %3374 = vmatpush1.bf16.msra.mxu0 %v4593_v46  ;;  %3088 = vmatprep.subr.bf16.mxu1 %v4598_v47  ;;  %v4680_v46 = vld [vmem:[%s6491_s1 + $0xbb4] ss:$8 sps:$4 sm:$0xff]   ;;  %v4675_v47 = vld [vmem:[%s6491_s1 + $0x4b0] ss:$8 sps:$4 sm:$0xff]  }
 0x105   : > { %3375 = vmatprep.subr.bf16.mxu0 %v4601_v49  ;;  %v4678_v49 = vld [vmem:[%s6491_s1 + $0xbb0] ss:$8 sps:$4 sm:$0xff]  }
 0x107   : > { %3089 = vmatpush1.bf16.msra.mxu1 %v4596_v53  ;;  %v4683_v53 = vld [vmem:[%s6491_s1 + $0x4c4] ss:$8 sps:$4 sm:$0xff]  }
 0x108   : > { %3376 = vmatpush1.bf16.msra.mxu0 %v4599_v54  ;;  %3090 = vmatprep.subr.bf16.mxu1 %v4604_v55  ;;  %v4686_v54 = vld [vmem:[%s6491_s1 + $0xbc4] ss:$8 sps:$4 sm:$0xff]   ;;  %v4681_v55 = vld [vmem:[%s6491_s1 + $0x4c0] ss:$8 sps:$4 sm:$0xff]  }
 0x109   : > { %3377 = vmatprep.subr.bf16.mxu0 %v4607_v28  ;;  %v4684_v28 = vld [vmem:[%s6491_s1 + $0xbc0] ss:$8 sps:$4 sm:$0xff]  }
 0x10b   : > { %3091 = vmatpush1.bf16.msra.mxu1 %v4602_v57  ;;  %v4689_v57 = vld [vmem:[%s6491_s1 + $0x4d4] ss:$8 sps:$4 sm:$0xff]  }
 0x10c   : > { %3378 = vmatpush1.bf16.msra.mxu0 %v4605_v58  ;;  %3101 = vmatprep.subr.bf16.mxu1 %v4610_v39  ;;  %v4692_v58 = vld [vmem:[%s6491_s1 + $0xbd4] ss:$8 sps:$4 sm:$0xff]   ;;  %v4687_v39 = vld [vmem:[%s6491_s1 + $0x4d0] ss:$8 sps:$4 sm:$0xff]  }
 0x10d   : > { %3388 = vmatprep.subr.bf16.mxu0 %v4614_v59  ;;  %v4690_v59 = vld [vmem:[%s6491_s1 + $0xbd0] ss:$8 sps:$4 sm:$0xff]  }
 0x10e   : > { %3093 = vmatmul.mubr.bf16.vlgmr.msra.gmra.mrb[0].mxu1 %v626_v62  ;;  %v4693_v62 = vld [vmem:[%s6491_s1 + $0x4e0] ss:$8 sps:$4 sm:$0xff]  }
 0x10f   : > { %3380 = vmatmul.mubr.bf16.vlgmr.msra.gmra.mrb[0].mxu0 %v5880_v63  ;;  %3102 = vmatpush1.bf16.msra.mxu1 %v4608_v61  ;;  %v4698_v61 = vld [vmem:[%s6491_s1 + $0xbe4] ss:$8 sps:$4 sm:$0xff]  }
 0x110   : > { %3389 = vmatpush1.bf16.msra.mxu0 %v4612_v0  ;;  %3103 = vmatprep.subr.bf16.mxu1 %v4617_v1  ;;  %v4696_v0 = vld [vmem:[%s6491_s1 + $0xbe0] ss:$8 sps:$4 sm:$0xff]   ;;  %v4701_v1 = vld [vmem:[%s6491_s1 + $0x4f4] ss:$8 sps:$4 sm:$0xff]  }
 0x111   : > { %3390 = vmatprep.subr.bf16.mxu0 %v4620_v50  ;;  %3133 = vmatprep.mubr.bf16.mxu1 %v5892_v2  ;;  %v4704_v50 = vld [vmem:[%s6491_s1 + $0xbf4] ss:$8 sps:$4 sm:$0xff]  }
 0x112   : > { %3420 = vmatprep.mubr.bf16.mxu0 %v726_v42  ;;  %v6067_v42 = vld.sshfl [vmem:[%s5153_s22 + $0x18] sm:$0x13 pattern:$0x75316420]  ;;  %s4879_s22 = scalar_lea.vmem %s6450_s3, 32 }
 0x113   : > { %3104 = vmatpush1.bf16.msra.mxu1 %v4615_v3  ;;  %v4699_v3 = vld [vmem:[%s6491_s1 + $0x4f0] ss:$8 sps:$4 sm:$0xff]   ;;  %p4880_p11 = scmp.ne.s32.totalorder %s6450_s3, %s4879_s22  ;;  %p4887_p1 = scmp.lt.s32.totalorder %s4885_s14, %s4879_s22 }
 0x114   : > { %3391 = vmatpush1.bf16.msra.mxu0 %v4618_v5  ;;  %3105 = vmatprep.subr.bf16.mxu1 %v4623_v6  ;;  %v4702_v5 = vld [vmem:[%s6491_s1 + $0xbf0] ss:$8 sps:$4 sm:$0xff]   ;;  %v4707_v6 = vld [vmem:[%s6491_s1 + $0x504] ss:$8 sps:$4 sm:$0xff]  }
 0x115   : > { %3392 = vmatprep.subr.bf16.mxu0 %v4626_v36  ;;  %v4710_v36 = vld [vmem:[%s6491_s1 + $0xc04] ss:$8 sps:$4 sm:$0xff]   ;;  %p4881_p12 = pnand %p4880_p11, %p4999_p5  ;;  %p4888_p2 = por %p4887_p1, %p4886_p0 }
 0x117   : > { %3106 = vmatpush1.bf16.msra.mxu1 %v4621_v7  ;;  %v734_v7 = vcombine.high %v6067_v42, %v6067_v42  ;;  %p4882_p13 = pneg %p4881_p12 }
 0x118   : > { %3393 = vmatpush1.bf16.msra.mxu0 %v4624_v8  ;;  %3107 = vmatprep.subr.bf16.mxu1 %v4629_v9  ;;  %v6085_v8 = vrot.slane %v5857_v56, %v5155_v51  ;;  %v724_v9 = vcombine.high %v5880_v63, %v5880_v63  ;;  %v4713_v56 = vld [vmem:[%s6491_s1 + $0x514] ss:$8 sps:$4 sm:$0xff]  }
 0x119   : > { %3394 = vmatprep.subr.bf16.mxu0 %v4632_v10  ;;  %v4705_v10 = vld [vmem:[%s6491_s1 + $0x500] ss:$8 sps:$4 sm:$0xff]   ;;  %v4716_v63 = vld [vmem:[%s6491_s1 + $0xc14] ss:$8 sps:$4 sm:$0xff]   ;;  %p4889_p3 = pnand %p4888_p2, %p4882_p13 }
 0x11b   : > { %3108 = vmatpush1.bf16.msra.mxu1 %v4627_v11  ;;  %v4708_v11 = vld [vmem:[%s6491_s1 + $0xc00] ss:$8 sps:$4 sm:$0xff]  }
 0x11c   : > { %3395 = vmatpush1.bf16.msra.mxu0 %v4630_v12  ;;  %3109 = vmatprep.subr.bf16.mxu1 %v4635_v13  ;;  %v676_v12 = vcombine.high %v5892_v2, %v5892_v2  ;;  %v748_v13 = vrot.slane %v734_v7, %v5155_v51  ;;  %v4719_v2 = vld [vmem:[%s6491_s1 + $0x524] ss:$8 sps:$4 sm:$0xff]  }
 0x11d   : > { %3396 = vmatprep.subr.bf16.mxu0 %v4638_v15  ;;  %v4711_v15 = vld [vmem:[%s6491_s1 + $0x510] ss:$8 sps:$4 sm:$0xff]   ;;  %v4791_v7 = vld [vmem:[%s6491_s1 + $0x5e4] ss:$8 sps:$4 sm:$0xff]  }
 0x11f   : > { %3110 = vmatpush1.bf16.msra.mxu1 %v4633_v16  ;;  %v4714_v16 = vld [vmem:[%s6491_s1 + $0xc10] ss:$8 sps:$4 sm:$0xff]  }
 0x120   : > { %3397 = vmatpush1.bf16.msra.mxu0 %v4636_v17  ;;  %3111 = vmatprep.subr.bf16.mxu1 %v4641_v18  ;;  %v4722_v17 = vld [vmem:[%s6491_s1 + $0xc24] ss:$8 sps:$4 sm:$0xff]   ;;  %v4717_v18 = vld [vmem:[%s6491_s1 + $0x520] ss:$8 sps:$4 sm:$0xff]  }
 0x121   : > { %3398 = vmatprep.subr.bf16.mxu0 %v4644_v20  ;;  %v4720_v20 = vld [vmem:[%s6491_s1 + $0xc20] ss:$8 sps:$4 sm:$0xff]  }
 0x123   : > { %3112 = vmatpush1.bf16.msra.mxu1 %v4639_v21  ;;  %v4725_v21 = vld [vmem:[%s6491_s1 + $0x534] ss:$8 sps:$4 sm:$0xff]  }
 0x124   : > { %3399 = vmatpush1.bf16.msra.mxu0 %v4642_v22  ;;  %3113 = vmatprep.subr.bf16.mxu1 %v4647_v23  ;;  %v4728_v22 = vld [vmem:[%s6491_s1 + $0xc34] ss:$8 sps:$4 sm:$0xff]   ;;  %v4723_v23 = vld [vmem:[%s6491_s1 + $0x530] ss:$8 sps:$4 sm:$0xff]  }
 0x125   : > { %3400 = vmatprep.subr.bf16.mxu0 %v4650_v24  ;;  %v4726_v24 = vld [vmem:[%s6491_s1 + $0xc30] ss:$8 sps:$4 sm:$0xff]  }
 0x127   : > { %3114 = vmatpush1.bf16.msra.mxu1 %v4645_v25  ;;  %v4731_v25 = vld [vmem:[%s6491_s1 + $0x544] ss:$8 sps:$4 sm:$0xff]  }
 0x128   : > { %3401 = vmatpush1.bf16.msra.mxu0 %v4648_v26  ;;  %3115 = vmatprep.subr.bf16.mxu1 %v4653_v27  ;;  %v4734_v26 = vld [vmem:[%s6491_s1 + $0xc44] ss:$8 sps:$4 sm:$0xff]   ;;  %v4729_v27 = vld [vmem:[%s6491_s1 + $0x540] ss:$8 sps:$4 sm:$0xff]  }
 0x129   : > { %3402 = vmatprep.subr.bf16.mxu0 %v4656_v52  ;;  %v4732_v52 = vld [vmem:[%s6491_s1 + $0xc40] ss:$8 sps:$4 sm:$0xff]  }
 0x12b   : > { %3116 = vmatpush1.bf16.msra.mxu1 %v4651_v29  ;;  %v4737_v29 = vld [vmem:[%s6491_s1 + $0x554] ss:$8 sps:$4 sm:$0xff]  }
 0x12c   : > { %3403 = vmatpush1.bf16.msra.mxu0 %v4654_v30  ;;  %3117 = vmatprep.subr.bf16.mxu1 %v4659_v31  ;;  %v4740_v30 = vld [vmem:[%s6491_s1 + $0xc54] ss:$8 sps:$4 sm:$0xff]   ;;  %v4735_v31 = vld [vmem:[%s6491_s1 + $0x550] ss:$8 sps:$4 sm:$0xff]  }
 0x12d   : > { %3404 = vmatprep.subr.bf16.mxu0 %v4662_v32  ;;  %v4738_v32 = vld [vmem:[%s6491_s1 + $0xc50] ss:$8 sps:$4 sm:$0xff]  }
 0x12f   : > { %3118 = vmatpush1.bf16.msra.mxu1 %v4657_v33  ;;  %v4743_v33 = vld [vmem:[%s6491_s1 + $0x564] ss:$8 sps:$4 sm:$0xff]  }
 0x130   : > { %3405 = vmatpush1.bf16.msra.mxu0 %v4660_v34  ;;  %3119 = vmatprep.subr.bf16.mxu1 %v4665_v35  ;;  %v4746_v34 = vld [vmem:[%s6491_s1 + $0xc64] ss:$8 sps:$4 sm:$0xff]   ;;  %v4741_v35 = vld [vmem:[%s6491_s1 + $0x560] ss:$8 sps:$4 sm:$0xff]  }
 0x131   : > { %3406 = vmatprep.subr.bf16.mxu0 %v4668_v37  ;;  %v4744_v37 = vld [vmem:[%s6491_s1 + $0xc60] ss:$8 sps:$4 sm:$0xff]  }
 0x133   : > { %3120 = vmatpush1.bf16.msra.mxu1 %v4663_v38  ;;  %v4749_v38 = vld [vmem:[%s6491_s1 + $0x574] ss:$8 sps:$4 sm:$0xff]  }
 0x134   : > { %3407 = vmatpush1.bf16.msra.mxu0 %v4666_v19  ;;  %3121 = vmatprep.subr.bf16.mxu1 %v4671_v41  ;;  %v4752_v19 = vld [vmem:[%s6491_s1 + $0xc74] ss:$8 sps:$4 sm:$0xff]   ;;  %v4747_v41 = vld [vmem:[%s6491_s1 + $0x570] ss:$8 sps:$4 sm:$0xff]  }
 0x135   : > { %3408 = vmatprep.subr.bf16.mxu0 %v4674_v48  ;;  %v4750_v48 = vld [vmem:[%s6491_s1 + $0xc70] ss:$8 sps:$4 sm:$0xff]  }
 0x137   : > { %3122 = vmatpush1.bf16.msra.mxu1 %v4669_v43  ;;  %v4755_v43 = vld [vmem:[%s6491_s1 + $0x584] ss:$8 sps:$4 sm:$0xff]  }
 0x138   : > { %3409 = vmatpush1.bf16.msra.mxu0 %v4672_v44  ;;  %3123 = vmatprep.subr.bf16.mxu1 %v4677_v45  ;;  %v4758_v44 = vld [vmem:[%s6491_s1 + $0xc84] ss:$8 sps:$4 sm:$0xff]   ;;  %v4753_v45 = vld [vmem:[%s6491_s1 + $0x580] ss:$8 sps:$4 sm:$0xff]  }
 0x139   : > { %3410 = vmatprep.subr.bf16.mxu0 %v4680_v46  ;;  %v4756_v46 = vld [vmem:[%s6491_s1 + $0xc80] ss:$8 sps:$4 sm:$0xff]  }
 0x13b   : > { %3124 = vmatpush1.bf16.msra.mxu1 %v4675_v47  ;;  %v4761_v47 = vld [vmem:[%s6491_s1 + $0x594] ss:$8 sps:$4 sm:$0xff]  }
 0x13c   : > { %3411 = vmatpush1.bf16.msra.mxu0 %v4678_v49  ;;  %3125 = vmatprep.subr.bf16.mxu1 %v4683_v53  ;;  %v4764_v49 = vld [vmem:[%s6491_s1 + $0xc94] ss:$8 sps:$4 sm:$0xff]   ;;  %v4759_v53 = vld [vmem:[%s6491_s1 + $0x590] ss:$8 sps:$4 sm:$0xff]  }
 0x13d   : > { %3412 = vmatprep.subr.bf16.mxu0 %v4686_v54  ;;  %v4762_v54 = vld [vmem:[%s6491_s1 + $0xc90] ss:$8 sps:$4 sm:$0xff]  }
 0x13f   : > { %3126 = vmatpush1.bf16.msra.mxu1 %v4681_v55  ;;  %v4767_v55 = vld [vmem:[%s6491_s1 + $0x5a4] ss:$8 sps:$4 sm:$0xff]  }
 0x140   : > { %3413 = vmatpush1.bf16.msra.mxu0 %v4684_v28  ;;  %3127 = vmatprep.subr.bf16.mxu1 %v4689_v57  ;;  %v4770_v28 = vld [vmem:[%s6491_s1 + $0xca4] ss:$8 sps:$4 sm:$0xff]   ;;  %v4765_v57 = vld [vmem:[%s6491_s1 + $0x5a0] ss:$8 sps:$4 sm:$0xff]  }
 0x141   : > { %3414 = vmatprep.subr.bf16.mxu0 %v4692_v58  ;;  %v4768_v58 = vld [vmem:[%s6491_s1 + $0xca0] ss:$8 sps:$4 sm:$0xff]  }
 0x143   : > { %3128 = vmatpush1.bf16.msra.mxu1 %v4687_v39  ;;  %v4773_v39 = vld [vmem:[%s6491_s1 + $0x5b4] ss:$8 sps:$4 sm:$0xff]  }
 0x144   : > { %3415 = vmatpush1.bf16.msra.mxu0 %v4690_v59  ;;  %3129 = vmatprep.subr.bf16.mxu1 %v4695_v60  ;;  %v4776_v59 = vld [vmem:[%s6491_s1 + $0xcb4] ss:$8 sps:$4 sm:$0xff]   ;;  %v4771_v60 = vld [vmem:[%s6491_s1 + $0x5b0] ss:$8 sps:$4 sm:$0xff]  }
 0x145   : > { %3416 = vmatprep.subr.bf16.mxu0 %v4698_v61  ;;  %v4774_v61 = vld [vmem:[%s6491_s1 + $0xcb0] ss:$8 sps:$4 sm:$0xff]  }
 0x147   : > { %3130 = vmatpush1.bf16.msra.mxu1 %v4693_v62  ;;  %v4779_v62 = vld [vmem:[%s6491_s1 + $0x5c4] ss:$8 sps:$4 sm:$0xff]  }
 0x148   : > { %3417 = vmatpush1.bf16.msra.mxu0 %v4696_v0  ;;  %3131 = vmatprep.subr.bf16.mxu1 %v4701_v1  ;;  %v4782_v0 = vld [vmem:[%s6491_s1 + $0xcc4] ss:$8 sps:$4 sm:$0xff]   ;;  %v4777_v1 = vld [vmem:[%s6491_s1 + $0x5c0] ss:$8 sps:$4 sm:$0xff]  }
 0x149   : > { %3418 = vmatprep.subr.bf16.mxu0 %v4704_v50  ;;  %v4780_v50 = vld [vmem:[%s6491_s1 + $0xcc0] ss:$8 sps:$4 sm:$0xff]  }
 0x14b   : > { %3132 = vmatpush1.bf16.msra.mxu1 %v4699_v3  ;;  %v4785_v3 = vld [vmem:[%s6491_s1 + $0x5d4] ss:$8 sps:$4 sm:$0xff]  }
 0x14c   : > { %3419 = vmatpush1.bf16.msra.mxu0 %v4702_v5  ;;  %3142 = vmatprep.subr.bf16.mxu1 %v4707_v6  ;;  %v4788_v5 = vld [vmem:[%s6491_s1 + $0xcd4] ss:$8 sps:$4 sm:$0xff]   ;;  %v4783_v6 = vld [vmem:[%s6491_s1 + $0x5d0] ss:$8 sps:$4 sm:$0xff]  }
 0x14d   : > { %3429 = vmatprep.subr.bf16.mxu0 %v4710_v36  ;;  %v4786_v36 = vld [vmem:[%s6491_s1 + $0xcd0] ss:$8 sps:$4 sm:$0xff]  }
 0x14e   : > { %3134 = vmatmul.mubr.bf16.vlgmr.msra.gmra.mrb[0].mxu1 %v6085_v8 }
 0x14f   : > { %3421 = vmatmul.mubr.bf16.vlgmr.msra.gmra.mrb[0].mxu0 %v724_v9  ;;  %3143 = vmatpush1.bf16.msra.mxu1 %v4705_v10  ;;  %v4794_v9 = vld [vmem:[%s6491_s1 + $0xce4] ss:$8 sps:$4 sm:$0xff]   ;;  %v4789_v10 = vld [vmem:[%s6491_s1 + $0x5e0] ss:$8 sps:$4 sm:$0xff]  }
 0x150   : > { %3430 = vmatpush1.bf16.msra.mxu0 %v4708_v11  ;;  %3144 = vmatprep.subr.bf16.mxu1 %v4713_v56  ;;  %v4792_v11 = vld [vmem:[%s6491_s1 + $0xce0] ss:$8 sps:$4 sm:$0xff]   ;;  %v4797_v56 = vld [vmem:[%s6491_s1 + $0x5f4] ss:$8 sps:$4 sm:$0xff]  }
 0x151   : > { %3431 = vmatprep.subr.bf16.mxu0 %v4716_v63  ;;  %3174 = vmatprep.mubr.bf16.mxu1 %v676_v12  ;;  %v4800_v63 = vld [vmem:[%s6491_s1 + $0xcf4] ss:$8 sps:$4 sm:$0xff]   ;;  %v4795_v12 = vld [vmem:[%s6491_s1 + $0x5f0] ss:$8 sps:$4 sm:$0xff]  }
 0x152   : > { %3461 = vmatprep.mubr.bf16.mxu0 %v748_v13  ;;  %v4798_v13 = vld [vmem:[%s6491_s1 + $0xcf0] ss:$8 sps:$4 sm:$0xff]  }
 0x153   : > { %3145 = vmatpush1.bf16.msra.mxu1 %v4711_v15  ;;  %v4803_v15 = vld [vmem:[%s6491_s1 + $0x604] ss:$8 sps:$4 sm:$0xff]  }
 0x154   : > { %3432 = vmatpush1.bf16.msra.mxu0 %v4714_v16  ;;  %3146 = vmatprep.subr.bf16.mxu1 %v4719_v2  ;;  %v4806_v16 = vld [vmem:[%s6491_s1 + $0xd04] ss:$8 sps:$4 sm:$0xff]   ;;  %v674_v2 = vcombine.high %v6085_v8, %v6085_v8  ;;  %v4809_v8 = vld [vmem:[%s6491_s1 + $0x614] ss:$8 sps:$4 sm:$0xff]  }
 0x155   : > { %3433 = vmatprep.subr.bf16.mxu0 %v4722_v17  ;;  %v6289_v17 = vrot.slane %v6067_v42, %v5155_v51  ;;  %v4812_v42 = vld [vmem:[%s6491_s1 + $0xd14] ss:$8 sps:$4 sm:$0xff]  }
 0x157   : > { %3147 = vmatpush1.bf16.msra.mxu1 %v4717_v18  ;;  %v4801_v18 = vld [vmem:[%s6491_s1 + $0x600] ss:$8 sps:$4 sm:$0xff]  }
 0x158   : > { %3434 = vmatpush1.bf16.msra.mxu0 %v4720_v20  ;;  %3148 = vmatprep.subr.bf16.mxu1 %v4725_v21  ;;  %v4804_v20 = vld [vmem:[%s6491_s1 + $0xd00] ss:$8 sps:$4 sm:$0xff]   ;;  %v4807_v21 = vld [vmem:[%s6491_s1 + $0x610] ss:$8 sps:$4 sm:$0xff]  }
 0x159   : > { %3435 = vmatprep.subr.bf16.mxu0 %v4728_v22  ;;  %v4810_v22 = vld [vmem:[%s6491_s1 + $0xd10] ss:$8 sps:$4 sm:$0xff]  }
 0x15b   : > { %3149 = vmatpush1.bf16.msra.mxu1 %v4723_v23  ;;  %v4815_v23 = vld [vmem:[%s6491_s1 + $0x624] ss:$8 sps:$4 sm:$0xff]  }
 0x15c   : > { %3436 = vmatpush1.bf16.msra.mxu0 %v4726_v24  ;;  %3150 = vmatprep.subr.bf16.mxu1 %v4731_v25  ;;  %v4818_v24 = vld [vmem:[%s6491_s1 + $0xd24] ss:$8 sps:$4 sm:$0xff]   ;;  %v4944_v25 = vmov 0  }
 0x15d   : > { %3437 = vmatprep.subr.bf16.mxu0 %v4734_v26  ;;  %v4813_v26 = vld [vmem:[%s6491_s1 + $0x620] ss:$8 sps:$4 sm:$0xff]  }
 0x15f   : > { %3151 = vmatpush1.bf16.msra.mxu1 %v4729_v27  ;;  %v4816_v27 = vld [vmem:[%s6491_s1 + $0xd20] ss:$8 sps:$4 sm:$0xff]  }
 0x160   : > { %3438 = vmatpush1.bf16.msra.mxu0 %v4732_v52  ;;  %3152 = vmatprep.subr.bf16.mxu1 %v4737_v29  ;;  %v4821_v52 = vld [vmem:[%s6491_s1 + $0x634] ss:$8 sps:$4 sm:$0xff]   ;;  %v4819_v29 = vld [vmem:[%s6491_s1 + $0x630] ss:$8 sps:$4 sm:$0xff]  }
 0x161   : > { %3439 = vmatprep.subr.bf16.mxu0 %v4740_v30  ;;  %v4822_v30 = vld [vmem:[%s6491_s1 + $0xd30] ss:$8 sps:$4 sm:$0xff]  }
 0x163   : > { %3153 = vmatpush1.bf16.msra.mxu1 %v4735_v31  ;;  %v4827_v31 = vld [vmem:[%s6491_s1 + $0x644] ss:$8 sps:$4 sm:$0xff]  }
 0x164   : > { %3440 = vmatpush1.bf16.msra.mxu0 %v4738_v32  ;;  %3154 = vmatprep.subr.bf16.mxu1 %v4743_v33  ;;  %v4830_v32 = vld [vmem:[%s6491_s1 + $0xd44] ss:$8 sps:$4 sm:$0xff]   ;;  %v4825_v33 = vld [vmem:[%s6491_s1 + $0x640] ss:$8 sps:$4 sm:$0xff]  }
 0x165   : > { %3441 = vmatprep.subr.bf16.mxu0 %v4746_v34  ;;  %v4828_v34 = vld [vmem:[%s6491_s1 + $0xd40] ss:$8 sps:$4 sm:$0xff]  }
 0x167   : > { %3155 = vmatpush1.bf16.msra.mxu1 %v4741_v35  ;;  %v4833_v35 = vld [vmem:[%s6491_s1 + $0x654] ss:$8 sps:$4 sm:$0xff]  }
 0x168   : > { %3442 = vmatpush1.bf16.msra.mxu0 %v4744_v37  ;;  %3156 = vmatprep.subr.bf16.mxu1 %v4749_v38  ;;  %v4836_v37 = vld [vmem:[%s6491_s1 + $0xd54] ss:$8 sps:$4 sm:$0xff]   ;;  %v4831_v38 = vld [vmem:[%s6491_s1 + $0x650] ss:$8 sps:$4 sm:$0xff]  }
 0x169   : > { %3443 = vmatprep.subr.bf16.mxu0 %v4752_v19  ;;  %v4834_v19 = vld [vmem:[%s6491_s1 + $0xd50] ss:$8 sps:$4 sm:$0xff]  }
 0x16b   : > { %3157 = vmatpush1.bf16.msra.mxu1 %v4747_v41  ;;  %v4839_v41 = vld [vmem:[%s6491_s1 + $0x664] ss:$8 sps:$4 sm:$0xff]  }
 0x16c   : > { %3444 = vmatpush1.bf16.msra.mxu0 %v4750_v48  ;;  %3158 = vmatprep.subr.bf16.mxu1 %v4755_v43  ;;  %v4842_v48 = vld [vmem:[%s6491_s1 + $0xd64] ss:$8 sps:$4 sm:$0xff]   ;;  %v4837_v43 = vld [vmem:[%s6491_s1 + $0x660] ss:$8 sps:$4 sm:$0xff]  }
 0x16d   : > { %3445 = vmatprep.subr.bf16.mxu0 %v4758_v44  ;;  %v4840_v44 = vld [vmem:[%s6491_s1 + $0xd60] ss:$8 sps:$4 sm:$0xff]  }
 0x16f   : > { %3159 = vmatpush1.bf16.msra.mxu1 %v4753_v45  ;;  %v4845_v45 = vld [vmem:[%s6491_s1 + $0x674] ss:$8 sps:$4 sm:$0xff]  }
 0x170   : > { %3446 = vmatpush1.bf16.msra.mxu0 %v4756_v46  ;;  %3160 = vmatprep.subr.bf16.mxu1 %v4761_v47  ;;  %v4848_v46 = vld [vmem:[%s6491_s1 + $0xd74] ss:$8 sps:$4 sm:$0xff]   ;;  %v4843_v47 = vld [vmem:[%s6491_s1 + $0x670] ss:$8 sps:$4 sm:$0xff]  }
 0x171   : > { %3447 = vmatprep.subr.bf16.mxu0 %v4764_v49  ;;  %v4846_v49 = vld [vmem:[%s6491_s1 + $0xd70] ss:$8 sps:$4 sm:$0xff]  }
 0x173   : > { %3161 = vmatpush1.bf16.msra.mxu1 %v4759_v53  ;;  %v4851_v53 = vld [vmem:[%s6491_s1 + $0x684] ss:$8 sps:$4 sm:$0xff]  }
 0x174   : > { %3448 = vmatpush1.bf16.msra.mxu0 %v4762_v54  ;;  %3162 = vmatprep.subr.bf16.mxu1 %v4767_v55  ;;  %v749_v54 = vcombine.high %v6289_v17, %v6289_v17  ;;  %v4849_v55 = vld [vmem:[%s6491_s1 + $0x680] ss:$8 sps:$4 sm:$0xff]  }
 0x175   : > { %3449 = vmatprep.subr.bf16.mxu0 %v4770_v28  ;;  %v4854_v28 = vld [vmem:[%s6491_s1 + $0x694] ss:$8 sps:$4 sm:$0xff]  }
 0x177   : > { %3163 = vmatpush1.bf16.msra.mxu1 %v4765_v57  ;;  %v4852_v57 = vld [vmem:[%s6491_s1 + $0x690] ss:$8 sps:$4 sm:$0xff]  }
 0x178   : > { %3450 = vmatpush1.bf16.msra.mxu0 %v4768_v58  ;;  %3164 = vmatprep.subr.bf16.mxu1 %v4773_v39  ;;  %v4857_v58 = vld [vmem:[%s6491_s1 + $0x6a4] ss:$8 sps:$4 sm:$0xff]   ;;  %v4855_v39 = vld [vmem:[%s6491_s1 + $0x6a0] ss:$8 sps:$4 sm:$0xff]  }
 0x179   : > { %3451 = vmatprep.subr.bf16.mxu0 %v4776_v59  ;;  %v4860_v59 = vld [vmem:[%s6491_s1 + $0x6b4] ss:$8 sps:$4 sm:$0xff]  }
 0x17b   : > { %3165 = vmatpush1.bf16.msra.mxu1 %v4771_v60  ;;  %v4858_v60 = vld [vmem:[%s6491_s1 + $0x6b0] ss:$8 sps:$4 sm:$0xff]  }
 0x17c   : > { %3452 = vmatpush1.bf16.msra.mxu0 %v4774_v61  ;;  %3166 = vmatprep.subr.bf16.mxu1 %v4779_v62  ;;  %v4863_v61 = vld [vmem:[%s6491_s1 + $0x6c4] ss:$8 sps:$4 sm:$0xff]   ;;  %v4861_v62 = vld [vmem:[%s6491_s1 + $0x6c0] ss:$8 sps:$4 sm:$0xff]  }
 0x17d   : > { %3453 = vmatprep.subr.bf16.mxu0 %v4782_v0  ;;  %v4866_v0 = vld [vmem:[%s6491_s1 + $0x6d4] ss:$8 sps:$4 sm:$0xff]  }
 0x17f   : > { %3167 = vmatpush1.bf16.msra.mxu1 %v4777_v1  ;;  %v4864_v1 = vld [vmem:[%s6491_s1 + $0x6d0] ss:$8 sps:$4 sm:$0xff]  }
 0x180   : > { %3454 = vmatpush1.bf16.msra.mxu0 %v4780_v50  ;;  %3168 = vmatprep.subr.bf16.mxu1 %v4785_v3  ;;  %v4869_v50 = vld [vmem:[%s6491_s1 + $0x6e4] ss:$8 sps:$4 sm:$0xff]   ;;  %v4867_v3 = vld [vmem:[%s6491_s1 + $0x6e0] ss:$8 sps:$4 sm:$0xff]  }
 0x181   : > { %3455 = vmatprep.subr.bf16.mxu0 %v4788_v5  ;;  %v4872_v5 = vld [vmem:[%s6491_s1 + $0x6f4] ss:$8 sps:$4 sm:$0xff]  }
 0x183   : > { %3169 = vmatpush1.bf16.msra.mxu1 %v4783_v6  ;;  %v4870_v6 = vld [vmem:[%s6491_s1 + $0x6f0] ss:$8 sps:$4 sm:$0xff]  }
 0x184   : > { %3456 = vmatpush1.bf16.msra.mxu0 %v4786_v36  ;;  %3170 = vmatprep.subr.bf16.mxu1 %v4791_v7 }
 0x185   : > { %3457 = vmatprep.subr.bf16.mxu0 %v4794_v9 }
 0x187   : > { %3171 = vmatpush1.bf16.msra.mxu1 %v4789_v10 }
 0x188   : > { %3458 = vmatpush1.bf16.msra.mxu0 %v4792_v11  ;;  %3172 = vmatprep.subr.bf16.mxu1 %v4797_v56 }
 0x189   : > { %3459 = vmatprep.subr.bf16.mxu0 %v4800_v63 }
 0x18b   : > { %3173 = vmatpush1.bf16.msra.mxu1 %v4795_v12 }
 0x18c   : > { %3460 = vmatpush1.bf16.msra.mxu0 %v4798_v13  ;;  %3183 = vmatprep.subr.bf16.mxu1 %v4803_v15 }
 0x18d   : > { %3470 = vmatprep.subr.bf16.mxu0 %v4806_v16 }
 0x18e   : > { %3175 = vmatmul.mubr.bf16.vlgmr.msra.gmra.mrb[0].mxu1 %v674_v2 }
 0x18f   : > { %3462 = vmatmul.mubr.bf16.vlgmr.msra.gmra.mrb[0].mxu0 %v6289_v17  ;;  %3184 = vmatpush1.bf16.msra.mxu1 %v4801_v18 }
 0x190   : > { %3471 = vmatpush1.bf16.msra.mxu0 %v4804_v20  ;;  %3185 = vmatprep.subr.bf16.mxu1 %v4809_v8 }
 0x191   : > { %3472 = vmatprep.subr.bf16.mxu0 %v4812_v42  ;;  %3502 = vmatprep.mubr.bf16.mxu0 %v4944_v25 }
 0x192   : > { %3215 = vmatprep.mubr.bf16.mxu1 %v5190_v4  ;;  %v4824_v4 = vld [vmem:[%s6491_s1 + $0xd34] ss:$8 sps:$4 sm:$0xff]  }
 0x193   : > { %3186 = vmatpush1.bf16.msra.mxu1 %v4807_v21 }
 0x194   : > { %3473 = vmatpush1.bf16.msra.mxu0 %v4810_v22  ;;  %3187 = vmatprep.subr.bf16.mxu1 %v4815_v23 }
 0x195   : > { %3474 = vmatprep.subr.bf16.mxu0 %v4818_v24 }
 0x197   : > { %3188 = vmatpush1.bf16.msra.mxu1 %v4813_v26 }
 0x198   : > { %3475 = vmatpush1.bf16.msra.mxu0 %v4816_v27  ;;  %3189 = vmatprep.subr.bf16.mxu1 %v4821_v52 }
 0x199   : > { %3476 = vmatprep.subr.bf16.mxu0 %v4824_v4 }
 0x19b   : > { %3190 = vmatpush1.bf16.msra.mxu1 %v4819_v29 }
 0x19c   : > { %3477 = vmatpush1.bf16.msra.mxu0 %v4822_v30  ;;  %3191 = vmatprep.subr.bf16.mxu1 %v4827_v31 }
 0x19d   : > { %3478 = vmatprep.subr.bf16.mxu0 %v4830_v32 }
 0x19f   : > { %3192 = vmatpush1.bf16.msra.mxu1 %v4825_v33 }
 0x1a0   : > { %3479 = vmatpush1.bf16.msra.mxu0 %v4828_v34  ;;  %3193 = vmatprep.subr.bf16.mxu1 %v4833_v35 }
 0x1a1   : > { %3480 = vmatprep.subr.bf16.mxu0 %v4836_v37 }
 0x1a3   : > { %3194 = vmatpush1.bf16.msra.mxu1 %v4831_v38 }
 0x1a4   : > { %3481 = vmatpush1.bf16.msra.mxu0 %v4834_v19  ;;  %3195 = vmatprep.subr.bf16.mxu1 %v4839_v41 }
 0x1a5   : > { %3482 = vmatprep.subr.bf16.mxu0 %v4842_v48 }
 0x1a7   : > { %3196 = vmatpush1.bf16.msra.mxu1 %v4837_v43 }
 0x1a8   : > { %3483 = vmatpush1.bf16.msra.mxu0 %v4840_v44  ;;  %3197 = vmatprep.subr.bf16.mxu1 %v4845_v45 }
 0x1a9   : > { %3484 = vmatprep.subr.bf16.mxu0 %v4848_v46 }
 0x1ab   : > { %3198 = vmatpush1.bf16.msra.mxu1 %v4843_v47 }
 0x1ac   : > { %3485 = vmatpush1.bf16.msra.mxu0 %v4846_v49  ;;  %3199 = vmatprep.subr.bf16.mxu1 %v4851_v53 }
 0x1af   : > { %3503 = vmatmul.mubr.bf16.vlgmr.msra.gmra.mrb[0].mxu0 %v749_v54  ;;  %3200 = vmatpush1.bf16.msra.mxu1 %v4849_v55 }
 0x1b0   : > { %3201 = vmatprep.subr.bf16.mxu1 %v4854_v28 }
 0x1b3   : > { %3202 = vmatpush1.bf16.msra.mxu1 %v4852_v57 }
 0x1b4   : > { %3203 = vmatprep.subr.bf16.mxu1 %v4857_v58 }
 0x1b7   : > { %3204 = vmatpush1.bf16.msra.mxu1 %v4855_v39 }
 0x1b8   : > { %3205 = vmatprep.subr.bf16.mxu1 %v4860_v59 }
 0x1bb   : > { %3206 = vmatpush1.bf16.msra.mxu1 %v4858_v60 }
 0x1bc   : > { %3207 = vmatprep.subr.bf16.mxu1 %v4863_v61 }
 0x1bf   : > { %3208 = vmatpush1.bf16.msra.mxu1 %v4861_v62 }
 0x1c0   : > { %3209 = vmatprep.subr.bf16.mxu1 %v4866_v0 }
 0x1c3   : > { %3210 = vmatpush1.bf16.msra.mxu1 %v4864_v1 }
 0x1c4   : > { %3211 = vmatprep.subr.bf16.mxu1 %v4869_v50 }
 0x1c7   : > { %3212 = vmatpush1.bf16.msra.mxu1 %v4867_v3 }
 0x1c8   : > { %3213 = vmatprep.subr.bf16.mxu1 %v4872_v5 }
 0x1cb   : > { %3214 = vmatpush1.bf16.msra.mxu1 %v4870_v6 }
 0x1ce   : > { %3216 = vmatmul.mubr.bf16.vlgmr.msra.gmra.mrb[0].mxu1 %v5219_v14 }
 0x282   : > { %v3504_v36 = vpop.f32.mrb[0].mxu0 }
 0x283   : > { %v3506_v7 = vpop.f32.mrb[1].mxu0 }
 0x284   : > { %v3508_v9 = vpop.f32.mrb[2].mxu0 }
 0x285   : > { %v3509_v10 = vpop.f32.mrb[3].mxu0 }
 0x2a1   : > { %v3217_v11 = vpop.f32.mrb[0].mxu1 }
 0x2a2   : > { %v4130_v56 = vadd.f32 %v3504_v36, %v3217_v11  ;;  %v3219_v63 = vpop.f32.mrb[1].mxu1 }
 0x2a3   : > { %v4131_v12 = vadd.f32 %v3506_v7, %v3219_v63  ;;  %v3221_v13 = vpop.f32.mrb[2].mxu1 }
 0x2a4   : > { %v3512_v15 = vsel %vm3511_vm0, %v4130_v56, 0.0  ;;  %v3529_v16 = vmul.f32 %v4130_v56, %v4130_v56  ;;  %v3222_v2 = vpop.f32.mrb[3].mxu1 }
 0x2a5   : > { %v3513_v17 = vrot.slane %v3512_v15, 4  ;;  %v3519_v18 = vsel %vm3511_vm0, %v4131_v12, 0.0  ;;  %v3530_v20 = vmul.f32 %v4131_v12, %v4131_v12 }
 0x2a6   : > { %v3531_v14 = vsel %vm3511_vm0, %v3529_v16, 0.0  ;;  %v3520_v8 = vrot.slane %v3519_v18, 4 }
 0x2a7   : > { %v3514_v42 = vadd.f32 %v3513_v17, %v3512_v15  ;;  %v3532_v21 = vrot.slane %v3531_v14, 4  ;;  %v3538_v22 = vsel %vm3511_vm0, %v3530_v20, 0.0 }
 0x2a8   : > { %v3521_v23 = vadd.f32 %v3520_v8, %v3519_v18  ;;  %v3539_v24 = vrot.slane %v3538_v22, 4 }
 0x2a9   : > { %v3515_v25 = vrot.slane %v3514_v42, 2  ;;  %v3533_v26 = vadd.f32 %v3532_v21, %v3531_v14 }
 0x2aa   : > { %v3522_v27 = vrot.slane %v3521_v23, 2  ;;  %v3540_v52 = vadd.f32 %v3539_v24, %v3538_v22 }
 0x2ab   : > { %v3516_v4 = vadd.f32 %v3515_v25, %v3514_v42  ;;  %v3534_v29 = vrot.slane %v3533_v26, 2 }
 0x2ac   : > { %v3523_v30 = vadd.f32 %v3522_v27, %v3521_v23  ;;  %v3541_v31 = vrot.slane %v3540_v52, 2 }
 0x2ad   : > { %v3517_v32 = vrot.slane %v3516_v4, 1  ;;  %v3535_v33 = vadd.f32 %v3534_v29, %v3533_v26 }
 0x2ae   : > { %v3524_v34 = vrot.slane %v3523_v30, 1  ;;  %v3542_v35 = vadd.f32 %v3541_v31, %v3540_v52 }
 0x2af   : > { %v3518_v37 = vadd.f32 %v3517_v32, %v3516_v4  ;;  %v3536_v38 = vrot.slane %v3535_v33, 1 }
 0x2b0   : > { %v3525_v19 = vadd.f32 %v3524_v34, %v3523_v30  ;;  %v3543_v41 = vrot.slane %v3542_v35, 1 }
 0x2b1   : > { %v3527_v48 = vmul.f32 0.5, %v3518_v37  ;;  %v3537_v43 = vadd.f32 %v3536_v38, %v3535_v33 }
 0x2b2   : > { %v3528_v44 = vmul.f32 0.5, %v3525_v19  ;;  %v3544_v45 = vadd.f32 %v3543_v41, %v3542_v35 }
 0x2b3   : > { %v3545_v46 = vmul.f32 0.5, %v3537_v43  ;;  %v3547_v47 = vmul.f32 %v3527_v48, %v3527_v48  ;;  %v3557_v59 = vsub.f32 %v4130_v56, %v3527_v48 }
 0x2b4   : > { %v3546_v49 = vmul.f32 0.5, %v3544_v45  ;;  %v3548_v53 = vmul.f32 %v3528_v44, %v3528_v44  ;;  %v3558_v61 = vsub.f32 %v4131_v12, %v3528_v44 }
 0x2b5   : > { %v3549_v54 = vsub.f32 %v3545_v46, %v3547_v47 }
 0x2b6   : > { %v3550_v55 = vsub.f32 %v3546_v49, %v3548_v53 }
 0x2b7   : > { %v3551_v28 = vmax.f32 %v3549_v54, 0.0 }
 0x2b8   : > { %v3552_v57 = vmax.f32 %v3550_v55, 0.0 }
 0x2b9   : > { %v3553_v58 = vadd.f32 1e-05, %v3551_v28 }
 0x2ba   : > { %v3554_v39 = vadd.f32 1e-05, %v3552_v57 }
 0x2bb   : > { %4873 = vrsqrt.f32 %v3553_v58 }
 0x2bc   : > { %4875 = vrsqrt.f32 %v3554_v39 }
 0x2c5   : > { %v4874_v60 = vpop.eup %4873 }
 0x2c6   : > { %v4876_v62 = vpop.eup %4875  ;;  %v3559_v0 = vmul.f32 %v4874_v60, %v3557_v59 }
 0x2c7   : > { %v3560_v1 = vmul.f32 %v4876_v62, %v3558_v61 }
 0x2c8   : > { %vm3561_vm1 = vcmp.ge.f32.partialorder %v3559_v0, 0.0  ;;  %v3563_v50 = vmul.f32 0.01, %v3559_v0 }
 0x2c9   : > { %vm3562_vm2 = vcmp.ge.f32.partialorder %v3560_v1, 0.0  ;;  %v3564_v3 = vmul.f32 0.01, %v3560_v1 }
 0x2ca   : > { %v3565_v5 = vsel %vm3561_vm1, %v3559_v0, %v3563_v50 }
 0x2cb   : > { %v3567_v6 = vsel %vm3511_vm0, %v3565_v5, 0.0  ;;  %v3566_v36 = vsel %vm3562_vm2, %v3560_v1, %v3564_v3 }
 0x2cc   : > { %v3568_v7 = vrot.slane %v3567_v6, 4  ;;  %v3574_v9 = vsel %vm3511_vm0, %v3566_v36, 0.0 }
 0x2cd   : > { %v3575_v10 = vrot.slane %v3574_v9, 4 }
 0x2ce   : > { %v3569_v11 = vadd.f32 %v3568_v7, %v3567_v6 }
 0x2cf   : > { %v3576_v56 = vadd.f32 %v3575_v10, %v3574_v9 }
 0x2d0   : > { %v3570_v63 = vrot.slane %v3569_v11, 2 }
 0x2d1   : > { %v3577_v12 = vrot.slane %v3576_v56, 2 }
 0x2d2   : > { %v3571_v13 = vadd.f32 %v3570_v63, %v3569_v11 }
 0x2d3   : > { %v3578_v15 = vadd.f32 %v3577_v12, %v3576_v56 }
 0x2d4   : > { %v3572_v16 = vrot.slane %v3571_v13, 1 }
 0x2d5   : > { %v3579_v2 = vrot.slane %v3578_v15, 1 }
 0x2d6   : > { %v3573_v17 = vadd.f32 %v3572_v16, %v3571_v13 }
 0x2d7   : > { %v3580_v18 = vadd.f32 %v3579_v2, %v3578_v15 }
 0x2d8   : > { %v3581_v20 = vmul.f32 0.5, %v3573_v17 }
 0x2d9   : > { %v3582_v14 = vmul.f32 0.5, %v3580_v18 }
 0x2da   : > { %vm3583_vm3 = vcmp.ge.f32.partialorder %v3581_v20, 0.0  ;;  %v3585_v8 = vmul.f32 0.01, %v3581_v20 }
 0x2db   : > { %vm3584_vm4 = vcmp.ge.f32.partialorder %v3582_v14, 0.0  ;;  %v3586_v42 = vmul.f32 0.01, %v3582_v14 }
 0x2dc   : > { %v3587_v21 = vsel %vm3583_vm3, %v3581_v20, %v3585_v8 }
 0x2dd   : > { %v3588_v22 = vsel %vm3584_vm4, %v3582_v14, %v3586_v42 }
 0x2de   : > { %v3591_v23 = vcombine.low %v3587_v21, %v3588_v22 }
 0x2e0   : > { %v3598_v24 = vrot.slane %v3591_v23, %v5155_v51 }
 0x2e2   : > { %v3605_v25 = vrot.slane %v3598_v24, %v5155_v51 }
 0x2e4   : > { %3611 = vst.msk [vmem:[%s134_s30] sm:$0x3] %vm3609_vm5, %v3605_v25 }
 0x2e5   : > { %4892 = shalt.err (!%p4889_p3)
}
 0x2e6   : > { %s4893_s16 = scalar_lea.hbm %s6448_s6, 32  ;;  %s4897_s23 = scalar_lea.hbm %s6492_s2, 64 }
 0x2e7   : > { %p4894_p4 = scmp.ne.s32.totalorder %s6448_s6, %s4893_s16  ;;  %p4898_p9 = scmp.lt.u32.totalorder %s6448_s6, %s6492_s2 }
 0x2e8   : > { %p4899_p10 = scmp.lt.u32.totalorder %s4897_s23, %s4893_s16  ;;  %p4901_p12 = scmp.lt.u32.totalorder %s4893_s16, %s6448_s6 }
 0x2e9   : > { %p4895_p7 = pnand %p4894_p4, %p4999_p5 }
 0x2ea   : > { %p4900_p11 = por %p4899_p10, %p4898_p9 }
 0x2eb   : > { %p4896_p8 = pneg %p4895_p7 }
 0x2ec   : > { %p4902_p13 = por %p4901_p12, %p4900_p11 }
 0x2ee   : > { %p4903_p0 = pnand %p4902_p13, %p4896_p8 }
 0x2f0   : > { %4906 = shalt.err (!%p4903_p0)
}
 0x2f1   : > { %4181 = dma.vmem_to_hbm [thread:$0]  (%p4999_p5), %s6450_s3, 32, %s6448_s6, %s3613_s13  }
 0x2f2 PF: > { %p4187_p1 = scmp.ge.s32.totalorder %s4941_s12, 2  ;;  %s3639_s26 = sand.u32 1, %s4929_s9  }
 0x2f3   : > { %s3640_s27 = scalar_lea.sflag [#allocation3], %s3639_s26 }
 0x2f4   : > { %p4184_p2 = pnand %p4187_p1, %p5003_p6 }
 0x2f6   : > { %4924 = dma.done.wait (!%p4184_p2), %s3640_s27, 32  }
 0x2f7   : > { %4926 = vsyncadd (!%p4184_p2), %s3640_s27, 4294967264  ;;  %p12_p3 = scmp.ge.s32.totalorder %s4986_s15, 4   ;;  %s6495_s9 = smov %s4933_s10 }
 0x2f8   : > { %s6496_s10 = smov %s4937_s11  ;;  %s6497_s11 = smov %s4997_s18 }
 0x2f9   : > { %s6498_s12 = smov %s4986_s15  ;;  %14 = sbr.rel (!%p12_p3) target bundleno = 3 (0x3), region = 63 }
 0x300   :  { %3645 = vsyncpa [#allocation3], 1 }
 0x301   :  { %3647 = vsyncpa [#allocation3 + $0x1], 1 }

</bundles_post_ra>
